<compile_context>
chip_gen: v7x
topology: tpu7x:2x2x1
jax: 0.10.0
libtpu: 0.0.40
codegen_flags: <defaults>
</compile_context>

<pallas_src>
import jax
import jax.numpy as jnp
from jax import lax
from jax.experimental import pallas as pl
from jax.experimental.pallas import tpu as pltpu

LANES = 128
_VMEM_LIMIT = 32 * 1024 * 1024

# ---- geometry (28x28 single-channel input) ---------------------------------
S0 = 32            # row stride for conv11/conv12 layouts (28 padded to 32)
S1 = 16            # row stride for conv21/conv22 layouts (12 padded to 16)

CL1 = 848          # conv11 rows computed (fills act1; >= 26*32 + slack)
CL2 = 768          # conv12 rows computed (24 rows * stride 32)
CL3 = 160          # conv21 rows computed (10 rows * stride 16)
CL4 = 120          # conv22 rows computed (covers 8 rows, last row up to col 7)

ACT1L = 848        # conv11 output buffer (bf16)
ACT2L = 208        # pooled 12x12 activation buffer (stride 16) + slack
ACT3L = 160        # conv21 output buffer (stride 16)
SHIFTL = 832       # kw-shift scratch buffers (sized for the conv12 stage)
ACCL = 848         # f32 accumulator (max of the CLs)
FLATL = 928        # zero-padded flattened input image length (28*32 + slack)


# ---------------------------------------------------------------------------
# The fused kernel: conv11 -> conv12 -> pool2 -> conv21 -> conv22 -> pool4
#                   -> fc1 -> ReLU -> fc2 -> log_softmax        (per image)
# ---------------------------------------------------------------------------
def _vggnet_kernel(x_ref, w11_ref, b11_ref, w12_ref, b12_ref,
                   w21_ref, b21_ref, w22_ref, b22_ref,
                   w1_ref, b1_ref, w2_ref, b2_ref, out_ref,
                   acc_ref, act1_ref, act2_ref, act3_ref, sh1_ref, sh2_ref):
    f32 = jnp.float32
    bf16 = jnp.bfloat16

    # act2 is only partially written by the pool-2 epilogue; zero it so the
    # never-used garbage columns stay deterministic / finite.
    act2_ref[...] = jnp.zeros_like(act2_ref)

    # ---- conv11: single large-M matmul on wrapper-built K-padded patches ----
    acc_ref[...] = jnp.dot(x_ref[...], w11_ref[...], preferred_element_type=f32)
    act1_ref[...] = jnp.maximum(acc_ref[...] + b11_ref[...], 0.0).astype(bf16)

    # Generic 3x3 stage: two shifted bf16 copies (kw = 1, 2) so all nine
    # per-tap matmul operands are aligned VMEM views; 9 large-M MXU matmuls
    # accumulated in f32 into acc_ref[0:cl].
    def conv3x3(src_ref, stride, cl, w_ref):
        copy_len = 2 * stride + cl
        sh1_ref[pl.ds(0, copy_len), :] = src_ref[pl.ds(1, copy_len), :]
        sh2_ref[pl.ds(0, copy_len), :] = src_ref[pl.ds(2, copy_len), :]
        srcs = (src_ref, sh1_ref, sh2_ref)
        for kh in range(3):
            for kw in range(3):
                t = 3 * kh + kw
                lhs = srcs[kw][pl.ds(kh * stride, cl), :]          # aligned view
                d = jnp.dot(lhs, w_ref[t], preferred_element_type=f32)
                if t == 0:
                    acc_ref[pl.ds(0, cl), :] = d
                else:
                    acc_ref[pl.ds(0, cl), :] = acc_ref[pl.ds(0, cl), :] + d

    # ---- conv12 + fused 2x2 max pool ----------------------------------------
    conv3x3(act1_ref, S0, CL2, w12_ref)
    b12 = b12_ref[...]
    for p in range(12):                               # pooled output rows
        base = 2 * p * S0
        v = jnp.maximum(
            jnp.maximum(acc_ref[pl.ds(base, 12, stride=2), :],
                        acc_ref[pl.ds(base + 1, 12, stride=2), :]),
            jnp.maximum(acc_ref[pl.ds(base + S0, 12, stride=2), :],
                        acc_ref[pl.ds(base + S0 + 1, 12, stride=2), :]))
        act2_ref[pl.ds(p * S1, 12), :] = jnp.maximum(v + b12, 0.0).astype(bf16)

    # ---- conv21 --------------------------------------------------------------
    conv3x3(act2_ref, S1, CL3, w21_ref)
    act3_ref[...] = jnp.maximum(acc_ref[pl.ds(0, CL3), :] + b21_ref[...],
                                0.0).astype(bf16)

    # ---- conv22 + fused 4x4 max pool (== the module's two 2x2 pools) --------
    conv3x3(act3_ref, S1, CL4, w22_ref)
    b22 = b22_ref[...]
    feats = []
    for ph in range(2):
        for pw in range(2):
            cand = [acc_ref[pl.ds((4 * ph + di) * S1 + 4 * pw, 4), :]
                    for di in range(4)]                       # 4 x (4, 128) f32
            m = jnp.maximum(jnp.maximum(cand[0], cand[1]),
                            jnp.maximum(cand[2], cand[3]))
            m = jnp.max(m, axis=0, keepdims=True)             # (1, 128)
            feats.append(jnp.maximum(m + b22, 0.0))           # f32, NHWC order

    # ---- fc1 + ReLU + fc2 + log_softmax --------------------------------------
    h = jnp.zeros((1, 1024), f32)
    for s in range(4):                                        # s = h*2 + w
        h = h + jnp.dot(feats[s].astype(bf16), w1_ref[s],
                        preferred_element_type=f32)
    h = jnp.maximum(h + b1_ref[...], 0.0)
    logits = jnp.dot(h.astype(bf16), w2_ref[...],
                     preferred_element_type=f32) + b2_ref[...]
    mx = jnp.max(logits, axis=-1, keepdims=True)
    lse = jnp.log(jnp.sum(jnp.exp(logits - mx), axis=-1, keepdims=True))
    out_ref[...] = logits - mx - lse


# ---------------------------------------------------------------------------
# Parameters: PyTorch-layout init, then one-time packing for the kernel
# ---------------------------------------------------------------------------
def init_raw_params(key):
    """Parameters in PyTorch layout (Conv2d: (Cout,Cin,3,3), Linear: (out,in))."""
    ks = jax.random.split(key, 12)

    def conv(kw, kb, cin, cout):
        bound = 1.0 / (cin * 9.0) ** 0.5
        w = jax.random.uniform(kw, (cout, cin, 3, 3), jnp.float32, -bound, bound)
        b = jax.random.uniform(kb, (cout,), jnp.float32, -bound, bound)
        return w, b

    def linear(kw, kb, fin, fout):
        bound = 1.0 / float(fin) ** 0.5
        w = jax.random.uniform(kw, (fout, fin), jnp.float32, -bound, bound)
        b = jax.random.uniform(kb, (fout,), jnp.float32, -bound, bound)
        return w, b

    p = {}
    p["conv11_w"], p["conv11_b"] = conv(ks[0], ks[1], 1, 64)
    p["conv12_w"], p["conv12_b"] = conv(ks[2], ks[3], 64, 64)
    p["conv21_w"], p["conv21_b"] = conv(ks[4], ks[5], 64, 128)
    p["conv22_w"], p["conv22_b"] = conv(ks[6], ks[7], 128, 128)
    p["fc1_w"], p["fc1_b"] = linear(ks[8], ks[9], 128 * 2 * 2, 1024)
    p["fc2_w"], p["fc2_b"] = linear(ks[10], ks[11], 1024, 10)
    return p


def pack_params(raw):
    """One-time packing: channels padded to 128 lanes, taps flattened to
    (9,Cin,Cout), fc1 rows pre-permuted (PyTorch NCHW flatten -> our NHWC
    flatten), fc2 output padded 10->128 (pad bias = -1e30 so padded logits are
    excluded from log_softmax).  Matmul operands bf16, biases f32."""
    def conv_pack(w, b):
        cout, cin = w.shape[0], w.shape[1]
        wt = jnp.transpose(w, (2, 3, 1, 0))                      # (3,3,Cin,Cout)
        wt = jnp.pad(wt, ((0, 0), (0, 0), (0, LANES - cin), (0, LANES - cout)))
        wt = wt.reshape(9, LANES, LANES).astype(jnp.bfloat16)
        bp = jnp.pad(b, (0, LANES - cout)).reshape(1, LANES).astype(jnp.float32)
        return wt, bp

    p = {}
    # conv11 (Cin=1): taps along K, K padded 9 -> 128, Cout padded 64 -> 128.
    w11 = jnp.transpose(raw["conv11_w"], (2, 3, 1, 0)).reshape(9, 64)
    w11 = jnp.pad(w11, ((0, LANES - 9), (0, LANES - 64)))
    p["conv11_w"] = w11.astype(jnp.bfloat16)                     # (128, 128)
    p["conv11_b"] = (jnp.pad(raw["conv11_b"], (0, LANES - 64))
                     .reshape(1, LANES).astype(jnp.float32))

    p["conv12_w"], p["conv12_b"] = conv_pack(raw["conv12_w"], raw["conv12_b"])
    p["conv21_w"], p["conv21_b"] = conv_pack(raw["conv21_w"], raw["conv21_b"])
    p["conv22_w"], p["conv22_b"] = conv_pack(raw["conv22_w"], raw["conv22_b"])

    # fc1: PyTorch flatten index = c*4 + h*2 + w; kernel consumes per spatial
    # position s = h*2 + w a (128,) channel vector -> pack as (4, 128, 1024).
    w1 = raw["fc1_w"].reshape(1024, 128, 2, 2)                   # (o, c, h, w)
    w1 = jnp.transpose(w1, (2, 3, 1, 0)).reshape(4, 128, 1024)   # (s, c, o)
    p["fc1_w"] = w1.astype(jnp.bfloat16)
    p["fc1_b"] = raw["fc1_b"].reshape(1, 1024).astype(jnp.float32)

    w2 = jnp.transpose(raw["fc2_w"])                             # (1024, 10)
    p["fc2_w"] = jnp.pad(w2, ((0, 0), (0, LANES - 10))).astype(jnp.bfloat16)
    b2 = jnp.full((LANES,), -1e30, jnp.float32).at[:10].set(raw["fc2_b"])
    p["fc2_b"] = b2.reshape(1, LANES)
    return p


# ---------------------------------------------------------------------------
# Forward pass (mirrors VGGNet.forward) -- one pallas_call for the whole net
# ---------------------------------------------------------------------------
def vggnet_forward(x_nchw, params):
    n = x_nchw.shape[0]
    img = x_nchw[:, 0, :, :].astype(jnp.float32)                 # (N, 28, 28)
    img = jnp.pad(img, ((0, 0), (0, 0), (0, S0 - 28)))           # stride-32 rows
    flat = img.reshape(n, 28 * S0)
    flat = jnp.pad(flat, ((0, 0), (0, FLATL - 28 * S0)))         # (N, 928)
    # Tiny K=9 im2col for conv11 (Cin=1), K padded to 128 lanes.
    shifts = [kh * S0 + kw for kh in range(3) for kw in range(3)]
    patches = jnp.stack([flat[:, s:s + CL1] for s in shifts], axis=-1)
    patches = jnp.pad(patches, ((0, 0), (0, 0), (0, LANES - 9)))
    patches = patches.astype(jnp.bfloat16)                       # (N, 848, 128)

    def full(shape):
        return pl.BlockSpec(shape, lambda b, _n=len(shape): (0,) * _n)

    out = pl.pallas_call(
        _vggnet_kernel,
        out_shape=jax.ShapeDtypeStruct((n, 1, LANES), jnp.float32),
        grid=(n,),
        in_specs=[
            pl.BlockSpec((None, CL1, LANES), lambda b: (b, 0, 0)),   # patches
            full((LANES, LANES)), full((1, LANES)),                  # conv11
            full((9, LANES, LANES)), full((1, LANES)),               # conv12
            full((9, LANES, LANES)), full((1, LANES)),               # conv21
            full((9, LANES, LANES)), full((1, LANES)),               # conv22
            full((4, LANES, 1024)), full((1, 1024)),                 # fc1
            full((1024, LANES)), full((1, LANES)),                   # fc2
        ],
        out_specs=pl.BlockSpec((None, 1, LANES), lambda b: (b, 0, 0)),
        scratch_shapes=[
            pltpu.VMEM((ACCL, LANES), jnp.float32),    # f32 accumulator
            pltpu.VMEM((ACT1L, LANES), jnp.bfloat16),  # conv11 output
            pltpu.VMEM((ACT2L, LANES), jnp.bfloat16),  # pooled 12x12
            pltpu.VMEM((ACT3L, LANES), jnp.bfloat16),  # conv21 output
            pltpu.VMEM((SHIFTL, LANES), jnp.bfloat16),  # kw = 1 shifted copy
            pltpu.VMEM((SHIFTL, LANES), jnp.bfloat16),  # kw = 2 shifted copy
        ],
        compiler_params=pltpu.CompilerParams(
            dimension_semantics=("parallel",),
            vmem_limit_bytes=_VMEM_LIMIT,
        ),
    )(patches,
      params["conv11_w"], params["conv11_b"],
      params["conv12_w"], params["conv12_b"],
      params["conv21_w"], params["conv21_b"],
      params["conv22_w"], params["conv22_b"],
      params["fc1_w"], params["fc1_b"],
      params["fc2_w"], params["fc2_b"])
    return out[:, 0, :10]


# ---------------------------------------------------------------------------
# Plain-XLA reference (same bf16 operand rounding points as the kernel)
# ---------------------------------------------------------------------------
def reference_forward(x_nchw, raw):
    def rb(a):
        return a.astype(jnp.bfloat16).astype(jnp.float32)

    def conv(x, w, b):
        y = lax.conv_general_dilated(rb(x), rb(w), (1, 1), "VALID",
                                     dimension_numbers=("NCHW", "OIHW", "NCHW"))
        return jax.nn.relu(y + b.reshape(1, -1, 1, 1))

    def pool(x, k):
        return lax.reduce_window(x, -jnp.inf, lax.max,
                                 (1, 1, k, k), (1, 1, k, k), "VALID")

    x = conv(x_nchw, raw["conv11_w"], raw["conv11_b"])
    x = conv(x, raw["conv12_w"], raw["conv12_b"])
    x = pool(x, 2)
    x = conv(x, raw["conv21_w"], raw["conv21_b"])
    x = conv(x, raw["conv22_w"], raw["conv22_b"])
    x = pool(x, 2)
    x = pool(x, 2)
    x = x.reshape(x.shape[0], -1)
    h = jax.nn.relu(rb(x) @ rb(raw["fc1_w"]).T + raw["fc1_b"])
    logits = rb(h) @ rb(raw["fc2_w"]).T + raw["fc2_b"]
    return jax.nn.log_softmax(logits, axis=-1)


# ---------------------------------------------------------------------------
if __name__ == "__main__":
    key = jax.random.PRNGKey(0)
    k_params, k_x = jax.random.split(key)
    raw = init_raw_params(k_params)
    params = pack_params(raw)
    # 28x28 single-channel input is what the module's 128*2*2 flatten implies.
    x = jax.random.normal(k_x, (2, 1, 28, 28), dtype=jnp.float32)

    fwd = jax.jit(vggnet_forward)
    out = jax.block_until_ready(fwd(x, params))

    assert out.shape == (2, 10)
    assert bool(jnp.all(jnp.isfinite(out)))
    # log_softmax rows integrate to 1 in probability space.
    assert bool(jnp.allclose(jnp.sum(jnp.exp(out), axis=-1), 1.0, atol=1e-3))
    # Cross-check against the plain-XLA reference (matched bf16 rounding).
    ref = jax.jit(reference_forward)(x, raw)
    assert bool(jnp.allclose(jnp.exp(out), jnp.exp(ref), atol=0.03)), float(
        jnp.max(jnp.abs(jnp.exp(out) - jnp.exp(ref))))
    print("KERNEL_OK")
</pallas_src>

<mosaic_0001>
module attributes {stable_mosaic.version = 11 : i64} {
  func.func @_vggnet_kernel(%arg0: i32, %arg1: memref<1x848x128xbf16, #tpu.memory_space<vmem>>, %arg2: memref<128x128xbf16, #tpu.memory_space<vmem>>, %arg3: memref<1x128xf32, #tpu.memory_space<vmem>>, %arg4: memref<9x128x128xbf16, #tpu.memory_space<vmem>>, %arg5: memref<1x128xf32, #tpu.memory_space<vmem>>, %arg6: memref<9x128x128xbf16, #tpu.memory_space<vmem>>, %arg7: memref<1x128xf32, #tpu.memory_space<vmem>>, %arg8: memref<9x128x128xbf16, #tpu.memory_space<vmem>>, %arg9: memref<1x128xf32, #tpu.memory_space<vmem>>, %arg10: memref<4x128x1024xbf16, #tpu.memory_space<vmem>>, %arg11: memref<1x1024xf32, #tpu.memory_space<vmem>>, %arg12: memref<1024x128xbf16, #tpu.memory_space<vmem>>, %arg13: memref<1x128xf32, #tpu.memory_space<vmem>>, %arg14: memref<1x1x128xf32, #tpu.memory_space<vmem>>, %arg15: memref<848x128xf32, #tpu.memory_space<vmem>>, %arg16: memref<848x128xbf16, #tpu.memory_space<vmem>>, %arg17: memref<208x128xbf16, #tpu.memory_space<vmem>>, %arg18: memref<160x128xbf16, #tpu.memory_space<vmem>>, %arg19: memref<832x128xbf16, #tpu.memory_space<vmem>>, %arg20: memref<832x128xbf16, #tpu.memory_space<vmem>>) attributes {dimension_semantics = [#tpu.dimension_semantics<parallel>], iteration_bounds = array<i64: 2>, scalar_prefetch = 0 : i64, scratch_operands = 6 : i64, tpu.core_type = #tpu.core_type<tc>, window_params = [{transform_indices = @transform_0, window_bounds = array<i64: 1, 848, 128>}, {pipeline_mode = #tpu.pipeline_mode<synchronous>, transform_indices = @transform_1, window_bounds = array<i64: 128, 128>}, {pipeline_mode = #tpu.pipeline_mode<synchronous>, transform_indices = @transform_2, window_bounds = array<i64: 1, 128>}, {pipeline_mode = #tpu.pipeline_mode<synchronous>, transform_indices = @transform_3, window_bounds = array<i64: 9, 128, 128>}, {pipeline_mode = #tpu.pipeline_mode<synchronous>, transform_indices = @transform_4, window_bounds = array<i64: 1, 128>}, {pipeline_mode = #tpu.pipeline_mode<synchronous>, transform_indices = @transform_5, window_bounds = array<i64: 9, 128, 128>}, {pipeline_mode = #tpu.pipeline_mode<synchronous>, transform_indices = @transform_6, window_bounds = array<i64: 1, 128>}, {pipeline_mode = #tpu.pipeline_mode<synchronous>, transform_indices = @transform_7, window_bounds = array<i64: 9, 128, 128>}, {pipeline_mode = #tpu.pipeline_mode<synchronous>, transform_indices = @transform_8, window_bounds = array<i64: 1, 128>}, {pipeline_mode = #tpu.pipeline_mode<synchronous>, transform_indices = @transform_9, window_bounds = array<i64: 4, 128, 1024>}, {pipeline_mode = #tpu.pipeline_mode<synchronous>, transform_indices = @transform_10, window_bounds = array<i64: 1, 1024>}, {pipeline_mode = #tpu.pipeline_mode<synchronous>, transform_indices = @transform_11, window_bounds = array<i64: 1024, 128>}, {pipeline_mode = #tpu.pipeline_mode<synchronous>, transform_indices = @transform_12, window_bounds = array<i64: 1, 128>}, {transform_indices = @transform_13, window_bounds = array<i64: 1, 1, 128>}]} {
    %cst = arith.constant 0.000000e+00 : bf16
    %0 = vector.broadcast %cst : bf16 to vector<208x128xbf16>
    %c0 = arith.constant 0 : index
    %c0_0 = arith.constant 0 : index
    %1 = vector.load %arg17[%c0, %c0_0] : memref<208x128xbf16, #tpu.memory_space<vmem>>, vector<208x128xbf16>
    tpu.vector_store %arg17[%c0, %c0_0], %0 {strides = array<i32>} : memref<208x128xbf16, #tpu.memory_space<vmem>>, vector<208x128xbf16>,
    %c0_1 = arith.constant 0 : index
    %c0_2 = arith.constant 0 : index
    %c0_3 = arith.constant 0 : index
    %2 = vector.load %arg1[%c0_1, %c0_2, %c0_3] : memref<1x848x128xbf16, #tpu.memory_space<vmem>>, vector<1x848x128xbf16>
    %3 = vector.shape_cast %2 : vector<1x848x128xbf16> to vector<848x128xbf16>
    %c0_4 = arith.constant 0 : index
    %c0_5 = arith.constant 0 : index
    %4 = vector.load %arg2[%c0_4, %c0_5] : memref<128x128xbf16, #tpu.memory_space<vmem>>, vector<128x128xbf16>
    %cst_6 = arith.constant dense<0.000000e+00> : vector<848x128xf32>
    %5 = tpu.matmul %3, %4, %cst_6 {dimension_numbers = #tpu.dot_dimension_numbers<[1], [0], [0], [1], [0, 0, 1, 1], [], []>} : vector<848x128xbf16>, vector<128x128xbf16>, vector<848x128xf32> -> vector<848x128xf32>
    %c0_7 = arith.constant 0 : index
    %c0_8 = arith.constant 0 : index
    %6 = vector.load %arg15[%c0_7, %c0_8] : memref<848x128xf32, #tpu.memory_space<vmem>>, vector<848x128xf32>
    tpu.vector_store %arg15[%c0_7, %c0_8], %5 {strides = array<i32>} : memref<848x128xf32, #tpu.memory_space<vmem>>, vector<848x128xf32>,
    %c0_9 = arith.constant 0 : index
    %c0_10 = arith.constant 0 : index
    %7 = vector.load %arg15[%c0_9, %c0_10] : memref<848x128xf32, #tpu.memory_space<vmem>>, vector<848x128xf32>
    %c0_11 = arith.constant 0 : index
    %c0_12 = arith.constant 0 : index
    %8 = vector.load %arg3[%c0_11, %c0_12] : memref<1x128xf32, #tpu.memory_space<vmem>>, vector<1x128xf32>
    %9 = vector.broadcast %8 : vector<1x128xf32> to vector<848x128xf32>
    %10 = arith.addf %7, %9 : vector<848x128xf32>
    %cst_13 = arith.constant 0.000000e+00 : f32
    %11 = vector.broadcast %cst_13 : f32 to vector<848x128xf32>
    %12 = arith.maximumf %10, %11 : vector<848x128xf32>
    %13 = arith.truncf %12 : vector<848x128xf32> to vector<848x128xbf16>
    %c0_14 = arith.constant 0 : index
    %c0_15 = arith.constant 0 : index
    %14 = vector.load %arg16[%c0_14, %c0_15] : memref<848x128xbf16, #tpu.memory_space<vmem>>, vector<848x128xbf16>
    tpu.vector_store %arg16[%c0_14, %c0_15], %13 {strides = array<i32>} : memref<848x128xbf16, #tpu.memory_space<vmem>>, vector<848x128xbf16>,
    %c1 = arith.constant 1 : index
    %c0_16 = arith.constant 0 : index
    %15 = vector.load %arg16[%c1, %c0_16] : memref<848x128xbf16, #tpu.memory_space<vmem>>, vector<832x128xbf16>
    %c0_17 = arith.constant 0 : index
    %c0_18 = arith.constant 0 : index
    %16 = vector.load %arg19[%c0_17, %c0_18] : memref<832x128xbf16, #tpu.memory_space<vmem>>, vector<832x128xbf16>
    tpu.vector_store %arg19[%c0_17, %c0_18], %15 {strides = array<i32>} : memref<832x128xbf16, #tpu.memory_space<vmem>>, vector<832x128xbf16>,
    %c2 = arith.constant 2 : index
    %c0_19 = arith.constant 0 : index
    %17 = vector.load %arg16[%c2, %c0_19] : memref<848x128xbf16, #tpu.memory_space<vmem>>, vector<832x128xbf16>
    %c0_20 = arith.constant 0 : index
    %c0_21 = arith.constant 0 : index
    %18 = vector.load %arg20[%c0_20, %c0_21] : memref<832x128xbf16, #tpu.memory_space<vmem>>, vector<832x128xbf16>
    tpu.vector_store %arg20[%c0_20, %c0_21], %17 {strides = array<i32>} : memref<832x128xbf16, #tpu.memory_space<vmem>>, vector<832x128xbf16>,
    %c0_22 = arith.constant 0 : index
    %c0_23 = arith.constant 0 : index
    %19 = vector.load %arg16[%c0_22, %c0_23] : memref<848x128xbf16, #tpu.memory_space<vmem>>, vector<768x128xbf16>
    %c0_24 = arith.constant 0 : index
    %c0_25 = arith.constant 0 : index
    %c0_26 = arith.constant 0 : index
    %20 = vector.load %arg4[%c0_24, %c0_25, %c0_26] : memref<9x128x128xbf16, #tpu.memory_space<vmem>>, vector<1x128x128xbf16>
    %21 = vector.shape_cast %20 : vector<1x128x128xbf16> to vector<128x128xbf16>
    %cst_27 = arith.constant dense<0.000000e+00> : vector<768x128xf32>
    %22 = tpu.matmul %19, %21, %cst_27 {dimension_numbers = #tpu.dot_dimension_numbers<[1], [0], [0], [1], [0, 0, 1, 1], [], []>} : vector<768x128xbf16>, vector<128x128xbf16>, vector<768x128xf32> -> vector<768x128xf32>
    %c0_28 = arith.constant 0 : index
    %c0_29 = arith.constant 0 : index
    %23 = vector.load %arg15[%c0_28, %c0_29] : memref<848x128xf32, #tpu.memory_space<vmem>>, vector<768x128xf32>
    tpu.vector_store %arg15[%c0_28, %c0_29], %22 {strides = array<i32>} : memref<848x128xf32, #tpu.memory_space<vmem>>, vector<768x128xf32>,
    %c0_30 = arith.constant 0 : index
    %c0_31 = arith.constant 0 : index
    %24 = vector.load %arg19[%c0_30, %c0_31] : memref<832x128xbf16, #tpu.memory_space<vmem>>, vector<768x128xbf16>
    %c1_32 = arith.constant 1 : index
    %c0_33 = arith.constant 0 : index
    %c0_34 = arith.constant 0 : index
    %25 = vector.load %arg4[%c1_32, %c0_33, %c0_34] : memref<9x128x128xbf16, #tpu.memory_space<vmem>>, vector<1x128x128xbf16>
    %26 = vector.shape_cast %25 : vector<1x128x128xbf16> to vector<128x128xbf16>
    %cst_35 = arith.constant dense<0.000000e+00> : vector<768x128xf32>
    %27 = tpu.matmul %24, %26, %cst_35 {dimension_numbers = #tpu.dot_dimension_numbers<[1], [0], [0], [1], [0, 0, 1, 1], [], []>} : vector<768x128xbf16>, vector<128x128xbf16>, vector<768x128xf32> -> vector<768x128xf32>
    %c0_36 = arith.constant 0 : index
    %c0_37 = arith.constant 0 : index
    %28 = vector.load %arg15[%c0_36, %c0_37] : memref<848x128xf32, #tpu.memory_space<vmem>>, vector<768x128xf32>
    %29 = arith.addf %28, %27 : vector<768x128xf32>
    %c0_38 = arith.constant 0 : index
    %c0_39 = arith.constant 0 : index
    %30 = vector.load %arg15[%c0_38, %c0_39] : memref<848x128xf32, #tpu.memory_space<vmem>>, vector<768x128xf32>
    tpu.vector_store %arg15[%c0_38, %c0_39], %29 {strides = array<i32>} : memref<848x128xf32, #tpu.memory_space<vmem>>, vector<768x128xf32>,
    %c0_40 = arith.constant 0 : index
    %c0_41 = arith.constant 0 : index
    %31 = vector.load %arg20[%c0_40, %c0_41] : memref<832x128xbf16, #tpu.memory_space<vmem>>, vector<768x128xbf16>
    %c2_42 = arith.constant 2 : index
    %c0_43 = arith.constant 0 : index
    %c0_44 = arith.constant 0 : index
    %32 = vector.load %arg4[%c2_42, %c0_43, %c0_44] : memref<9x128x128xbf16, #tpu.memory_space<vmem>>, vector<1x128x128xbf16>
    %33 = vector.shape_cast %32 : vector<1x128x128xbf16> to vector<128x128xbf16>
    %cst_45 = arith.constant dense<0.000000e+00> : vector<768x128xf32>
    %34 = tpu.matmul %31, %33, %cst_45 {dimension_numbers = #tpu.dot_dimension_numbers<[1], [0], [0], [1], [0, 0, 1, 1], [], []>} : vector<768x128xbf16>, vector<128x128xbf16>, vector<768x128xf32> -> vector<768x128xf32>
    %c0_46 = arith.constant 0 : index
    %c0_47 = arith.constant 0 : index
    %35 = vector.load %arg15[%c0_46, %c0_47] : memref<848x128xf32, #tpu.memory_space<vmem>>, vector<768x128xf32>
    %36 = arith.addf %35, %34 : vector<768x128xf32>
    %c0_48 = arith.constant 0 : index
    %c0_49 = arith.constant 0 : index
    %37 = vector.load %arg15[%c0_48, %c0_49] : memref<848x128xf32, #tpu.memory_space<vmem>>, vector<768x128xf32>
    tpu.vector_store %arg15[%c0_48, %c0_49], %36 {strides = array<i32>} : memref<848x128xf32, #tpu.memory_space<vmem>>, vector<768x128xf32>,
    %c32 = arith.constant 32 : index
    %c0_50 = arith.constant 0 : index
    %38 = vector.load %arg16[%c32, %c0_50] : memref<848x128xbf16, #tpu.memory_space<vmem>>, vector<768x128xbf16>
    %c3 = arith.constant 3 : index
    %c0_51 = arith.constant 0 : index
    %c0_52 = arith.constant 0 : index
    %39 = vector.load %arg4[%c3, %c0_51, %c0_52] : memref<9x128x128xbf16, #tpu.memory_space<vmem>>, vector<1x128x128xbf16>
    %40 = vector.shape_cast %39 : vector<1x128x128xbf16> to vector<128x128xbf16>
    %cst_53 = arith.constant dense<0.000000e+00> : vector<768x128xf32>
    %41 = tpu.matmul %38, %40, %cst_53 {dimension_numbers = #tpu.dot_dimension_numbers<[1], [0], [0], [1], [0, 0, 1, 1], [], []>} : vector<768x128xbf16>, vector<128x128xbf16>, vector<768x128xf32> -> vector<768x128xf32>
    %c0_54 = arith.constant 0 : index
    %c0_55 = arith.constant 0 : index
    %42 = vector.load %arg15[%c0_54, %c0_55] : memref<848x128xf32, #tpu.memory_space<vmem>>, vector<768x128xf32>
    %43 = arith.addf %42, %41 : vector<768x128xf32>
    %c0_56 = arith.constant 0 : index
    %c0_57 = arith.constant 0 : index
    %44 = vector.load %arg15[%c0_56, %c0_57] : memref<848x128xf32, #tpu.memory_space<vmem>>, vector<768x128xf32>
    tpu.vector_store %arg15[%c0_56, %c0_57], %43 {strides = array<i32>} : memref<848x128xf32, #tpu.memory_space<vmem>>, vector<768x128xf32>,
    %c32_58 = arith.constant 32 : index
    %c0_59 = arith.constant 0 : index
    %45 = vector.load %arg19[%c32_58, %c0_59] : memref<832x128xbf16, #tpu.memory_space<vmem>>, vector<768x128xbf16>
    %c4 = arith.constant 4 : index
    %c0_60 = arith.constant 0 : index
    %c0_61 = arith.constant 0 : index
    %46 = vector.load %arg4[%c4, %c0_60, %c0_61] : memref<9x128x128xbf16, #tpu.memory_space<vmem>>, vector<1x128x128xbf16>
    %47 = vector.shape_cast %46 : vector<1x128x128xbf16> to vector<128x128xbf16>
    %cst_62 = arith.constant dense<0.000000e+00> : vector<768x128xf32>
    %48 = tpu.matmul %45, %47, %cst_62 {dimension_numbers = #tpu.dot_dimension_numbers<[1], [0], [0], [1], [0, 0, 1, 1], [], []>} : vector<768x128xbf16>, vector<128x128xbf16>, vector<768x128xf32> -> vector<768x128xf32>
    %c0_63 = arith.constant 0 : index
    %c0_64 = arith.constant 0 : index
    %49 = vector.load %arg15[%c0_63, %c0_64] : memref<848x128xf32, #tpu.memory_space<vmem>>, vector<768x128xf32>
    %50 = arith.addf %49, %48 : vector<768x128xf32>
    %c0_65 = arith.constant 0 : index
    %c0_66 = arith.constant 0 : index
    %51 = vector.load %arg15[%c0_65, %c0_66] : memref<848x128xf32, #tpu.memory_space<vmem>>, vector<768x128xf32>
    tpu.vector_store %arg15[%c0_65, %c0_66], %50 {strides = array<i32>} : memref<848x128xf32, #tpu.memory_space<vmem>>, vector<768x128xf32>,
    %c32_67 = arith.constant 32 : index
    %c0_68 = arith.constant 0 : index
    %52 = vector.load %arg20[%c32_67, %c0_68] : memref<832x128xbf16, #tpu.memory_space<vmem>>, vector<768x128xbf16>
    %c5 = arith.constant 5 : index
    %c0_69 = arith.constant 0 : index
    %c0_70 = arith.constant 0 : index
    %53 = vector.load %arg4[%c5, %c0_69, %c0_70] : memref<9x128x128xbf16, #tpu.memory_space<vmem>>, vector<1x128x128xbf16>
    %54 = vector.shape_cast %53 : vector<1x128x128xbf16> to vector<128x128xbf16>
    %cst_71 = arith.constant dense<0.000000e+00> : vector<768x128xf32>
    %55 = tpu.matmul %52, %54, %cst_71 {dimension_numbers = #tpu.dot_dimension_numbers<[1], [0], [0], [1], [0, 0, 1, 1], [], []>} : vector<768x128xbf16>, vector<128x128xbf16>, vector<768x128xf32> -> vector<768x128xf32>
    %c0_72 = arith.constant 0 : index
    %c0_73 = arith.constant 0 : index
    %56 = vector.load %arg15[%c0_72, %c0_73] : memref<848x128xf32, #tpu.memory_space<vmem>>, vector<768x128xf32>
    %57 = arith.addf %56, %55 : vector<768x128xf32>
    %c0_74 = arith.constant 0 : index
    %c0_75 = arith.constant 0 : index
    %58 = vector.load %arg15[%c0_74, %c0_75] : memref<848x128xf32, #tpu.memory_space<vmem>>, vector<768x128xf32>
    tpu.vector_store %arg15[%c0_74, %c0_75], %57 {strides = array<i32>} : memref<848x128xf32, #tpu.memory_space<vmem>>, vector<768x128xf32>,
    %c64 = arith.constant 64 : index
    %c0_76 = arith.constant 0 : index
    %59 = vector.load %arg16[%c64, %c0_76] : memref<848x128xbf16, #tpu.memory_space<vmem>>, vector<768x128xbf16>
    %c6 = arith.constant 6 : index
    %c0_77 = arith.constant 0 : index
    %c0_78 = arith.constant 0 : index
    %60 = vector.load %arg4[%c6, %c0_77, %c0_78] : memref<9x128x128xbf16, #tpu.memory_space<vmem>>, vector<1x128x128xbf16>
    %61 = vector.shape_cast %60 : vector<1x128x128xbf16> to vector<128x128xbf16>
    %cst_79 = arith.constant dense<0.000000e+00> : vector<768x128xf32>
    %62 = tpu.matmul %59, %61, %cst_79 {dimension_numbers = #tpu.dot_dimension_numbers<[1], [0], [0], [1], [0, 0, 1, 1], [], []>} : vector<768x128xbf16>, vector<128x128xbf16>, vector<768x128xf32> -> vector<768x128xf32>
    %c0_80 = arith.constant 0 : index
    %c0_81 = arith.constant 0 : index
    %63 = vector.load %arg15[%c0_80, %c0_81] : memref<848x128xf32, #tpu.memory_space<vmem>>, vector<768x128xf32>
    %64 = arith.addf %63, %62 : vector<768x128xf32>
    %c0_82 = arith.constant 0 : index
    %c0_83 = arith.constant 0 : index
    %65 = vector.load %arg15[%c0_82, %c0_83] : memref<848x128xf32, #tpu.memory_space<vmem>>, vector<768x128xf32>
    tpu.vector_store %arg15[%c0_82, %c0_83], %64 {strides = array<i32>} : memref<848x128xf32, #tpu.memory_space<vmem>>, vector<768x128xf32>,
    %c64_84 = arith.constant 64 : index
    %c0_85 = arith.constant 0 : index
    %66 = vector.load %arg19[%c64_84, %c0_85] : memref<832x128xbf16, #tpu.memory_space<vmem>>, vector<768x128xbf16>
    %c7 = arith.constant 7 : index
    %c0_86 = arith.constant 0 : index
    %c0_87 = arith.constant 0 : index
    %67 = vector.load %arg4[%c7, %c0_86, %c0_87] : memref<9x128x128xbf16, #tpu.memory_space<vmem>>, vector<1x128x128xbf16>
    %68 = vector.shape_cast %67 : vector<1x128x128xbf16> to vector<128x128xbf16>
    %cst_88 = arith.constant dense<0.000000e+00> : vector<768x128xf32>
    %69 = tpu.matmul %66, %68, %cst_88 {dimension_numbers = #tpu.dot_dimension_numbers<[1], [0], [0], [1], [0, 0, 1, 1], [], []>} : vector<768x128xbf16>, vector<128x128xbf16>, vector<768x128xf32> -> vector<768x128xf32>
    %c0_89 = arith.constant 0 : index
    %c0_90 = arith.constant 0 : index
    %70 = vector.load %arg15[%c0_89, %c0_90] : memref<848x128xf32, #tpu.memory_space<vmem>>, vector<768x128xf32>
    %71 = arith.addf %70, %69 : vector<768x128xf32>
    %c0_91 = arith.constant 0 : index
    %c0_92 = arith.constant 0 : index
    %72 = vector.load %arg15[%c0_91, %c0_92] : memref<848x128xf32, #tpu.memory_space<vmem>>, vector<768x128xf32>
    tpu.vector_store %arg15[%c0_91, %c0_92], %71 {strides = array<i32>} : memref<848x128xf32, #tpu.memory_space<vmem>>, vector<768x128xf32>,
    %c64_93 = arith.constant 64 : index
    %c0_94 = arith.constant 0 : index
    %73 = vector.load %arg20[%c64_93, %c0_94] : memref<832x128xbf16, #tpu.memory_space<vmem>>, vector<768x128xbf16>
    %c8 = arith.constant 8 : index
    %c0_95 = arith.constant 0 : index
    %c0_96 = arith.constant 0 : index
    %74 = vector.load %arg4[%c8, %c0_95, %c0_96] : memref<9x128x128xbf16, #tpu.memory_space<vmem>>, vector<1x128x128xbf16>
    %75 = vector.shape_cast %74 : vector<1x128x128xbf16> to vector<128x128xbf16>
    %cst_97 = arith.constant dense<0.000000e+00> : vector<768x128xf32>
    %76 = tpu.matmul %73, %75, %cst_97 {dimension_numbers = #tpu.dot_dimension_numbers<[1], [0], [0], [1], [0, 0, 1, 1], [], []>} : vector<768x128xbf16>, vector<128x128xbf16>, vector<768x128xf32> -> vector<768x128xf32>
    %c0_98 = arith.constant 0 : index
    %c0_99 = arith.constant 0 : index
    %77 = vector.load %arg15[%c0_98, %c0_99] : memref<848x128xf32, #tpu.memory_space<vmem>>, vector<768x128xf32>
    %78 = arith.addf %77, %76 : vector<768x128xf32>
    %c0_100 = arith.constant 0 : index
    %c0_101 = arith.constant 0 : index
    %79 = vector.load %arg15[%c0_100, %c0_101] : memref<848x128xf32, #tpu.memory_space<vmem>>, vector<768x128xf32>
    tpu.vector_store %arg15[%c0_100, %c0_101], %78 {strides = array<i32>} : memref<848x128xf32, #tpu.memory_space<vmem>>, vector<768x128xf32>,
    %c0_102 = arith.constant 0 : index
    %c0_103 = arith.constant 0 : index
    %80 = vector.load %arg5[%c0_102, %c0_103] : memref<1x128xf32, #tpu.memory_space<vmem>>, vector<1x128xf32>
    %c0_104 = arith.constant 0 : index
    %c0_105 = arith.constant 0 : index
    %81 = tpu.strided_load %arg15[%c0_104, %c0_105] {strides = array<i32: 2, 1>} : memref<848x128xf32, #tpu.memory_space<vmem>>, vector<12x128xf32>
    %c1_106 = arith.constant 1 : index
    %c0_107 = arith.constant 0 : index
    %82 = tpu.strided_load %arg15[%c1_106, %c0_107] {strides = array<i32: 2, 1>} : memref<848x128xf32, #tpu.memory_space<vmem>>, vector<12x128xf32>
    %83 = arith.maximumf %81, %82 : vector<12x128xf32>
    %c32_108 = arith.constant 32 : index
    %c0_109 = arith.constant 0 : index
    %84 = tpu.strided_load %arg15[%c32_108, %c0_109] {strides = array<i32: 2, 1>} : memref<848x128xf32, #tpu.memory_space<vmem>>, vector<12x128xf32>
    %c33 = arith.constant 33 : index
    %c0_110 = arith.constant 0 : index
    %85 = tpu.strided_load %arg15[%c33, %c0_110] {strides = array<i32: 2, 1>} : memref<848x128xf32, #tpu.memory_space<vmem>>, vector<12x128xf32>
    %86 = arith.maximumf %84, %85 : vector<12x128xf32>
    %87 = arith.maximumf %83, %86 : vector<12x128xf32>
    %88 = vector.broadcast %80 : vector<1x128xf32> to vector<12x128xf32>
    %89 = arith.addf %87, %88 : vector<12x128xf32>
    %cst_111 = arith.constant 0.000000e+00 : f32
    %90 = vector.broadcast %cst_111 : f32 to vector<12x128xf32>
    %91 = arith.maximumf %89, %90 : vector<12x128xf32>
    %92 = arith.truncf %91 : vector<12x128xf32> to vector<12x128xbf16>
    %c0_112 = arith.constant 0 : index
    %c0_113 = arith.constant 0 : index
    %93 = vector.load %arg17[%c0_112, %c0_113] : memref<208x128xbf16, #tpu.memory_space<vmem>>, vector<12x128xbf16>
    tpu.vector_store %arg17[%c0_112, %c0_113], %92 {strides = array<i32>} : memref<208x128xbf16, #tpu.memory_space<vmem>>, vector<12x128xbf16>,
    %c64_114 = arith.constant 64 : index
    %c0_115 = arith.constant 0 : index
    %94 = tpu.strided_load %arg15[%c64_114, %c0_115] {strides = array<i32: 2, 1>} : memref<848x128xf32, #tpu.memory_space<vmem>>, vector<12x128xf32>
    %c65 = arith.constant 65 : index
    %c0_116 = arith.constant 0 : index
    %95 = tpu.strided_load %arg15[%c65, %c0_116] {strides = array<i32: 2, 1>} : memref<848x128xf32, #tpu.memory_space<vmem>>, vector<12x128xf32>
    %96 = arith.maximumf %94, %95 : vector<12x128xf32>
    %c96 = arith.constant 96 : index
    %c0_117 = arith.constant 0 : index
    %97 = tpu.strided_load %arg15[%c96, %c0_117] {strides = array<i32: 2, 1>} : memref<848x128xf32, #tpu.memory_space<vmem>>, vector<12x128xf32>
    %c97 = arith.constant 97 : index
    %c0_118 = arith.constant 0 : index
    %98 = tpu.strided_load %arg15[%c97, %c0_118] {strides = array<i32: 2, 1>} : memref<848x128xf32, #tpu.memory_space<vmem>>, vector<12x128xf32>
    %99 = arith.maximumf %97, %98 : vector<12x128xf32>
    %100 = arith.maximumf %96, %99 : vector<12x128xf32>
    %101 = vector.broadcast %80 : vector<1x128xf32> to vector<12x128xf32>
    %102 = arith.addf %100, %101 : vector<12x128xf32>
    %cst_119 = arith.constant 0.000000e+00 : f32
    %103 = vector.broadcast %cst_119 : f32 to vector<12x128xf32>
    %104 = arith.maximumf %102, %103 : vector<12x128xf32>
    %105 = arith.truncf %104 : vector<12x128xf32> to vector<12x128xbf16>
    %c16 = arith.constant 16 : index
    %c0_120 = arith.constant 0 : index
    %106 = vector.load %arg17[%c16, %c0_120] : memref<208x128xbf16, #tpu.memory_space<vmem>>, vector<12x128xbf16>
    tpu.vector_store %arg17[%c16, %c0_120], %105 {strides = array<i32>} : memref<208x128xbf16, #tpu.memory_space<vmem>>, vector<12x128xbf16>,
    %c128 = arith.constant 128 : index
    %c0_121 = arith.constant 0 : index
    %107 = tpu.strided_load %arg15[%c128, %c0_121] {strides = array<i32: 2, 1>} : memref<848x128xf32, #tpu.memory_space<vmem>>, vector<12x128xf32>
    %c129 = arith.constant 129 : index
    %c0_122 = arith.constant 0 : index
    %108 = tpu.strided_load %arg15[%c129, %c0_122] {strides = array<i32: 2, 1>} : memref<848x128xf32, #tpu.memory_space<vmem>>, vector<12x128xf32>
    %109 = arith.maximumf %107, %108 : vector<12x128xf32>
    %c160 = arith.constant 160 : index
    %c0_123 = arith.constant 0 : index
    %110 = tpu.strided_load %arg15[%c160, %c0_123] {strides = array<i32: 2, 1>} : memref<848x128xf32, #tpu.memory_space<vmem>>, vector<12x128xf32>
    %c161 = arith.constant 161 : index
    %c0_124 = arith.constant 0 : index
    %111 = tpu.strided_load %arg15[%c161, %c0_124] {strides = array<i32: 2, 1>} : memref<848x128xf32, #tpu.memory_space<vmem>>, vector<12x128xf32>
    %112 = arith.maximumf %110, %111 : vector<12x128xf32>
    %113 = arith.maximumf %109, %112 : vector<12x128xf32>
    %114 = vector.broadcast %80 : vector<1x128xf32> to vector<12x128xf32>
    %115 = arith.addf %113, %114 : vector<12x128xf32>
    %cst_125 = arith.constant 0.000000e+00 : f32
    %116 = vector.broadcast %cst_125 : f32 to vector<12x128xf32>
    %117 = arith.maximumf %115, %116 : vector<12x128xf32>
    %118 = arith.truncf %117 : vector<12x128xf32> to vector<12x128xbf16>
    %c32_126 = arith.constant 32 : index
    %c0_127 = arith.constant 0 : index
    %119 = vector.load %arg17[%c32_126, %c0_127] : memref<208x128xbf16, #tpu.memory_space<vmem>>, vector<12x128xbf16>
    tpu.vector_store %arg17[%c32_126, %c0_127], %118 {strides = array<i32>} : memref<208x128xbf16, #tpu.memory_space<vmem>>, vector<12x128xbf16>,
    %c192 = arith.constant 192 : index
    %c0_128 = arith.constant 0 : index
    %120 = tpu.strided_load %arg15[%c192, %c0_128] {strides = array<i32: 2, 1>} : memref<848x128xf32, #tpu.memory_space<vmem>>, vector<12x128xf32>
    %c193 = arith.constant 193 : index
    %c0_129 = arith.constant 0 : index
    %121 = tpu.strided_load %arg15[%c193, %c0_129] {strides = array<i32: 2, 1>} : memref<848x128xf32, #tpu.memory_space<vmem>>, vector<12x128xf32>
    %122 = arith.maximumf %120, %121 : vector<12x128xf32>
    %c224 = arith.constant 224 : index
    %c0_130 = arith.constant 0 : index
    %123 = tpu.strided_load %arg15[%c224, %c0_130] {strides = array<i32: 2, 1>} : memref<848x128xf32, #tpu.memory_space<vmem>>, vector<12x128xf32>
    %c225 = arith.constant 225 : index
    %c0_131 = arith.constant 0 : index
    %124 = tpu.strided_load %arg15[%c225, %c0_131] {strides = array<i32: 2, 1>} : memref<848x128xf32, #tpu.memory_space<vmem>>, vector<12x128xf32>
    %125 = arith.maximumf %123, %124 : vector<12x128xf32>
    %126 = arith.maximumf %122, %125 : vector<12x128xf32>
    %127 = vector.broadcast %80 : vector<1x128xf32> to vector<12x128xf32>
    %128 = arith.addf %126, %127 : vector<12x128xf32>
    %cst_132 = arith.constant 0.000000e+00 : f32
    %129 = vector.broadcast %cst_132 : f32 to vector<12x128xf32>
    %130 = arith.maximumf %128, %129 : vector<12x128xf32>
    %131 = arith.truncf %130 : vector<12x128xf32> to vector<12x128xbf16>
    %c48 = arith.constant 48 : index
    %c0_133 = arith.constant 0 : index
    %132 = vector.load %arg17[%c48, %c0_133] : memref<208x128xbf16, #tpu.memory_space<vmem>>, vector<12x128xbf16>
    tpu.vector_store %arg17[%c48, %c0_133], %131 {strides = array<i32>} : memref<208x128xbf16, #tpu.memory_space<vmem>>, vector<12x128xbf16>,
    %c256 = arith.constant 256 : index
    %c0_134 = arith.constant 0 : index
    %133 = tpu.strided_load %arg15[%c256, %c0_134] {strides = array<i32: 2, 1>} : memref<848x128xf32, #tpu.memory_space<vmem>>, vector<12x128xf32>
    %c257 = arith.constant 257 : index
    %c0_135 = arith.constant 0 : index
    %134 = tpu.strided_load %arg15[%c257, %c0_135] {strides = array<i32: 2, 1>} : memref<848x128xf32, #tpu.memory_space<vmem>>, vector<12x128xf32>
    %135 = arith.maximumf %133, %134 : vector<12x128xf32>
    %c288 = arith.constant 288 : index
    %c0_136 = arith.constant 0 : index
    %136 = tpu.strided_load %arg15[%c288, %c0_136] {strides = array<i32: 2, 1>} : memref<848x128xf32, #tpu.memory_space<vmem>>, vector<12x128xf32>
    %c289 = arith.constant 289 : index
    %c0_137 = arith.constant 0 : index
    %137 = tpu.strided_load %arg15[%c289, %c0_137] {strides = array<i32: 2, 1>} : memref<848x128xf32, #tpu.memory_space<vmem>>, vector<12x128xf32>
    %138 = arith.maximumf %136, %137 : vector<12x128xf32>
    %139 = arith.maximumf %135, %138 : vector<12x128xf32>
    %140 = vector.broadcast %80 : vector<1x128xf32> to vector<12x128xf32>
    %141 = arith.addf %139, %140 : vector<12x128xf32>
    %cst_138 = arith.constant 0.000000e+00 : f32
    %142 = vector.broadcast %cst_138 : f32 to vector<12x128xf32>
    %143 = arith.maximumf %141, %142 : vector<12x128xf32>
    %144 = arith.truncf %143 : vector<12x128xf32> to vector<12x128xbf16>
    %c64_139 = arith.constant 64 : index
    %c0_140 = arith.constant 0 : index
    %145 = vector.load %arg17[%c64_139, %c0_140] : memref<208x128xbf16, #tpu.memory_space<vmem>>, vector<12x128xbf16>
    tpu.vector_store %arg17[%c64_139, %c0_140], %144 {strides = array<i32>} : memref<208x128xbf16, #tpu.memory_space<vmem>>, vector<12x128xbf16>,
    %c320 = arith.constant 320 : index
    %c0_141 = arith.constant 0 : index
    %146 = tpu.strided_load %arg15[%c320, %c0_141] {strides = array<i32: 2, 1>} : memref<848x128xf32, #tpu.memory_space<vmem>>, vector<12x128xf32>
    %c321 = arith.constant 321 : index
    %c0_142 = arith.constant 0 : index
    %147 = tpu.strided_load %arg15[%c321, %c0_142] {strides = array<i32: 2, 1>} : memref<848x128xf32, #tpu.memory_space<vmem>>, vector<12x128xf32>
    %148 = arith.maximumf %146, %147 : vector<12x128xf32>
    %c352 = arith.constant 352 : index
    %c0_143 = arith.constant 0 : index
    %149 = tpu.strided_load %arg15[%c352, %c0_143] {strides = array<i32: 2, 1>} : memref<848x128xf32, #tpu.memory_space<vmem>>, vector<12x128xf32>
    %c353 = arith.constant 353 : index
    %c0_144 = arith.constant 0 : index
    %150 = tpu.strided_load %arg15[%c353, %c0_144] {strides = array<i32: 2, 1>} : memref<848x128xf32, #tpu.memory_space<vmem>>, vector<12x128xf32>
    %151 = arith.maximumf %149, %150 : vector<12x128xf32>
    %152 = arith.maximumf %148, %151 : vector<12x128xf32>
    %153 = vector.broadcast %80 : vector<1x128xf32> to vector<12x128xf32>
    %154 = arith.addf %152, %153 : vector<12x128xf32>
    %cst_145 = arith.constant 0.000000e+00 : f32
    %155 = vector.broadcast %cst_145 : f32 to vector<12x128xf32>
    %156 = arith.maximumf %154, %155 : vector<12x128xf32>
    %157 = arith.truncf %156 : vector<12x128xf32> to vector<12x128xbf16>
    %c80 = arith.constant 80 : index
    %c0_146 = arith.constant 0 : index
    %158 = vector.load %arg17[%c80, %c0_146] : memref<208x128xbf16, #tpu.memory_space<vmem>>, vector<12x128xbf16>
    tpu.vector_store %arg17[%c80, %c0_146], %157 {strides = array<i32>} : memref<208x128xbf16, #tpu.memory_space<vmem>>, vector<12x128xbf16>,
    %c384 = arith.constant 384 : index
    %c0_147 = arith.constant 0 : index
    %159 = tpu.strided_load %arg15[%c384, %c0_147] {strides = array<i32: 2, 1>} : memref<848x128xf32, #tpu.memory_space<vmem>>, vector<12x128xf32>
    %c385 = arith.constant 385 : index
    %c0_148 = arith.constant 0 : index
    %160 = tpu.strided_load %arg15[%c385, %c0_148] {strides = array<i32: 2, 1>} : memref<848x128xf32, #tpu.memory_space<vmem>>, vector<12x128xf32>
    %161 = arith.maximumf %159, %160 : vector<12x128xf32>
    %c416 = arith.constant 416 : index
    %c0_149 = arith.constant 0 : index
    %162 = tpu.strided_load %arg15[%c416, %c0_149] {strides = array<i32: 2, 1>} : memref<848x128xf32, #tpu.memory_space<vmem>>, vector<12x128xf32>
    %c417 = arith.constant 417 : index
    %c0_150 = arith.constant 0 : index
    %163 = tpu.strided_load %arg15[%c417, %c0_150] {strides = array<i32: 2, 1>} : memref<848x128xf32, #tpu.memory_space<vmem>>, vector<12x128xf32>
    %164 = arith.maximumf %162, %163 : vector<12x128xf32>
    %165 = arith.maximumf %161, %164 : vector<12x128xf32>
    %166 = vector.broadcast %80 : vector<1x128xf32> to vector<12x128xf32>
    %167 = arith.addf %165, %166 : vector<12x128xf32>
    %cst_151 = arith.constant 0.000000e+00 : f32
    %168 = vector.broadcast %cst_151 : f32 to vector<12x128xf32>
    %169 = arith.maximumf %167, %168 : vector<12x128xf32>
    %170 = arith.truncf %169 : vector<12x128xf32> to vector<12x128xbf16>
    %c96_152 = arith.constant 96 : index
    %c0_153 = arith.constant 0 : index
    %171 = vector.load %arg17[%c96_152, %c0_153] : memref<208x128xbf16, #tpu.memory_space<vmem>>, vector<12x128xbf16>
    tpu.vector_store %arg17[%c96_152, %c0_153], %170 {strides = array<i32>} : memref<208x128xbf16, #tpu.memory_space<vmem>>, vector<12x128xbf16>,
    %c448 = arith.constant 448 : index
    %c0_154 = arith.constant 0 : index
    %172 = tpu.strided_load %arg15[%c448, %c0_154] {strides = array<i32: 2, 1>} : memref<848x128xf32, #tpu.memory_space<vmem>>, vector<12x128xf32>
    %c449 = arith.constant 449 : index
    %c0_155 = arith.constant 0 : index
    %173 = tpu.strided_load %arg15[%c449, %c0_155] {strides = array<i32: 2, 1>} : memref<848x128xf32, #tpu.memory_space<vmem>>, vector<12x128xf32>
    %174 = arith.maximumf %172, %173 : vector<12x128xf32>
    %c480 = arith.constant 480 : index
    %c0_156 = arith.constant 0 : index
    %175 = tpu.strided_load %arg15[%c480, %c0_156] {strides = array<i32: 2, 1>} : memref<848x128xf32, #tpu.memory_space<vmem>>, vector<12x128xf32>
    %c481 = arith.constant 481 : index
    %c0_157 = arith.constant 0 : index
    %176 = tpu.strided_load %arg15[%c481, %c0_157] {strides = array<i32: 2, 1>} : memref<848x128xf32, #tpu.memory_space<vmem>>, vector<12x128xf32>
    %177 = arith.maximumf %175, %176 : vector<12x128xf32>
    %178 = arith.maximumf %174, %177 : vector<12x128xf32>
    %179 = vector.broadcast %80 : vector<1x128xf32> to vector<12x128xf32>
    %180 = arith.addf %178, %179 : vector<12x128xf32>
    %cst_158 = arith.constant 0.000000e+00 : f32
    %181 = vector.broadcast %cst_158 : f32 to vector<12x128xf32>
    %182 = arith.maximumf %180, %181 : vector<12x128xf32>
    %183 = arith.truncf %182 : vector<12x128xf32> to vector<12x128xbf16>
    %c112 = arith.constant 112 : index
    %c0_159 = arith.constant 0 : index
    %184 = vector.load %arg17[%c112, %c0_159] : memref<208x128xbf16, #tpu.memory_space<vmem>>, vector<12x128xbf16>
    tpu.vector_store %arg17[%c112, %c0_159], %183 {strides = array<i32>} : memref<208x128xbf16, #tpu.memory_space<vmem>>, vector<12x128xbf16>,
    %c512 = arith.constant 512 : index
    %c0_160 = arith.constant 0 : index
    %185 = tpu.strided_load %arg15[%c512, %c0_160] {strides = array<i32: 2, 1>} : memref<848x128xf32, #tpu.memory_space<vmem>>, vector<12x128xf32>
    %c513 = arith.constant 513 : index
    %c0_161 = arith.constant 0 : index
    %186 = tpu.strided_load %arg15[%c513, %c0_161] {strides = array<i32: 2, 1>} : memref<848x128xf32, #tpu.memory_space<vmem>>, vector<12x128xf32>
    %187 = arith.maximumf %185, %186 : vector<12x128xf32>
    %c544 = arith.constant 544 : index
    %c0_162 = arith.constant 0 : index
    %188 = tpu.strided_load %arg15[%c544, %c0_162] {strides = array<i32: 2, 1>} : memref<848x128xf32, #tpu.memory_space<vmem>>, vector<12x128xf32>
    %c545 = arith.constant 545 : index
    %c0_163 = arith.constant 0 : index
    %189 = tpu.strided_load %arg15[%c545, %c0_163] {strides = array<i32: 2, 1>} : memref<848x128xf32, #tpu.memory_space<vmem>>, vector<12x128xf32>
    %190 = arith.maximumf %188, %189 : vector<12x128xf32>
    %191 = arith.maximumf %187, %190 : vector<12x128xf32>
    %192 = vector.broadcast %80 : vector<1x128xf32> to vector<12x128xf32>
    %193 = arith.addf %191, %192 : vector<12x128xf32>
    %cst_164 = arith.constant 0.000000e+00 : f32
    %194 = vector.broadcast %cst_164 : f32 to vector<12x128xf32>
    %195 = arith.maximumf %193, %194 : vector<12x128xf32>
    %196 = arith.truncf %195 : vector<12x128xf32> to vector<12x128xbf16>
    %c128_165 = arith.constant 128 : index
    %c0_166 = arith.constant 0 : index
    %197 = vector.load %arg17[%c128_165, %c0_166] : memref<208x128xbf16, #tpu.memory_space<vmem>>, vector<12x128xbf16>
    tpu.vector_store %arg17[%c128_165, %c0_166], %196 {strides = array<i32>} : memref<208x128xbf16, #tpu.memory_space<vmem>>, vector<12x128xbf16>,
    %c576 = arith.constant 576 : index
    %c0_167 = arith.constant 0 : index
    %198 = tpu.strided_load %arg15[%c576, %c0_167] {strides = array<i32: 2, 1>} : memref<848x128xf32, #tpu.memory_space<vmem>>, vector<12x128xf32>
    %c577 = arith.constant 577 : index
    %c0_168 = arith.constant 0 : index
    %199 = tpu.strided_load %arg15[%c577, %c0_168] {strides = array<i32: 2, 1>} : memref<848x128xf32, #tpu.memory_space<vmem>>, vector<12x128xf32>
    %200 = arith.maximumf %198, %199 : vector<12x128xf32>
    %c608 = arith.constant 608 : index
    %c0_169 = arith.constant 0 : index
    %201 = tpu.strided_load %arg15[%c608, %c0_169] {strides = array<i32: 2, 1>} : memref<848x128xf32, #tpu.memory_space<vmem>>, vector<12x128xf32>
    %c609 = arith.constant 609 : index
    %c0_170 = arith.constant 0 : index
    %202 = tpu.strided_load %arg15[%c609, %c0_170] {strides = array<i32: 2, 1>} : memref<848x128xf32, #tpu.memory_space<vmem>>, vector<12x128xf32>
    %203 = arith.maximumf %201, %202 : vector<12x128xf32>
    %204 = arith.maximumf %200, %203 : vector<12x128xf32>
    %205 = vector.broadcast %80 : vector<1x128xf32> to vector<12x128xf32>
    %206 = arith.addf %204, %205 : vector<12x128xf32>
    %cst_171 = arith.constant 0.000000e+00 : f32
    %207 = vector.broadcast %cst_171 : f32 to vector<12x128xf32>
    %208 = arith.maximumf %206, %207 : vector<12x128xf32>
    %209 = arith.truncf %208 : vector<12x128xf32> to vector<12x128xbf16>
    %c144 = arith.constant 144 : index
    %c0_172 = arith.constant 0 : index
    %210 = vector.load %arg17[%c144, %c0_172] : memref<208x128xbf16, #tpu.memory_space<vmem>>, vector<12x128xbf16>
    tpu.vector_store %arg17[%c144, %c0_172], %209 {strides = array<i32>} : memref<208x128xbf16, #tpu.memory_space<vmem>>, vector<12x128xbf16>,
    %c640 = arith.constant 640 : index
    %c0_173 = arith.constant 0 : index
    %211 = tpu.strided_load %arg15[%c640, %c0_173] {strides = array<i32: 2, 1>} : memref<848x128xf32, #tpu.memory_space<vmem>>, vector<12x128xf32>
    %c641 = arith.constant 641 : index
    %c0_174 = arith.constant 0 : index
    %212 = tpu.strided_load %arg15[%c641, %c0_174] {strides = array<i32: 2, 1>} : memref<848x128xf32, #tpu.memory_space<vmem>>, vector<12x128xf32>
    %213 = arith.maximumf %211, %212 : vector<12x128xf32>
    %c672 = arith.constant 672 : index
    %c0_175 = arith.constant 0 : index
    %214 = tpu.strided_load %arg15[%c672, %c0_175] {strides = array<i32: 2, 1>} : memref<848x128xf32, #tpu.memory_space<vmem>>, vector<12x128xf32>
    %c673 = arith.constant 673 : index
    %c0_176 = arith.constant 0 : index
    %215 = tpu.strided_load %arg15[%c673, %c0_176] {strides = array<i32: 2, 1>} : memref<848x128xf32, #tpu.memory_space<vmem>>, vector<12x128xf32>
    %216 = arith.maximumf %214, %215 : vector<12x128xf32>
    %217 = arith.maximumf %213, %216 : vector<12x128xf32>
    %218 = vector.broadcast %80 : vector<1x128xf32> to vector<12x128xf32>
    %219 = arith.addf %217, %218 : vector<12x128xf32>
    %cst_177 = arith.constant 0.000000e+00 : f32
    %220 = vector.broadcast %cst_177 : f32 to vector<12x128xf32>
    %221 = arith.maximumf %219, %220 : vector<12x128xf32>
    %222 = arith.truncf %221 : vector<12x128xf32> to vector<12x128xbf16>
    %c160_178 = arith.constant 160 : index
    %c0_179 = arith.constant 0 : index
    %223 = vector.load %arg17[%c160_178, %c0_179] : memref<208x128xbf16, #tpu.memory_space<vmem>>, vector<12x128xbf16>
    tpu.vector_store %arg17[%c160_178, %c0_179], %222 {strides = array<i32>} : memref<208x128xbf16, #tpu.memory_space<vmem>>, vector<12x128xbf16>,
    %c704 = arith.constant 704 : index
    %c0_180 = arith.constant 0 : index
    %224 = tpu.strided_load %arg15[%c704, %c0_180] {strides = array<i32: 2, 1>} : memref<848x128xf32, #tpu.memory_space<vmem>>, vector<12x128xf32>
    %c705 = arith.constant 705 : index
    %c0_181 = arith.constant 0 : index
    %225 = tpu.strided_load %arg15[%c705, %c0_181] {strides = array<i32: 2, 1>} : memref<848x128xf32, #tpu.memory_space<vmem>>, vector<12x128xf32>
    %226 = arith.maximumf %224, %225 : vector<12x128xf32>
    %c736 = arith.constant 736 : index
    %c0_182 = arith.constant 0 : index
    %227 = tpu.strided_load %arg15[%c736, %c0_182] {strides = array<i32: 2, 1>} : memref<848x128xf32, #tpu.memory_space<vmem>>, vector<12x128xf32>
    %c737 = arith.constant 737 : index
    %c0_183 = arith.constant 0 : index
    %228 = tpu.strided_load %arg15[%c737, %c0_183] {strides = array<i32: 2, 1>} : memref<848x128xf32, #tpu.memory_space<vmem>>, vector<12x128xf32>
    %229 = arith.maximumf %227, %228 : vector<12x128xf32>
    %230 = arith.maximumf %226, %229 : vector<12x128xf32>
    %231 = vector.broadcast %80 : vector<1x128xf32> to vector<12x128xf32>
    %232 = arith.addf %230, %231 : vector<12x128xf32>
    %cst_184 = arith.constant 0.000000e+00 : f32
    %233 = vector.broadcast %cst_184 : f32 to vector<12x128xf32>
    %234 = arith.maximumf %232, %233 : vector<12x128xf32>
    %235 = arith.truncf %234 : vector<12x128xf32> to vector<12x128xbf16>
    %c176 = arith.constant 176 : index
    %c0_185 = arith.constant 0 : index
    %236 = vector.load %arg17[%c176, %c0_185] : memref<208x128xbf16, #tpu.memory_space<vmem>>, vector<12x128xbf16>
    tpu.vector_store %arg17[%c176, %c0_185], %235 {strides = array<i32>} : memref<208x128xbf16, #tpu.memory_space<vmem>>, vector<12x128xbf16>,
    %c1_186 = arith.constant 1 : index
    %c0_187 = arith.constant 0 : index
    %237 = vector.load %arg17[%c1_186, %c0_187] : memref<208x128xbf16, #tpu.memory_space<vmem>>, vector<192x128xbf16>
    %c0_188 = arith.constant 0 : index
    %c0_189 = arith.constant 0 : index
    %238 = vector.load %arg19[%c0_188, %c0_189] : memref<832x128xbf16, #tpu.memory_space<vmem>>, vector<192x128xbf16>
    tpu.vector_store %arg19[%c0_188, %c0_189], %237 {strides = array<i32>} : memref<832x128xbf16, #tpu.memory_space<vmem>>, vector<192x128xbf16>,
    %c2_190 = arith.constant 2 : index
    %c0_191 = arith.constant 0 : index
    %239 = vector.load %arg17[%c2_190, %c0_191] : memref<208x128xbf16, #tpu.memory_space<vmem>>, vector<192x128xbf16>
    %c0_192 = arith.constant 0 : index
    %c0_193 = arith.constant 0 : index
    %240 = vector.load %arg20[%c0_192, %c0_193] : memref<832x128xbf16, #tpu.memory_space<vmem>>, vector<192x128xbf16>
    tpu.vector_store %arg20[%c0_192, %c0_193], %239 {strides = array<i32>} : memref<832x128xbf16, #tpu.memory_space<vmem>>, vector<192x128xbf16>,
    %c0_194 = arith.constant 0 : index
    %c0_195 = arith.constant 0 : index
    %241 = vector.load %arg17[%c0_194, %c0_195] : memref<208x128xbf16, #tpu.memory_space<vmem>>, vector<160x128xbf16>
    %c0_196 = arith.constant 0 : index
    %c0_197 = arith.constant 0 : index
    %c0_198 = arith.constant 0 : index
    %242 = vector.load %arg6[%c0_196, %c0_197, %c0_198] : memref<9x128x128xbf16, #tpu.memory_space<vmem>>, vector<1x128x128xbf16>
    %243 = vector.shape_cast %242 : vector<1x128x128xbf16> to vector<128x128xbf16>
    %cst_199 = arith.constant dense<0.000000e+00> : vector<160x128xf32>
    %244 = tpu.matmul %241, %243, %cst_199 {dimension_numbers = #tpu.dot_dimension_numbers<[1], [0], [0], [1], [0, 0, 1, 1], [], []>} : vector<160x128xbf16>, vector<128x128xbf16>, vector<160x128xf32> -> vector<160x128xf32>
    %c0_200 = arith.constant 0 : index
    %c0_201 = arith.constant 0 : index
    %245 = vector.load %arg15[%c0_200, %c0_201] : memref<848x128xf32, #tpu.memory_space<vmem>>, vector<160x128xf32>
    tpu.vector_store %arg15[%c0_200, %c0_201], %244 {strides = array<i32>} : memref<848x128xf32, #tpu.memory_space<vmem>>, vector<160x128xf32>,
    %c0_202 = arith.constant 0 : index
    %c0_203 = arith.constant 0 : index
    %246 = vector.load %arg19[%c0_202, %c0_203] : memref<832x128xbf16, #tpu.memory_space<vmem>>, vector<160x128xbf16>
    %c1_204 = arith.constant 1 : index
    %c0_205 = arith.constant 0 : index
    %c0_206 = arith.constant 0 : index
    %247 = vector.load %arg6[%c1_204, %c0_205, %c0_206] : memref<9x128x128xbf16, #tpu.memory_space<vmem>>, vector<1x128x128xbf16>
    %248 = vector.shape_cast %247 : vector<1x128x128xbf16> to vector<128x128xbf16>
    %cst_207 = arith.constant dense<0.000000e+00> : vector<160x128xf32>
    %249 = tpu.matmul %246, %248, %cst_207 {dimension_numbers = #tpu.dot_dimension_numbers<[1], [0], [0], [1], [0, 0, 1, 1], [], []>} : vector<160x128xbf16>, vector<128x128xbf16>, vector<160x128xf32> -> vector<160x128xf32>
    %c0_208 = arith.constant 0 : index
    %c0_209 = arith.constant 0 : index
    %250 = vector.load %arg15[%c0_208, %c0_209] : memref<848x128xf32, #tpu.memory_space<vmem>>, vector<160x128xf32>
    %251 = arith.addf %250, %249 : vector<160x128xf32>
    %c0_210 = arith.constant 0 : index
    %c0_211 = arith.constant 0 : index
    %252 = vector.load %arg15[%c0_210, %c0_211] : memref<848x128xf32, #tpu.memory_space<vmem>>, vector<160x128xf32>
    tpu.vector_store %arg15[%c0_210, %c0_211], %251 {strides = array<i32>} : memref<848x128xf32, #tpu.memory_space<vmem>>, vector<160x128xf32>,
    %c0_212 = arith.constant 0 : index
    %c0_213 = arith.constant 0 : index
    %253 = vector.load %arg20[%c0_212, %c0_213] : memref<832x128xbf16, #tpu.memory_space<vmem>>, vector<160x128xbf16>
    %c2_214 = arith.constant 2 : index
    %c0_215 = arith.constant 0 : index
    %c0_216 = arith.constant 0 : index
    %254 = vector.load %arg6[%c2_214, %c0_215, %c0_216] : memref<9x128x128xbf16, #tpu.memory_space<vmem>>, vector<1x128x128xbf16>
    %255 = vector.shape_cast %254 : vector<1x128x128xbf16> to vector<128x128xbf16>
    %cst_217 = arith.constant dense<0.000000e+00> : vector<160x128xf32>
    %256 = tpu.matmul %253, %255, %cst_217 {dimension_numbers = #tpu.dot_dimension_numbers<[1], [0], [0], [1], [0, 0, 1, 1], [], []>} : vector<160x128xbf16>, vector<128x128xbf16>, vector<160x128xf32> -> vector<160x128xf32>
    %c0_218 = arith.constant 0 : index
    %c0_219 = arith.constant 0 : index
    %257 = vector.load %arg15[%c0_218, %c0_219] : memref<848x128xf32, #tpu.memory_space<vmem>>, vector<160x128xf32>
    %258 = arith.addf %257, %256 : vector<160x128xf32>
    %c0_220 = arith.constant 0 : index
    %c0_221 = arith.constant 0 : index
    %259 = vector.load %arg15[%c0_220, %c0_221] : memref<848x128xf32, #tpu.memory_space<vmem>>, vector<160x128xf32>
    tpu.vector_store %arg15[%c0_220, %c0_221], %258 {strides = array<i32>} : memref<848x128xf32, #tpu.memory_space<vmem>>, vector<160x128xf32>,
    %c16_222 = arith.constant 16 : index
    %c0_223 = arith.constant 0 : index
    %260 = vector.load %arg17[%c16_222, %c0_223] : memref<208x128xbf16, #tpu.memory_space<vmem>>, vector<160x128xbf16>
    %c3_224 = arith.constant 3 : index
    %c0_225 = arith.constant 0 : index
    %c0_226 = arith.constant 0 : index
    %261 = vector.load %arg6[%c3_224, %c0_225, %c0_226] : memref<9x128x128xbf16, #tpu.memory_space<vmem>>, vector<1x128x128xbf16>
    %262 = vector.shape_cast %261 : vector<1x128x128xbf16> to vector<128x128xbf16>
    %cst_227 = arith.constant dense<0.000000e+00> : vector<160x128xf32>
    %263 = tpu.matmul %260, %262, %cst_227 {dimension_numbers = #tpu.dot_dimension_numbers<[1], [0], [0], [1], [0, 0, 1, 1], [], []>} : vector<160x128xbf16>, vector<128x128xbf16>, vector<160x128xf32> -> vector<160x128xf32>
    %c0_228 = arith.constant 0 : index
    %c0_229 = arith.constant 0 : index
    %264 = vector.load %arg15[%c0_228, %c0_229] : memref<848x128xf32, #tpu.memory_space<vmem>>, vector<160x128xf32>
    %265 = arith.addf %264, %263 : vector<160x128xf32>
    %c0_230 = arith.constant 0 : index
    %c0_231 = arith.constant 0 : index
    %266 = vector.load %arg15[%c0_230, %c0_231] : memref<848x128xf32, #tpu.memory_space<vmem>>, vector<160x128xf32>
    tpu.vector_store %arg15[%c0_230, %c0_231], %265 {strides = array<i32>} : memref<848x128xf32, #tpu.memory_space<vmem>>, vector<160x128xf32>,
    %c16_232 = arith.constant 16 : index
    %c0_233 = arith.constant 0 : index
    %267 = vector.load %arg19[%c16_232, %c0_233] : memref<832x128xbf16, #tpu.memory_space<vmem>>, vector<160x128xbf16>
    %c4_234 = arith.constant 4 : index
    %c0_235 = arith.constant 0 : index
    %c0_236 = arith.constant 0 : index
    %268 = vector.load %arg6[%c4_234, %c0_235, %c0_236] : memref<9x128x128xbf16, #tpu.memory_space<vmem>>, vector<1x128x128xbf16>
    %269 = vector.shape_cast %268 : vector<1x128x128xbf16> to vector<128x128xbf16>
    %cst_237 = arith.constant dense<0.000000e+00> : vector<160x128xf32>
    %270 = tpu.matmul %267, %269, %cst_237 {dimension_numbers = #tpu.dot_dimension_numbers<[1], [0], [0], [1], [0, 0, 1, 1], [], []>} : vector<160x128xbf16>, vector<128x128xbf16>, vector<160x128xf32> -> vector<160x128xf32>
    %c0_238 = arith.constant 0 : index
    %c0_239 = arith.constant 0 : index
    %271 = vector.load %arg15[%c0_238, %c0_239] : memref<848x128xf32, #tpu.memory_space<vmem>>, vector<160x128xf32>
    %272 = arith.addf %271, %270 : vector<160x128xf32>
    %c0_240 = arith.constant 0 : index
    %c0_241 = arith.constant 0 : index
    %273 = vector.load %arg15[%c0_240, %c0_241] : memref<848x128xf32, #tpu.memory_space<vmem>>, vector<160x128xf32>
    tpu.vector_store %arg15[%c0_240, %c0_241], %272 {strides = array<i32>} : memref<848x128xf32, #tpu.memory_space<vmem>>, vector<160x128xf32>,
    %c16_242 = arith.constant 16 : index
    %c0_243 = arith.constant 0 : index
    %274 = vector.load %arg20[%c16_242, %c0_243] : memref<832x128xbf16, #tpu.memory_space<vmem>>, vector<160x128xbf16>
    %c5_244 = arith.constant 5 : index
    %c0_245 = arith.constant 0 : index
    %c0_246 = arith.constant 0 : index
    %275 = vector.load %arg6[%c5_244, %c0_245, %c0_246] : memref<9x128x128xbf16, #tpu.memory_space<vmem>>, vector<1x128x128xbf16>
    %276 = vector.shape_cast %275 : vector<1x128x128xbf16> to vector<128x128xbf16>
    %cst_247 = arith.constant dense<0.000000e+00> : vector<160x128xf32>
    %277 = tpu.matmul %274, %276, %cst_247 {dimension_numbers = #tpu.dot_dimension_numbers<[1], [0], [0], [1], [0, 0, 1, 1], [], []>} : vector<160x128xbf16>, vector<128x128xbf16>, vector<160x128xf32> -> vector<160x128xf32>
    %c0_248 = arith.constant 0 : index
    %c0_249 = arith.constant 0 : index
    %278 = vector.load %arg15[%c0_248, %c0_249] : memref<848x128xf32, #tpu.memory_space<vmem>>, vector<160x128xf32>
    %279 = arith.addf %278, %277 : vector<160x128xf32>
    %c0_250 = arith.constant 0 : index
    %c0_251 = arith.constant 0 : index
    %280 = vector.load %arg15[%c0_250, %c0_251] : memref<848x128xf32, #tpu.memory_space<vmem>>, vector<160x128xf32>
    tpu.vector_store %arg15[%c0_250, %c0_251], %279 {strides = array<i32>} : memref<848x128xf32, #tpu.memory_space<vmem>>, vector<160x128xf32>,
    %c32_252 = arith.constant 32 : index
    %c0_253 = arith.constant 0 : index
    %281 = vector.load %arg17[%c32_252, %c0_253] : memref<208x128xbf16, #tpu.memory_space<vmem>>, vector<160x128xbf16>
    %c6_254 = arith.constant 6 : index
    %c0_255 = arith.constant 0 : index
    %c0_256 = arith.constant 0 : index
    %282 = vector.load %arg6[%c6_254, %c0_255, %c0_256] : memref<9x128x128xbf16, #tpu.memory_space<vmem>>, vector<1x128x128xbf16>
    %283 = vector.shape_cast %282 : vector<1x128x128xbf16> to vector<128x128xbf16>
    %cst_257 = arith.constant dense<0.000000e+00> : vector<160x128xf32>
    %284 = tpu.matmul %281, %283, %cst_257 {dimension_numbers = #tpu.dot_dimension_numbers<[1], [0], [0], [1], [0, 0, 1, 1], [], []>} : vector<160x128xbf16>, vector<128x128xbf16>, vector<160x128xf32> -> vector<160x128xf32>
    %c0_258 = arith.constant 0 : index
    %c0_259 = arith.constant 0 : index
    %285 = vector.load %arg15[%c0_258, %c0_259] : memref<848x128xf32, #tpu.memory_space<vmem>>, vector<160x128xf32>
    %286 = arith.addf %285, %284 : vector<160x128xf32>
    %c0_260 = arith.constant 0 : index
    %c0_261 = arith.constant 0 : index
    %287 = vector.load %arg15[%c0_260, %c0_261] : memref<848x128xf32, #tpu.memory_space<vmem>>, vector<160x128xf32>
    tpu.vector_store %arg15[%c0_260, %c0_261], %286 {strides = array<i32>} : memref<848x128xf32, #tpu.memory_space<vmem>>, vector<160x128xf32>,
    %c32_262 = arith.constant 32 : index
    %c0_263 = arith.constant 0 : index
    %288 = vector.load %arg19[%c32_262, %c0_263] : memref<832x128xbf16, #tpu.memory_space<vmem>>, vector<160x128xbf16>
    %c7_264 = arith.constant 7 : index
    %c0_265 = arith.constant 0 : index
    %c0_266 = arith.constant 0 : index
    %289 = vector.load %arg6[%c7_264, %c0_265, %c0_266] : memref<9x128x128xbf16, #tpu.memory_space<vmem>>, vector<1x128x128xbf16>
    %290 = vector.shape_cast %289 : vector<1x128x128xbf16> to vector<128x128xbf16>
    %cst_267 = arith.constant dense<0.000000e+00> : vector<160x128xf32>
    %291 = tpu.matmul %288, %290, %cst_267 {dimension_numbers = #tpu.dot_dimension_numbers<[1], [0], [0], [1], [0, 0, 1, 1], [], []>} : vector<160x128xbf16>, vector<128x128xbf16>, vector<160x128xf32> -> vector<160x128xf32>
    %c0_268 = arith.constant 0 : index
    %c0_269 = arith.constant 0 : index
    %292 = vector.load %arg15[%c0_268, %c0_269] : memref<848x128xf32, #tpu.memory_space<vmem>>, vector<160x128xf32>
    %293 = arith.addf %292, %291 : vector<160x128xf32>
    %c0_270 = arith.constant 0 : index
    %c0_271 = arith.constant 0 : index
    %294 = vector.load %arg15[%c0_270, %c0_271] : memref<848x128xf32, #tpu.memory_space<vmem>>, vector<160x128xf32>
    tpu.vector_store %arg15[%c0_270, %c0_271], %293 {strides = array<i32>} : memref<848x128xf32, #tpu.memory_space<vmem>>, vector<160x128xf32>,
    %c32_272 = arith.constant 32 : index
    %c0_273 = arith.constant 0 : index
    %295 = vector.load %arg20[%c32_272, %c0_273] : memref<832x128xbf16, #tpu.memory_space<vmem>>, vector<160x128xbf16>
    %c8_274 = arith.constant 8 : index
    %c0_275 = arith.constant 0 : index
    %c0_276 = arith.constant 0 : index
    %296 = vector.load %arg6[%c8_274, %c0_275, %c0_276] : memref<9x128x128xbf16, #tpu.memory_space<vmem>>, vector<1x128x128xbf16>
    %297 = vector.shape_cast %296 : vector<1x128x128xbf16> to vector<128x128xbf16>
    %cst_277 = arith.constant dense<0.000000e+00> : vector<160x128xf32>
    %298 = tpu.matmul %295, %297, %cst_277 {dimension_numbers = #tpu.dot_dimension_numbers<[1], [0], [0], [1], [0, 0, 1, 1], [], []>} : vector<160x128xbf16>, vector<128x128xbf16>, vector<160x128xf32> -> vector<160x128xf32>
    %c0_278 = arith.constant 0 : index
    %c0_279 = arith.constant 0 : index
    %299 = vector.load %arg15[%c0_278, %c0_279] : memref<848x128xf32, #tpu.memory_space<vmem>>, vector<160x128xf32>
    %300 = arith.addf %299, %298 : vector<160x128xf32>
    %c0_280 = arith.constant 0 : index
    %c0_281 = arith.constant 0 : index
    %301 = vector.load %arg15[%c0_280, %c0_281] : memref<848x128xf32, #tpu.memory_space<vmem>>, vector<160x128xf32>
    tpu.vector_store %arg15[%c0_280, %c0_281], %300 {strides = array<i32>} : memref<848x128xf32, #tpu.memory_space<vmem>>, vector<160x128xf32>,
    %c0_282 = arith.constant 0 : index
    %c0_283 = arith.constant 0 : index
    %302 = vector.load %arg15[%c0_282, %c0_283] : memref<848x128xf32, #tpu.memory_space<vmem>>, vector<160x128xf32>
    %c0_284 = arith.constant 0 : index
    %c0_285 = arith.constant 0 : index
    %303 = vector.load %arg7[%c0_284, %c0_285] : memref<1x128xf32, #tpu.memory_space<vmem>>, vector<1x128xf32>
    %304 = vector.broadcast %303 : vector<1x128xf32> to vector<160x128xf32>
    %305 = arith.addf %302, %304 : vector<160x128xf32>
    %cst_286 = arith.constant 0.000000e+00 : f32
    %306 = vector.broadcast %cst_286 : f32 to vector<160x128xf32>
    %307 = arith.maximumf %305, %306 : vector<160x128xf32>
    %308 = arith.truncf %307 : vector<160x128xf32> to vector<160x128xbf16>
    %c0_287 = arith.constant 0 : index
    %c0_288 = arith.constant 0 : index
    %309 = vector.load %arg18[%c0_287, %c0_288] : memref<160x128xbf16, #tpu.memory_space<vmem>>, vector<160x128xbf16>
    tpu.vector_store %arg18[%c0_287, %c0_288], %308 {strides = array<i32>} : memref<160x128xbf16, #tpu.memory_space<vmem>>, vector<160x128xbf16>,
    %c1_289 = arith.constant 1 : index
    %c0_290 = arith.constant 0 : index
    %310 = vector.load %arg18[%c1_289, %c0_290] : memref<160x128xbf16, #tpu.memory_space<vmem>>, vector<152x128xbf16>
    %c0_291 = arith.constant 0 : index
    %c0_292 = arith.constant 0 : index
    %311 = vector.load %arg19[%c0_291, %c0_292] : memref<832x128xbf16, #tpu.memory_space<vmem>>, vector<152x128xbf16>
    tpu.vector_store %arg19[%c0_291, %c0_292], %310 {strides = array<i32>} : memref<832x128xbf16, #tpu.memory_space<vmem>>, vector<152x128xbf16>,
    %c2_293 = arith.constant 2 : index
    %c0_294 = arith.constant 0 : index
    %312 = vector.load %arg18[%c2_293, %c0_294] : memref<160x128xbf16, #tpu.memory_space<vmem>>, vector<152x128xbf16>
    %c0_295 = arith.constant 0 : index
    %c0_296 = arith.constant 0 : index
    %313 = vector.load %arg20[%c0_295, %c0_296] : memref<832x128xbf16, #tpu.memory_space<vmem>>, vector<152x128xbf16>
    tpu.vector_store %arg20[%c0_295, %c0_296], %312 {strides = array<i32>} : memref<832x128xbf16, #tpu.memory_space<vmem>>, vector<152x128xbf16>,
    %c0_297 = arith.constant 0 : index
    %c0_298 = arith.constant 0 : index
    %314 = vector.load %arg18[%c0_297, %c0_298] : memref<160x128xbf16, #tpu.memory_space<vmem>>, vector<120x128xbf16>
    %c0_299 = arith.constant 0 : index
    %c0_300 = arith.constant 0 : index
    %c0_301 = arith.constant 0 : index
    %315 = vector.load %arg8[%c0_299, %c0_300, %c0_301] : memref<9x128x128xbf16, #tpu.memory_space<vmem>>, vector<1x128x128xbf16>
    %316 = vector.shape_cast %315 : vector<1x128x128xbf16> to vector<128x128xbf16>
    %cst_302 = arith.constant dense<0.000000e+00> : vector<120x128xf32>
    %317 = tpu.matmul %314, %316, %cst_302 {dimension_numbers = #tpu.dot_dimension_numbers<[1], [0], [0], [1], [0, 0, 1, 1], [], []>} : vector<120x128xbf16>, vector<128x128xbf16>, vector<120x128xf32> -> vector<120x128xf32>
    %c0_303 = arith.constant 0 : index
    %c0_304 = arith.constant 0 : index
    %318 = vector.load %arg15[%c0_303, %c0_304] : memref<848x128xf32, #tpu.memory_space<vmem>>, vector<120x128xf32>
    tpu.vector_store %arg15[%c0_303, %c0_304], %317 {strides = array<i32>} : memref<848x128xf32, #tpu.memory_space<vmem>>, vector<120x128xf32>,
    %c0_305 = arith.constant 0 : index
    %c0_306 = arith.constant 0 : index
    %319 = vector.load %arg19[%c0_305, %c0_306] : memref<832x128xbf16, #tpu.memory_space<vmem>>, vector<120x128xbf16>
    %c1_307 = arith.constant 1 : index
    %c0_308 = arith.constant 0 : index
    %c0_309 = arith.constant 0 : index
    %320 = vector.load %arg8[%c1_307, %c0_308, %c0_309] : memref<9x128x128xbf16, #tpu.memory_space<vmem>>, vector<1x128x128xbf16>
    %321 = vector.shape_cast %320 : vector<1x128x128xbf16> to vector<128x128xbf16>
    %cst_310 = arith.constant dense<0.000000e+00> : vector<120x128xf32>
    %322 = tpu.matmul %319, %321, %cst_310 {dimension_numbers = #tpu.dot_dimension_numbers<[1], [0], [0], [1], [0, 0, 1, 1], [], []>} : vector<120x128xbf16>, vector<128x128xbf16>, vector<120x128xf32> -> vector<120x128xf32>
    %c0_311 = arith.constant 0 : index
    %c0_312 = arith.constant 0 : index
    %323 = vector.load %arg15[%c0_311, %c0_312] : memref<848x128xf32, #tpu.memory_space<vmem>>, vector<120x128xf32>
    %324 = arith.addf %323, %322 : vector<120x128xf32>
    %c0_313 = arith.constant 0 : index
    %c0_314 = arith.constant 0 : index
    %325 = vector.load %arg15[%c0_313, %c0_314] : memref<848x128xf32, #tpu.memory_space<vmem>>, vector<120x128xf32>
    tpu.vector_store %arg15[%c0_313, %c0_314], %324 {strides = array<i32>} : memref<848x128xf32, #tpu.memory_space<vmem>>, vector<120x128xf32>,
    %c0_315 = arith.constant 0 : index
    %c0_316 = arith.constant 0 : index
    %326 = vector.load %arg20[%c0_315, %c0_316] : memref<832x128xbf16, #tpu.memory_space<vmem>>, vector<120x128xbf16>
    %c2_317 = arith.constant 2 : index
    %c0_318 = arith.constant 0 : index
    %c0_319 = arith.constant 0 : index
    %327 = vector.load %arg8[%c2_317, %c0_318, %c0_319] : memref<9x128x128xbf16, #tpu.memory_space<vmem>>, vector<1x128x128xbf16>
    %328 = vector.shape_cast %327 : vector<1x128x128xbf16> to vector<128x128xbf16>
    %cst_320 = arith.constant dense<0.000000e+00> : vector<120x128xf32>
    %329 = tpu.matmul %326, %328, %cst_320 {dimension_numbers = #tpu.dot_dimension_numbers<[1], [0], [0], [1], [0, 0, 1, 1], [], []>} : vector<120x128xbf16>, vector<128x128xbf16>, vector<120x128xf32> -> vector<120x128xf32>
    %c0_321 = arith.constant 0 : index
    %c0_322 = arith.constant 0 : index
    %330 = vector.load %arg15[%c0_321, %c0_322] : memref<848x128xf32, #tpu.memory_space<vmem>>, vector<120x128xf32>
    %331 = arith.addf %330, %329 : vector<120x128xf32>
    %c0_323 = arith.constant 0 : index
    %c0_324 = arith.constant 0 : index
    %332 = vector.load %arg15[%c0_323, %c0_324] : memref<848x128xf32, #tpu.memory_space<vmem>>, vector<120x128xf32>
    tpu.vector_store %arg15[%c0_323, %c0_324], %331 {strides = array<i32>} : memref<848x128xf32, #tpu.memory_space<vmem>>, vector<120x128xf32>,
    %c16_325 = arith.constant 16 : index
    %c0_326 = arith.constant 0 : index
    %333 = vector.load %arg18[%c16_325, %c0_326] : memref<160x128xbf16, #tpu.memory_space<vmem>>, vector<120x128xbf16>
    %c3_327 = arith.constant 3 : index
    %c0_328 = arith.constant 0 : index
    %c0_329 = arith.constant 0 : index
    %334 = vector.load %arg8[%c3_327, %c0_328, %c0_329] : memref<9x128x128xbf16, #tpu.memory_space<vmem>>, vector<1x128x128xbf16>
    %335 = vector.shape_cast %334 : vector<1x128x128xbf16> to vector<128x128xbf16>
    %cst_330 = arith.constant dense<0.000000e+00> : vector<120x128xf32>
    %336 = tpu.matmul %333, %335, %cst_330 {dimension_numbers = #tpu.dot_dimension_numbers<[1], [0], [0], [1], [0, 0, 1, 1], [], []>} : vector<120x128xbf16>, vector<128x128xbf16>, vector<120x128xf32> -> vector<120x128xf32>
    %c0_331 = arith.constant 0 : index
    %c0_332 = arith.constant 0 : index
    %337 = vector.load %arg15[%c0_331, %c0_332] : memref<848x128xf32, #tpu.memory_space<vmem>>, vector<120x128xf32>
    %338 = arith.addf %337, %336 : vector<120x128xf32>
    %c0_333 = arith.constant 0 : index
    %c0_334 = arith.constant 0 : index
    %339 = vector.load %arg15[%c0_333, %c0_334] : memref<848x128xf32, #tpu.memory_space<vmem>>, vector<120x128xf32>
    tpu.vector_store %arg15[%c0_333, %c0_334], %338 {strides = array<i32>} : memref<848x128xf32, #tpu.memory_space<vmem>>, vector<120x128xf32>,
    %c16_335 = arith.constant 16 : index
    %c0_336 = arith.constant 0 : index
    %340 = vector.load %arg19[%c16_335, %c0_336] : memref<832x128xbf16, #tpu.memory_space<vmem>>, vector<120x128xbf16>
    %c4_337 = arith.constant 4 : index
    %c0_338 = arith.constant 0 : index
    %c0_339 = arith.constant 0 : index
    %341 = vector.load %arg8[%c4_337, %c0_338, %c0_339] : memref<9x128x128xbf16, #tpu.memory_space<vmem>>, vector<1x128x128xbf16>
    %342 = vector.shape_cast %341 : vector<1x128x128xbf16> to vector<128x128xbf16>
    %cst_340 = arith.constant dense<0.000000e+00> : vector<120x128xf32>
    %343 = tpu.matmul %340, %342, %cst_340 {dimension_numbers = #tpu.dot_dimension_numbers<[1], [0], [0], [1], [0, 0, 1, 1], [], []>} : vector<120x128xbf16>, vector<128x128xbf16>, vector<120x128xf32> -> vector<120x128xf32>
    %c0_341 = arith.constant 0 : index
    %c0_342 = arith.constant 0 : index
    %344 = vector.load %arg15[%c0_341, %c0_342] : memref<848x128xf32, #tpu.memory_space<vmem>>, vector<120x128xf32>
    %345 = arith.addf %344, %343 : vector<120x128xf32>
    %c0_343 = arith.constant 0 : index
    %c0_344 = arith.constant 0 : index
    %346 = vector.load %arg15[%c0_343, %c0_344] : memref<848x128xf32, #tpu.memory_space<vmem>>, vector<120x128xf32>
    tpu.vector_store %arg15[%c0_343, %c0_344], %345 {strides = array<i32>} : memref<848x128xf32, #tpu.memory_space<vmem>>, vector<120x128xf32>,
    %c16_345 = arith.constant 16 : index
    %c0_346 = arith.constant 0 : index
    %347 = vector.load %arg20[%c16_345, %c0_346] : memref<832x128xbf16, #tpu.memory_space<vmem>>, vector<120x128xbf16>
    %c5_347 = arith.constant 5 : index
    %c0_348 = arith.constant 0 : index
    %c0_349 = arith.constant 0 : index
    %348 = vector.load %arg8[%c5_347, %c0_348, %c0_349] : memref<9x128x128xbf16, #tpu.memory_space<vmem>>, vector<1x128x128xbf16>
    %349 = vector.shape_cast %348 : vector<1x128x128xbf16> to vector<128x128xbf16>
    %cst_350 = arith.constant dense<0.000000e+00> : vector<120x128xf32>
    %350 = tpu.matmul %347, %349, %cst_350 {dimension_numbers = #tpu.dot_dimension_numbers<[1], [0], [0], [1], [0, 0, 1, 1], [], []>} : vector<120x128xbf16>, vector<128x128xbf16>, vector<120x128xf32> -> vector<120x128xf32>
    %c0_351 = arith.constant 0 : index
    %c0_352 = arith.constant 0 : index
    %351 = vector.load %arg15[%c0_351, %c0_352] : memref<848x128xf32, #tpu.memory_space<vmem>>, vector<120x128xf32>
    %352 = arith.addf %351, %350 : vector<120x128xf32>
    %c0_353 = arith.constant 0 : index
    %c0_354 = arith.constant 0 : index
    %353 = vector.load %arg15[%c0_353, %c0_354] : memref<848x128xf32, #tpu.memory_space<vmem>>, vector<120x128xf32>
    tpu.vector_store %arg15[%c0_353, %c0_354], %352 {strides = array<i32>} : memref<848x128xf32, #tpu.memory_space<vmem>>, vector<120x128xf32>,
    %c32_355 = arith.constant 32 : index
    %c0_356 = arith.constant 0 : index
    %354 = vector.load %arg18[%c32_355, %c0_356] : memref<160x128xbf16, #tpu.memory_space<vmem>>, vector<120x128xbf16>
    %c6_357 = arith.constant 6 : index
    %c0_358 = arith.constant 0 : index
    %c0_359 = arith.constant 0 : index
    %355 = vector.load %arg8[%c6_357, %c0_358, %c0_359] : memref<9x128x128xbf16, #tpu.memory_space<vmem>>, vector<1x128x128xbf16>
    %356 = vector.shape_cast %355 : vector<1x128x128xbf16> to vector<128x128xbf16>
    %cst_360 = arith.constant dense<0.000000e+00> : vector<120x128xf32>
    %357 = tpu.matmul %354, %356, %cst_360 {dimension_numbers = #tpu.dot_dimension_numbers<[1], [0], [0], [1], [0, 0, 1, 1], [], []>} : vector<120x128xbf16>, vector<128x128xbf16>, vector<120x128xf32> -> vector<120x128xf32>
    %c0_361 = arith.constant 0 : index
    %c0_362 = arith.constant 0 : index
    %358 = vector.load %arg15[%c0_361, %c0_362] : memref<848x128xf32, #tpu.memory_space<vmem>>, vector<120x128xf32>
    %359 = arith.addf %358, %357 : vector<120x128xf32>
    %c0_363 = arith.constant 0 : index
    %c0_364 = arith.constant 0 : index
    %360 = vector.load %arg15[%c0_363, %c0_364] : memref<848x128xf32, #tpu.memory_space<vmem>>, vector<120x128xf32>
    tpu.vector_store %arg15[%c0_363, %c0_364], %359 {strides = array<i32>} : memref<848x128xf32, #tpu.memory_space<vmem>>, vector<120x128xf32>,
    %c32_365 = arith.constant 32 : index
    %c0_366 = arith.constant 0 : index
    %361 = vector.load %arg19[%c32_365, %c0_366] : memref<832x128xbf16, #tpu.memory_space<vmem>>, vector<120x128xbf16>
    %c7_367 = arith.constant 7 : index
    %c0_368 = arith.constant 0 : index
    %c0_369 = arith.constant 0 : index
    %362 = vector.load %arg8[%c7_367, %c0_368, %c0_369] : memref<9x128x128xbf16, #tpu.memory_space<vmem>>, vector<1x128x128xbf16>
    %363 = vector.shape_cast %362 : vector<1x128x128xbf16> to vector<128x128xbf16>
    %cst_370 = arith.constant dense<0.000000e+00> : vector<120x128xf32>
    %364 = tpu.matmul %361, %363, %cst_370 {dimension_numbers = #tpu.dot_dimension_numbers<[1], [0], [0], [1], [0, 0, 1, 1], [], []>} : vector<120x128xbf16>, vector<128x128xbf16>, vector<120x128xf32> -> vector<120x128xf32>
    %c0_371 = arith.constant 0 : index
    %c0_372 = arith.constant 0 : index
    %365 = vector.load %arg15[%c0_371, %c0_372] : memref<848x128xf32, #tpu.memory_space<vmem>>, vector<120x128xf32>
    %366 = arith.addf %365, %364 : vector<120x128xf32>
    %c0_373 = arith.constant 0 : index
    %c0_374 = arith.constant 0 : index
    %367 = vector.load %arg15[%c0_373, %c0_374] : memref<848x128xf32, #tpu.memory_space<vmem>>, vector<120x128xf32>
    tpu.vector_store %arg15[%c0_373, %c0_374], %366 {strides = array<i32>} : memref<848x128xf32, #tpu.memory_space<vmem>>, vector<120x128xf32>,
    %c32_375 = arith.constant 32 : index
    %c0_376 = arith.constant 0 : index
    %368 = vector.load %arg20[%c32_375, %c0_376] : memref<832x128xbf16, #tpu.memory_space<vmem>>, vector<120x128xbf16>
    %c8_377 = arith.constant 8 : index
    %c0_378 = arith.constant 0 : index
    %c0_379 = arith.constant 0 : index
    %369 = vector.load %arg8[%c8_377, %c0_378, %c0_379] : memref<9x128x128xbf16, #tpu.memory_space<vmem>>, vector<1x128x128xbf16>
    %370 = vector.shape_cast %369 : vector<1x128x128xbf16> to vector<128x128xbf16>
    %cst_380 = arith.constant dense<0.000000e+00> : vector<120x128xf32>
    %371 = tpu.matmul %368, %370, %cst_380 {dimension_numbers = #tpu.dot_dimension_numbers<[1], [0], [0], [1], [0, 0, 1, 1], [], []>} : vector<120x128xbf16>, vector<128x128xbf16>, vector<120x128xf32> -> vector<120x128xf32>
    %c0_381 = arith.constant 0 : index
    %c0_382 = arith.constant 0 : index
    %372 = vector.load %arg15[%c0_381, %c0_382] : memref<848x128xf32, #tpu.memory_space<vmem>>, vector<120x128xf32>
    %373 = arith.addf %372, %371 : vector<120x128xf32>
    %c0_383 = arith.constant 0 : index
    %c0_384 = arith.constant 0 : index
    %374 = vector.load %arg15[%c0_383, %c0_384] : memref<848x128xf32, #tpu.memory_space<vmem>>, vector<120x128xf32>
    tpu.vector_store %arg15[%c0_383, %c0_384], %373 {strides = array<i32>} : memref<848x128xf32, #tpu.memory_space<vmem>>, vector<120x128xf32>,
    %c0_385 = arith.constant 0 : index
    %c0_386 = arith.constant 0 : index
    %375 = vector.load %arg9[%c0_385, %c0_386] : memref<1x128xf32, #tpu.memory_space<vmem>>, vector<1x128xf32>
    %c0_387 = arith.constant 0 : index
    %c0_388 = arith.constant 0 : index
    %376 = vector.load %arg15[%c0_387, %c0_388] : memref<848x128xf32, #tpu.memory_space<vmem>>, vector<4x128xf32>
    %c16_389 = arith.constant 16 : index
    %c0_390 = arith.constant 0 : index
    %377 = vector.load %arg15[%c16_389, %c0_390] : memref<848x128xf32, #tpu.memory_space<vmem>>, vector<4x128xf32>
    %c32_391 = arith.constant 32 : index
    %c0_392 = arith.constant 0 : index
    %378 = vector.load %arg15[%c32_391, %c0_392] : memref<848x128xf32, #tpu.memory_space<vmem>>, vector<4x128xf32>
    %c48_393 = arith.constant 48 : index
    %c0_394 = arith.constant 0 : index
    %379 = vector.load %arg15[%c48_393, %c0_394] : memref<848x128xf32, #tpu.memory_space<vmem>>, vector<4x128xf32>
    %380 = arith.maximumf %376, %377 : vector<4x128xf32>
    %381 = arith.maximumf %378, %379 : vector<4x128xf32>
    %382 = arith.maximumf %380, %381 : vector<4x128xf32>
    %cst_395 = arith.constant dense<0xFF800000> : vector<128xf32>
    %383 = vector.multi_reduction <maximumf>, %382, %cst_395 [0] : vector<4x128xf32> to vector<128xf32>
    %384 = vector.shape_cast %383 : vector<128xf32> to vector<1x128xf32>
    %385 = arith.addf %384, %375 : vector<1x128xf32>
    %cst_396 = arith.constant 0.000000e+00 : f32
    %386 = vector.broadcast %cst_396 : f32 to vector<1x128xf32>
    %387 = arith.maximumf %385, %386 : vector<1x128xf32>
    %c4_397 = arith.constant 4 : index
    %c0_398 = arith.constant 0 : index
    %388 = vector.load %arg15[%c4_397, %c0_398] : memref<848x128xf32, #tpu.memory_space<vmem>>, vector<4x128xf32>
    %c20 = arith.constant 20 : index
    %c0_399 = arith.constant 0 : index
    %389 = vector.load %arg15[%c20, %c0_399] : memref<848x128xf32, #tpu.memory_space<vmem>>, vector<4x128xf32>
    %c36 = arith.constant 36 : index
    %c0_400 = arith.constant 0 : index
    %390 = vector.load %arg15[%c36, %c0_400] : memref<848x128xf32, #tpu.memory_space<vmem>>, vector<4x128xf32>
    %c52 = arith.constant 52 : index
    %c0_401 = arith.constant 0 : index
    %391 = vector.load %arg15[%c52, %c0_401] : memref<848x128xf32, #tpu.memory_space<vmem>>, vector<4x128xf32>
    %392 = arith.maximumf %388, %389 : vector<4x128xf32>
    %393 = arith.maximumf %390, %391 : vector<4x128xf32>
    %394 = arith.maximumf %392, %393 : vector<4x128xf32>
    %cst_402 = arith.constant dense<0xFF800000> : vector<128xf32>
    %395 = vector.multi_reduction <maximumf>, %394, %cst_402 [0] : vector<4x128xf32> to vector<128xf32>
    %396 = vector.shape_cast %395 : vector<128xf32> to vector<1x128xf32>
    %397 = arith.addf %396, %375 : vector<1x128xf32>
    %cst_403 = arith.constant 0.000000e+00 : f32
    %398 = vector.broadcast %cst_403 : f32 to vector<1x128xf32>
    %399 = arith.maximumf %397, %398 : vector<1x128xf32>
    %c64_404 = arith.constant 64 : index
    %c0_405 = arith.constant 0 : index
    %400 = vector.load %arg15[%c64_404, %c0_405] : memref<848x128xf32, #tpu.memory_space<vmem>>, vector<4x128xf32>
    %c80_406 = arith.constant 80 : index
    %c0_407 = arith.constant 0 : index
    %401 = vector.load %arg15[%c80_406, %c0_407] : memref<848x128xf32, #tpu.memory_space<vmem>>, vector<4x128xf32>
    %c96_408 = arith.constant 96 : index
    %c0_409 = arith.constant 0 : index
    %402 = vector.load %arg15[%c96_408, %c0_409] : memref<848x128xf32, #tpu.memory_space<vmem>>, vector<4x128xf32>
    %c112_410 = arith.constant 112 : index
    %c0_411 = arith.constant 0 : index
    %403 = vector.load %arg15[%c112_410, %c0_411] : memref<848x128xf32, #tpu.memory_space<vmem>>, vector<4x128xf32>
    %404 = arith.maximumf %400, %401 : vector<4x128xf32>
    %405 = arith.maximumf %402, %403 : vector<4x128xf32>
    %406 = arith.maximumf %404, %405 : vector<4x128xf32>
    %cst_412 = arith.constant dense<0xFF800000> : vector<128xf32>
    %407 = vector.multi_reduction <maximumf>, %406, %cst_412 [0] : vector<4x128xf32> to vector<128xf32>
    %408 = vector.shape_cast %407 : vector<128xf32> to vector<1x128xf32>
    %409 = arith.addf %408, %375 : vector<1x128xf32>
    %cst_413 = arith.constant 0.000000e+00 : f32
    %410 = vector.broadcast %cst_413 : f32 to vector<1x128xf32>
    %411 = arith.maximumf %409, %410 : vector<1x128xf32>
    %c68 = arith.constant 68 : index
    %c0_414 = arith.constant 0 : index
    %412 = vector.load %arg15[%c68, %c0_414] : memref<848x128xf32, #tpu.memory_space<vmem>>, vector<4x128xf32>
    %c84 = arith.constant 84 : index
    %c0_415 = arith.constant 0 : index
    %413 = vector.load %arg15[%c84, %c0_415] : memref<848x128xf32, #tpu.memory_space<vmem>>, vector<4x128xf32>
    %c100 = arith.constant 100 : index
    %c0_416 = arith.constant 0 : index
    %414 = vector.load %arg15[%c100, %c0_416] : memref<848x128xf32, #tpu.memory_space<vmem>>, vector<4x128xf32>
    %c116 = arith.constant 116 : index
    %c0_417 = arith.constant 0 : index
    %415 = vector.load %arg15[%c116, %c0_417] : memref<848x128xf32, #tpu.memory_space<vmem>>, vector<4x128xf32>
    %416 = arith.maximumf %412, %413 : vector<4x128xf32>
    %417 = arith.maximumf %414, %415 : vector<4x128xf32>
    %418 = arith.maximumf %416, %417 : vector<4x128xf32>
    %cst_418 = arith.constant dense<0xFF800000> : vector<128xf32>
    %419 = vector.multi_reduction <maximumf>, %418, %cst_418 [0] : vector<4x128xf32> to vector<128xf32>
    %420 = vector.shape_cast %419 : vector<128xf32> to vector<1x128xf32>
    %421 = arith.addf %420, %375 : vector<1x128xf32>
    %cst_419 = arith.constant 0.000000e+00 : f32
    %422 = vector.broadcast %cst_419 : f32 to vector<1x128xf32>
    %423 = arith.maximumf %421, %422 : vector<1x128xf32>
    %cst_420 = arith.constant 0.000000e+00 : f32
    %424 = vector.broadcast %cst_420 : f32 to vector<1x1024xf32>
    %425 = arith.truncf %387 : vector<1x128xf32> to vector<1x128xbf16>
    %c0_421 = arith.constant 0 : index
    %c0_422 = arith.constant 0 : index
    %c0_423 = arith.constant 0 : index
    %426 = vector.load %arg10[%c0_421, %c0_422, %c0_423] : memref<4x128x1024xbf16, #tpu.memory_space<vmem>>, vector<1x128x1024xbf16>
    %427 = vector.shape_cast %426 : vector<1x128x1024xbf16> to vector<128x1024xbf16>
    %cst_424 = arith.constant dense<0.000000e+00> : vector<1x1024xf32>
    %428 = tpu.matmul %425, %427, %cst_424 {dimension_numbers = #tpu.dot_dimension_numbers<[1], [0], [0], [1], [0, 0, 1, 1], [], []>} : vector<1x128xbf16>, vector<128x1024xbf16>, vector<1x1024xf32> -> vector<1x1024xf32>
    %429 = arith.addf %424, %428 : vector<1x1024xf32>
    %430 = arith.truncf %399 : vector<1x128xf32> to vector<1x128xbf16>
    %c1_425 = arith.constant 1 : index
    %c0_426 = arith.constant 0 : index
    %c0_427 = arith.constant 0 : index
    %431 = vector.load %arg10[%c1_425, %c0_426, %c0_427] : memref<4x128x1024xbf16, #tpu.memory_space<vmem>>, vector<1x128x1024xbf16>
    %432 = vector.shape_cast %431 : vector<1x128x1024xbf16> to vector<128x1024xbf16>
    %cst_428 = arith.constant dense<0.000000e+00> : vector<1x1024xf32>
    %433 = tpu.matmul %430, %432, %cst_428 {dimension_numbers = #tpu.dot_dimension_numbers<[1], [0], [0], [1], [0, 0, 1, 1], [], []>} : vector<1x128xbf16>, vector<128x1024xbf16>, vector<1x1024xf32> -> vector<1x1024xf32>
    %434 = arith.addf %429, %433 : vector<1x1024xf32>
    %435 = arith.truncf %411 : vector<1x128xf32> to vector<1x128xbf16>
    %c2_429 = arith.constant 2 : index
    %c0_430 = arith.constant 0 : index
    %c0_431 = arith.constant 0 : index
    %436 = vector.load %arg10[%c2_429, %c0_430, %c0_431] : memref<4x128x1024xbf16, #tpu.memory_space<vmem>>, vector<1x128x1024xbf16>
    %437 = vector.shape_cast %436 : vector<1x128x1024xbf16> to vector<128x1024xbf16>
    %cst_432 = arith.constant dense<0.000000e+00> : vector<1x1024xf32>
    %438 = tpu.matmul %435, %437, %cst_432 {dimension_numbers = #tpu.dot_dimension_numbers<[1], [0], [0], [1], [0, 0, 1, 1], [], []>} : vector<1x128xbf16>, vector<128x1024xbf16>, vector<1x1024xf32> -> vector<1x1024xf32>
    %439 = arith.addf %434, %438 : vector<1x1024xf32>
    %440 = arith.truncf %423 : vector<1x128xf32> to vector<1x128xbf16>
    %c3_433 = arith.constant 3 : index
    %c0_434 = arith.constant 0 : index
    %c0_435 = arith.constant 0 : index
    %441 = vector.load %arg10[%c3_433, %c0_434, %c0_435] : memref<4x128x1024xbf16, #tpu.memory_space<vmem>>, vector<1x128x1024xbf16>
    %442 = vector.shape_cast %441 : vector<1x128x1024xbf16> to vector<128x1024xbf16>
    %cst_436 = arith.constant dense<0.000000e+00> : vector<1x1024xf32>
    %443 = tpu.matmul %440, %442, %cst_436 {dimension_numbers = #tpu.dot_dimension_numbers<[1], [0], [0], [1], [0, 0, 1, 1], [], []>} : vector<1x128xbf16>, vector<128x1024xbf16>, vector<1x1024xf32> -> vector<1x1024xf32>
    %444 = arith.addf %439, %443 : vector<1x1024xf32>
    %c0_437 = arith.constant 0 : index
    %c0_438 = arith.constant 0 : index
    %445 = vector.load %arg11[%c0_437, %c0_438] : memref<1x1024xf32, #tpu.memory_space<vmem>>, vector<1x1024xf32>
    %446 = arith.addf %444, %445 : vector<1x1024xf32>
    %cst_439 = arith.constant 0.000000e+00 : f32
    %447 = vector.broadcast %cst_439 : f32 to vector<1x1024xf32>
    %448 = arith.maximumf %446, %447 : vector<1x1024xf32>
    %449 = arith.truncf %448 : vector<1x1024xf32> to vector<1x1024xbf16>
    %c0_440 = arith.constant 0 : index
    %c0_441 = arith.constant 0 : index
    %450 = vector.load %arg12[%c0_440, %c0_441] : memref<1024x128xbf16, #tpu.memory_space<vmem>>, vector<1024x128xbf16>
    %cst_442 = arith.constant dense<0.000000e+00> : vector<1x128xf32>
    %451 = tpu.matmul %449, %450, %cst_442 {dimension_numbers = #tpu.dot_dimension_numbers<[1], [0], [0], [1], [0, 0, 1, 1], [], []>} : vector<1x1024xbf16>, vector<1024x128xbf16>, vector<1x128xf32> -> vector<1x128xf32>
    %c0_443 = arith.constant 0 : index
    %c0_444 = arith.constant 0 : index
    %452 = vector.load %arg13[%c0_443, %c0_444] : memref<1x128xf32, #tpu.memory_space<vmem>>, vector<1x128xf32>
    %453 = arith.addf %451, %452 : vector<1x128xf32>
    %cst_445 = arith.constant dense<0xFF800000> : vector<1xf32>
    %454 = vector.multi_reduction <maximumf>, %453, %cst_445 [1] : vector<1x128xf32> to vector<1xf32>
    %455 = vector.shape_cast %454 : vector<1xf32> to vector<1x1xf32>
    %456 = vector.broadcast %455 : vector<1x1xf32> to vector<1x128xf32>
    %457 = arith.subf %453, %456 : vector<1x128xf32>
    %458 = math.exp %457 : vector<1x128xf32>
    %cst_446 = arith.constant dense<0.000000e+00> : vector<1xf32>
    %459 = vector.multi_reduction <add>, %458, %cst_446 [1] : vector<1x128xf32> to vector<1xf32>
    %460 = vector.shape_cast %459 : vector<1xf32> to vector<1x1xf32>
    %461 = math.log %460 : vector<1x1xf32>
    %462 = vector.broadcast %455 : vector<1x1xf32> to vector<1x128xf32>
    %463 = arith.subf %453, %462 : vector<1x128xf32>
    %464 = vector.broadcast %461 : vector<1x1xf32> to vector<1x128xf32>
    %465 = arith.subf %463, %464 : vector<1x128xf32>
    %c0_447 = arith.constant 0 : index
    %c0_448 = arith.constant 0 : index
    %c0_449 = arith.constant 0 : index
    %466 = vector.load %arg14[%c0_447, %c0_448, %c0_449] : memref<1x1x128xf32, #tpu.memory_space<vmem>>, vector<1x1x128xf32>
    %467 = vector.shape_cast %466 : vector<1x1x128xf32> to vector<1x128xf32>
    %468 = vector.shape_cast %465 : vector<1x128xf32> to vector<1x1x128xf32>
    tpu.vector_store %arg14[%c0_447, %c0_448, %c0_449], %468 {strides = array<i32>} : memref<1x1x128xf32, #tpu.memory_space<vmem>>, vector<1x1x128xf32>,
    return
  }
  func.func @transform_0(%arg0: i32) -> (i32, i32, i32) {
    %c0_i32 = arith.constant 0 : i32
    %c0_i32_0 = arith.constant 0 : i32
    %c0_i32_1 = arith.constant 0 : i32
    return %arg0, %c0_i32, %c0_i32_0 : i32, i32, i32
  }
  func.func @transform_1(%arg0: i32) -> (i32, i32) {
    %c0_i32 = arith.constant 0 : i32
    %c0_i32_0 = arith.constant 0 : i32
    %c0_i32_1 = arith.constant 0 : i32
    return %c0_i32, %c0_i32_0 : i32, i32
  }
  func.func @transform_2(%arg0: i32) -> (i32, i32) {
    %c0_i32 = arith.constant 0 : i32
    %c0_i32_0 = arith.constant 0 : i32
    %c0_i32_1 = arith.constant 0 : i32
    return %c0_i32, %c0_i32_0 : i32, i32
  }
  func.func @transform_3(%arg0: i32) -> (i32, i32, i32) {
    %c0_i32 = arith.constant 0 : i32
    %c0_i32_0 = arith.constant 0 : i32
    %c0_i32_1 = arith.constant 0 : i32
    %c0_i32_2 = arith.constant 0 : i32
    return %c0_i32, %c0_i32_0, %c0_i32_1 : i32, i32, i32
  }
  func.func @transform_4(%arg0: i32) -> (i32, i32) {
    %c0_i32 = arith.constant 0 : i32
    %c0_i32_0 = arith.constant 0 : i32
    %c0_i32_1 = arith.constant 0 : i32
    return %c0_i32, %c0_i32_0 : i32, i32
  }
  func.func @transform_5(%arg0: i32) -> (i32, i32, i32) {
    %c0_i32 = arith.constant 0 : i32
    %c0_i32_0 = arith.constant 0 : i32
    %c0_i32_1 = arith.constant 0 : i32
    %c0_i32_2 = arith.constant 0 : i32
    return %c0_i32, %c0_i32_0, %c0_i32_1 : i32, i32, i32
  }
  func.func @transform_6(%arg0: i32) -> (i32, i32) {
    %c0_i32 = arith.constant 0 : i32
    %c0_i32_0 = arith.constant 0 : i32
    %c0_i32_1 = arith.constant 0 : i32
    return %c0_i32, %c0_i32_0 : i32, i32
  }
  func.func @transform_7(%arg0: i32) -> (i32, i32, i32) {
    %c0_i32 = arith.constant 0 : i32
    %c0_i32_0 = arith.constant 0 : i32
    %c0_i32_1 = arith.constant 0 : i32
    %c0_i32_2 = arith.constant 0 : i32
    return %c0_i32, %c0_i32_0, %c0_i32_1 : i32, i32, i32
  }
  func.func @transform_8(%arg0: i32) -> (i32, i32) {
    %c0_i32 = arith.constant 0 : i32
    %c0_i32_0 = arith.constant 0 : i32
    %c0_i32_1 = arith.constant 0 : i32
    return %c0_i32, %c0_i32_0 : i32, i32
  }
  func.func @transform_9(%arg0: i32) -> (i32, i32, i32) {
    %c0_i32 = arith.constant 0 : i32
    %c0_i32_0 = arith.constant 0 : i32
    %c0_i32_1 = arith.constant 0 : i32
    %c0_i32_2 = arith.constant 0 : i32
    return %c0_i32, %c0_i32_0, %c0_i32_1 : i32, i32, i32
  }
  func.func @transform_10(%arg0: i32) -> (i32, i32) {
    %c0_i32 = arith.constant 0 : i32
    %c0_i32_0 = arith.constant 0 : i32
    %c0_i32_1 = arith.constant 0 : i32
    return %c0_i32, %c0_i32_0 : i32, i32
  }
  func.func @transform_11(%arg0: i32) -> (i32, i32) {
    %c0_i32 = arith.constant 0 : i32
    %c0_i32_0 = arith.constant 0 : i32
    %c0_i32_1 = arith.constant 0 : i32
    return %c0_i32, %c0_i32_0 : i32, i32
  }
  func.func @transform_12(%arg0: i32) -> (i32, i32) {
    %c0_i32 = arith.constant 0 : i32
    %c0_i32_0 = arith.constant 0 : i32
    %c0_i32_1 = arith.constant 0 : i32
    return %c0_i32, %c0_i32_0 : i32, i32
  }
  func.func @transform_13(%arg0: i32) -> (i32, i32, i32) {
    %c0_i32 = arith.constant 0 : i32
    %c0_i32_0 = arith.constant 0 : i32
    %c0_i32_1 = arith.constant 0 : i32
    return %arg0, %c0_i32, %c0_i32_0 : i32, i32, i32
  }
}

</mosaic_0001>

<bundles_post_ra>
// kernel: vggnet_forward.1
= control target key start
LH: loop header
LB: loop body
LE: loop exit
PB: predicated region body
PF: predicated region fallthrough
CT: control target
= control target key end

     0   :  { %s26594_s0 = inlined_call_operand.vmem [shape: bf16[2,848,128], index: 0, kind: input, shape index: {}]   ;;  %s26595_s1 = inlined_call_operand.vmem [shape: bf16[128,128], index: 1, kind: input, shape index: {}]   ;;  %s26596_s2 = inlined_call_operand.vmem [shape: f32[1,128], index: 2, kind: input, shape index: {}]   ;;  %s26597_s3 = inlined_call_operand.vmem [shape: bf16[9,128,128], index: 3, kind: input, shape index: {}]   ;;  %s26598_s4 = inlined_call_operand.vmem [shape: f32[1,128], index: 4, kind: input, shape index: {}]   ;;  %s26599_s5 = inlined_call_operand.hbm [shape: bf16[9,128,128], index: 5, kind: input, shape index: {}]   ;;  %s26600_s6 = inlined_call_operand.vmem [shape: f32[1,128], index: 6, kind: input, shape index: {}]   ;;  %s26601_s7 = inlined_call_operand.hbm [shape: bf16[9,128,128], index: 7, kind: input, shape index: {}]   ;;  %s26602_s8 = inlined_call_operand.vmem [shape: f32[1,128], index: 8, kind: input, shape index: {}]   ;;  %s26603_s9 = inlined_call_operand.vmem [shape: bf16[4,128,1024], index: 9, kind: input, shape index: {}]   ;;  %s26604_s10 = inlined_call_operand.vmem [shape: f32[1,1024], index: 10, kind: input, shape index: {}]   ;;  %s26605_s11 = inlined_call_operand.hbm [shape: bf16[1024,128], index: 11, kind: input, shape index: {}]   ;;  %s26606_s12 = inlined_call_operand.vmem [shape: f32[1,128], index: 12, kind: input, shape index: {}]   ;;  %s26607_s13 = inlined_call_operand.hbm [shape: f32[2,1,128], index: 13, kind: output, shape index: {}]  }
   0x1   :  { %26693 = sst [smem:[#allocation90_spill]] %s26607_s13 }
   0x2   :  { %18 = vsyncpa [#allocation9], 0 }
   0x3   :  { %19 = vsyncpa [#allocation12], 0 }
   0x4   :  { %20 = vsyncpa [#allocation10], 0 }
   0x5   :  { %22 = vsyncpa [#allocation10 + $0x1], 0  ;;  %s23600_s25 = smov 0   ;;  %s23602_s26 = smov 0  }
   0x6   :  { %s23604_s27 = smov 0   ;;  %s23606_s28 = smov 0  }
   0x7 LB: > { %26694 = sst [smem:[#allocation18_spill]] %s23507_s25  ;;  %s23621_s29 = sadd.s32 4294967295, %s23519_s28   ;;  %s23519_s28 = sphi %s23606_s28, %s26862_s28   ;;  %s23515_s27 = sphi %s23604_s27, %s26865_s27   ;;  %s23511_s26 = sphi %s23602_s26, %s26864_s26   ;;  %s23507_s25 = sphi %s23600_s25, %s26863_s25  }
   0x8   : > { %26695 = sst [smem:[#allocation19_spill]] %s23511_s26  ;;  %s18069_s30 = sadd.s32 4294967294, %s23519_s28  }
   0x9   : > { %26696 = sst [smem:[#allocation20_spill]] %s23515_s27  ;;  %s23625_s14 = sadd.s32 1, %s23519_s28  }
   0xa   : > { %26697 = sst [smem:[#allocation21_spill]] %s23519_s28  ;;  %s313_s15 = sadd.s32 1, %s23515_s27 }
   0xb   : > { %26698 = sst [smem:[#allocation22_spill]] %s23625_s14  ;;  %s310_s16 = ssub.s32 %s23519_s28, %s23625_s14 }
   0xc   : > { %p323_p0 = scmp.ne.s32.totalorder %s23515_s27, %s23511_s26  ;;  %p311_p1 = scmp.eq.s32.totalorder %s310_s16, 0 }
   0xd   : > { %p324_p2 = scmp.eq.s32.totalorder %s23621_s29, 1  ;;  %p329_p3 = scmp.ne.s32.totalorder %s23511_s26, %s23507_s25 }
   0xe   : > { %p330_p4 = scmp.eq.s32.totalorder %s18069_s30, 1  ;;  %p18070_p7 = scmp.ge.s32.totalorder %s23519_s28, 1 }
   0xf   : > { %s23636_s17 = scalar_select %p311_p1, %s23515_s27, %s313_s15  }
  0x10   : > { %p23638_p5 = por %p324_p2, %p323_p0  ;;  %p23642_p6 = por %p330_p4, %p329_p3 }
  0x11   : > { %26699 = sst [smem:[#allocation23_spill]] %s23636_s17  ;;  %p337_p8 = scmp.lt.s32.totalorder %s23519_s28, 3 }
  0x12   : > { %s26700_s18 = scalar_select %p23638_p5, 1, 0 }
  0x13   : > { %s26702_s19 = scalar_select %p23642_p6, 1, 0 }
  0x14   : > { %26701 = sst [smem:[#allocation24_spill]] %s26700_s18  ;;  %p26613_p9 = scmp.eq.s32.totalorder %s23621_s29, 0 }
  0x15   : > { %26703 = sst [smem:[#allocation25_spill]] %s26702_s19  ;;  %p23649_p10 = pnand %p18070_p7, %p337_p8 }
  0x16   : > { %s23521_s21 = smov [#allocation11]   ;;  %s23522_s24 = smov [#allocation8]  }
  0x17   : > { %s26704_s20 = scalar_select %p23649_p10, 1, 0 }
  0x18   : > { %p22881_p11 = pneg %p23649_p10  ;;  %s377_s22 = sshll.u32 %s23521_s21, 4  ;;  %s23655_s22 = int_to_ptr.vmem [resolvable:$true] %s377_s22 }
  0x19   : > { %s361_s30 = sshll.u32 %s23522_s24, 4  ;;  %s23523_s15 = smov [#allocation13]   ;;  %s23663_s30 = int_to_ptr.vmem [resolvable:$true] %s361_s30 }
  0x1a   : > { %p23659_p12 = pnand %p26613_p9, %p22881_p11  ;;  %s23665_s16 = sshll.u32 %s23523_s15, 4  ;;  %s400_s16 = int_to_ptr.vmem [resolvable:$true] %s23665_s16 }
  0x1b   : > { %s23365_s14 = scalar_lea.hbm %s26601_s7, 9216 }
  0x1c   : > { %p23366_p13 = scmp.ne.s32.totalorder %s26601_s7, %s23365_s14  ;;  %p23675_p0 = pneg %p23659_p12 }
  0x1d   : > { %p23372_p3 = scmp.lt.u32.totalorder %s23365_s14, %s26601_s7 }
  0x1e   : > { %p23368_p1 = pnand %p23675_p0, %p23366_p13 }
  0x20   : > { %p23369_p2 = pneg %p23368_p1 }
  0x22   : > { %p23374_p4 = pnand %p23372_p3, %p23369_p2 }
  0x24   : > { %23377 = shalt.err (!%p23374_p4)
}
  0x25   : > { %s23378_s27 = scalar_lea.vmem %s23655_s22, 9216  ;;  %p23386_p9 = scmp.lt.s32.totalorder %s23655_s22, %s23655_s22 }
  0x26   : > { %p23379_p7 = scmp.ne.s32.totalorder %s23655_s22, %s23378_s27  ;;  %p23387_p6 = scmp.lt.s32.totalorder %s23378_s27, %s23378_s27 }
  0x28   : > { %p23381_p8 = pnand %p23379_p7, %p23675_p0  ;;  %p23388_p13 = por %p23387_p6, %p23386_p9 }
  0x2a   : > { %p23382_p11 = pneg %p23381_p8 }
  0x2c   : > { %p23389_p1 = pnand %p23388_p13, %p23382_p11 }
  0x2e   : > { %23392 = shalt.err (!%p23389_p1)
}
  0x2f   : > { %s23524_s17 = smov 64   ;;  %s23525_s14 = smov 4  }
  0x30   : > { %22887 = dma.hbm_to_vmem [thread:$0]  (!%p23659_p12), %s26601_s7, 9216, %s23655_s22, [#allocation12], %s23524_s17, %s23524_s17, %s23525_s14  }
  0x31   : > { %s23393_s27 = scalar_lea.hbm %s26599_s5, 9216 }
  0x32   : > { %p23394_p6 = scmp.ne.s32.totalorder %s26599_s5, %s23393_s27  ;;  %p23400_p3 = scmp.lt.u32.totalorder %s23393_s27, %s26599_s5 }
  0x34   : > { %p23396_p9 = pnand %p23394_p6, %p23675_p0 }
  0x36   : > { %p23397_p2 = pneg %p23396_p9 }
  0x38   : > { %p23402_p4 = pnand %p23400_p3, %p23397_p2 }
  0x3a   : > { %23405 = shalt.err (!%p23402_p4)
}
  0x3b   : > { %s23406_s22 = scalar_lea.vmem %s23663_s30, 9216  ;;  %p23414_p13 = scmp.lt.s32.totalorder %s23663_s30, %s23663_s30 }
  0x3c   : > { %p23407_p7 = scmp.ne.s32.totalorder %s23663_s30, %s23406_s22  ;;  %p23415_p1 = scmp.lt.s32.totalorder %s23406_s22, %s23406_s22 }
  0x3e   : > { %p23409_p8 = pnand %p23407_p7, %p23675_p0  ;;  %p23416_p6 = por %p23415_p1, %p23414_p13 }
  0x40   : > { %p23410_p11 = pneg %p23409_p8 }
  0x42   : > { %p23417_p9 = pnand %p23416_p6, %p23410_p11 }
  0x44   : > { %23420 = shalt.err (!%p23417_p9)
}
  0x45   : > { %22884 = dma.hbm_to_vmem [thread:$0]  (!%p23659_p12), %s26599_s5, 9216, %s23663_s30, [#allocation9], %s23524_s17, %s23524_s17, %s23525_s14  }
  0x46   : > { %s23421_s19 = scalar_lea.hbm %s26605_s11, 8192 }
  0x47   : > { %p23422_p2 = scmp.ne.s32.totalorder %s26605_s11, %s23421_s19  ;;  %p23428_p7 = scmp.lt.u32.totalorder %s23421_s19, %s26605_s11 }
  0x49   : > { %p23424_p3 = pnand %p23422_p2, %p23675_p0 }
  0x4b   : > { %p23425_p4 = pneg %p23424_p3 }
  0x4d   : > { %p23430_p8 = pnand %p23428_p7, %p23425_p4 }
  0x4f   : > { %23433 = shalt.err (!%p23430_p8)
}
  0x50   : > { %s23434_s22 = scalar_lea.vmem %s400_s16, 8192  ;;  %p23442_p6 = scmp.lt.s32.totalorder %s400_s16, %s400_s16 }
  0x51   : > { %p23435_p11 = scmp.ne.s32.totalorder %s400_s16, %s23434_s22  ;;  %p23443_p9 = scmp.lt.s32.totalorder %s23434_s22, %s23434_s22 }
  0x53   : > { %p23437_p13 = pnand %p23435_p11, %p23675_p0  ;;  %p23444_p5 = por %p23443_p9, %p23442_p6 }
  0x55   : > { %p23438_p1 = pneg %p23437_p13 }
  0x57   : > { %p23445_p10 = pnand %p23444_p5, %p23438_p1 }
  0x59   : > { %23448 = shalt.err (!%p23445_p10)
}
  0x5a   : > { %22890 = dma.hbm_to_vmem [thread:$0]  (!%p23659_p12), %s26605_s11, 8192, %s400_s16, [#allocation12], %s23524_s17, %s23524_s17, %s23525_s14  }
  0x5b   : > { %p26707_p2 = scmp.ne.s32.totalorder %s26704_s20, 0 }
  0x5d   : > { %426 = sbr.rel (%p26707_p2) target bundleno = 4753 (0x1291), region = 72 }
  0x64   : > { %p26708_p0 = scmp.eq.s32.totalorder %s23621_s29, 0 }
  0x66   : > { %23494 = dma.done.wait (%p26708_p0), [#allocation9], 9216   ;;  %p26709_p3 = pmov %p26708_p0 }
  0x67   : > { %p26710_p5 = pmov %p26708_p0 }
  0x68   : > { %23496 = vsyncadd (%p26709_p3), [#allocation9], 4294958080 }
  0x69   : > { %23498 = dma.done.wait (%p26710_p5), [#allocation12], 17408   ;;  %p26711_p10 = pmov %p26708_p0 }
  0x6a   : > { %v26621_v0 = vmov 0.0   ;;  %vm23527_vm0 = vmmov 0   ;;  %p477_p12 = scmp.lt.s32.totalorder %s23621_s29, 1  ;;  %v22942_v1 = vld [vmem:[%s26595_s1] sm:$0xff]   ;;  %v22943_v2 = vld [vmem:[%s26595_s1 + $0x8] sm:$0xff]   ;;  %v22944_v3 = vld [vmem:[%s26595_s1 + $0x10] sm:$0xff]  }
  0x6b   : > { %23500 = vsyncadd (%p26711_p10), [#allocation12], 4294949888  ;;  %19962 = vmatprep.subr.bf16.mxu0 %v26621_v0  ;;  %19978 = vmatprep.mubr.msk.bf16.mxu0 %vm23527_vm0, %v26621_v0  ;;  %v22945_v4 = vld [vmem:[%s26595_s1 + $0x18] sm:$0xff]   ;;  %v22946_v5 = vld [vmem:[%s26595_s1 + $0x20] sm:$0xff]   ;;  %vm2662_vm1 = vcmask 1046528   ;;  %vm14944_vm3 = vcmask 1043456  }
  0x6c   : > { %s478_s25 = scalar_select %p477_p12, %s23621_s29, 1  ;;  %19963 = vmatpush3.bf16.msra.mxu0 %v22942_v1  ;;  %v22947_v6 = vld [vmem:[%s26595_s1 + $0x28] sm:$0xff]   ;;  %v22948_v7 = vld [vmem:[%s26595_s1 + $0x30] sm:$0xff]   ;;  %v22949_v8 = vld [vmem:[%s26595_s1 + $0x38] sm:$0xff]   ;;  %vm2031_vm2 = vsmask.f32 7424 }
  0x6d   : > { %19964 = vmatprep.subr.bf16.mxu0 %v26621_v0  ;;  %v22977_v19 = vld [vmem:[%s26597_s3] sm:$0xff]   ;;  %v22979_v20 = vld [vmem:[%s26597_s3 + $0x8] sm:$0xff]   ;;  %v22980_v22 = vld [vmem:[%s26597_s3 + $0x10] sm:$0xff]   ;;  %vm17956_vm4 = vcmask 1040384   ;;  %s19000_s28 = sshll.u32 %s23621_s29, 4  ;;  %s26855_s27 = sld [smem:[#allocation90_spill]] }
  0x6e   : > { %s22866_s14 = smul.u32 424, %s478_s25  ;;  %20190 = vmatprep.subr.bf16.mxu1 %v22977_v19  ;;  %v22982_v23 = vld [vmem:[%s26597_s3 + $0x18] sm:$0xff]   ;;  %v22983_v24 = vld [vmem:[%s26597_s3 + $0x20] sm:$0xff]   ;;  %v22985_v26 = vld [vmem:[%s26597_s3 + $0x28] sm:$0xff]   ;;  %s23529_s29 = smov [#allocation14]  }
  0x6f   : > { %20191 = vmatpush3.bf16.msra.mxu1 %v22977_v19  ;;  %v22986_v28 = vld [vmem:[%s26597_s3 + $0x30] sm:$0xff]   ;;  %v22988_v29 = vld [vmem:[%s26597_s3 + $0x38] sm:$0xff]   ;;  %v23904_v44 = vld [vmem:[%s26596_s2] ss:$0 sm:$0xff]  ;;  %s23453_s20 = sshll.u32 %s23529_s29, 4  ;;  %s23454_s20 = int_to_ptr.vmem [resolvable:$false] %s23453_s20 }
  0x70   : > { %19965 = vmatpush3.bf16.msra.mxu0 %v22943_v2  ;;  %s23776_s21 = scalar_lea.vmem %s26594_s0, %s22866_s14  ;;  %20192 = vmatprep.subr.bf16.mxu1 %v22979_v20  ;;  %s26853_s14 = sld [smem:[#allocation19_spill]] }
  0x71   : > { %19966 = vmatprep.subr.bf16.mxu0 %v26621_v0  ;;  %v22950_v9 = vld [vmem:[%s23776_s21] sm:$0xff]   ;;  %v22951_v10 = vld [vmem:[%s23776_s21 + $0x8] sm:$0xff]   ;;  %v22952_v11 = vld [vmem:[%s23776_s21 + $0x10] sm:$0xff]   ;;  %s23455_s23 = scalar_lea.vmem %s23454_s20, 32 }
  0x72   : > { %v22953_v12 = vld [vmem:[%s23776_s21 + $0x18] sm:$0xff]   ;;  %v22954_v13 = vld [vmem:[%s23776_s21 + $0x20] sm:$0xff]   ;;  %v22955_v14 = vld [vmem:[%s23776_s21 + $0x28] sm:$0xff]  }
  0x73   : > { %v22956_v15 = vld [vmem:[%s23776_s21 + $0x30] sm:$0xff]   ;;  %v22957_v16 = vld [vmem:[%s23776_s21 + $0x38] sm:$0xff]   ;;  %v22958_v17 = vld [vmem:[%s23776_s21 + $0x40] sm:$0xff]   ;;  %20193 = vmatpush3.bf16.msra.mxu1 %v22979_v20  ;;  %s26856_s22 = smov %s26855_s27  ;;  %s26552_s30 = scalar_lea.hbm %s26855_s27, %s19000_s28 }
  0x74   : > { %19967 = vmatpush3.bf16.msra.mxu0 %v22944_v3  ;;  %v22959_v18 = vld [vmem:[%s23776_s21 + $0x48] sm:$0xff]   ;;  %v22960_v21 = vld [vmem:[%s23776_s21 + $0x50] sm:$0xff]   ;;  %20194 = vmatprep.subr.bf16.mxu1 %v22980_v22  ;;  %v22961_v25 = vld [vmem:[%s23776_s21 + $0x58] sm:$0xff]  }
  0x75   : > { %19968 = vmatprep.subr.bf16.mxu0 %v26621_v0  ;;  %v22962_v27 = vld [vmem:[%s23776_s21 + $0x60] sm:$0xff]   ;;  %v22963_v30 = vld [vmem:[%s23776_s21 + $0x68] sm:$0xff]   ;;  %v22964_v31 = vld [vmem:[%s23776_s21 + $0x70] sm:$0xff]  }
  0x76   : > { %v22965_v32 = vld [vmem:[%s23776_s21 + $0x78] sm:$0xff]   ;;  %v22966_v33 = vld [vmem:[%s23776_s21 + $0x80] sm:$0xff]   ;;  %v22967_v34 = vld [vmem:[%s23776_s21 + $0x88] sm:$0xff]   ;;  %s475_s26 = sand.u32 1, %s26853_s14  }
  0x77   : > { %20195 = vmatpush3.bf16.msra.mxu1 %v22980_v22  ;;  %v22968_v35 = vld [vmem:[%s23776_s21 + $0x90] sm:$0xff]   ;;  %v22969_v36 = vld [vmem:[%s23776_s21 + $0x98] sm:$0xff]   ;;  %v22970_v37 = vld [vmem:[%s23776_s21 + $0xa0] sm:$0xff]   ;;  %s476_s18 = scalar_lea.vmem [#allocation14], %s475_s26  ;;  %s17971_s13 = scalar_lea.sflag [#allocation10], %s475_s26 }
  0x78   : > { %19969 = vmatpush3.bf16.msra.mxu0 %v22945_v4  ;;  %20196 = vmatprep.subr.bf16.mxu1 %v22982_v23  ;;  %v22971_v38 = vld [vmem:[%s23776_s21 + $0xa8] sm:$0xff]   ;;  %v22972_v39 = vld [vmem:[%s23776_s21 + $0xb0] sm:$0xff]   ;;  %v22973_v40 = vld [vmem:[%s23776_s21 + $0xb8] sm:$0xff]   ;;  %s17983_s19 = sshll.u32 %s476_s18, 4  ;;  %s26554_s19 = int_to_ptr.vmem [resolvable:$true] %s17983_s19 }
  0x79   : > { %19970 = vmatprep.subr.bf16.mxu0 %v26621_v0  ;;  %v22974_v41 = vld [vmem:[%s23776_s21 + $0xc0] sm:$0xff]   ;;  %v22975_v42 = vld [vmem:[%s23776_s21 + $0xc8] sm:$0xff]   ;;  %v22976_v43 = vld [vmem:[%s23776_s21 + $0xd0] sm:$0xff]   ;;  %s23449_s25 = scalar_lea.vmem %s26554_s19, 16  ;;  %p23456_p13 = scmp.lt.s32.totalorder %s26554_s19, %s23454_s20 }
  0x7a   : > { %v22978_v47 = vld [vmem:[%s23776_s21 + $0xd8] sm:$0xff]   ;;  %v22981_v58 = vld [vmem:[%s23776_s21 + $0xe0] sm:$0xff]   ;;  %p23450_p4 = scmp.ne.s32.totalorder %s26554_s19, %s23449_s25  ;;  %p23457_p1 = scmp.lt.s32.totalorder %s23455_s23, %s23449_s25 }
  0x7b   : > { %20197 = vmatpush3.bf16.msra.mxu1 %v22982_v23 }
  0x7c   : > { %19971 = vmatpush3.bf16.msra.mxu0 %v22946_v5  ;;  %20198 = vmatprep.subr.bf16.mxu1 %v22983_v24  ;;  %v22984_v5 = vld [vmem:[%s23776_s21 + $0xe8] sm:$0xff]   ;;  %p23458_p6 = por %p23457_p1, %p23456_p13 }
  0x7d   : > { %19972 = vmatprep.subr.bf16.mxu0 %v26621_v0 }
  0x7f   : > { %20199 = vmatpush3.bf16.msra.mxu1 %v22983_v24 }
  0x80   : > { %19973 = vmatpush3.bf16.msra.mxu0 %v22947_v6  ;;  %20200 = vmatprep.subr.bf16.mxu1 %v22985_v26 }
  0x81   : > { %19974 = vmatprep.subr.bf16.mxu0 %v26621_v0 }
  0x83   : > { %20201 = vmatpush3.bf16.msra.mxu1 %v22985_v26 }
  0x84   : > { %19975 = vmatpush3.bf16.msra.mxu0 %v22948_v7  ;;  %20202 = vmatprep.subr.bf16.mxu1 %v22986_v28 }
  0x85   : > { %19976 = vmatprep.subr.bf16.mxu0 %v26621_v0 }
  0x87   : > { %20203 = vmatpush3.bf16.msra.mxu1 %v22986_v28 }
  0x88   : > { %19977 = vmatpush3.bf16.msra.mxu0 %v22949_v8  ;;  %20204 = vmatprep.subr.bf16.mxu1 %v22988_v29 }
  0x8b   : > { %19979 = vmatmul.mubr.bf16.vlgmr.msra.gmra.mrb[0].mxu0 %v22950_v9  ;;  %20205 = vmatpush3.bf16.msra.mxu1 %v22988_v29 }
  0x8c   : > { %19982 = vmatprep.mubr.msk.bf16.mxu0 %vm23527_vm0, %v26621_v0 }
  0x93   : > { %19983 = vmatmul.mubr.bf16.gmra.mrb[4].mxu0 %v22951_v10 }
  0x94   : > { %19986 = vmatprep.mubr.msk.bf16.mxu0 %vm23527_vm0, %v26621_v0 }
  0x9b   : > { %19987 = vmatmul.mubr.bf16.gmra.mrb[8].mxu0 %v22952_v11 }
  0x9c   : > { %19990 = vmatprep.mubr.msk.bf16.mxu0 %vm23527_vm0, %v26621_v0 }
  0xa3   : > { %19991 = vmatmul.mubr.bf16.gmra.mrb[12].mxu0 %v22953_v12 }
  0xa4   : > { %19994 = vmatprep.mubr.msk.bf16.mxu0 %vm23527_vm0, %v26621_v0 }
  0xab   : > { %19995 = vmatmul.mubr.bf16.gmra.mrb[16].mxu0 %v22954_v13 }
  0xac   : > { %19998 = vmatprep.mubr.msk.bf16.mxu0 %vm23527_vm0, %v26621_v0 }
  0xb3   : > { %19999 = vmatmul.mubr.bf16.gmra.mrb[20].mxu0 %v22955_v14 }
  0xb4   : > { %20002 = vmatprep.mubr.msk.bf16.mxu0 %vm23527_vm0, %v26621_v0 }
  0xbb   : > { %20003 = vmatmul.mubr.bf16.gmra.mrb[24].mxu0 %v22956_v15  ;;  %v22987_v15 = vld [vmem:[%s23776_s21 + $0xf0] sm:$0xff]  }
  0xbc   : > { %20006 = vmatprep.mubr.msk.bf16.mxu0 %vm23527_vm0, %v26621_v0 }
  0xc3   : > { %20007 = vmatmul.mubr.bf16.gmra.mrb[28].mxu0 %v22957_v16 }
  0xc4   : > { %20010 = vmatprep.mubr.msk.bf16.mxu0 %vm23527_vm0, %v26621_v0 }
  0xcb   : > { %20011 = vmatmul.mubr.bf16.gmra.mrb[32].mxu0 %v22958_v17 }
  0xcc   : > { %20014 = vmatprep.mubr.msk.bf16.mxu0 %vm23527_vm0, %v26621_v0 }
  0xd3   : > { %20015 = vmatmul.mubr.bf16.gmra.mrb[36].mxu0 %v22959_v18 }
  0xd4   : > { %20018 = vmatprep.mubr.msk.bf16.mxu0 %vm23527_vm0, %v26621_v0 }
  0xdb   : > { %20019 = vmatmul.mubr.bf16.gmra.mrb[40].mxu0 %v22960_v21 }
  0xdc   : > { %20022 = vmatprep.mubr.msk.bf16.mxu0 %vm23527_vm0, %v26621_v0 }
  0xe3   : > { %20023 = vmatmul.mubr.bf16.gmra.mrb[44].mxu0 %v22961_v25 }
  0xe4   : > { %20026 = vmatprep.mubr.msk.bf16.mxu0 %vm23527_vm0, %v26621_v0 }
  0xeb   : > { %20027 = vmatmul.mubr.bf16.gmra.mrb[48].mxu0 %v22962_v27  ;;  %v22989_v27 = vld [vmem:[%s23776_s21 + $0xf8] sm:$0xff]  }
  0xec   : > { %20030 = vmatprep.mubr.msk.bf16.mxu0 %vm23527_vm0, %v26621_v0 }
  0xf3   : > { %20031 = vmatmul.mubr.bf16.gmra.mrb[52].mxu0 %v22963_v30 }
  0xf4   : > { %20034 = vmatprep.mubr.msk.bf16.mxu0 %vm23527_vm0, %v26621_v0 }
  0xfb   : > { %20035 = vmatmul.mubr.bf16.gmra.mrb[56].mxu0 %v22964_v31 }
  0xfc   : > { %20038 = vmatprep.mubr.msk.bf16.mxu0 %vm23527_vm0, %v26621_v0 }
 0x103   : > { %20039 = vmatmul.mubr.bf16.gmra.mrb[60].mxu0 %v22965_v32 }
 0x104   : > { %20042 = vmatprep.mubr.msk.bf16.mxu0 %vm23527_vm0, %v26621_v0 }
 0x10b   : > { %20043 = vmatmul.mubr.bf16.gmra.mrb[64].mxu0 %v22966_v33 }
 0x10c   : > { %20046 = vmatprep.mubr.msk.bf16.mxu0 %vm23527_vm0, %v26621_v0 }
 0x113   : > { %20047 = vmatmul.mubr.bf16.gmra.mrb[68].mxu0 %v22967_v34 }
 0x114   : > { %20050 = vmatprep.mubr.msk.bf16.mxu0 %vm23527_vm0, %v26621_v0 }
 0x11b   : > { %20051 = vmatmul.mubr.bf16.gmra.mrb[72].mxu0 %v22968_v35 }
 0x11c   : > { %20054 = vmatprep.mubr.msk.bf16.mxu0 %vm23527_vm0, %v26621_v0 }
 0x123   : > { %20055 = vmatmul.mubr.bf16.gmra.mrb[76].mxu0 %v22969_v36 }
 0x124   : > { %20058 = vmatprep.mubr.msk.bf16.mxu0 %vm23527_vm0, %v26621_v0 }
 0x12b   : > { %20059 = vmatmul.mubr.bf16.gmra.mrb[80].mxu0 %v22970_v37 }
 0x12c   : > { %20062 = vmatprep.mubr.msk.bf16.mxu0 %vm23527_vm0, %v26621_v0 }
 0x133   : > { %20063 = vmatmul.mubr.bf16.gmra.mrb[84].mxu0 %v22971_v38 }
 0x134   : > { %20066 = vmatprep.mubr.msk.bf16.mxu0 %vm23527_vm0, %v26621_v0 }
 0x13b   : > { %20067 = vmatmul.mubr.bf16.gmra.mrb[88].mxu0 %v22972_v39 }
 0x13c   : > { %20070 = vmatprep.mubr.msk.bf16.mxu0 %vm23527_vm0, %v26621_v0 }
 0x143   : > { %20071 = vmatmul.mubr.bf16.gmra.mrb[92].mxu0 %v22973_v40 }
 0x144   : > { %20074 = vmatprep.mubr.msk.bf16.mxu0 %vm23527_vm0, %v26621_v0 }
 0x14b   : > { %20075 = vmatmul.mubr.bf16.gmra.mrb[96].mxu0 %v22974_v41 }
 0x14c   : > { %20078 = vmatprep.mubr.msk.bf16.mxu0 %vm23527_vm0, %v26621_v0 }
 0x153   : > { %20079 = vmatmul.mubr.bf16.gmra.mrb[100].mxu0 %v22975_v42 }
 0x154   : > { %20082 = vmatprep.mubr.msk.bf16.mxu0 %vm23527_vm0, %v26621_v0 }
 0x15b   : > { %20083 = vmatmul.mubr.bf16.gmra.mrb[104].mxu0 %v22976_v43  ;;  %v22990_v43 = vld [vmem:[%s23776_s21 + $0x100] sm:$0xff]  }
 0x15c   : > { %20086 = vmatprep.mubr.msk.bf16.mxu0 %vm23527_vm0, %v26621_v0 }
 0x15e   : > { %v1018_v45 = vpop.f32.mrb[0].mxu0 }
 0x15f   : > { %v19980_v46 = vpop.f32.mrb[1].mxu0  ;;  %v1660_v48 = vadd.f32 %v23904_v44, %v1018_v45 }
 0x160   : > { %v1021_v49 = vpop.f32.mrb[2].mxu0 }
 0x161   : > { %v19981_v50 = vpop.f32.mrb[3].mxu0  ;;  %v1661_v51 = vadd.f32 %v23904_v44, %v1021_v49  ;;  %v1766_v52 = vmax.f32 %v1660_v48, 0.0 }
 0x163   : > { %20087 = vmatmul.mubr.bf16.gmra.mrb[108].mxu0 %v22978_v47  ;;  %v1767_v53 = vmax.f32 %v1661_v51, 0.0 }
 0x164   : > { %20090 = vmatprep.mubr.msk.bf16.mxu0 %vm23527_vm0, %v26621_v0 }
 0x165   : > { %v1872_v54 = vpack.c.bf16 %v1767_v53, %v1766_v52 }
 0x166   : > { %v1026_v55 = vpop.f32.mrb[4].mxu0 }
 0x167   : > { %v1662_v56 = vadd.f32 %v23904_v44, %v1026_v55  ;;  %v19984_v57 = vpop.f32.mrb[5].mxu0  ;;  %1925 = vst [vmem:[#allocation3] sm:$0xff] %v1872_v54  ;;  %20206 = vmatprep.mubr.bf16.mxu1 %v1872_v54 }
 0x168   : > { %v1029_v59 = vpop.f32.mrb[6].mxu0 }
 0x169   : > { %v1663_v60 = vadd.f32 %v23904_v44, %v1029_v59  ;;  %v19985_v61 = vpop.f32.mrb[7].mxu0  ;;  %v1768_v62 = vmax.f32 %v1662_v56, 0.0 }
 0x16b   : > { %v1769_v63 = vmax.f32 %v1663_v60, 0.0  ;;  %20091 = vmatmul.mubr.bf16.gmra.mrb[112].mxu0 %v22981_v58 }
 0x16c   : > { %20094 = vmatprep.mubr.msk.bf16.mxu0 %vm23527_vm0, %v26621_v0 }
 0x16d   : > { %v1873_v1 = vpack.c.bf16 %v1769_v63, %v1768_v62  ;;  %v22991_v62 = vld [vmem:[%s23776_s21 + $0x108] sm:$0xff]  }
 0x16e   : > { %v1034_v2 = vpop.f32.mrb[8].mxu0 }
 0x16f   : > { %v1664_v3 = vadd.f32 %v23904_v44, %v1034_v2  ;;  %v19988_v4 = vpop.f32.mrb[9].mxu0  ;;  %1926 = vst [vmem:[#allocation3 + $0x8] sm:$0xff] %v1873_v1  ;;  %20207 = vmatmul.mubr.bf16.vlgmr.msra.gmra.mrb[0].mxu1 %v1873_v1 }
 0x170   : > { %v1037_v6 = vpop.f32.mrb[10].mxu0 }
 0x171   : > { %v1665_v7 = vadd.f32 %v23904_v44, %v1037_v6  ;;  %v19989_v8 = vpop.f32.mrb[11].mxu0  ;;  %v1770_v9 = vmax.f32 %v1664_v3, 0.0 }
 0x173   : > { %v1771_v10 = vmax.f32 %v1665_v7, 0.0  ;;  %20095 = vmatmul.mubr.bf16.gmra.mrb[116].mxu0 %v22984_v5 }
 0x174   : > { %20098 = vmatprep.mubr.msk.bf16.mxu0 %vm23527_vm0, %v26621_v0 }
 0x175   : > { %v1874_v11 = vpack.c.bf16 %v1771_v10, %v1770_v9 }
 0x176   : > { %v1042_v12 = vpop.f32.mrb[12].mxu0  ;;  %v23928_v21 = vld [vmem:[#allocation3 + $0x8] sm:$0xff] }
 0x177   : > { %v1666_v13 = vadd.f32 %v23904_v44, %v1042_v12  ;;  %v19992_v14 = vpop.f32.mrb[13].mxu0  ;;  %1927 = vst [vmem:[#allocation3 + $0x10] sm:$0xff] %v1874_v11  ;;  %20210 = vmatprep.mubr.bf16.mxu1 %v1874_v11  ;;  %v26623_v28 = vrot.slane %v23928_v21, 1 }
 0x178   : > { %v1045_v16 = vpop.f32.mrb[14].mxu0 }
 0x179   : > { %v1667_v17 = vadd.f32 %v23904_v44, %v1045_v16  ;;  %v19993_v18 = vpop.f32.mrb[15].mxu0  ;;  %v1772_v19 = vmax.f32 %v1666_v13, 0.0 }
 0x17b   : > { %v1773_v20 = vmax.f32 %v1667_v17, 0.0  ;;  %20099 = vmatmul.mubr.bf16.gmra.mrb[120].mxu0 %v22987_v15  ;;  %v22992_v17 = vld [vmem:[%s23776_s21 + $0x110] sm:$0xff]  }
 0x17c   : > { %20102 = vmatprep.mubr.msk.bf16.mxu0 %vm23527_vm0, %v26621_v0 }
 0x17d   : > { %v1875_v22 = vpack.c.bf16 %v1773_v20, %v1772_v19 }
 0x17e   : > { %v1050_v23 = vpop.f32.mrb[16].mxu0  ;;  %v1980_v24 = vld [vmem:[#allocation3 + $0x10] sm:$0xff] }
 0x17f   : > { %v1668_v25 = vadd.f32 %v23904_v44, %v1050_v23  ;;  %v19996_v26 = vpop.f32.mrb[17].mxu0  ;;  %1928 = vst [vmem:[#allocation3 + $0x18] sm:$0xff] %v1875_v22  ;;  %20211 = vmatmul.mubr.bf16.gmra.mrb[4].mxu1 %v1875_v22  ;;  %v2666_v29 = vrot.slane %v1980_v24, 1  ;;  %v2048_v33 = vshll.u32 %v1980_v24, 16  ;;  %v2052_v45 = vshrl.u32 %v1980_v24, 16 }
 0x180   : > { %v1053_v30 = vpop.f32.mrb[18].mxu0 }
 0x181   : > { %v1669_v31 = vadd.f32 %v23904_v44, %v1053_v30  ;;  %v19997_v32 = vpop.f32.mrb[19].mxu0  ;;  %v23937_v34 = vsel %vm2662_vm1, %v26623_v28, %v2666_v29  ;;  %v1774_v35 = vmax.f32 %v1668_v25, 0.0  ;;  %v23941_v38 = vrot.slane %v2048_v33, 1 }
 0x183   : > { %v1775_v36 = vmax.f32 %v1669_v31, 0.0  ;;  %20103 = vmatmul.mubr.bf16.gmra.mrb[124].mxu0 %v22989_v27  ;;  %v2054_v51 = vor.u32 %v2052_v45, %v23941_v38 }
 0x184   : > { %20106 = vmatprep.mubr.msk.bf16.mxu0 %vm23527_vm0, %v26621_v0 }
 0x185   : > { %v1876_v37 = vpack.c.bf16 %v1775_v36, %v1774_v35 }
 0x186   : > { %v1058_v39 = vpop.f32.mrb[20].mxu0  ;;  %v1981_v40 = vld [vmem:[#allocation3 + $0x18] sm:$0xff] }
 0x187   : > { %v1670_v41 = vadd.f32 %v23904_v44, %v1058_v39  ;;  %v20000_v42 = vpop.f32.mrb[21].mxu0  ;;  %1929 = vst [vmem:[#allocation3 + $0x20] sm:$0xff] %v1876_v37  ;;  %20214 = vmatprep.mubr.bf16.mxu1 %v1876_v37  ;;  %v2056_v46 = vshll.u32 %v1981_v40, 16  ;;  %v2668_v47 = vrot.slane %v1981_v40, 1  ;;  %v2060_v63 = vshrl.u32 %v1981_v40, 16  ;;  %v22993_v39 = vld [vmem:[%s23776_s21 + $0x118] sm:$0xff]  }
 0x188   : > { %v1061_v48 = vpop.f32.mrb[22].mxu0 }
 0x189   : > { %v1671_v49 = vadd.f32 %v23904_v44, %v1061_v48  ;;  %v20001_v50 = vpop.f32.mrb[23].mxu0  ;;  %v2058_v52 = vrot.slane %v2056_v46, 1  ;;  %v2669_v53 = vsel %vm2662_vm1, %v2666_v29, %v2668_v47  ;;  %v1776_v54 = vmax.f32 %v1670_v41, 0.0 }
 0x18a   : > { %2822 = vst [vmem:[#allocation7 + $0x10] sm:$0xff] %v2669_v53 }
 0x18b   : > { %v1777_v55 = vmax.f32 %v1671_v49, 0.0  ;;  %20107 = vmatmul.mubr.bf16.gmra.mrb[128].mxu0 %v22990_v43  ;;  %v2059_v56 = vsel %vm2031_vm2, %v2054_v51, %v2058_v52  ;;  %v2062_v6 = vor.u32 %v2060_v63, %v2058_v52 }
 0x18c   : > { %20110 = vmatprep.mubr.msk.bf16.mxu0 %vm23527_vm0, %v26621_v0  ;;  %2506 = vst [vmem:[#allocation6 + $0x10] sm:$0xff] %v2059_v56 }
 0x18d   : > { %v1877_v57 = vpack.c.bf16 %v1777_v55, %v1776_v54 }
 0x18e   : > { %v1066_v58 = vpop.f32.mrb[24].mxu0  ;;  %v1982_v59 = vld [vmem:[#allocation3 + $0x20] sm:$0xff] }
 0x18f   : > { %v1672_v60 = vadd.f32 %v23904_v44, %v1066_v58  ;;  %v20004_v61 = vpop.f32.mrb[25].mxu0  ;;  %1930 = vst [vmem:[#allocation3 + $0x28] sm:$0xff] %v1877_v57  ;;  %20215 = vmatmul.mubr.bf16.gmra.mrb[8].mxu1 %v1877_v57  ;;  %v2064_v1 = vshll.u32 %v1982_v59, 16  ;;  %v2670_v2 = vrot.slane %v1982_v59, 1  ;;  %v2068_v18 = vshrl.u32 %v1982_v59, 16  ;;  %v22994_v58 = vld [vmem:[%s23776_s21 + $0x120] sm:$0xff]  }
 0x190   : > { %v1069_v3 = vpop.f32.mrb[26].mxu0 }
 0x191   : > { %v1673_v4 = vadd.f32 %v23904_v44, %v1069_v3  ;;  %v20005_v5 = vpop.f32.mrb[27].mxu0  ;;  %v2066_v7 = vrot.slane %v2064_v1, 1  ;;  %v2671_v8 = vsel %vm2662_vm1, %v2668_v47, %v2670_v2  ;;  %v1778_v9 = vmax.f32 %v1672_v60, 0.0 }
 0x192   : > { %2823 = vst [vmem:[#allocation7 + $0x18] sm:$0xff] %v2671_v8 }
 0x193   : > { %v1779_v10 = vmax.f32 %v1673_v4, 0.0  ;;  %20111 = vmatmul.mubr.bf16.gmra.mrb[132].mxu0 %v22991_v62  ;;  %v2067_v11 = vsel %vm2031_vm2, %v2062_v6, %v2066_v7  ;;  %v2070_v25 = vor.u32 %v2068_v18, %v2066_v7 }
 0x194   : > { %20114 = vmatprep.mubr.msk.bf16.mxu0 %vm23527_vm0, %v26621_v0  ;;  %2507 = vst [vmem:[#allocation6 + $0x18] sm:$0xff] %v2067_v11 }
 0x195   : > { %v1878_v12 = vpack.c.bf16 %v1779_v10, %v1778_v9 }
 0x196   : > { %v1074_v13 = vpop.f32.mrb[28].mxu0  ;;  %v1983_v14 = vld [vmem:[#allocation3 + $0x28] sm:$0xff] }
 0x197   : > { %v1674_v15 = vadd.f32 %v23904_v44, %v1074_v13  ;;  %v20008_v16 = vpop.f32.mrb[29].mxu0  ;;  %1931 = vst [vmem:[#allocation3 + $0x30] sm:$0xff] %v1878_v12  ;;  %20218 = vmatprep.mubr.bf16.mxu1 %v1878_v12  ;;  %v2072_v19 = vshll.u32 %v1983_v14, 16  ;;  %v2672_v20 = vrot.slane %v1983_v14, 1  ;;  %v2076_v40 = vshrl.u32 %v1983_v14, 16  ;;  %v22995_v13 = vld [vmem:[%s23776_s21 + $0x128] sm:$0xff]  }
 0x198   : > { %v1077_v22 = vpop.f32.mrb[30].mxu0 }
 0x199   : > { %v1675_v23 = vadd.f32 %v23904_v44, %v1077_v22  ;;  %v20009_v24 = vpop.f32.mrb[31].mxu0  ;;  %v2074_v26 = vrot.slane %v2072_v19, 1  ;;  %v2673_v27 = vsel %vm2662_vm1, %v2670_v2, %v2672_v20  ;;  %v1780_v29 = vmax.f32 %v1674_v15, 0.0 }
 0x19a   : > { %2824 = vst [vmem:[#allocation7 + $0x20] sm:$0xff] %v2673_v27 }
 0x19b   : > { %v1781_v30 = vmax.f32 %v1675_v23, 0.0  ;;  %20115 = vmatmul.mubr.bf16.gmra.mrb[136].mxu0 %v22992_v17  ;;  %v2075_v31 = vsel %vm2031_vm2, %v2070_v25, %v2074_v26  ;;  %v2078_v47 = vor.u32 %v2076_v40, %v2074_v26 }
 0x19c   : > { %20118 = vmatprep.mubr.msk.bf16.mxu0 %vm23527_vm0, %v26621_v0  ;;  %2508 = vst [vmem:[#allocation6 + $0x20] sm:$0xff] %v2075_v31 }
 0x19d   : > { %v1879_v32 = vpack.c.bf16 %v1781_v30, %v1780_v29 }
 0x19e   : > { %v1082_v33 = vpop.f32.mrb[32].mxu0  ;;  %v1984_v35 = vld [vmem:[#allocation3 + $0x30] sm:$0xff] }
 0x19f   : > { %v1676_v36 = vadd.f32 %v23904_v44, %v1082_v33  ;;  %v20012_v37 = vpop.f32.mrb[33].mxu0  ;;  %1932 = vst [vmem:[#allocation3 + $0x38] sm:$0xff] %v1879_v32  ;;  %20219 = vmatmul.mubr.bf16.gmra.mrb[12].mxu1 %v1879_v32  ;;  %v2080_v41 = vshll.u32 %v1984_v35, 16  ;;  %v2674_v42 = vrot.slane %v1984_v35, 1  ;;  %v2084_v59 = vshrl.u32 %v1984_v35, 16  ;;  %v22996_v33 = vld [vmem:[%s23776_s21 + $0x130] sm:$0xff]  }
 0x1a0   : > { %v1085_v43 = vpop.f32.mrb[34].mxu0 }
 0x1a1   : > { %v1677_v45 = vadd.f32 %v23904_v44, %v1085_v43  ;;  %v20013_v46 = vpop.f32.mrb[35].mxu0  ;;  %v2082_v48 = vrot.slane %v2080_v41, 1  ;;  %v2675_v49 = vsel %vm2662_vm1, %v2672_v20, %v2674_v42  ;;  %v1782_v50 = vmax.f32 %v1676_v36, 0.0 }
 0x1a2   : > { %2825 = vst [vmem:[#allocation7 + $0x28] sm:$0xff] %v2675_v49 }
 0x1a3   : > { %v1783_v51 = vmax.f32 %v1677_v45, 0.0  ;;  %20119 = vmatmul.mubr.bf16.gmra.mrb[140].mxu0 %v22993_v39  ;;  %v2083_v52 = vsel %vm2031_vm2, %v2078_v47, %v2082_v48  ;;  %v2086_v2 = vor.u32 %v2084_v59, %v2082_v48 }
 0x1a4   : > { %20122 = vmatprep.mubr.msk.bf16.mxu0 %vm23527_vm0, %v26621_v0  ;;  %2509 = vst [vmem:[#allocation6 + $0x28] sm:$0xff] %v2083_v52 }
 0x1a5   : > { %v1880_v53 = vpack.c.bf16 %v1783_v51, %v1782_v50 }
 0x1a6   : > { %v1090_v54 = vpop.f32.mrb[36].mxu0  ;;  %v1985_v55 = vld [vmem:[#allocation3 + $0x38] sm:$0xff] }
 0x1a7   : > { %v1678_v56 = vadd.f32 %v23904_v44, %v1090_v54  ;;  %v20016_v57 = vpop.f32.mrb[37].mxu0  ;;  %1933 = vst [vmem:[#allocation3 + $0x40] sm:$0xff] %v1880_v53  ;;  %20222 = vmatprep.mubr.bf16.mxu1 %v1880_v53  ;;  %v2088_v60 = vshll.u32 %v1985_v55, 16  ;;  %v2676_v61 = vrot.slane %v1985_v55, 1  ;;  %v2092_v14 = vshrl.u32 %v1985_v55, 16  ;;  %v22997_v55 = vld [vmem:[%s23776_s21 + $0x138] sm:$0xff]  }
 0x1a8   : > { %v1093_v62 = vpop.f32.mrb[38].mxu0 }
 0x1a9   : > { %v1679_v63 = vadd.f32 %v23904_v44, %v1093_v62  ;;  %v20017_v1 = vpop.f32.mrb[39].mxu0  ;;  %v2090_v3 = vrot.slane %v2088_v60, 1  ;;  %v2677_v4 = vsel %vm2662_vm1, %v2674_v42, %v2676_v61  ;;  %v1784_v5 = vmax.f32 %v1678_v56, 0.0  ;;  %v23007_v42 = vld [vmem:[%s26597_s3 + $0x40] sm:$0xff]  }
 0x1aa   : > { %2826 = vst [vmem:[#allocation7 + $0x30] sm:$0xff] %v2677_v4  ;;  %20302 = vmatprep.subr.bf16.mxu1 %v23007_v42 }
 0x1ab   : > { %v1785_v6 = vmax.f32 %v1679_v63, 0.0  ;;  %20123 = vmatmul.mubr.bf16.gmra.mrb[144].mxu0 %v22994_v58  ;;  %v2091_v7 = vsel %vm2031_vm2, %v2086_v2, %v2090_v3  ;;  %v2094_v20 = vor.u32 %v2092_v14, %v2090_v3  ;;  %20303 = vmatpush3.bf16.msra.mxu1 %v23007_v42 }
 0x1ac   : > { %20126 = vmatprep.mubr.msk.bf16.mxu0 %vm23527_vm0, %v26621_v0  ;;  %2510 = vst [vmem:[#allocation6 + $0x30] sm:$0xff] %v2091_v7 }
 0x1ad   : > { %v1881_v8 = vpack.c.bf16 %v1785_v6, %v1784_v5 }
 0x1ae   : > { %v1098_v9 = vpop.f32.mrb[40].mxu0  ;;  %v1986_v10 = vld [vmem:[#allocation3 + $0x40] sm:$0xff] }
 0x1af   : > { %v1680_v11 = vadd.f32 %v23904_v44, %v1098_v9  ;;  %v20020_v12 = vpop.f32.mrb[41].mxu0  ;;  %1934 = vst [vmem:[#allocation3 + $0x48] sm:$0xff] %v1881_v8  ;;  %20223 = vmatmul.mubr.bf16.gmra.mrb[16].mxu1 %v1881_v8  ;;  %v2096_v15 = vshll.u32 %v1986_v10, 16  ;;  %v2678_v16 = vrot.slane %v1986_v10, 1  ;;  %v2100_v35 = vshrl.u32 %v1986_v10, 16  ;;  %v22998_v10 = vld [vmem:[%s23776_s21 + $0x140] sm:$0xff]  }
 0x1b0   : > { %v1101_v17 = vpop.f32.mrb[42].mxu0 }
 0x1b1   : > { %v1681_v18 = vadd.f32 %v23904_v44, %v1101_v17  ;;  %v20021_v19 = vpop.f32.mrb[43].mxu0  ;;  %v2098_v22 = vrot.slane %v2096_v15, 1  ;;  %v2679_v23 = vsel %vm2662_vm1, %v2676_v61, %v2678_v16  ;;  %v1786_v24 = vmax.f32 %v1680_v11, 0.0 }
 0x1b2   : > { %2827 = vst [vmem:[#allocation7 + $0x38] sm:$0xff] %v2679_v23 }
 0x1b3   : > { %v1787_v25 = vmax.f32 %v1681_v18, 0.0  ;;  %20127 = vmatmul.mubr.bf16.gmra.mrb[148].mxu0 %v22995_v13  ;;  %v2099_v26 = vsel %vm2031_vm2, %v2094_v20, %v2098_v22  ;;  %v2102_v43 = vor.u32 %v2100_v35, %v2098_v22 }
 0x1b4   : > { %20130 = vmatprep.mubr.msk.bf16.mxu0 %vm23527_vm0, %v26621_v0  ;;  %2511 = vst [vmem:[#allocation6 + $0x38] sm:$0xff] %v2099_v26 }
 0x1b5   : > { %v1882_v27 = vpack.c.bf16 %v1787_v25, %v1786_v24 }
 0x1b6   : > { %v1106_v29 = vpop.f32.mrb[44].mxu0  ;;  %v1987_v30 = vld [vmem:[#allocation3 + $0x48] sm:$0xff] }
 0x1b7   : > { %v1682_v31 = vadd.f32 %v23904_v44, %v1106_v29  ;;  %v20024_v32 = vpop.f32.mrb[45].mxu0  ;;  %1935 = vst [vmem:[#allocation3 + $0x50] sm:$0xff] %v1882_v27  ;;  %20226 = vmatprep.mubr.bf16.mxu1 %v1882_v27  ;;  %v2104_v36 = vshll.u32 %v1987_v30, 16  ;;  %v2680_v37 = vrot.slane %v1987_v30, 1  ;;  %v2108_v56 = vshrl.u32 %v1987_v30, 16  ;;  %v22999_v30 = vld [vmem:[%s23776_s21 + $0x148] sm:$0xff]  }
 0x1b8   : > { %v1109_v39 = vpop.f32.mrb[46].mxu0 }
 0x1b9   : > { %v1683_v40 = vadd.f32 %v23904_v44, %v1109_v39  ;;  %v20025_v41 = vpop.f32.mrb[47].mxu0  ;;  %v2106_v45 = vrot.slane %v2104_v36, 1  ;;  %v2681_v46 = vsel %vm2662_vm1, %v2678_v16, %v2680_v37  ;;  %v1788_v47 = vmax.f32 %v1682_v31, 0.0  ;;  %v23008_v39 = vld [vmem:[%s26597_s3 + $0x48] sm:$0xff]  }
 0x1ba   : > { %2828 = vst [vmem:[#allocation7 + $0x40] sm:$0xff] %v2681_v46  ;;  %20304 = vmatprep.subr.bf16.mxu1 %v23008_v39 }
 0x1bb   : > { %v1789_v48 = vmax.f32 %v1683_v40, 0.0  ;;  %20131 = vmatmul.mubr.bf16.gmra.mrb[152].mxu0 %v22996_v33  ;;  %v2107_v49 = vsel %vm2031_vm2, %v2102_v43, %v2106_v45  ;;  %v2110_v62 = vor.u32 %v2108_v56, %v2106_v45  ;;  %20305 = vmatpush3.bf16.msra.mxu1 %v23008_v39 }
 0x1bc   : > { %20134 = vmatprep.mubr.msk.bf16.mxu0 %vm23527_vm0, %v26621_v0  ;;  %2512 = vst [vmem:[#allocation6 + $0x40] sm:$0xff] %v2107_v49 }
 0x1bd   : > { %v1883_v50 = vpack.c.bf16 %v1789_v48, %v1788_v47 }
 0x1be   : > { %v1114_v51 = vpop.f32.mrb[48].mxu0  ;;  %v1988_v52 = vld [vmem:[#allocation3 + $0x50] sm:$0xff] }
 0x1bf   : > { %v1684_v53 = vadd.f32 %v23904_v44, %v1114_v51  ;;  %v20028_v54 = vpop.f32.mrb[49].mxu0  ;;  %1936 = vst [vmem:[#allocation3 + $0x58] sm:$0xff] %v1883_v50  ;;  %20227 = vmatmul.mubr.bf16.gmra.mrb[20].mxu1 %v1883_v50  ;;  %v2112_v57 = vshll.u32 %v1988_v52, 16  ;;  %v2682_v58 = vrot.slane %v1988_v52, 1  ;;  %v2116_v11 = vshrl.u32 %v1988_v52, 16  ;;  %v23000_v52 = vld [vmem:[%s23776_s21 + $0x150] sm:$0xff]  }
 0x1c0   : > { %v1117_v59 = vpop.f32.mrb[50].mxu0 }
 0x1c1   : > { %v1685_v60 = vadd.f32 %v23904_v44, %v1117_v59  ;;  %v20029_v61 = vpop.f32.mrb[51].mxu0  ;;  %v2114_v63 = vrot.slane %v2112_v57, 1  ;;  %v2683_v1 = vsel %vm2662_vm1, %v2680_v37, %v2682_v58  ;;  %v1790_v2 = vmax.f32 %v1684_v53, 0.0 }
 0x1c2   : > { %2829 = vst [vmem:[#allocation7 + $0x48] sm:$0xff] %v2683_v1 }
 0x1c3   : > { %v1791_v3 = vmax.f32 %v1685_v60, 0.0  ;;  %20135 = vmatmul.mubr.bf16.gmra.mrb[156].mxu0 %v22997_v55  ;;  %v2115_v4 = vsel %vm2031_vm2, %v2110_v62, %v2114_v63  ;;  %v2118_v17 = vor.u32 %v2116_v11, %v2114_v63 }
 0x1c4   : > { %20138 = vmatprep.mubr.msk.bf16.mxu0 %vm23527_vm0, %v26621_v0  ;;  %2513 = vst [vmem:[#allocation6 + $0x48] sm:$0xff] %v2115_v4 }
 0x1c5   : > { %v1884_v5 = vpack.c.bf16 %v1791_v3, %v1790_v2 }
 0x1c6   : > { %v1122_v6 = vpop.f32.mrb[52].mxu0  ;;  %v1989_v7 = vld [vmem:[#allocation3 + $0x58] sm:$0xff] }
 0x1c7   : > { %v1686_v8 = vadd.f32 %v23904_v44, %v1122_v6  ;;  %v20032_v9 = vpop.f32.mrb[53].mxu0  ;;  %1937 = vst [vmem:[#allocation3 + $0x60] sm:$0xff] %v1884_v5  ;;  %20230 = vmatprep.mubr.bf16.mxu1 %v1884_v5  ;;  %v2120_v12 = vshll.u32 %v1989_v7, 16  ;;  %v2684_v13 = vrot.slane %v1989_v7, 1  ;;  %v2124_v31 = vshrl.u32 %v1989_v7, 16  ;;  %v23001_v7 = vld [vmem:[%s23776_s21 + $0x158] sm:$0xff]  }
 0x1c8   : > { %v1125_v14 = vpop.f32.mrb[54].mxu0 }
 0x1c9   : > { %v1687_v15 = vadd.f32 %v23904_v44, %v1125_v14  ;;  %v20033_v16 = vpop.f32.mrb[55].mxu0  ;;  %v2122_v18 = vrot.slane %v2120_v12, 1  ;;  %v2685_v19 = vsel %vm2662_vm1, %v2682_v58, %v2684_v13  ;;  %v1792_v20 = vmax.f32 %v1686_v8, 0.0 }
 0x1ca   : > { %2830 = vst [vmem:[#allocation7 + $0x50] sm:$0xff] %v2685_v19 }
 0x1cb   : > { %v1793_v22 = vmax.f32 %v1687_v15, 0.0  ;;  %20139 = vmatmul.mubr.bf16.gmra.mrb[160].mxu0 %v22998_v10  ;;  %v2123_v23 = vsel %vm2031_vm2, %v2118_v17, %v2122_v18  ;;  %v2126_v40 = vor.u32 %v2124_v31, %v2122_v18 }
 0x1cc   : > { %20142 = vmatprep.mubr.msk.bf16.mxu0 %vm23527_vm0, %v26621_v0  ;;  %2514 = vst [vmem:[#allocation6 + $0x50] sm:$0xff] %v2123_v23 }
 0x1cd   : > { %v1885_v24 = vpack.c.bf16 %v1793_v22, %v1792_v20 }
 0x1ce   : > { %v1130_v25 = vpop.f32.mrb[56].mxu0  ;;  %v1990_v26 = vld [vmem:[#allocation3 + $0x60] sm:$0xff] }
 0x1cf   : > { %v1688_v27 = vadd.f32 %v23904_v44, %v1130_v25  ;;  %v20036_v29 = vpop.f32.mrb[57].mxu0  ;;  %1938 = vst [vmem:[#allocation3 + $0x68] sm:$0xff] %v1885_v24  ;;  %20231 = vmatmul.mubr.bf16.gmra.mrb[24].mxu1 %v1885_v24  ;;  %v2128_v32 = vshll.u32 %v1990_v26, 16  ;;  %v2686_v33 = vrot.slane %v1990_v26, 1  ;;  %v2132_v53 = vshrl.u32 %v1990_v26, 16  ;;  %v23002_v26 = vld [vmem:[%s23776_s21 + $0x160] sm:$0xff]  }
 0x1d0   : > { %v1133_v35 = vpop.f32.mrb[58].mxu0 }
 0x1d1   : > { %v1689_v36 = vadd.f32 %v23904_v44, %v1133_v35  ;;  %v20037_v37 = vpop.f32.mrb[59].mxu0  ;;  %v2130_v41 = vrot.slane %v2128_v32, 1  ;;  %v2687_v42 = vsel %vm2662_vm1, %v2684_v13, %v2686_v33  ;;  %v1794_v43 = vmax.f32 %v1688_v27, 0.0  ;;  %v23009_v35 = vld [vmem:[%s26597_s3 + $0x50] sm:$0xff]  }
 0x1d2   : > { %2831 = vst [vmem:[#allocation7 + $0x58] sm:$0xff] %v2687_v42  ;;  %20306 = vmatprep.subr.bf16.mxu1 %v23009_v35 }
 0x1d3   : > { %v1795_v45 = vmax.f32 %v1689_v36, 0.0  ;;  %20143 = vmatmul.mubr.bf16.gmra.mrb[164].mxu0 %v22999_v30  ;;  %v2131_v46 = vsel %vm2031_vm2, %v2126_v40, %v2130_v41  ;;  %v2134_v59 = vor.u32 %v2132_v53, %v2130_v41  ;;  %20307 = vmatpush3.bf16.msra.mxu1 %v23009_v35 }
 0x1d4   : > { %20146 = vmatprep.mubr.msk.bf16.mxu0 %vm23527_vm0, %v26621_v0  ;;  %2515 = vst [vmem:[#allocation6 + $0x58] sm:$0xff] %v2131_v46 }
 0x1d5   : > { %v1886_v47 = vpack.c.bf16 %v1795_v45, %v1794_v43 }
 0x1d6   : > { %v1138_v48 = vpop.f32.mrb[60].mxu0  ;;  %v1991_v49 = vld [vmem:[#allocation3 + $0x68] sm:$0xff] }
 0x1d7   : > { %v1690_v50 = vadd.f32 %v23904_v44, %v1138_v48  ;;  %v20040_v51 = vpop.f32.mrb[61].mxu0  ;;  %1939 = vst [vmem:[#allocation3 + $0x70] sm:$0xff] %v1886_v47  ;;  %20234 = vmatprep.mubr.bf16.mxu1 %v1886_v47  ;;  %v2136_v54 = vshll.u32 %v1991_v49, 16  ;;  %v2688_v55 = vrot.slane %v1991_v49, 1  ;;  %v2140_v8 = vshrl.u32 %v1991_v49, 16  ;;  %v23003_v49 = vld [vmem:[%s23776_s21 + $0x168] sm:$0xff]  }
 0x1d8   : > { %v1141_v56 = vpop.f32.mrb[62].mxu0 }
 0x1d9   : > { %v1691_v57 = vadd.f32 %v23904_v44, %v1141_v56  ;;  %v20041_v58 = vpop.f32.mrb[63].mxu0  ;;  %v2138_v60 = vrot.slane %v2136_v54, 1  ;;  %v2689_v61 = vsel %vm2662_vm1, %v2686_v33, %v2688_v55  ;;  %v1796_v62 = vmax.f32 %v1690_v50, 0.0 }
 0x1da   : > { %2832 = vst [vmem:[#allocation7 + $0x60] sm:$0xff] %v2689_v61 }
 0x1db   : > { %v1797_v63 = vmax.f32 %v1691_v57, 0.0  ;;  %20147 = vmatmul.mubr.bf16.gmra.mrb[168].mxu0 %v23000_v52  ;;  %v2139_v1 = vsel %vm2031_vm2, %v2134_v59, %v2138_v60  ;;  %v2142_v14 = vor.u32 %v2140_v8, %v2138_v60 }
 0x1dc   : > { %20150 = vmatprep.mubr.msk.bf16.mxu0 %vm23527_vm0, %v26621_v0  ;;  %2516 = vst [vmem:[#allocation6 + $0x60] sm:$0xff] %v2139_v1 }
 0x1dd   : > { %v1887_v2 = vpack.c.bf16 %v1797_v63, %v1796_v62 }
 0x1de   : > { %v1146_v3 = vpop.f32.mrb[64].mxu0  ;;  %v1992_v4 = vld [vmem:[#allocation3 + $0x70] sm:$0xff] }
 0x1df   : > { %v1692_v5 = vadd.f32 %v23904_v44, %v1146_v3  ;;  %v20044_v6 = vpop.f32.mrb[65].mxu0  ;;  %1940 = vst [vmem:[#allocation3 + $0x78] sm:$0xff] %v1887_v2  ;;  %20235 = vmatmul.mubr.bf16.gmra.mrb[28].mxu1 %v1887_v2  ;;  %v2144_v9 = vshll.u32 %v1992_v4, 16  ;;  %v2690_v10 = vrot.slane %v1992_v4, 1  ;;  %v2148_v27 = vshrl.u32 %v1992_v4, 16  ;;  %v23004_v4 = vld [vmem:[%s23776_s21 + $0x170] sm:$0xff]  }
 0x1e0   : > { %v1149_v11 = vpop.f32.mrb[66].mxu0 }
 0x1e1   : > { %v1693_v12 = vadd.f32 %v23904_v44, %v1149_v11  ;;  %v20045_v13 = vpop.f32.mrb[67].mxu0  ;;  %v2146_v15 = vrot.slane %v2144_v9, 1  ;;  %v2691_v16 = vsel %vm2662_vm1, %v2688_v55, %v2690_v10  ;;  %v1798_v17 = vmax.f32 %v1692_v5, 0.0 }
 0x1e2   : > { %2833 = vst [vmem:[#allocation7 + $0x68] sm:$0xff] %v2691_v16 }
 0x1e3   : > { %v1799_v18 = vmax.f32 %v1693_v12, 0.0  ;;  %20151 = vmatmul.mubr.bf16.gmra.mrb[172].mxu0 %v23001_v7  ;;  %v2147_v19 = vsel %vm2031_vm2, %v2142_v14, %v2146_v15  ;;  %v2150_v36 = vor.u32 %v2148_v27, %v2146_v15 }
 0x1e4   : > { %20154 = vmatprep.mubr.msk.bf16.mxu0 %vm23527_vm0, %v26621_v0  ;;  %2517 = vst [vmem:[#allocation6 + $0x68] sm:$0xff] %v2147_v19 }
 0x1e5   : > { %v1888_v20 = vpack.c.bf16 %v1799_v18, %v1798_v17 }
 0x1e6   : > { %v1154_v22 = vpop.f32.mrb[68].mxu0  ;;  %v1993_v23 = vld [vmem:[#allocation3 + $0x78] sm:$0xff] }
 0x1e7   : > { %v1694_v24 = vadd.f32 %v23904_v44, %v1154_v22  ;;  %v20048_v25 = vpop.f32.mrb[69].mxu0  ;;  %1941 = vst [vmem:[#allocation3 + $0x80] sm:$0xff] %v1888_v20  ;;  %20238 = vmatprep.mubr.bf16.mxu1 %v1888_v20  ;;  %v2152_v29 = vshll.u32 %v1993_v23, 16  ;;  %v2692_v30 = vrot.slane %v1993_v23, 1  ;;  %v2156_v50 = vshrl.u32 %v1993_v23, 16  ;;  %v23005_v23 = vld [vmem:[%s23776_s21 + $0x178] sm:$0xff]  }
 0x1e8   : > { %v1157_v31 = vpop.f32.mrb[70].mxu0 }
 0x1e9   : > { %v1695_v32 = vadd.f32 %v23904_v44, %v1157_v31  ;;  %v20049_v33 = vpop.f32.mrb[71].mxu0  ;;  %v2154_v37 = vrot.slane %v2152_v29, 1  ;;  %v2693_v39 = vsel %vm2662_vm1, %v2690_v10, %v2692_v30  ;;  %v1800_v40 = vmax.f32 %v1694_v24, 0.0  ;;  %v23010_v31 = vld [vmem:[%s26597_s3 + $0x58] sm:$0xff]  }
 0x1ea   : > { %2834 = vst [vmem:[#allocation7 + $0x70] sm:$0xff] %v2693_v39  ;;  %20308 = vmatprep.subr.bf16.mxu1 %v23010_v31 }
 0x1eb   : > { %v1801_v41 = vmax.f32 %v1695_v32, 0.0  ;;  %20155 = vmatmul.mubr.bf16.gmra.mrb[176].mxu0 %v23002_v26  ;;  %v2155_v42 = vsel %vm2031_vm2, %v2150_v36, %v2154_v37  ;;  %v2158_v56 = vor.u32 %v2156_v50, %v2154_v37  ;;  %20309 = vmatpush3.bf16.msra.mxu1 %v23010_v31 }
 0x1ec   : > { %20158 = vmatprep.mubr.msk.bf16.mxu0 %vm23527_vm0, %v26621_v0  ;;  %2518 = vst [vmem:[#allocation6 + $0x70] sm:$0xff] %v2155_v42 }
 0x1ed   : > { %v1889_v43 = vpack.c.bf16 %v1801_v41, %v1800_v40 }
 0x1ee   : > { %v1162_v45 = vpop.f32.mrb[72].mxu0  ;;  %v1994_v46 = vld [vmem:[#allocation3 + $0x80] sm:$0xff] }
 0x1ef   : > { %v1696_v47 = vadd.f32 %v23904_v44, %v1162_v45  ;;  %v20052_v48 = vpop.f32.mrb[73].mxu0  ;;  %1942 = vst [vmem:[#allocation3 + $0x88] sm:$0xff] %v1889_v43  ;;  %20239 = vmatmul.mubr.bf16.gmra.mrb[32].mxu1 %v1889_v43  ;;  %v2160_v51 = vshll.u32 %v1994_v46, 16  ;;  %v2694_v52 = vrot.slane %v1994_v46, 1  ;;  %v2164_v5 = vshrl.u32 %v1994_v46, 16  ;;  %v23006_v46 = vld [vmem:[%s23776_s21 + $0x180] sm:$0xff]  }
 0x1f0   : > { %v1165_v53 = vpop.f32.mrb[74].mxu0 }
 0x1f1   : > { %v1697_v54 = vadd.f32 %v23904_v44, %v1165_v53  ;;  %v20053_v55 = vpop.f32.mrb[75].mxu0  ;;  %v2162_v57 = vrot.slane %v2160_v51, 1  ;;  %v2695_v58 = vsel %vm2662_vm1, %v2692_v30, %v2694_v52  ;;  %v1802_v59 = vmax.f32 %v1696_v47, 0.0 }
 0x1f2   : > { %2835 = vst [vmem:[#allocation7 + $0x78] sm:$0xff] %v2695_v58 }
 0x1f3   : > { %v1803_v60 = vmax.f32 %v1697_v54, 0.0  ;;  %20159 = vmatmul.mubr.bf16.gmra.mrb[180].mxu0 %v23003_v49  ;;  %v2163_v61 = vsel %vm2031_vm2, %v2158_v56, %v2162_v57  ;;  %v2166_v11 = vor.u32 %v2164_v5, %v2162_v57 }
 0x1f4   : > { %20162 = vmatprep.mubr.msk.bf16.mxu0 %vm23527_vm0, %v26621_v0  ;;  %2519 = vst [vmem:[#allocation6 + $0x78] sm:$0xff] %v2163_v61 }
 0x1f5   : > { %v1890_v62 = vpack.c.bf16 %v1803_v60, %v1802_v59 }
 0x1f6   : > { %v1170_v63 = vpop.f32.mrb[76].mxu0  ;;  %v1995_v1 = vld [vmem:[#allocation3 + $0x88] sm:$0xff] }
 0x1f7   : > { %v1698_v2 = vadd.f32 %v23904_v44, %v1170_v63  ;;  %v20056_v3 = vpop.f32.mrb[77].mxu0  ;;  %1943 = vst [vmem:[#allocation3 + $0x90] sm:$0xff] %v1890_v62  ;;  %20242 = vmatprep.mubr.bf16.mxu1 %v1890_v62  ;;  %v2168_v6 = vshll.u32 %v1995_v1, 16  ;;  %v2696_v7 = vrot.slane %v1995_v1, 1  ;;  %v2172_v24 = vshrl.u32 %v1995_v1, 16 }
 0x1f8   : > { %v1173_v8 = vpop.f32.mrb[78].mxu0 }
 0x1f9   : > { %v1699_v9 = vadd.f32 %v23904_v44, %v1173_v8  ;;  %v20057_v10 = vpop.f32.mrb[79].mxu0  ;;  %v2170_v12 = vrot.slane %v2168_v6, 1  ;;  %v2697_v13 = vsel %vm2662_vm1, %v2694_v52, %v2696_v7  ;;  %v1804_v14 = vmax.f32 %v1698_v2, 0.0 }
 0x1fa   : > { %2836 = vst [vmem:[#allocation7 + $0x80] sm:$0xff] %v2697_v13 }
 0x1fb   : > { %v1805_v15 = vmax.f32 %v1699_v9, 0.0  ;;  %20163 = vmatmul.mubr.bf16.gmra.mrb[184].mxu0 %v23004_v4  ;;  %v2171_v16 = vsel %vm2031_vm2, %v2166_v11, %v2170_v12  ;;  %v2174_v32 = vor.u32 %v2172_v24, %v2170_v12 }
 0x1fc   : > { %20166 = vmatprep.mubr.msk.bf16.mxu0 %vm23527_vm0, %v26621_v0  ;;  %2520 = vst [vmem:[#allocation6 + $0x80] sm:$0xff] %v2171_v16 }
 0x1fd   : > { %v1891_v17 = vpack.c.bf16 %v1805_v15, %v1804_v14 }
 0x1fe   : > { %v1178_v18 = vpop.f32.mrb[80].mxu0  ;;  %v1996_v19 = vld [vmem:[#allocation3 + $0x90] sm:$0xff] }
 0x1ff   : > { %v1700_v20 = vadd.f32 %v23904_v44, %v1178_v18  ;;  %v20060_v22 = vpop.f32.mrb[81].mxu0  ;;  %1944 = vst [vmem:[#allocation3 + $0x98] sm:$0xff] %v1891_v17  ;;  %20243 = vmatmul.mubr.bf16.gmra.mrb[36].mxu1 %v1891_v17  ;;  %v2176_v25 = vshll.u32 %v1996_v19, 16  ;;  %v2698_v26 = vrot.slane %v1996_v19, 1  ;;  %v2180_v47 = vshrl.u32 %v1996_v19, 16 }
 0x200   : > { %v1181_v27 = vpop.f32.mrb[82].mxu0 }
 0x201   : > { %v1701_v29 = vadd.f32 %v23904_v44, %v1181_v27  ;;  %v20061_v30 = vpop.f32.mrb[83].mxu0  ;;  %v2178_v33 = vrot.slane %v2176_v25, 1  ;;  %v2699_v35 = vsel %vm2662_vm1, %v2696_v7, %v2698_v26  ;;  %v1806_v36 = vmax.f32 %v1700_v20, 0.0  ;;  %v23011_v25 = vld [vmem:[%s26597_s3 + $0x60] sm:$0xff]  }
 0x202   : > { %2837 = vst [vmem:[#allocation7 + $0x88] sm:$0xff] %v2699_v35  ;;  %20310 = vmatprep.subr.bf16.mxu1 %v23011_v25 }
 0x203   : > { %v1807_v37 = vmax.f32 %v1701_v29, 0.0  ;;  %20167 = vmatmul.mubr.bf16.gmra.mrb[188].mxu0 %v23005_v23  ;;  %v2179_v39 = vsel %vm2031_vm2, %v2174_v32, %v2178_v33  ;;  %v2182_v53 = vor.u32 %v2180_v47, %v2178_v33  ;;  %20311 = vmatpush3.bf16.msra.mxu1 %v23011_v25  ;;  %v23013_v25 = vld [vmem:[%s23776_s21 + $0x188] sm:$0xff]  }
 0x204   : > { %20170 = vmatprep.mubr.msk.bf16.mxu0 %vm23527_vm0, %v26621_v0  ;;  %2521 = vst [vmem:[#allocation6 + $0x88] sm:$0xff] %v2179_v39 }
 0x205   : > { %v1892_v40 = vpack.c.bf16 %v1807_v37, %v1806_v36 }
 0x206   : > { %v1186_v41 = vpop.f32.mrb[84].mxu0  ;;  %v1997_v42 = vld [vmem:[#allocation3 + $0x98] sm:$0xff] }
 0x207   : > { %v1702_v43 = vadd.f32 %v23904_v44, %v1186_v41  ;;  %v20064_v45 = vpop.f32.mrb[85].mxu0  ;;  %1945 = vst [vmem:[#allocation3 + $0xa0] sm:$0xff] %v1892_v40  ;;  %20246 = vmatprep.mubr.bf16.mxu1 %v1892_v40  ;;  %v2184_v48 = vshll.u32 %v1997_v42, 16  ;;  %v2700_v49 = vrot.slane %v1997_v42, 1  ;;  %v2188_v1 = vshrl.u32 %v1997_v42, 16 }
 0x208   : > { %v1189_v50 = vpop.f32.mrb[86].mxu0 }
 0x209   : > { %v1703_v51 = vadd.f32 %v23904_v44, %v1189_v50  ;;  %v20065_v52 = vpop.f32.mrb[87].mxu0  ;;  %v2186_v54 = vrot.slane %v2184_v48, 1  ;;  %v2701_v55 = vsel %vm2662_vm1, %v2698_v26, %v2700_v49  ;;  %v1808_v56 = vmax.f32 %v1702_v43, 0.0  ;;  %v24078_v44 = vld [vmem:[%s26596_s2] ss:$0 sm:$0xff] }
 0x20a   : > { %2838 = vst [vmem:[#allocation7 + $0x90] sm:$0xff] %v2701_v55 }
 0x20b   : > { %v1809_v57 = vmax.f32 %v1703_v51, 0.0  ;;  %20171 = vmatmul.mubr.bf16.gmra.mrb[192].mxu0 %v23006_v46  ;;  %v2187_v58 = vsel %vm2031_vm2, %v2182_v53, %v2186_v54  ;;  %v2190_v7 = vor.u32 %v2188_v1, %v2186_v54 }
 0x20c   : > { %20174 = vmatprep.mubr.msk.bf16.mxu0 %vm23527_vm0, %v26621_v0  ;;  %2522 = vst [vmem:[#allocation6 + $0x90] sm:$0xff] %v2187_v58 }
 0x20d   : > { %v1893_v59 = vpack.c.bf16 %v1809_v57, %v1808_v56 }
 0x20e   : > { %v1194_v60 = vpop.f32.mrb[88].mxu0  ;;  %v1998_v61 = vld [vmem:[#allocation3 + $0xa0] sm:$0xff] }
 0x20f   : > { %v1704_v62 = vadd.f32 %v24078_v44, %v1194_v60  ;;  %v20068_v63 = vpop.f32.mrb[89].mxu0  ;;  %1946 = vst [vmem:[#allocation3 + $0xa8] sm:$0xff] %v1893_v59  ;;  %20247 = vmatmul.mubr.bf16.gmra.mrb[40].mxu1 %v1893_v59  ;;  %v2192_v2 = vshll.u32 %v1998_v61, 16  ;;  %v2702_v3 = vrot.slane %v1998_v61, 1  ;;  %v2196_v18 = vshrl.u32 %v1998_v61, 16 }
 0x210   : > { %v1197_v4 = vpop.f32.mrb[90].mxu0 }
 0x211   : > { %v1705_v5 = vadd.f32 %v24078_v44, %v1197_v4  ;;  %v20069_v6 = vpop.f32.mrb[91].mxu0  ;;  %v2194_v8 = vrot.slane %v2192_v2, 1  ;;  %v2703_v9 = vsel %vm2662_vm1, %v2700_v49, %v2702_v3  ;;  %v1810_v10 = vmax.f32 %v1704_v62, 0.0 }
 0x212   : > { %2839 = vst [vmem:[#allocation7 + $0x98] sm:$0xff] %v2703_v9 }
 0x213   : > { %v1811_v11 = vmax.f32 %v1705_v5, 0.0  ;;  %v2195_v12 = vsel %vm2031_vm2, %v2190_v7, %v2194_v8  ;;  %v2198_v26 = vor.u32 %v2196_v18, %v2194_v8  ;;  %v23012_v18 = vld [vmem:[%s26597_s3 + $0x68] sm:$0xff]   ;;  %20175 = vmatmul.mubr.bf16.gmra.mrb[196].mxu0 %v23013_v25 }
 0x214   : > { %2523 = vst [vmem:[#allocation6 + $0x98] sm:$0xff] %v2195_v12  ;;  %20312 = vmatprep.subr.bf16.mxu1 %v23012_v18  ;;  %20178 = vmatprep.mubr.msk.bf16.mxu0 %vm23527_vm0, %v26621_v0 }
 0x215   : > { %v1894_v13 = vpack.c.bf16 %v1811_v11, %v1810_v10  ;;  %20313 = vmatpush3.bf16.msra.mxu1 %v23012_v18 }
 0x216   : > { %v1202_v14 = vpop.f32.mrb[92].mxu0  ;;  %v1999_v15 = vld [vmem:[#allocation3 + $0xa8] sm:$0xff] }
 0x217   : > { %v1706_v16 = vadd.f32 %v24078_v44, %v1202_v14  ;;  %v20072_v17 = vpop.f32.mrb[93].mxu0  ;;  %1947 = vst [vmem:[#allocation3 + $0xb0] sm:$0xff] %v1894_v13  ;;  %20250 = vmatprep.mubr.bf16.mxu1 %v1894_v13  ;;  %v2200_v19 = vshll.u32 %v1999_v15, 16  ;;  %v2704_v20 = vrot.slane %v1999_v15, 1  ;;  %v2204_v40 = vshrl.u32 %v1999_v15, 16 }
 0x218   : > { %v1205_v22 = vpop.f32.mrb[94].mxu0 }
 0x219   : > { %v1707_v23 = vadd.f32 %v24078_v44, %v1205_v22  ;;  %v20073_v24 = vpop.f32.mrb[95].mxu0  ;;  %v2202_v27 = vrot.slane %v2200_v19, 1  ;;  %v2705_v29 = vsel %vm2662_vm1, %v2702_v3, %v2704_v20  ;;  %v1812_v30 = vmax.f32 %v1706_v16, 0.0 }
 0x21a   : > { %2840 = vst [vmem:[#allocation7 + $0xa0] sm:$0xff] %v2705_v29 }
 0x21b   : > { %v1813_v31 = vmax.f32 %v1707_v23, 0.0  ;;  %v2203_v32 = vsel %vm2031_vm2, %v2198_v26, %v2202_v27  ;;  %v2206_v47 = vor.u32 %v2204_v40, %v2202_v27 }
 0x21c   : > { %2524 = vst [vmem:[#allocation6 + $0xa0] sm:$0xff] %v2203_v32 }
 0x21d   : > { %v1895_v33 = vpack.c.bf16 %v1813_v31, %v1812_v30 }
 0x21e   : > { %v1210_v35 = vpop.f32.mrb[96].mxu0  ;;  %v2000_v36 = vld [vmem:[#allocation3 + $0xb0] sm:$0xff] }
 0x21f   : > { %v1708_v37 = vadd.f32 %v24078_v44, %v1210_v35  ;;  %v20076_v39 = vpop.f32.mrb[97].mxu0  ;;  %1948 = vst [vmem:[#allocation3 + $0xb8] sm:$0xff] %v1895_v33  ;;  %20251 = vmatmul.mubr.bf16.gmra.mrb[44].mxu1 %v1895_v33  ;;  %v2208_v41 = vshll.u32 %v2000_v36, 16  ;;  %v2706_v42 = vrot.slane %v2000_v36, 1  ;;  %v2212_v58 = vshrl.u32 %v2000_v36, 16 }
 0x220   : > { %v1213_v43 = vpop.f32.mrb[98].mxu0 }
 0x221   : > { %v1709_v45 = vadd.f32 %v24078_v44, %v1213_v43  ;;  %v20077_v46 = vpop.f32.mrb[99].mxu0  ;;  %v2210_v48 = vrot.slane %v2208_v41, 1  ;;  %v2707_v49 = vsel %vm2662_vm1, %v2704_v20, %v2706_v42  ;;  %v1814_v50 = vmax.f32 %v1708_v37, 0.0 }
 0x222   : > { %2841 = vst [vmem:[#allocation7 + $0xa8] sm:$0xff] %v2707_v49 }
 0x223   : > { %v1815_v51 = vmax.f32 %v1709_v45, 0.0  ;;  %v2211_v52 = vsel %vm2031_vm2, %v2206_v47, %v2210_v48  ;;  %v2214_v1 = vor.u32 %v2212_v58, %v2210_v48 }
 0x224   : > { %2525 = vst [vmem:[#allocation6 + $0xa8] sm:$0xff] %v2211_v52 }
 0x225   : > { %v1896_v53 = vpack.c.bf16 %v1815_v51, %v1814_v50 }
 0x226   : > { %v1218_v54 = vpop.f32.mrb[100].mxu0  ;;  %v2001_v55 = vld [vmem:[#allocation3 + $0xb8] sm:$0xff] }
 0x227   : > { %v1710_v56 = vadd.f32 %v24078_v44, %v1218_v54  ;;  %v20080_v57 = vpop.f32.mrb[101].mxu0  ;;  %1949 = vst [vmem:[#allocation3 + $0xc0] sm:$0xff] %v1896_v53  ;;  %20254 = vmatprep.mubr.bf16.mxu1 %v1896_v53  ;;  %v2216_v59 = vshll.u32 %v2001_v55, 16  ;;  %v2708_v60 = vrot.slane %v2001_v55, 1  ;;  %v2220_v12 = vshrl.u32 %v2001_v55, 16 }
 0x228   : > { %v1221_v61 = vpop.f32.mrb[102].mxu0 }
 0x229   : > { %v1711_v62 = vadd.f32 %v24078_v44, %v1221_v61  ;;  %v20081_v63 = vpop.f32.mrb[103].mxu0  ;;  %v2218_v2 = vrot.slane %v2216_v59, 1  ;;  %v2709_v3 = vsel %vm2662_vm1, %v2706_v42, %v2708_v60  ;;  %v1816_v4 = vmax.f32 %v1710_v56, 0.0 }
 0x22a   : > { %2842 = vst [vmem:[#allocation7 + $0xb0] sm:$0xff] %v2709_v3 }
 0x22b   : > { %v1817_v5 = vmax.f32 %v1711_v62, 0.0  ;;  %v2219_v6 = vsel %vm2031_vm2, %v2214_v1, %v2218_v2  ;;  %v2222_v19 = vor.u32 %v2220_v12, %v2218_v2 }
 0x22c   : > { %2526 = vst [vmem:[#allocation6 + $0xb0] sm:$0xff] %v2219_v6 }
 0x22d   : > { %v1897_v7 = vpack.c.bf16 %v1817_v5, %v1816_v4 }
 0x22e   : > { %v1226_v8 = vpop.f32.mrb[104].mxu0  ;;  %v2002_v9 = vld [vmem:[#allocation3 + $0xc0] sm:$0xff] }
 0x22f   : > { %v1712_v10 = vadd.f32 %v24078_v44, %v1226_v8  ;;  %v20084_v11 = vpop.f32.mrb[105].mxu0  ;;  %1950 = vst [vmem:[#allocation3 + $0xc8] sm:$0xff] %v1897_v7  ;;  %20255 = vmatmul.mubr.bf16.gmra.mrb[48].mxu1 %v1897_v7  ;;  %v2224_v13 = vshll.u32 %v2002_v9, 16  ;;  %v2710_v14 = vrot.slane %v2002_v9, 1  ;;  %v2228_v33 = vshrl.u32 %v2002_v9, 16 }
 0x230   : > { %v1229_v15 = vpop.f32.mrb[106].mxu0 }
 0x231   : > { %v1713_v16 = vadd.f32 %v24078_v44, %v1229_v15  ;;  %v20085_v17 = vpop.f32.mrb[107].mxu0  ;;  %v2226_v20 = vrot.slane %v2224_v13, 1  ;;  %v2711_v22 = vsel %vm2662_vm1, %v2708_v60, %v2710_v14  ;;  %v1818_v23 = vmax.f32 %v1712_v10, 0.0  ;;  %v23014_v13 = vld [vmem:[%s26597_s3 + $0x70] sm:$0xff]  }
 0x232   : > { %2843 = vst [vmem:[#allocation7 + $0xb8] sm:$0xff] %v2711_v22  ;;  %20314 = vmatprep.subr.bf16.mxu1 %v23014_v13 }
 0x233   : > { %v1819_v24 = vmax.f32 %v1713_v16, 0.0  ;;  %v2227_v26 = vsel %vm2031_vm2, %v2222_v19, %v2226_v20  ;;  %v2230_v41 = vor.u32 %v2228_v33, %v2226_v20  ;;  %20315 = vmatpush3.bf16.msra.mxu1 %v23014_v13 }
 0x234   : > { %2527 = vst [vmem:[#allocation6 + $0xb8] sm:$0xff] %v2227_v26 }
 0x235   : > { %v1898_v27 = vpack.c.bf16 %v1819_v24, %v1818_v23 }
 0x236   : > { %v1234_v29 = vpop.f32.mrb[108].mxu0  ;;  %v2003_v30 = vld [vmem:[#allocation3 + $0xc8] sm:$0xff] }
 0x237   : > { %v1714_v31 = vadd.f32 %v24078_v44, %v1234_v29  ;;  %v20088_v32 = vpop.f32.mrb[109].mxu0  ;;  %1951 = vst [vmem:[#allocation3 + $0xd0] sm:$0xff] %v1898_v27  ;;  %20258 = vmatprep.mubr.bf16.mxu1 %v1898_v27  ;;  %v2232_v35 = vshll.u32 %v2003_v30, 16  ;;  %v2712_v36 = vrot.slane %v2003_v30, 1  ;;  %v2236_v53 = vshrl.u32 %v2003_v30, 16 }
 0x238   : > { %v1237_v37 = vpop.f32.mrb[110].mxu0 }
 0x239   : > { %v1715_v39 = vadd.f32 %v24078_v44, %v1237_v37  ;;  %v20089_v40 = vpop.f32.mrb[111].mxu0  ;;  %v2234_v42 = vrot.slane %v2232_v35, 1  ;;  %v2713_v43 = vsel %vm2662_vm1, %v2710_v14, %v2712_v36  ;;  %v1820_v45 = vmax.f32 %v1714_v31, 0.0 }
 0x23a   : > { %2844 = vst [vmem:[#allocation7 + $0xc0] sm:$0xff] %v2713_v43 }
 0x23b   : > { %v1821_v46 = vmax.f32 %v1715_v39, 0.0  ;;  %v2235_v47 = vsel %vm2031_vm2, %v2230_v41, %v2234_v42  ;;  %v2238_v59 = vor.u32 %v2236_v53, %v2234_v42 }
 0x23c   : > { %2528 = vst [vmem:[#allocation6 + $0xc0] sm:$0xff] %v2235_v47 }
 0x23d   : > { %v1899_v48 = vpack.c.bf16 %v1821_v46, %v1820_v45 }
 0x23e   : > { %v1242_v49 = vpop.f32.mrb[112].mxu0  ;;  %v2004_v50 = vld [vmem:[#allocation3 + $0xd0] sm:$0xff] }
 0x23f   : > { %v1716_v51 = vadd.f32 %v24078_v44, %v1242_v49  ;;  %v20092_v52 = vpop.f32.mrb[113].mxu0  ;;  %1952 = vst [vmem:[#allocation3 + $0xd8] sm:$0xff] %v1899_v48  ;;  %20259 = vmatmul.mubr.bf16.gmra.mrb[52].mxu1 %v1899_v48  ;;  %v2240_v54 = vshll.u32 %v2004_v50, 16  ;;  %v2714_v55 = vrot.slane %v2004_v50, 1  ;;  %v2244_v7 = vshrl.u32 %v2004_v50, 16 }
 0x240   : > { %v1245_v56 = vpop.f32.mrb[114].mxu0 }
 0x241   : > { %v1717_v57 = vadd.f32 %v24078_v44, %v1245_v56  ;;  %v20093_v58 = vpop.f32.mrb[115].mxu0  ;;  %v2242_v60 = vrot.slane %v2240_v54, 1  ;;  %v2715_v61 = vsel %vm2662_vm1, %v2712_v36, %v2714_v55  ;;  %v1822_v62 = vmax.f32 %v1716_v51, 0.0 }
 0x242   : > { %2845 = vst [vmem:[#allocation7 + $0xc8] sm:$0xff] %v2715_v61 }
 0x243   : > { %v1823_v63 = vmax.f32 %v1717_v57, 0.0  ;;  %v2243_v1 = vsel %vm2031_vm2, %v2238_v59, %v2242_v60  ;;  %v2246_v14 = vor.u32 %v2244_v7, %v2242_v60  ;;  %v23015_v7 = vld [vmem:[%s26597_s3 + $0x78] sm:$0xff]  }
 0x244   : > { %2529 = vst [vmem:[#allocation6 + $0xc8] sm:$0xff] %v2243_v1  ;;  %20316 = vmatprep.subr.bf16.mxu1 %v23015_v7 }
 0x245   : > { %v1900_v2 = vpack.c.bf16 %v1823_v63, %v1822_v62  ;;  %20317 = vmatpush3.bf16.msra.mxu1 %v23015_v7 }
 0x246   : > { %v1250_v3 = vpop.f32.mrb[116].mxu0  ;;  %v2005_v4 = vld [vmem:[#allocation3 + $0xd8] sm:$0xff] }
 0x247   : > { %v1718_v5 = vadd.f32 %v24078_v44, %v1250_v3  ;;  %v20096_v6 = vpop.f32.mrb[117].mxu0  ;;  %1953 = vst [vmem:[#allocation3 + $0xe0] sm:$0xff] %v1900_v2  ;;  %20262 = vmatprep.mubr.bf16.mxu1 %v1900_v2  ;;  %v2248_v8 = vshll.u32 %v2005_v4, 16  ;;  %v2716_v9 = vrot.slane %v2005_v4, 1  ;;  %v2252_v26 = vshrl.u32 %v2005_v4, 16 }
 0x248   : > { %v1253_v10 = vpop.f32.mrb[118].mxu0 }
 0x249   : > { %v1719_v11 = vadd.f32 %v24078_v44, %v1253_v10  ;;  %v20097_v12 = vpop.f32.mrb[119].mxu0  ;;  %v2250_v15 = vrot.slane %v2248_v8, 1  ;;  %v2717_v16 = vsel %vm2662_vm1, %v2714_v55, %v2716_v9  ;;  %v1824_v17 = vmax.f32 %v1718_v5, 0.0 }
 0x24a   : > { %2846 = vst [vmem:[#allocation7 + $0xd0] sm:$0xff] %v2717_v16 }
 0x24b   : > { %v1825_v18 = vmax.f32 %v1719_v11, 0.0  ;;  %v24124_v19 = vsel %vm2031_vm2, %v2246_v14, %v2250_v15  ;;  %v2254_v33 = vor.u32 %v2252_v26, %v2250_v15 }
 0x24c   : > { %2530 = vst [vmem:[#allocation6 + $0xd0] sm:$0xff] %v24124_v19 }
 0x24d   : > { %v1901_v20 = vpack.c.bf16 %v1825_v18, %v1824_v17 }
 0x24e   : > { %v1258_v22 = vpop.f32.mrb[120].mxu0  ;;  %v2006_v23 = vld [vmem:[#allocation3 + $0xe0] sm:$0xff] }
 0x24f   : > { %v1720_v24 = vadd.f32 %v24078_v44, %v1258_v22  ;;  %v20100_v25 = vpop.f32.mrb[121].mxu0  ;;  %1954 = vst [vmem:[#allocation3 + $0xe8] sm:$0xff] %v1901_v20  ;;  %20263 = vmatmul.mubr.bf16.gmra.mrb[56].mxu1 %v1901_v20  ;;  %v2256_v27 = vshll.u32 %v2006_v23, 16  ;;  %v2718_v29 = vrot.slane %v2006_v23, 1  ;;  %v2260_v47 = vshrl.u32 %v2006_v23, 16  ;;  %v24155_v20 = vld [vmem:[%s26597_s3 + $0x80] sm:$0xff]  }
 0x250   : > { %v1261_v30 = vpop.f32.mrb[122].mxu0  ;;  %20414 = vmatprep.subr.bf16.mxu1 %v24155_v20 }
 0x251   : > { %v1721_v31 = vadd.f32 %v24078_v44, %v1261_v30  ;;  %v20101_v32 = vpop.f32.mrb[123].mxu0  ;;  %v2258_v35 = vrot.slane %v2256_v27, 1  ;;  %v2719_v36 = vsel %vm2662_vm1, %v2716_v9, %v2718_v29  ;;  %v1826_v37 = vmax.f32 %v1720_v24, 0.0 }
 0x252   : > { %2847 = vst [vmem:[#allocation7 + $0xd8] sm:$0xff] %v2719_v36 }
 0x253   : > { %v1827_v39 = vmax.f32 %v1721_v31, 0.0  ;;  %v24131_v40 = vsel %vm2031_vm2, %v2254_v33, %v2258_v35  ;;  %v2262_v53 = vor.u32 %v2260_v47, %v2258_v35 }
 0x254   : > { %2531 = vst [vmem:[#allocation6 + $0xd8] sm:$0xff] %v24131_v40 }
 0x255   : > { %v1902_v41 = vpack.c.bf16 %v1827_v39, %v1826_v37 }
 0x256   : > { %v1266_v42 = vpop.f32.mrb[124].mxu0  ;;  %v2007_v43 = vld [vmem:[#allocation3 + $0xe8] sm:$0xff] }
 0x257   : > { %v1722_v45 = vadd.f32 %v24078_v44, %v1266_v42  ;;  %v20104_v46 = vpop.f32.mrb[125].mxu0  ;;  %1955 = vst [vmem:[#allocation3 + $0xf0] sm:$0xff] %v1902_v41  ;;  %20266 = vmatprep.mubr.bf16.mxu1 %v1902_v41  ;;  %v2264_v48 = vshll.u32 %v2007_v43, 16  ;;  %v2720_v49 = vrot.slane %v2007_v43, 1  ;;  %v2268_v1 = vshrl.u32 %v2007_v43, 16 }
 0x258   : > { %v1269_v50 = vpop.f32.mrb[126].mxu0 }
 0x259   : > { %v1723_v51 = vadd.f32 %v24078_v44, %v1269_v50  ;;  %v20105_v52 = vpop.f32.mrb[127].mxu0  ;;  %v2266_v54 = vrot.slane %v2264_v48, 1  ;;  %v2721_v55 = vsel %vm2662_vm1, %v2718_v29, %v2720_v49  ;;  %v1828_v56 = vmax.f32 %v1722_v45, 0.0 }
 0x25a   : > { %2848 = vst [vmem:[#allocation7 + $0xe0] sm:$0xff] %v2721_v55 }
 0x25b   : > { %v1829_v57 = vmax.f32 %v1723_v51, 0.0  ;;  %v24138_v58 = vsel %vm2031_vm2, %v2262_v53, %v2266_v54  ;;  %v2270_v8 = vor.u32 %v2268_v1, %v2266_v54 }
 0x25c   : > { %2532 = vst [vmem:[#allocation6 + $0xe0] sm:$0xff] %v24138_v58 }
 0x25d   : > { %v1903_v59 = vpack.c.bf16 %v1829_v57, %v1828_v56 }
 0x25e   : > { %v1274_v60 = vpop.f32.mrb[128].mxu0  ;;  %v2008_v61 = vld [vmem:[#allocation3 + $0xf0] sm:$0xff] }
 0x25f   : > { %v1724_v62 = vadd.f32 %v24078_v44, %v1274_v60  ;;  %v20108_v63 = vpop.f32.mrb[129].mxu0  ;;  %1956 = vst [vmem:[#allocation3 + $0xf8] sm:$0xff] %v1903_v59  ;;  %20267 = vmatmul.mubr.bf16.gmra.mrb[60].mxu1 %v1903_v59  ;;  %v2272_v2 = vshll.u32 %v2008_v61, 16  ;;  %v2722_v3 = vrot.slane %v2008_v61, 1  ;;  %v2276_v22 = vshrl.u32 %v2008_v61, 16 }
 0x260   : > { %v1277_v4 = vpop.f32.mrb[130].mxu0 }
 0x261   : > { %v1725_v5 = vadd.f32 %v24078_v44, %v1277_v4  ;;  %v20109_v6 = vpop.f32.mrb[131].mxu0  ;;  %v2274_v9 = vrot.slane %v2272_v2, 1  ;;  %v2723_v10 = vsel %vm2662_vm1, %v2720_v49, %v2722_v3  ;;  %v1830_v11 = vmax.f32 %v1724_v62, 0.0 }
 0x262   : > { %2849 = vst [vmem:[#allocation7 + $0xe8] sm:$0xff] %v2723_v10 }
 0x263   : > { %v1831_v12 = vmax.f32 %v1725_v5, 0.0  ;;  %v24148_v13 = vsel %vm2031_vm2, %v2270_v8, %v2274_v9  ;;  %v2278_v29 = vor.u32 %v2276_v22, %v2274_v9 }
 0x264   : > { %2533 = vst [vmem:[#allocation6 + $0xe8] sm:$0xff] %v24148_v13 }
 0x265   : > { %v1904_v14 = vpack.c.bf16 %v1831_v12, %v1830_v11 }
 0x266   : > { %v1282_v15 = vpop.f32.mrb[132].mxu0  ;;  %v2009_v16 = vld [vmem:[#allocation3 + $0xf8] sm:$0xff] }
 0x267   : > { %v1726_v17 = vadd.f32 %v24078_v44, %v1282_v15  ;;  %v20112_v18 = vpop.f32.mrb[133].mxu0  ;;  %1957 = vst [vmem:[#allocation3 + $0x100] sm:$0xff] %v1904_v14  ;;  %20270 = vmatprep.mubr.bf16.mxu1 %v1904_v14  ;;  %v2280_v23 = vshll.u32 %v2009_v16, 16  ;;  %v2724_v24 = vrot.slane %v2009_v16, 1  ;;  %v2284_v43 = vshrl.u32 %v2009_v16, 16 }
 0x268   : > { %v1285_v25 = vpop.f32.mrb[134].mxu0 }
 0x269   : > { %v1727_v26 = vadd.f32 %v24078_v44, %v1285_v25  ;;  %v20113_v27 = vpop.f32.mrb[135].mxu0  ;;  %v2282_v30 = vrot.slane %v2280_v23, 1  ;;  %v24160_v31 = vsel %vm2662_vm1, %v2722_v3, %v2724_v24  ;;  %v1832_v32 = vmax.f32 %v1726_v17, 0.0 }
 0x26a   : > { %2850 = vst [vmem:[#allocation7 + $0xf0] sm:$0xff] %v24160_v31 }
 0x26b   : > { %v1833_v33 = vmax.f32 %v1727_v26, 0.0  ;;  %v24164_v35 = vsel %vm2031_vm2, %v2278_v29, %v2282_v30  ;;  %v2286_v50 = vor.u32 %v2284_v43, %v2282_v30 }
 0x26c   : > { %2534 = vst [vmem:[#allocation6 + $0xf0] sm:$0xff] %v24164_v35 }
 0x26d   : > { %v1905_v36 = vpack.c.bf16 %v1833_v33, %v1832_v32 }
 0x26e   : > { %v1290_v37 = vpop.f32.mrb[136].mxu0  ;;  %v2010_v39 = vld [vmem:[#allocation3 + $0x100] sm:$0xff] }
 0x26f   : > { %v1728_v41 = vadd.f32 %v24078_v44, %v1290_v37  ;;  %v20116_v42 = vpop.f32.mrb[137].mxu0  ;;  %1958 = vst [vmem:[#allocation3 + $0x108] sm:$0xff] %v1905_v36  ;;  %20271 = vmatmul.mubr.bf16.gmra.mrb[64].mxu1 %v1905_v36  ;;  %v2288_v45 = vshll.u32 %v2010_v39, 16  ;;  %v2726_v46 = vrot.slane %v2010_v39, 1  ;;  %v2292_v62 = vshrl.u32 %v2010_v39, 16 }
 0x270   : > { %v1293_v47 = vpop.f32.mrb[138].mxu0 }
 0x271   : > { %v1729_v48 = vadd.f32 %v24078_v44, %v1293_v47  ;;  %v20117_v49 = vpop.f32.mrb[139].mxu0  ;;  %v2290_v51 = vrot.slane %v2288_v45, 1  ;;  %v24170_v52 = vsel %vm2662_vm1, %v2724_v24, %v2726_v46  ;;  %v1834_v53 = vmax.f32 %v1728_v41, 0.0 }
 0x272   : > { %2851 = vst [vmem:[#allocation7 + $0xf8] sm:$0xff] %v24170_v52 }
 0x273   : > { %v1835_v54 = vmax.f32 %v1729_v48, 0.0  ;;  %v24174_v55 = vsel %vm2031_vm2, %v2286_v50, %v2290_v51  ;;  %v2294_v5 = vor.u32 %v2292_v62, %v2290_v51 }
 0x274   : > { %2535 = vst [vmem:[#allocation6 + $0xf8] sm:$0xff] %v24174_v55 }
 0x275   : > { %v1906_v56 = vpack.c.bf16 %v1835_v54, %v1834_v53 }
 0x276   : > { %v1298_v57 = vpop.f32.mrb[140].mxu0  ;;  %v2011_v59 = vld [vmem:[#allocation3 + $0x108] sm:$0xff] }
 0x277   : > { %v1730_v60 = vadd.f32 %v24078_v44, %v1298_v57  ;;  %v20120_v61 = vpop.f32.mrb[141].mxu0  ;;  %1959 = vst [vmem:[#allocation3 + $0x110] sm:$0xff] %v1906_v56  ;;  %20274 = vmatprep.mubr.bf16.mxu1 %v1906_v56  ;;  %v2296_v63 = vshll.u32 %v2011_v59, 16  ;;  %v2728_v1 = vrot.slane %v2011_v59, 1  ;;  %v2300_v17 = vshrl.u32 %v2011_v59, 16 }
 0x278   : > { %v1301_v2 = vpop.f32.mrb[142].mxu0 }
 0x279   : > { %v1731_v3 = vadd.f32 %v24078_v44, %v1301_v2  ;;  %v20121_v4 = vpop.f32.mrb[143].mxu0  ;;  %v2298_v6 = vrot.slane %v2296_v63, 1  ;;  %v24180_v7 = vsel %vm2662_vm1, %v2726_v46, %v2728_v1  ;;  %v1836_v8 = vmax.f32 %v1730_v60, 0.0 }
 0x27a   : > { %2852 = vst [vmem:[#allocation7 + $0x100] sm:$0xff] %v24180_v7 }
 0x27b   : > { %v1837_v9 = vmax.f32 %v1731_v3, 0.0  ;;  %v24184_v10 = vsel %vm2031_vm2, %v2294_v5, %v2298_v6  ;;  %v2302_v26 = vor.u32 %v2300_v17, %v2298_v6 }
 0x27c   : > { %2536 = vst [vmem:[#allocation6 + $0x100] sm:$0xff] %v24184_v10 }
 0x27d   : > { %v1907_v11 = vpack.c.bf16 %v1837_v9, %v1836_v8 }
 0x27e   : > { %v1306_v12 = vpop.f32.mrb[144].mxu0  ;;  %v2012_v14 = vld [vmem:[#allocation3 + $0x110] sm:$0xff] }
 0x27f   : > { %v1732_v15 = vadd.f32 %v24078_v44, %v1306_v12  ;;  %v20124_v16 = vpop.f32.mrb[145].mxu0  ;;  %1960 = vst [vmem:[#allocation3 + $0x118] sm:$0xff] %v1907_v11  ;;  %20275 = vmatmul.mubr.bf16.gmra.mrb[68].mxu1 %v1907_v11  ;;  %v2304_v18 = vshll.u32 %v2012_v14, 16  ;;  %v2730_v22 = vrot.slane %v2012_v14, 1  ;;  %v2308_v43 = vshrl.u32 %v2012_v14, 16 }
 0x280   : > { %v1309_v23 = vpop.f32.mrb[146].mxu0 }
 0x281   : > { %v1733_v24 = vadd.f32 %v24078_v44, %v1309_v23  ;;  %v20125_v25 = vpop.f32.mrb[147].mxu0  ;;  %v2306_v27 = vrot.slane %v2304_v18, 1  ;;  %v24190_v29 = vsel %vm2662_vm1, %v2728_v1, %v2730_v22  ;;  %v1838_v30 = vmax.f32 %v1732_v15, 0.0 }
 0x282   : > { %2853 = vst [vmem:[#allocation7 + $0x108] sm:$0xff] %v24190_v29 }
 0x283   : > { %v1839_v32 = vmax.f32 %v1733_v24, 0.0  ;;  %v24194_v33 = vsel %vm2031_vm2, %v2302_v26, %v2306_v27  ;;  %v2310_v50 = vor.u32 %v2308_v43, %v2306_v27 }
 0x284   : > { %2537 = vst [vmem:[#allocation6 + $0x108] sm:$0xff] %v24194_v33 }
 0x285   : > { %v1908_v36 = vpack.c.bf16 %v1839_v32, %v1838_v30 }
 0x286   : > { %v1314_v37 = vpop.f32.mrb[148].mxu0  ;;  %v2013_v39 = vld [vmem:[#allocation3 + $0x118] sm:$0xff] }
 0x287   : > { %v1734_v41 = vadd.f32 %v24078_v44, %v1314_v37  ;;  %v20128_v42 = vpop.f32.mrb[149].mxu0  ;;  %1961 = vst [vmem:[#allocation3 + $0x120] sm:$0xff] %v1908_v36  ;;  %20278 = vmatprep.mubr.bf16.mxu1 %v1908_v36  ;;  %v2312_v45 = vshll.u32 %v2013_v39, 16  ;;  %v2732_v46 = vrot.slane %v2013_v39, 1  ;;  %v2316_v1 = vshrl.u32 %v2013_v39, 16 }
 0x288   : > { %v1317_v47 = vpop.f32.mrb[150].mxu0 }
 0x289   : > { %v1735_v48 = vadd.f32 %v24078_v44, %v1317_v47  ;;  %v20129_v49 = vpop.f32.mrb[151].mxu0  ;;  %v2314_v51 = vrot.slane %v2312_v45, 1  ;;  %v24200_v53 = vsel %vm2662_vm1, %v2730_v22, %v2732_v46  ;;  %v1840_v54 = vmax.f32 %v1734_v41, 0.0 }
 0x28a   : > { %2854 = vst [vmem:[#allocation7 + $0x110] sm:$0xff] %v24200_v53 }
 0x28b   : > { %v1841_v56 = vmax.f32 %v1735_v48, 0.0  ;;  %v24204_v57 = vsel %vm2031_vm2, %v2310_v50, %v2314_v51  ;;  %v2318_v8 = vor.u32 %v2316_v1, %v2314_v51 }
 0x28c   : > { %2538 = vst [vmem:[#allocation6 + $0x110] sm:$0xff] %v24204_v57 }
 0x28d   : > { %v1909_v59 = vpack.c.bf16 %v1841_v56, %v1840_v54 }
 0x28e   : > { %v1322_v60 = vpop.f32.mrb[152].mxu0  ;;  %v2014_v61 = vld [vmem:[#allocation3 + $0x120] sm:$0xff] }
 0x28f   : > { %v1736_v62 = vadd.f32 %v24078_v44, %v1322_v60  ;;  %v20132_v63 = vpop.f32.mrb[153].mxu0  ;;  %1962 = vst [vmem:[#allocation3 + $0x128] sm:$0xff] %v1909_v59  ;;  %20279 = vmatmul.mubr.bf16.gmra.mrb[72].mxu1 %v1909_v59  ;;  %v2320_v2 = vshll.u32 %v2014_v61, 16  ;;  %v2734_v3 = vrot.slane %v2014_v61, 1  ;;  %v2324_v24 = vshrl.u32 %v2014_v61, 16 }
 0x290   : > { %v1325_v4 = vpop.f32.mrb[154].mxu0 }
 0x291   : > { %v1737_v5 = vadd.f32 %v24078_v44, %v1325_v4  ;;  %v20133_v6 = vpop.f32.mrb[155].mxu0  ;;  %v2322_v9 = vrot.slane %v2320_v2, 1  ;;  %v24210_v11 = vsel %vm2662_vm1, %v2732_v46, %v2734_v3  ;;  %v1842_v12 = vmax.f32 %v1736_v62, 0.0 }
 0x292   : > { %2855 = vst [vmem:[#allocation7 + $0x118] sm:$0xff] %v24210_v11 }
 0x293   : > { %v1843_v14 = vmax.f32 %v1737_v5, 0.0  ;;  %v24214_v15 = vsel %vm2031_vm2, %v2318_v8, %v2322_v9  ;;  %v2326_v36 = vor.u32 %v2324_v24, %v2322_v9 }
 0x294   : > { %2539 = vst [vmem:[#allocation6 + $0x118] sm:$0xff] %v24214_v15 }
 0x295   : > { %v1910_v16 = vpack.c.bf16 %v1843_v14, %v1842_v12 }
 0x296   : > { %v1330_v17 = vpop.f32.mrb[156].mxu0  ;;  %v2015_v18 = vld [vmem:[#allocation3 + $0x128] sm:$0xff] }
 0x297   : > { %v1738_v22 = vadd.f32 %v24078_v44, %v1330_v17  ;;  %v20136_v23 = vpop.f32.mrb[157].mxu0  ;;  %1963 = vst [vmem:[#allocation3 + $0x130] sm:$0xff] %v1910_v16  ;;  %20282 = vmatprep.mubr.bf16.mxu1 %v1910_v16  ;;  %v2328_v25 = vshll.u32 %v2015_v18, 16  ;;  %v2736_v26 = vrot.slane %v2015_v18, 1  ;;  %v2332_v50 = vshrl.u32 %v2015_v18, 16 }
 0x298   : > { %v1333_v27 = vpop.f32.mrb[158].mxu0 }
 0x299   : > { %v1739_v30 = vadd.f32 %v24078_v44, %v1333_v27  ;;  %v20137_v32 = vpop.f32.mrb[159].mxu0  ;;  %v2330_v37 = vrot.slane %v2328_v25, 1  ;;  %v24220_v39 = vsel %vm2662_vm1, %v2734_v3, %v2736_v26  ;;  %v1844_v41 = vmax.f32 %v1738_v22, 0.0 }
 0x29a   : > { %2856 = vst [vmem:[#allocation7 + $0x120] sm:$0xff] %v24220_v39 }
 0x29b   : > { %v1845_v42 = vmax.f32 %v1739_v30, 0.0  ;;  %v24224_v43 = vsel %vm2031_vm2, %v2326_v36, %v2330_v37  ;;  %v2334_v61 = vor.u32 %v2332_v50, %v2330_v37 }
 0x29c   : > { %2540 = vst [vmem:[#allocation6 + $0x120] sm:$0xff] %v24224_v43 }
 0x29d   : > { %v1911_v45 = vpack.c.bf16 %v1845_v42, %v1844_v41 }
 0x29e   : > { %v1338_v46 = vpop.f32.mrb[160].mxu0  ;;  %v2016_v47 = vld [vmem:[#allocation3 + $0x130] sm:$0xff] }
 0x29f   : > { %v1740_v48 = vadd.f32 %v24078_v44, %v1338_v46  ;;  %v20140_v49 = vpop.f32.mrb[161].mxu0  ;;  %1964 = vst [vmem:[#allocation3 + $0x138] sm:$0xff] %v1911_v45  ;;  %20283 = vmatmul.mubr.bf16.gmra.mrb[76].mxu1 %v1911_v45  ;;  %v2336_v51 = vshll.u32 %v2016_v47, 16  ;;  %v2738_v54 = vrot.slane %v2016_v47, 1  ;;  %v2340_v12 = vshrl.u32 %v2016_v47, 16 }
 0x2a0   : > { %v1341_v56 = vpop.f32.mrb[162].mxu0 }
 0x2a1   : > { %v1741_v59 = vadd.f32 %v24078_v44, %v1341_v56  ;;  %v20141_v60 = vpop.f32.mrb[163].mxu0  ;;  %v2338_v62 = vrot.slane %v2336_v51, 1  ;;  %v24230_v63 = vsel %vm2662_vm1, %v2736_v26, %v2738_v54  ;;  %v1846_v1 = vmax.f32 %v1740_v48, 0.0 }
 0x2a2   : > { %2857 = vst [vmem:[#allocation7 + $0x128] sm:$0xff] %v24230_v63 }
 0x2a3   : > { %v1847_v2 = vmax.f32 %v1741_v59, 0.0  ;;  %v24234_v3 = vsel %vm2031_vm2, %v2334_v61, %v2338_v62  ;;  %v2342_v24 = vor.u32 %v2340_v12, %v2338_v62 }
 0x2a4   : > { %2541 = vst [vmem:[#allocation6 + $0x128] sm:$0xff] %v24234_v3 }
 0x2a5   : > { %v1912_v4 = vpack.c.bf16 %v1847_v2, %v1846_v1 }
 0x2a6   : > { %v1346_v5 = vpop.f32.mrb[164].mxu0  ;;  %v2017_v6 = vld [vmem:[#allocation3 + $0x138] sm:$0xff] }
 0x2a7   : > { %v1742_v8 = vadd.f32 %v24078_v44, %v1346_v5  ;;  %v20144_v9 = vpop.f32.mrb[165].mxu0  ;;  %1965 = vst [vmem:[#allocation3 + $0x140] sm:$0xff] %v1912_v4  ;;  %20286 = vmatprep.mubr.bf16.mxu1 %v1912_v4  ;;  %v2344_v14 = vshll.u32 %v2017_v6, 16  ;;  %v2352_v16 = vshll.u32 %v1912_v4, 16  ;;  %v2740_v18 = vrot.slane %v2017_v6, 1 }
 0x2a8   : > { %v1349_v17 = vpop.f32.mrb[166].mxu0  ;;  %v2348_v26 = vshrl.u32 %v2017_v6, 16  ;;  %v2356_v50 = vshrl.u32 %v1912_v4, 16 }
 0x2a9   : > { %v1743_v22 = vadd.f32 %v24078_v44, %v1349_v17  ;;  %v20145_v23 = vpop.f32.mrb[167].mxu0  ;;  %v2346_v25 = vrot.slane %v2344_v14, 1  ;;  %v1848_v27 = vmax.f32 %v1742_v8, 0.0  ;;  %v24240_v30 = vsel %vm2662_vm1, %v2738_v54, %v2740_v18 }
 0x2aa   : > { %v2354_v41 = vrot.slane %v2352_v16, 1  ;;  %2858 = vst [vmem:[#allocation7 + $0x130] sm:$0xff] %v24240_v30 }
 0x2ab   : > { %v1849_v32 = vmax.f32 %v1743_v22, 0.0  ;;  %v24243_v36 = vsel %vm2031_vm2, %v2342_v24, %v2346_v25  ;;  %v2350_v37 = vor.u32 %v2348_v26, %v2346_v25 }
 0x2ac   : > { %2542 = vst [vmem:[#allocation6 + $0x130] sm:$0xff] %v24243_v36  ;;  %v2358_v61 = vor.u32 %v2356_v50, %v2354_v41 }
 0x2ad   : > { %v1913_v42 = vpack.c.bf16 %v1849_v32, %v1848_v27  ;;  %v24248_v45 = vsel %vm2031_vm2, %v2350_v37, %v2354_v41 }
 0x2ae   : > { %v1354_v46 = vpop.f32.mrb[168].mxu0  ;;  %2543 = vst [vmem:[#allocation6 + $0x138] sm:$0xff] %v24248_v45  ;;  %v24251_v47 = vld [vmem:[#allocation3 + $0x140] sm:$0xff] }
 0x2af   : > { %v1744_v48 = vadd.f32 %v24078_v44, %v1354_v46  ;;  %v20148_v49 = vpop.f32.mrb[169].mxu0  ;;  %1966 = vst [vmem:[#allocation3 + $0x148] sm:$0xff] %v1913_v42  ;;  %20287 = vmatmul.mubr.bf16.gmra.mrb[80].mxu1 %v1913_v42  ;;  %v2360_v51 = vshll.u32 %v1913_v42, 16  ;;  %v2742_v54 = vrot.slane %v24251_v47, 1  ;;  %v2364_v16 = vshrl.u32 %v1913_v42, 16 }
 0x2b0   : > { %v1357_v56 = vpop.f32.mrb[170].mxu0 }
 0x2b1   : > { %v1745_v59 = vadd.f32 %v24078_v44, %v1357_v56  ;;  %v20149_v60 = vpop.f32.mrb[171].mxu0  ;;  %v2362_v62 = vrot.slane %v2360_v51, 1  ;;  %v24257_v1 = vsel %vm2662_vm1, %v2740_v18, %v2742_v54  ;;  %v1850_v2 = vmax.f32 %v1744_v48, 0.0 }
 0x2b2   : > { %2859 = vst [vmem:[#allocation7 + $0x138] sm:$0xff] %v24257_v1 }
 0x2b3   : > { %v1851_v5 = vmax.f32 %v1745_v59, 0.0  ;;  %v24261_v6 = vsel %vm2031_vm2, %v2358_v61, %v2362_v62  ;;  %v2366_v25 = vor.u32 %v2364_v16, %v2362_v62 }
 0x2b4   : > { %2544 = vst [vmem:[#allocation6 + $0x140] sm:$0xff] %v24261_v6 }
 0x2b5   : > { %v1914_v4 = vpack.c.bf16 %v1851_v5, %v1850_v2 }
 0x2b6   : > { %v1362_v8 = vpop.f32.mrb[172].mxu0  ;;  %v24264_v9 = vld [vmem:[#allocation3 + $0x148] sm:$0xff] }
 0x2b7   : > { %v1746_v12 = vadd.f32 %v24078_v44, %v1362_v8  ;;  %v20152_v14 = vpop.f32.mrb[173].mxu0  ;;  %1967 = vst [vmem:[#allocation3 + $0x150] sm:$0xff] %v1914_v4  ;;  %20290 = vmatprep.mubr.bf16.mxu1 %v1914_v4  ;;  %v2368_v17 = vshll.u32 %v1914_v4, 16  ;;  %v2744_v18 = vrot.slane %v24264_v9, 1  ;;  %v2372_v51 = vshrl.u32 %v1914_v4, 16 }
 0x2b8   : > { %v1365_v22 = vpop.f32.mrb[174].mxu0 }
 0x2b9   : > { %v1747_v23 = vadd.f32 %v24078_v44, %v1365_v22  ;;  %v20153_v24 = vpop.f32.mrb[175].mxu0  ;;  %v2370_v26 = vrot.slane %v2368_v17, 1  ;;  %v24270_v27 = vsel %vm2662_vm1, %v2742_v54, %v2744_v18  ;;  %v1852_v32 = vmax.f32 %v1746_v12, 0.0 }
 0x2ba   : > { %2860 = vst [vmem:[#allocation7 + $0x140] sm:$0xff] %v24270_v27 }
 0x2bb   : > { %v1853_v37 = vmax.f32 %v1747_v23, 0.0  ;;  %v24274_v41 = vsel %vm2031_vm2, %v2366_v25, %v2370_v26  ;;  %v2374_v62 = vor.u32 %v2372_v51, %v2370_v26 }
 0x2bc   : > { %2545 = vst [vmem:[#allocation6 + $0x148] sm:$0xff] %v24274_v41 }
 0x2bd   : > { %v1915_v42 = vpack.c.bf16 %v1853_v37, %v1852_v32  ;;  %v24297_v32 = vld [vmem:[%s26596_s2] ss:$0 sm:$0xff] }
 0x2be   : > { %v1370_v46 = vpop.f32.mrb[176].mxu0  ;;  %v24277_v48 = vld [vmem:[#allocation3 + $0x150] sm:$0xff] }
 0x2bf   : > { %26712 = vst [vmem:[#allocation26_spill] sm:$0xff] %v24277_v48  ;;  %v1748_v49 = vadd.f32 %v24078_v44, %v1370_v46  ;;  %v20156_v50 = vpop.f32.mrb[177].mxu0  ;;  %1968 = vst [vmem:[#allocation3 + $0x158] sm:$0xff] %v1915_v42  ;;  %20291 = vmatmul.mubr.bf16.gmra.mrb[84].mxu1 %v1915_v42  ;;  %v2376_v54 = vshll.u32 %v1915_v42, 16  ;;  %v2746_v56 = vrot.slane %v24277_v48, 1 }
 0x2c0   : > { %v1373_v59 = vpop.f32.mrb[178].mxu0 }
 0x2c1   : > { %v1749_v60 = vadd.f32 %v24078_v44, %v1373_v59  ;;  %v20157_v61 = vpop.f32.mrb[179].mxu0  ;;  %v2378_v2 = vrot.slane %v2376_v54, 1  ;;  %v24283_v5 = vsel %vm2662_vm1, %v2744_v18, %v2746_v56  ;;  %v1854_v8 = vmax.f32 %v1748_v49, 0.0 }
 0x2c2   : > { %2861 = vst [vmem:[#allocation7 + $0x148] sm:$0xff] %v24283_v5  ;;  %v2380_v18 = vshrl.u32 %v1915_v42, 16 }
 0x2c3   : > { %v1855_v12 = vmax.f32 %v1749_v60, 0.0  ;;  %v24287_v14 = vsel %vm2031_vm2, %v2374_v62, %v2378_v2 }
 0x2c4   : > { %2546 = vst [vmem:[#allocation6 + $0x150] sm:$0xff] %v24287_v14  ;;  %v2382_v49 = vor.u32 %v2380_v18, %v2378_v2  ;;  %v1978_v18 = vld [vmem:[#allocation3] sm:$0xff] }
 0x2c5   : > { %v1916_v4 = vpack.c.bf16 %v1855_v12, %v1854_v8 }
 0x2c6   : > { %v1378_v16 = vpop.f32.mrb[180].mxu0  ;;  %v24290_v17 = vld [vmem:[#allocation3 + $0x158] sm:$0xff] }
 0x2c7   : > { %26713 = vst [vmem:[#allocation27_spill] sm:$0xff] %v24290_v17  ;;  %v1750_v22 = vadd.f32 %v24078_v44, %v1378_v16  ;;  %v20160_v23 = vpop.f32.mrb[181].mxu0  ;;  %1969 = vst [vmem:[#allocation3 + $0x160] sm:$0xff] %v1916_v4  ;;  %20294 = vmatprep.mubr.bf16.mxu1 %v1916_v4  ;;  %v2384_v24 = vshll.u32 %v1916_v4, 16  ;;  %v2748_v25 = vrot.slane %v24290_v17, 1  ;;  %v2033_v17 = vshrl.u32 %v1978_v18, 16 }
 0x2c8   : > { %v1381_v26 = vpop.f32.mrb[182].mxu0 }
 0x2c9   : > { %v1751_v37 = vadd.f32 %v24297_v32, %v1381_v26  ;;  %v20161_v46 = vpop.f32.mrb[183].mxu0  ;;  %v2386_v50 = vrot.slane %v2384_v24, 1  ;;  %v24301_v44 = vsel %vm2662_vm1, %v2746_v56, %v2748_v25  ;;  %v1856_v42 = vmax.f32 %v1750_v22, 0.0 }
 0x2ca   : > { %2862 = vst [vmem:[#allocation7 + $0x150] sm:$0xff] %v24301_v44  ;;  %v2388_v56 = vshrl.u32 %v1916_v4, 16  ;;  %v2035_v4 = vshll.u32 %v1978_v18, 16 }
 0x2cb   : > { %v1857_v51 = vmax.f32 %v1751_v37, 0.0  ;;  %v24305_v54 = vsel %vm2031_vm2, %v2382_v49, %v2386_v50 }
 0x2cc   : > { %2547 = vst [vmem:[#allocation6 + $0x158] sm:$0xff] %v24305_v54  ;;  %v2390_v24 = vor.u32 %v2388_v56, %v2386_v50 }
 0x2cd   : > { %v1917_v59 = vpack.c.bf16 %v1857_v51, %v1856_v42 }
 0x2ce   : > { %v1386_v60 = vpop.f32.mrb[184].mxu0  ;;  %v24308_v61 = vld [vmem:[#allocation3 + $0x160] sm:$0xff] }
 0x2cf   : > { %26714 = vst [vmem:[#allocation28_spill] sm:$0xff] %v24308_v61  ;;  %v1752_v62 = vadd.f32 %v24297_v32, %v1386_v60  ;;  %v20164_v2 = vpop.f32.mrb[185].mxu0  ;;  %1970 = vst [vmem:[#allocation3 + $0x168] sm:$0xff] %v1917_v59  ;;  %20295 = vmatmul.mubr.bf16.gmra.mrb[88].mxu1 %v1917_v59  ;;  %v2392_v8 = vshll.u32 %v1917_v59, 16  ;;  %v2750_v12 = vrot.slane %v24308_v61, 1  ;;  %v2396_v56 = vshrl.u32 %v1917_v59, 16 }
 0x2d0   : > { %v1389_v16 = vpop.f32.mrb[186].mxu0  ;;  %v23289_v2 = vld [vmem:[#allocation3 + $0x8] sm:$0xff] }
 0x2d1   : > { %v1753_v22 = vadd.f32 %v24297_v32, %v1389_v16  ;;  %v20165_v23 = vpop.f32.mrb[187].mxu0  ;;  %v2394_v26 = vrot.slane %v2392_v8, 1  ;;  %v24314_v37 = vsel %vm2662_vm1, %v2748_v25, %v2750_v12  ;;  %v1858_v46 = vmax.f32 %v1752_v62, 0.0 }
 0x2d2   : > { %2863 = vst [vmem:[#allocation7 + $0x158] sm:$0xff] %v24314_v37  ;;  %v2040_v16 = vshll.u32 %v23289_v2, 16 }
 0x2d3   : > { %v1859_v49 = vmax.f32 %v1753_v22, 0.0  ;;  %v24318_v42 = vsel %vm2031_vm2, %v2390_v24, %v2394_v26  ;;  %v2037_v24 = vrot.slane %v2035_v4, 1 }
 0x2d4   : > { %2548 = vst [vmem:[#allocation6 + $0x160] sm:$0xff] %v24318_v42  ;;  %v2042_v48 = vrot.slane %v2040_v16, 1 }
 0x2d5   : > { %v1918_v51 = vpack.c.bf16 %v1859_v49, %v1858_v46  ;;  %v2398_v46 = vor.u32 %v2396_v56, %v2394_v26 }
 0x2d6   : > { %v1394_v60 = vpop.f32.mrb[188].mxu0  ;;  %v24321_v23 = vld [vmem:[#allocation3 + $0x168] sm:$0xff] }
 0x2d7   : > { %26715 = vst [vmem:[#allocation29_spill] sm:$0xff] %v24321_v23  ;;  %v1754_v50 = vadd.f32 %v24297_v32, %v1394_v60  ;;  %v20168_v25 = vpop.f32.mrb[189].mxu0  ;;  %1971 = vst [vmem:[#allocation3 + $0x170] sm:$0xff] %v1918_v51  ;;  %20298 = vmatprep.mubr.bf16.mxu1 %v1918_v51  ;;  %v2400_v62 = vshll.u32 %v1918_v51, 16  ;;  %v2752_v8 = vrot.slane %v24321_v23, 1  ;;  %v2038_v23 = vor.u32 %v2037_v24, %v2033_v17 }
 0x2d8   : > { %v1397_v22 = vpop.f32.mrb[190].mxu0 }
 0x2d9   : > { %v1755_v0 = vadd.f32 %v24297_v32, %v1397_v22  ;;  %v20169_v28 = vpop.f32.mrb[191].mxu0  ;;  %v2402_v49 = vrot.slane %v2400_v62, 1  ;;  %v24327_v61 = vsel %vm2662_vm1, %v2750_v12, %v2752_v8  ;;  %v1860_v60 = vmax.f32 %v1754_v50, 0.0 }
 0x2da   : > { %2864 = vst [vmem:[#allocation7 + $0x160] sm:$0xff] %v24327_v61  ;;  %v2404_v28 = vshrl.u32 %v1918_v51, 16  ;;  %v2043_v18 = vsel %vm2031_vm2, %v2038_v23, %v2042_v48 }
 0x2db   : > { %v1861_v25 = vmax.f32 %v1755_v0, 0.0  ;;  %v24331_v59 = vsel %vm2031_vm2, %v2398_v46, %v2402_v49 }
 0x2dc   : > { %2549 = vst [vmem:[#allocation6 + $0x168] sm:$0xff] %v24331_v59  ;;  %v2406_v62 = vor.u32 %v2404_v28, %v2402_v49  ;;  %v23017_v49 = vld [vmem:[%s26597_s3 + $0x88] sm:$0xff]  }
 0x2dd   : > { %v1919_v4 = vpack.c.bf16 %v1861_v25, %v1860_v60  ;;  %v2044_v25 = vshrl.u32 %v23289_v2, 16 }
 0x2de   : > { %v1402_v22 = vpop.f32.mrb[192].mxu0  ;;  %v24334_v26 = vld [vmem:[#allocation3 + $0x170] sm:$0xff] }
 0x2df   : > { %v1756_v12 = vadd.f32 %v24297_v32, %v1402_v22  ;;  %v20172_v56 = vpop.f32.mrb[193].mxu0  ;;  %1972 = vst [vmem:[#allocation3 + $0x178] sm:$0xff] %v1919_v4  ;;  %20299 = vmatmul.mubr.bf16.gmra.mrb[92].mxu1 %v1919_v4  ;;  %v2408_v0 = vshll.u32 %v1919_v4, 16  ;;  %v2754_v16 = vrot.slane %v24334_v26, 1  ;;  %v2412_v2 = vshrl.u32 %v1919_v4, 16 }
 0x2e0   : > { %v1405_v50 = vpop.f32.mrb[194].mxu0  ;;  %20318 = vmatprep.mubr.bf16.mxu1 %v2043_v18  ;;  %v2046_v56 = vor.u32 %v2044_v25, %v2042_v48  ;;  %v23020_v25 = vld [vmem:[%s26597_s3 + $0xa0] sm:$0xff]  }
 0x2e1   : > { %v1862_v46 = vmax.f32 %v1756_v12, 0.0  ;;  %v1757_v17 = vadd.f32 %v24297_v32, %v1405_v50  ;;  %v20173_v24 = vpop.f32.mrb[195].mxu0  ;;  %v2410_v51 = vrot.slane %v2408_v0, 1  ;;  %v24341_v60 = vsel %vm2662_vm1, %v2752_v8, %v2754_v16  ;;  %v23290_v0 = vld [vmem:[#allocation6 + $0x10] sm:$0xff]  ;;  %v23018_v50 = vld [vmem:[%s26597_s3 + $0x90] sm:$0xff]  }
 0x2e2   : > { %2865 = vst [vmem:[#allocation7 + $0x168] sm:$0xff] %v24341_v60  ;;  %v2051_v8 = vsel %vm2031_vm2, %v2046_v56, %v23941_v38  ;;  %v23291_v24 = vld [vmem:[#allocation6 + $0x18] sm:$0xff] }
 0x2e3   : > { %v1863_v22 = vmax.f32 %v1757_v17, 0.0  ;;  %v24345_v23 = vsel %vm2031_vm2, %v2406_v62, %v2410_v51  ;;  %v2414_v38 = vor.u32 %v2412_v2, %v2410_v51  ;;  %v23292_v51 = vld [vmem:[#allocation6 + $0x20] sm:$0xff]  ;;  %v23021_v56 = vld [vmem:[%s26597_s3 + $0xa8] sm:$0xff]  }
 0x2e4   : > { %2550 = vst [vmem:[#allocation6 + $0x170] sm:$0xff] %v24345_v23  ;;  %v23022_v2 = vld [vmem:[%s26597_s3 + $0xb0] sm:$0xff]  }
 0x2e5   : > { %v24348_v18 = vpack.c.bf16 %v1863_v22, %v1862_v46 }
 0x2e6   : > { %v24355_v28 = vld [vmem:[#allocation3 + $0x178] sm:$0xff] }
 0x2e7   : > { %1973 = vst [vmem:[#allocation3 + $0x180] sm:$0xff] %v24348_v18  ;;  %20319 = vmatmul.mubr.bf16.vlgmr.msra.gmra.mrb[0].mxu1 %v2051_v8  ;;  %v2416_v12 = vshll.u32 %v24348_v18, 16  ;;  %v2756_v48 = vrot.slane %v24355_v28, 1  ;;  %v23294_v8 = vld [vmem:[#allocation6 + $0x30] sm:$0xff] }
 0x2e8   : > { %20415 = vmatpush3.bf16.msra.mxu1 %v24155_v20  ;;  %20322 = vmatprep.mubr.bf16.mxu1 %v23290_v0  ;;  %v23019_v20 = vld [vmem:[%s26597_s3 + $0x98] sm:$0xff]  }
 0x2e9   : > { %20416 = vmatprep.subr.bf16.mxu1 %v23017_v49  ;;  %v24364_v62 = vrot.slane %v2416_v12, 1  ;;  %v24367_v46 = vsel %vm2662_vm1, %v2754_v16, %v2756_v48  ;;  %v23295_v12 = vld [vmem:[#allocation6 + $0x38] sm:$0xff]  ;;  %v23297_v0 = vld [vmem:[#allocation6 + $0x48] sm:$0xff] }
 0x2ea   : > { %2866 = vst [vmem:[#allocation7 + $0x170] sm:$0xff] %v24367_v46 }
 0x2eb   : > { %v24372_v4 = vsel %vm2031_vm2, %v2414_v38, %v24364_v62  ;;  %v1410_v38 = vpop.f32.mrb[196].mxu0 }
 0x2ec   : > { %20417 = vmatpush3.bf16.msra.mxu1 %v23017_v49  ;;  %2551 = vst [vmem:[#allocation6 + $0x178] sm:$0xff] %v24372_v4  ;;  %v23293_v49 = vld [vmem:[#allocation6 + $0x28] sm:$0xff] }
 0x2ed   : > { %20418 = vmatprep.subr.bf16.mxu1 %v23018_v50 }
 0x2ee   : > { %v24378_v17 = vld [vmem:[#allocation3 + $0x180] sm:$0xff] }
 0x2ef   : > { %20323 = vmatmul.mubr.bf16.gmra.mrb[4].mxu1 %v23291_v24  ;;  %v26628_v16 = vrot.slane %v24378_v17, 1  ;;  %v20176_v24 = vpop.f32.mrb[197].mxu0 }
 0x2f0   : > { %20326 = vmatprep.mubr.bf16.mxu1 %v23292_v51  ;;  %20419 = vmatpush3.bf16.msra.mxu1 %v23018_v50  ;;  %v23298_v50 = vld [vmem:[#allocation6 + $0x50] sm:$0xff]  ;;  %v1413_v51 = vpop.f32.mrb[198].mxu0 }
 0x2f1   : > { %20420 = vmatprep.subr.bf16.mxu1 %v23019_v20  ;;  %v24387_v22 = vsel %vm2662_vm1, %v2756_v48, %v26628_v16  ;;  %v23296_v48 = vld [vmem:[#allocation6 + $0x40] sm:$0xff]  ;;  %v23302_v16 = vld [vmem:[#allocation6 + $0x70] sm:$0xff] }
 0x2f2   : > { %2867 = vst [vmem:[#allocation7 + $0x178] sm:$0xff] %v24387_v22 }
 0x2f4   : > { %20421 = vmatpush3.bf16.msra.mxu1 %v23019_v20  ;;  %v23023_v20 = vld [vmem:[%s26597_s3 + $0xb8] sm:$0xff]  }
 0x2f5   : > { %20422 = vmatprep.subr.bf16.mxu1 %v23020_v25 }
 0x2f7   : > { %20327 = vmatmul.mubr.bf16.gmra.mrb[8].mxu1 %v23293_v49  ;;  %v1758_v49 = vadd.f32 %v24297_v32, %v1410_v38 }
 0x2f8   : > { %20330 = vmatprep.mubr.bf16.mxu1 %v23294_v8  ;;  %20423 = vmatpush3.bf16.msra.mxu1 %v23020_v25  ;;  %v20177_v25 = vpop.f32.mrb[199].mxu0  ;;  %v1759_v8 = vadd.f32 %v24297_v32, %v1413_v51 }
 0x2f9   : > { %20424 = vmatprep.subr.bf16.mxu1 %v23021_v56 }
 0x2fc   : > { %20425 = vmatpush3.bf16.msra.mxu1 %v23021_v56  ;;  %v23299_v56 = vld [vmem:[#allocation6 + $0x58] sm:$0xff] }
 0x2fd   : > { %20426 = vmatprep.subr.bf16.mxu1 %v23022_v2 }
 0x2ff   : > { %20331 = vmatmul.mubr.bf16.gmra.mrb[12].mxu1 %v23295_v12  ;;  %v1864_v12 = vmax.f32 %v1758_v49, 0.0  ;;  %v23304_v49 = vld [vmem:[#allocation6 + $0x80] sm:$0xff] }
 0x300   : > { %20334 = vmatprep.mubr.bf16.mxu1 %v23296_v48  ;;  %20427 = vmatpush3.bf16.msra.mxu1 %v23022_v2  ;;  %v23300_v2 = vld [vmem:[#allocation6 + $0x60] sm:$0xff]  ;;  %v1865_v48 = vmax.f32 %v1759_v8, 0.0 }
 0x301   : > { %20428 = vmatprep.subr.bf16.mxu1 %v23023_v20 }
 0x304   : > { %20429 = vmatpush3.bf16.msra.mxu1 %v23023_v20  ;;  %v2420_v20 = vshrl.u32 %v24348_v18, 16  ;;  %v23024_v18 = vld [vmem:[%s26597_s3 + $0xc0] sm:$0xff]  }
 0x305   : > { %20526 = vmatprep.subr.bf16.mxu1 %v23024_v18 }
 0x306   : > { %v2422_v38 = vor.u32 %v2420_v20, %v24364_v62  ;;  %v26716_v62 = vrot.slane %v24378_v17, 1  ;;  %v23309_v20 = vld [vmem:[#allocation6 + $0xa8] sm:$0xff] }
 0x307   : > { %20335 = vmatmul.mubr.bf16.gmra.mrb[16].mxu1 %v23297_v0  ;;  %v23301_v0 = vld [vmem:[#allocation6 + $0x68] sm:$0xff] }
 0x308   : > { %20338 = vmatprep.mubr.bf16.mxu1 %v23298_v50  ;;  %v24401_v50 = vpack.c.bf16 %v1865_v48, %v1864_v12  ;;  %v23306_v12 = vld [vmem:[#allocation6 + $0x90] sm:$0xff]  ;;  %v23307_v48 = vld [vmem:[#allocation6 + $0x98] sm:$0xff] }
 0x30a   : > { %1974 = vst [vmem:[#allocation3 + $0x188] sm:$0xff] %v24401_v50  ;;  %v2424_v24 = vshll.u32 %v24401_v50, 16 }
 0x30c   : > { %v24407_v25 = vrot.slane %v2424_v24, 1  ;;  %v23310_v24 = vld [vmem:[#allocation6 + $0xb0] sm:$0xff] }
 0x30e   : > { %v24411_v51 = vsel %vm2031_vm2, %v2422_v38, %v24407_v25  ;;  %v23311_v38 = vld [vmem:[#allocation6 + $0xb8] sm:$0xff] }
 0x30f   : > { %20339 = vmatmul.mubr.bf16.gmra.mrb[20].mxu1 %v23299_v56  ;;  %2552 = vst [vmem:[#allocation6 + $0x180] sm:$0xff] %v24411_v51  ;;  %v23303_v56 = vld [vmem:[#allocation6 + $0x78] sm:$0xff] }
 0x310   : > { %20342 = vmatprep.mubr.bf16.mxu1 %v23300_v2  ;;  %v23305_v2 = vld [vmem:[#allocation6 + $0x88] sm:$0xff] }
 0x317   : > { %20343 = vmatmul.mubr.bf16.gmra.mrb[24].mxu1 %v23301_v0  ;;  %v23308_v0 = vld [vmem:[#allocation6 + $0xa0] sm:$0xff] }
 0x318   : > { %20346 = vmatprep.mubr.bf16.mxu1 %v23302_v16  ;;  %v2760_v16 = vrot.slane %v24401_v50, 1 }
 0x31a   : > { %v24423_v8 = vsel %vm2662_vm1, %v26716_v62, %v2760_v16  ;;  %v23326_v62 = vld [vmem:[#allocation7 + $0x70] sm:$0xff] }
 0x31b   : > { %2868 = vst [vmem:[#allocation7 + $0x180] sm:$0xff] %v24423_v8 }
 0x31f   : > { %20347 = vmatmul.mubr.bf16.gmra.mrb[28].mxu1 %v23303_v56  ;;  %v23312_v56 = vld [vmem:[#allocation6 + $0xc0] sm:$0xff] }
 0x320   : > { %20350 = vmatprep.mubr.bf16.mxu1 %v23304_v49  ;;  %v23313_v49 = vld [vmem:[#allocation6 + $0xc8] sm:$0xff] }
 0x327   : > { %20351 = vmatmul.mubr.bf16.gmra.mrb[32].mxu1 %v23305_v2  ;;  %v23327_v2 = vld [vmem:[#allocation7 + $0x78] sm:$0xff] }
 0x328   : > { %20354 = vmatprep.mubr.bf16.mxu1 %v23306_v12  ;;  %v23328_v12 = vld [vmem:[#allocation7 + $0x80] sm:$0xff] }
 0x32f   : > { %20355 = vmatmul.mubr.bf16.gmra.mrb[36].mxu1 %v23307_v48  ;;  %v23033_v48 = vld [vmem:[%s26597_s3 + $0x100] sm:$0xff]  }
 0x330   : > { %20358 = vmatprep.mubr.bf16.mxu1 %v23308_v0  ;;  %v23329_v0 = vld [vmem:[#allocation7 + $0x88] sm:$0xff] }
 0x337   : > { %20359 = vmatmul.mubr.bf16.gmra.mrb[40].mxu1 %v23309_v20  ;;  %v23330_v20 = vld [vmem:[#allocation7 + $0x90] sm:$0xff] }
 0x338   : > { %20362 = vmatprep.mubr.bf16.mxu1 %v23310_v24  ;;  %v23331_v24 = vld [vmem:[#allocation7 + $0x98] sm:$0xff] }
 0x33f   : > { %20363 = vmatmul.mubr.bf16.gmra.mrb[44].mxu1 %v23311_v38  ;;  %v23332_v38 = vld [vmem:[#allocation7 + $0xa0] sm:$0xff] }
 0x340   : > { %20366 = vmatprep.mubr.bf16.mxu1 %v23312_v56  ;;  %v23333_v56 = vld [vmem:[#allocation7 + $0xa8] sm:$0xff] }
 0x347   : > { %20367 = vmatmul.mubr.bf16.gmra.mrb[48].mxu1 %v23313_v49  ;;  %v23334_v49 = vld [vmem:[#allocation7 + $0xb0] sm:$0xff] }
 0x348   : > { %20370 = vmatprep.mubr.bf16.mxu1 %v24124_v19  ;;  %v2556_v19 = vld [vmem:[#allocation3] sm:$0xfe] }
 0x34f   : > { %20371 = vmatmul.mubr.bf16.gmra.mrb[52].mxu1 %v24131_v40  ;;  %v2663_v40 = vrot.slane %v2556_v19, 1  ;;  %v23335_v19 = vld [vmem:[#allocation7 + $0xb8] sm:$0xff] }
 0x350   : > { %20374 = vmatprep.mubr.bf16.mxu1 %v24138_v58  ;;  %v26717_v58 = vrot.slane %v23928_v21, 1  ;;  %v23027_v21 = vld [vmem:[%s26597_s3 + $0xd8] sm:$0xff]  }
 0x357   : > { %20375 = vmatmul.mubr.bf16.gmra.mrb[56].mxu1 %v24148_v13  ;;  %v2665_v13 = vsel %vm2662_vm1, %v2663_v40, %v26717_v58  ;;  %v23336_v40 = vld [vmem:[#allocation7 + $0xc0] sm:$0xff]  ;;  %v23337_v58 = vld [vmem:[#allocation7 + $0xc8] sm:$0xff] }
 0x358   : > { %20378 = vmatprep.mubr.bf16.mxu1 %v24164_v35  ;;  %v23025_v35 = vld [vmem:[%s26597_s3 + $0xc8] sm:$0xff]  }
 0x35f   : > { %20379 = vmatmul.mubr.bf16.gmra.mrb[60].mxu1 %v24174_v55  ;;  %v23314_v55 = vld [vmem:[#allocation7 + $0x10] sm:$0xff] }
 0x360   : > { %20382 = vmatprep.mubr.bf16.mxu1 %v24184_v10  ;;  %v23026_v10 = vld [vmem:[%s26597_s3 + $0xd0] sm:$0xff]  }
 0x367   : > { %20383 = vmatmul.mubr.bf16.gmra.mrb[64].mxu1 %v24194_v33  ;;  %v23315_v33 = vld [vmem:[#allocation7 + $0x18] sm:$0xff] }
 0x368   : > { %20386 = vmatprep.mubr.bf16.mxu1 %v24204_v57  ;;  %v23316_v57 = vld [vmem:[#allocation7 + $0x20] sm:$0xff] }
 0x36f   : > { %20387 = vmatmul.mubr.bf16.gmra.mrb[68].mxu1 %v24214_v15  ;;  %v23028_v15 = vld [vmem:[%s26597_s3 + $0xe0] sm:$0xff]  }
 0x370   : > { %20390 = vmatprep.mubr.bf16.mxu1 %v24224_v43  ;;  %v26718_v43 = vmov 0.0  }
 0x377   : > { %20391 = vmatmul.mubr.bf16.gmra.mrb[72].mxu1 %v24234_v3  ;;  %v23029_v3 = vld [vmem:[%s26597_s3 + $0xe8] sm:$0xff]  }
 0x378   : > { %20394 = vmatprep.mubr.bf16.mxu1 %v24243_v36  ;;  %v23317_v36 = vld [vmem:[#allocation7 + $0x28] sm:$0xff] }
 0x37f   : > { %20395 = vmatmul.mubr.bf16.gmra.mrb[76].mxu1 %v24248_v45  ;;  %v23318_v45 = vld [vmem:[#allocation7 + $0x30] sm:$0xff] }
 0x380   : > { %20398 = vmatprep.mubr.bf16.mxu1 %v24261_v6  ;;  %v23031_v6 = vld [vmem:[%s26597_s3 + $0xf0] sm:$0xff]  }
 0x387   : > { %20399 = vmatmul.mubr.bf16.gmra.mrb[80].mxu1 %v24274_v41  ;;  %v23319_v41 = vld [vmem:[#allocation7 + $0x38] sm:$0xff] }
 0x388   : > { %20402 = vmatprep.mubr.bf16.mxu1 %v24287_v14  ;;  %v23320_v14 = vld [vmem:[#allocation7 + $0x40] sm:$0xff] }
 0x38f   : > { %20403 = vmatmul.mubr.bf16.gmra.mrb[84].mxu1 %v24305_v54  ;;  %v23321_v54 = vld [vmem:[#allocation7 + $0x48] sm:$0xff] }
 0x390   : > { %20406 = vmatprep.mubr.bf16.mxu1 %v24318_v42  ;;  %v23322_v42 = vld [vmem:[#allocation7 + $0x50] sm:$0xff] }
 0x397   : > { %20407 = vmatmul.mubr.bf16.gmra.mrb[88].mxu1 %v24331_v59  ;;  %v23032_v59 = vld [vmem:[%s26597_s3 + $0xf8] sm:$0xff]  }
 0x398   : > { %20410 = vmatprep.mubr.bf16.mxu1 %v24345_v23  ;;  %v23323_v23 = vld [vmem:[#allocation7 + $0x58] sm:$0xff] }
 0x39f   : > { %20411 = vmatmul.mubr.bf16.gmra.mrb[92].mxu1 %v24372_v4  ;;  %v23324_v4 = vld [vmem:[#allocation7 + $0x60] sm:$0xff] }
 0x3a0   : > { %20430 = vmatprep.mubr.bf16.mxu1 %v2665_v13  ;;  %v23338_v13 = vld [vmem:[#allocation7 + $0xd0] sm:$0xff] }
 0x3a7   : > { %20431 = vmatmul.mubr.bf16.vlgmr.msra.gmra.mrb[0].mxu1 %v23937_v34  ;;  %v23030_v34 = vld [vmem:[%s23776_s21 + $0x190] sm:$0xff]  }
 0x3a8   : > { %20527 = vmatpush3.bf16.msra.mxu1 %v23024_v18  ;;  %20434 = vmatprep.mubr.bf16.mxu1 %v23314_v55  ;;  %v23325_v18 = vld [vmem:[#allocation7 + $0x68] sm:$0xff]  ;;  %v23340_v55 = vld [vmem:[#allocation7 + $0xe0] sm:$0xff] }
 0x3a9   : > { %20528 = vmatprep.subr.bf16.mxu1 %v23025_v35  ;;  %20179 = vmatmul.mubr.bf16.gmra.mrb[200].mxu0 %v23030_v34 }
 0x3aa   : > { %20182 = vmatprep.mubr.msk.bf16.mxu0 %vm23527_vm0, %v26718_v43 }
 0x3ac   : > { %20529 = vmatpush3.bf16.msra.mxu1 %v23025_v35  ;;  %v23339_v35 = vld [vmem:[#allocation7 + $0xd8] sm:$0xff] }
 0x3ad   : > { %20530 = vmatprep.subr.bf16.mxu1 %v23026_v10 }
 0x3af   : > { %20435 = vmatmul.mubr.bf16.gmra.mrb[4].mxu1 %v23315_v33 }
 0x3b0   : > { %20438 = vmatprep.mubr.bf16.mxu1 %v23316_v57  ;;  %20531 = vmatpush3.bf16.msra.mxu1 %v23026_v10  ;;  %v23341_v10 = vld [vmem:[#allocation7 + $0xe8] sm:$0xff]  ;;  %v24543_v57 = vld [vmem:[#allocation3 + $0x60] sm:$0xff] }
 0x3b1   : > { %20532 = vmatprep.subr.bf16.mxu1 %v23027_v21 }
 0x3b4   : > { %20533 = vmatpush3.bf16.msra.mxu1 %v23027_v21 }
 0x3b5   : > { %20534 = vmatprep.subr.bf16.mxu1 %v23028_v15 }
 0x3b7   : > { %20439 = vmatmul.mubr.bf16.gmra.mrb[8].mxu1 %v23317_v36 }
 0x3b8   : > { %20442 = vmatprep.mubr.bf16.mxu1 %v23318_v45  ;;  %20535 = vmatpush3.bf16.msra.mxu1 %v23028_v15 }
 0x3b9   : > { %20536 = vmatprep.subr.bf16.mxu1 %v23029_v3 }
 0x3bc   : > { %20537 = vmatpush3.bf16.msra.mxu1 %v23029_v3  ;;  %v23041_v3 = vld [vmem:[%s26597_s3 + $0x138] sm:$0xff]  }
 0x3bd   : > { %20538 = vmatprep.subr.bf16.mxu1 %v23031_v6 }
 0x3bf   : > { %20443 = vmatmul.mubr.bf16.gmra.mrb[12].mxu1 %v23319_v41  ;;  %v24552_v41 = vld [vmem:[#allocation3 + $0x68] sm:$0xff] }
 0x3c0   : > { %20446 = vmatprep.mubr.bf16.mxu1 %v23320_v14  ;;  %20539 = vmatpush3.bf16.msra.mxu1 %v23031_v6  ;;  %v24555_v14 = vld [vmem:[#allocation3 + $0x70] sm:$0xff] }
 0x3c1   : > { %20540 = vmatprep.subr.bf16.mxu1 %v23032_v59 }
 0x3c4   : > { %20541 = vmatpush3.bf16.msra.mxu1 %v23032_v59  ;;  %v24564_v59 = vld [vmem:[#allocation3 + $0x88] sm:$0xff] }
 0x3c5   : > { %20638 = vmatprep.subr.bf16.mxu1 %v23033_v48 }
 0x3c7   : > { %20447 = vmatmul.mubr.bf16.gmra.mrb[16].mxu1 %v23321_v54  ;;  %v24558_v54 = vld [vmem:[#allocation3 + $0x78] sm:$0xff] }
 0x3c8   : > { %20450 = vmatprep.mubr.bf16.mxu1 %v23322_v42  ;;  %v24561_v42 = vld [vmem:[#allocation3 + $0x80] sm:$0xff] }
 0x3cf   : > { %20451 = vmatmul.mubr.bf16.gmra.mrb[20].mxu1 %v23323_v23  ;;  %v2428_v23 = vshrl.u32 %v24401_v50, 16 }
 0x3d0   : > { %20454 = vmatprep.mubr.bf16.mxu1 %v23324_v4 }
 0x3d7   : > { %20455 = vmatmul.mubr.bf16.gmra.mrb[24].mxu1 %v23325_v18 }
 0x3d8   : > { %20458 = vmatprep.mubr.bf16.mxu1 %v23326_v62  ;;  %v24570_v62 = vld [vmem:[#allocation3 + $0x90] sm:$0xff] }
 0x3df   : > { %20459 = vmatmul.mubr.bf16.gmra.mrb[28].mxu1 %v23327_v2  ;;  %v24576_v2 = vld [vmem:[%s26597_s3 + $0x140] sm:$0xff]  }
 0x3e0   : > { %20462 = vmatprep.mubr.bf16.mxu1 %v23328_v12  ;;  %v2430_v12 = vor.u32 %v2428_v23, %v24407_v25  ;;  %v24597_v25 = vld [vmem:[#allocation3 + $0xa0] sm:$0xff] }
 0x3e7   : > { %20463 = vmatmul.mubr.bf16.gmra.mrb[32].mxu1 %v23329_v0 }
 0x3e8   : > { %20466 = vmatprep.mubr.bf16.mxu1 %v23330_v20 }
 0x3ef   : > { %20467 = vmatmul.mubr.bf16.gmra.mrb[36].mxu1 %v23331_v24  ;;  %v24594_v24 = vld [vmem:[#allocation3 + $0x98] sm:$0xff] }
 0x3f0   : > { %20470 = vmatprep.mubr.bf16.mxu1 %v23332_v38  ;;  %v24600_v38 = vld [vmem:[#allocation3 + $0xa8] sm:$0xff] }
 0x3f7   : > { %20471 = vmatmul.mubr.bf16.gmra.mrb[40].mxu1 %v23333_v56  ;;  %v24606_v56 = vld [vmem:[#allocation3 + $0xb8] sm:$0xff] }
 0x3f8   : > { %20474 = vmatprep.mubr.bf16.mxu1 %v23334_v49  ;;  %v24609_v49 = vld [vmem:[#allocation3 + $0xc0] sm:$0xff] }
 0x3ff   : > { %20475 = vmatmul.mubr.bf16.gmra.mrb[44].mxu1 %v23335_v19  ;;  %v24612_v19 = vld [vmem:[#allocation3 + $0xc8] sm:$0xff] }
 0x400   : > { %20478 = vmatprep.mubr.bf16.mxu1 %v23336_v40  ;;  %v24615_v40 = vld [vmem:[#allocation3 + $0xd0] sm:$0xff] }
 0x407   : > { %20479 = vmatmul.mubr.bf16.gmra.mrb[48].mxu1 %v23337_v58  ;;  %v24618_v58 = vld [vmem:[#allocation3 + $0xd8] sm:$0xff] }
 0x408   : > { %20482 = vmatprep.mubr.bf16.mxu1 %v23338_v13  ;;  %v24621_v13 = vld [vmem:[#allocation3 + $0xe0] sm:$0xff] }
 0x40f   : > { %20483 = vmatmul.mubr.bf16.gmra.mrb[52].mxu1 %v23339_v35  ;;  %v24624_v35 = vld [vmem:[#allocation3 + $0xe8] sm:$0xff] }
 0x410   : > { %20486 = vmatprep.mubr.bf16.mxu1 %v23340_v55  ;;  %v24627_v55 = vld [vmem:[#allocation3 + $0xf0] sm:$0xff] }
 0x417   : > { %20487 = vmatmul.mubr.bf16.gmra.mrb[56].mxu1 %v23341_v10  ;;  %v24630_v10 = vld [vmem:[#allocation3 + $0xf8] sm:$0xff] }
 0x418   : > { %20490 = vmatprep.mubr.bf16.mxu1 %v24160_v31  ;;  %v5133_v31 = vld [vmem:[#allocation3 + $0x10] sm:$0xff] }
 0x41f   : > { %20491 = vmatmul.mubr.bf16.gmra.mrb[60].mxu1 %v24170_v52  ;;  %v23039_v52 = vld [vmem:[%s23776_s21 + $0x198] sm:$0xff]  }
 0x420   : > { %20494 = vmatprep.mubr.bf16.mxu1 %v24180_v7  ;;  %20183 = vmatmul.mubr.bf16.gmra.mrb[204].mxu0 %v23039_v52  ;;  %v23034_v7 = vld [vmem:[%s26597_s3 + $0x108] sm:$0xff]   ;;  %v24636_v52 = vld [vmem:[#allocation3 + $0x108] sm:$0xff] }
 0x421   : > { %20186 = vmatprep.mubr.msk.bf16.mxu0 %vm23527_vm0, %v26718_v43 }
 0x427   : > { %20495 = vmatmul.mubr.bf16.gmra.mrb[64].mxu1 %v24190_v29  ;;  %v5134_v29 = vld [vmem:[#allocation3 + $0x18] sm:$0xff] }
 0x428   : > { %20498 = vmatprep.mubr.bf16.mxu1 %v24200_v53  ;;  %v24503_v53 = vld [vmem:[#allocation3 + $0x20] sm:$0xff] }
 0x42f   : > { %20499 = vmatmul.mubr.bf16.gmra.mrb[68].mxu1 %v24210_v11  ;;  %v23035_v11 = vld [vmem:[%s26597_s3 + $0x110] sm:$0xff]  }
 0x430   : > { %20502 = vmatprep.mubr.bf16.mxu1 %v24220_v39  ;;  %v23036_v39 = vld [vmem:[%s26597_s3 + $0x118] sm:$0xff]  }
 0x437   : > { %20503 = vmatmul.mubr.bf16.gmra.mrb[72].mxu1 %v24230_v63  ;;  %v24512_v63 = vld [vmem:[#allocation3 + $0x28] sm:$0xff] }
 0x438   : > { %20506 = vmatprep.mubr.bf16.mxu1 %v24240_v30  ;;  %v24515_v30 = vld [vmem:[#allocation3 + $0x30] sm:$0xff] }
 0x43f   : > { %20507 = vmatmul.mubr.bf16.gmra.mrb[76].mxu1 %v24257_v1  ;;  %v23037_v1 = vld [vmem:[%s26597_s3 + $0x120] sm:$0xff]  }
 0x440   : > { %20510 = vmatprep.mubr.bf16.mxu1 %v24270_v27  ;;  %v23038_v27 = vld [vmem:[%s26597_s3 + $0x128] sm:$0xff]  }
 0x447   : > { %20511 = vmatmul.mubr.bf16.gmra.mrb[80].mxu1 %v24283_v5  ;;  %v24524_v5 = vld [vmem:[#allocation3 + $0x38] sm:$0xff] }
 0x448   : > { %20514 = vmatprep.mubr.bf16.mxu1 %v24301_v44  ;;  %v24527_v44 = vld [vmem:[#allocation3 + $0x40] sm:$0xff] }
 0x44f   : > { %20515 = vmatmul.mubr.bf16.gmra.mrb[84].mxu1 %v24314_v37  ;;  %v24533_v37 = vld [vmem:[#allocation3 + $0x48] sm:$0xff] }
 0x450   : > { %20518 = vmatprep.mubr.bf16.mxu1 %v24327_v61  ;;  %v23040_v61 = vld [vmem:[%s26597_s3 + $0x130] sm:$0xff]  }
 0x457   : > { %20519 = vmatmul.mubr.bf16.gmra.mrb[88].mxu1 %v24341_v60  ;;  %v24536_v60 = vld [vmem:[#allocation3 + $0x50] sm:$0xff] }
 0x458   : > { %20522 = vmatprep.mubr.bf16.mxu1 %v24367_v46 }
 0x45f   : > { %20523 = vmatmul.mubr.bf16.gmra.mrb[92].mxu1 %v24387_v22  ;;  %v24539_v22 = vld [vmem:[#allocation3 + $0x58] sm:$0xff] }
 0x460   : > { %20542 = vmatprep.mubr.bf16.mxu1 %v5133_v31  ;;  %v24633_v31 = vld [vmem:[#allocation3 + $0x100] sm:$0xff] }
 0x467   : > { %20543 = vmatmul.mubr.bf16.vlgmr.msra.gmra.mrb[0].mxu1 %v5134_v29  ;;  %v24642_v29 = vld [vmem:[#allocation3 + $0x118] sm:$0xff] }
 0x468   : > { %20639 = vmatpush3.bf16.msra.mxu1 %v23033_v48  ;;  %20546 = vmatprep.mubr.bf16.mxu1 %v24503_v53 }
 0x469   : > { %20640 = vmatprep.subr.bf16.mxu1 %v23034_v7 }
 0x46c   : > { %20641 = vmatpush3.bf16.msra.mxu1 %v23034_v7  ;;  %v24639_v7 = vld [vmem:[#allocation3 + $0x110] sm:$0xff] }
 0x46d   : > { %20642 = vmatprep.subr.bf16.mxu1 %v23035_v11 }
 0x46f   : > { %20547 = vmatmul.mubr.bf16.gmra.mrb[4].mxu1 %v24512_v63 }
 0x470   : > { %20550 = vmatprep.mubr.bf16.mxu1 %v24515_v30  ;;  %20643 = vmatpush3.bf16.msra.mxu1 %v23035_v11  ;;  %v24645_v11 = vld [vmem:[#allocation3 + $0x120] sm:$0xff] }
 0x471   : > { %20644 = vmatprep.subr.bf16.mxu1 %v23036_v39 }
 0x474   : > { %20645 = vmatpush3.bf16.msra.mxu1 %v23036_v39  ;;  %v24648_v39 = vld [vmem:[#allocation3 + $0x128] sm:$0xff] }
 0x475   : > { %20646 = vmatprep.subr.bf16.mxu1 %v23037_v1 }
 0x477   : > { %20551 = vmatmul.mubr.bf16.gmra.mrb[8].mxu1 %v24524_v5 }
 0x478   : > { %20554 = vmatprep.mubr.bf16.mxu1 %v24527_v44  ;;  %20647 = vmatpush3.bf16.msra.mxu1 %v23037_v1  ;;  %v24651_v1 = vld [vmem:[#allocation3 + $0x130] sm:$0xff] }
 0x479   : > { %20648 = vmatprep.subr.bf16.mxu1 %v23038_v27 }
 0x47c   : > { %20649 = vmatpush3.bf16.msra.mxu1 %v23038_v27  ;;  %v1418_v46 = vpop.f32.mrb[200].mxu0  ;;  %v24654_v27 = vld [vmem:[#allocation3 + $0x138] sm:$0xff] }
 0x47d   : > { %20650 = vmatprep.subr.bf16.mxu1 %v23040_v61  ;;  %v1760_v21 = vadd.f32 %v24297_v32, %v1418_v46  ;;  %v20180_v33 = vpop.f32.mrb[201].mxu0  ;;  %v26721_v46 = vld [vmem:[#allocation27_spill] sm:$0xff] }
 0x47e   : > { %v1421_v34 = vpop.f32.mrb[202].mxu0  ;;  %v26723_v33 = vld [vmem:[#allocation29_spill] sm:$0xff] }
 0x47f   : > { %20555 = vmatmul.mubr.bf16.gmra.mrb[12].mxu1 %v24533_v37  ;;  %v1866_v15 = vmax.f32 %v1760_v21, 0.0  ;;  %v1761_v43 = vadd.f32 %v24297_v32, %v1421_v34  ;;  %v20181_v36 = vpop.f32.mrb[203].mxu0  ;;  %v26722_v21 = vld [vmem:[#allocation28_spill] sm:$0xff] }
 0x480   : > { %20558 = vmatprep.mubr.bf16.mxu1 %v24536_v60  ;;  %20651 = vmatpush3.bf16.msra.mxu1 %v23040_v61  ;;  %v26720_v61 = vld [vmem:[#allocation26_spill] sm:$0xff]  ;;  %v5951_v34 = vld [vmem:[#allocation6 + $0x10] sm:$0xff] }
 0x481   : > { %v1867_v45 = vmax.f32 %v1761_v43, 0.0  ;;  %20652 = vmatprep.subr.bf16.mxu1 %v23041_v3  ;;  %v23046_v43 = vld [vmem:[%s26597_s3 + $0x160] sm:$0xff]  }
 0x483   : > { %v24550_v6 = vpack.c.bf16 %v1867_v45, %v1866_v15  ;;  %v24670_v15 = vld [vmem:[#allocation6 + $0x20] sm:$0xff]  ;;  %v24692_v45 = vld [vmem:[#allocation6 + $0x38] sm:$0xff] }
 0x484   : > { %20653 = vmatpush3.bf16.msra.mxu1 %v23041_v3  ;;  %v23047_v3 = vld [vmem:[%s26597_s3 + $0x168] sm:$0xff]  }
 0x485   : > { %v2432_v4 = vshll.u32 %v24550_v6, 16  ;;  %v26629_v18 = vrot.slane %v24550_v6, 1  ;;  %20750 = vmatprep.subr.bf16.mxu1 %v24576_v2 }
 0x487   : > { %20559 = vmatmul.mubr.bf16.gmra.mrb[16].mxu1 %v24539_v22  ;;  %v24579_v48 = vrot.slane %v2432_v4, 1  ;;  %v24586_v0 = vsel %vm2662_vm1, %v2760_v16, %v26629_v18  ;;  %v24603_v16 = vld [vmem:[#allocation3 + $0xb0] sm:$0xff]  ;;  %v24695_v4 = vld [vmem:[#allocation6 + $0x40] sm:$0xff]  ;;  %v2436_v18 = vshrl.u32 %v24550_v6, 16 }
 0x488   : > { %20562 = vmatprep.mubr.bf16.mxu1 %v24543_v57  ;;  %2869 = vst [vmem:[#allocation7 + $0x188] sm:$0xff] %v24586_v0 }
 0x489   : > { %v24592_v20 = vsel %vm2031_vm2, %v2430_v12, %v24579_v48  ;;  %v23048_v12 = vld [vmem:[%s26597_s3 + $0x170] sm:$0xff]  }
 0x48a   : > { %26719 = vst [vmem:[#allocation30_spill] sm:$0xff] %v24592_v20 }
 0x48f   : > { %20563 = vmatmul.mubr.bf16.gmra.mrb[20].mxu1 %v24552_v41 }
 0x490   : > { %20566 = vmatprep.mubr.bf16.mxu1 %v24555_v14 }
 0x497   : > { %20567 = vmatmul.mubr.bf16.gmra.mrb[24].mxu1 %v24558_v54 }
 0x498   : > { %20570 = vmatprep.mubr.bf16.mxu1 %v24561_v42 }
 0x49f   : > { %20571 = vmatmul.mubr.bf16.gmra.mrb[28].mxu1 %v24564_v59 }
 0x4a0   : > { %20574 = vmatprep.mubr.bf16.mxu1 %v24570_v62 }
 0x4a7   : > { %20575 = vmatmul.mubr.bf16.gmra.mrb[32].mxu1 %v24594_v24 }
 0x4a8   : > { %20578 = vmatprep.mubr.bf16.mxu1 %v24597_v25 }
 0x4af   : > { %20579 = vmatmul.mubr.bf16.gmra.mrb[36].mxu1 %v24600_v38 }
 0x4b0   : > { %20582 = vmatprep.mubr.bf16.mxu1 %v24603_v16 }
 0x4b7   : > { %20583 = vmatmul.mubr.bf16.gmra.mrb[40].mxu1 %v24606_v56 }
 0x4b8   : > { %20586 = vmatprep.mubr.bf16.mxu1 %v24609_v49 }
 0x4bf   : > { %20587 = vmatmul.mubr.bf16.gmra.mrb[44].mxu1 %v24612_v19 }
 0x4c0   : > { %20590 = vmatprep.mubr.bf16.mxu1 %v24615_v40 }
 0x4c7   : > { %20591 = vmatmul.mubr.bf16.gmra.mrb[48].mxu1 %v24618_v58 }
 0x4c8   : > { %20594 = vmatprep.mubr.bf16.mxu1 %v24621_v13 }
 0x4cf   : > { %20595 = vmatmul.mubr.bf16.gmra.mrb[52].mxu1 %v24624_v35 }
 0x4d0   : > { %20598 = vmatprep.mubr.bf16.mxu1 %v24627_v55 }
 0x4d7   : > { %20599 = vmatmul.mubr.bf16.gmra.mrb[56].mxu1 %v24630_v10 }
 0x4d8   : > { %20602 = vmatprep.mubr.bf16.mxu1 %v24633_v31 }
 0x4df   : > { %20603 = vmatmul.mubr.bf16.gmra.mrb[60].mxu1 %v24636_v52 }
 0x4e0   : > { %20606 = vmatprep.mubr.bf16.mxu1 %v24639_v7 }
 0x4e7   : > { %20607 = vmatmul.mubr.bf16.gmra.mrb[64].mxu1 %v24642_v29 }
 0x4e8   : > { %20610 = vmatprep.mubr.bf16.mxu1 %v24645_v11 }
 0x4ef   : > { %20611 = vmatmul.mubr.bf16.gmra.mrb[68].mxu1 %v24648_v39 }
 0x4f0   : > { %20614 = vmatprep.mubr.bf16.mxu1 %v24651_v1 }
 0x4f3   : > { %v1426_v36 = vpop.f32.mrb[204].mxu0 }
 0x4f4   : > { %v20184_v23 = vpop.f32.mrb[205].mxu0 }
 0x4f7   : > { %20615 = vmatmul.mubr.bf16.gmra.mrb[72].mxu1 %v24654_v27 }
 0x4f8   : > { %20618 = vmatprep.mubr.bf16.mxu1 %v24251_v47  ;;  %v23043_v47 = vld [vmem:[%s26597_s3 + $0x148] sm:$0xff]  }
 0x4ff   : > { %20619 = vmatmul.mubr.bf16.gmra.mrb[76].mxu1 %v24264_v9  ;;  %v5952_v9 = vld [vmem:[#allocation6 + $0x18] sm:$0xff] }
 0x500   : > { %20622 = vmatprep.mubr.bf16.mxu1 %v26720_v61 }
 0x507   : > { %20623 = vmatmul.mubr.bf16.gmra.mrb[80].mxu1 %v26721_v46  ;;  %v24701_v46 = vld [vmem:[#allocation6 + $0x48] sm:$0xff] }
 0x508   : > { %20626 = vmatprep.mubr.bf16.mxu1 %v26722_v21  ;;  %v24704_v21 = vld [vmem:[#allocation6 + $0x50] sm:$0xff] }
 0x50f   : > { %20627 = vmatmul.mubr.bf16.gmra.mrb[84].mxu1 %v26723_v33  ;;  %v24707_v33 = vld [vmem:[#allocation6 + $0x58] sm:$0xff] }
 0x510   : > { %20630 = vmatprep.mubr.bf16.mxu1 %v24334_v26  ;;  %v23044_v26 = vld [vmem:[%s26597_s3 + $0x150] sm:$0xff]  }
 0x517   : > { %20631 = vmatmul.mubr.bf16.gmra.mrb[88].mxu1 %v24355_v28  ;;  %v23045_v28 = vld [vmem:[%s26597_s3 + $0x158] sm:$0xff]  }
 0x518   : > { %20634 = vmatprep.mubr.bf16.mxu1 %v24378_v17  ;;  %v24680_v17 = vld [vmem:[#allocation6 + $0x28] sm:$0xff] }
 0x51f   : > { %20635 = vmatmul.mubr.bf16.gmra.mrb[92].mxu1 %v24401_v50  ;;  %v24683_v50 = vld [vmem:[#allocation6 + $0x30] sm:$0xff] }
 0x520   : > { %20654 = vmatprep.mubr.bf16.mxu1 %v5951_v34  ;;  %v24710_v34 = vld [vmem:[#allocation6 + $0x60] sm:$0xff] }
 0x527   : > { %20655 = vmatmul.mubr.bf16.vlgmr.msra.gmra.mrb[0].mxu1 %v5952_v9  ;;  %v24716_v9 = vld [vmem:[#allocation6 + $0x68] sm:$0xff] }
 0x528   : > { %20751 = vmatpush3.bf16.msra.mxu1 %v24576_v2  ;;  %20658 = vmatprep.mubr.bf16.mxu1 %v24670_v15  ;;  %v1429_v2 = vpop.f32.mrb[206].mxu0 }
 0x529   : > { %20752 = vmatprep.subr.bf16.mxu1 %v23043_v47  ;;  %v20185_v61 = vpop.f32.mrb[207].mxu0 }
 0x52a   : > { %v24727_v61 = vld [vmem:[#allocation6 + $0x80] sm:$0xff] }
 0x52b   : > { %26725 = vst [vmem:[#allocation27_spill] sm:$0xff] %v24727_v61 }
 0x52c   : > { %20753 = vmatpush3.bf16.msra.mxu1 %v23043_v47  ;;  %v23049_v47 = vld [vmem:[%s26597_s3 + $0x178] sm:$0xff]  }
 0x52d   : > { %20754 = vmatprep.subr.bf16.mxu1 %v23044_v26 }
 0x52f   : > { %20659 = vmatmul.mubr.bf16.gmra.mrb[4].mxu1 %v24680_v17 }
 0x530   : > { %20662 = vmatprep.mubr.bf16.mxu1 %v24683_v50  ;;  %20755 = vmatpush3.bf16.msra.mxu1 %v23044_v26  ;;  %v24719_v26 = vld [vmem:[#allocation6 + $0x70] sm:$0xff] }
 0x531   : > { %20756 = vmatprep.subr.bf16.mxu1 %v23045_v28 }
 0x534   : > { %20757 = vmatpush3.bf16.msra.mxu1 %v23045_v28  ;;  %v1762_v28 = vadd.f32 %v24297_v32, %v1426_v36 }
 0x535   : > { %20758 = vmatprep.subr.bf16.mxu1 %v23046_v43 }
 0x537   : > { %20663 = vmatmul.mubr.bf16.gmra.mrb[8].mxu1 %v24692_v45 }
 0x538   : > { %20666 = vmatprep.mubr.bf16.mxu1 %v24695_v4  ;;  %20759 = vmatpush3.bf16.msra.mxu1 %v23046_v43  ;;  %v1763_v43 = vadd.f32 %v24297_v32, %v1429_v2  ;;  %v2438_v2 = vor.u32 %v2436_v18, %v24579_v48  ;;  %v24758_v18 = vld [vmem:[%s26597_s3 + $0x180] sm:$0xff]   ;;  %v24761_v48 = vld [vmem:[#allocation6 + $0x98] sm:$0xff] }
 0x539   : > { %20760 = vmatprep.subr.bf16.mxu1 %v23047_v3  ;;  %26731 = vst [vmem:[#allocation33_spill] sm:$0xff] %v24761_v48 }
 0x53a   : > { %v1869_v23 = vmax.f32 %v1763_v43, 0.0  ;;  %v26726_v43 = vrot.slane %v24550_v6, 1 }
 0x53c   : > { %20761 = vmatpush3.bf16.msra.mxu1 %v23047_v3  ;;  %v1868_v3 = vmax.f32 %v1762_v28, 0.0 }
 0x53d   : > { %20762 = vmatprep.subr.bf16.mxu1 %v23048_v12 }
 0x53f   : > { %20667 = vmatmul.mubr.bf16.gmra.mrb[12].mxu1 %v24701_v46 }
 0x540   : > { %20670 = vmatprep.mubr.bf16.mxu1 %v24704_v21  ;;  %20763 = vmatpush3.bf16.msra.mxu1 %v23048_v12  ;;  %v24724_v12 = vld [vmem:[#allocation6 + $0x78] sm:$0xff] }
 0x541   : > { %20764 = vmatprep.subr.bf16.mxu1 %v23049_v47  ;;  %26724 = vst [vmem:[#allocation26_spill] sm:$0xff] %v24724_v12 }
 0x544   : > { %20765 = vmatpush3.bf16.msra.mxu1 %v23049_v47  ;;  %v24729_v47 = vpack.c.bf16 %v1869_v23, %v1868_v3  ;;  %v24749_v23 = vld [vmem:[#allocation6 + $0x88] sm:$0xff] }
 0x545   : > { %26729 = vst [vmem:[#allocation31_spill] sm:$0xff] %v24749_v23  ;;  %20862 = vmatprep.subr.bf16.mxu1 %v24758_v18 }
 0x546   : > { %v2440_v36 = vshll.u32 %v24729_v47, 16  ;;  %v26632_v32 = vrot.slane %v24729_v47, 1 }
 0x547   : > { %20671 = vmatmul.mubr.bf16.gmra.mrb[16].mxu1 %v24707_v33 }
 0x548   : > { %20674 = vmatprep.mubr.bf16.mxu1 %v24710_v34  ;;  %v24736_v28 = vrot.slane %v2440_v36, 1  ;;  %v24764_v36 = vld [vmem:[#allocation6 + $0xa0] sm:$0xff] }
 0x549   : > { %26732 = vst [vmem:[#allocation34_spill] sm:$0xff] %v24764_v36 }
 0x54a   : > { %v24747_v3 = vsel %vm2031_vm2, %v2438_v2, %v24736_v28  ;;  %v24767_v2 = vld [vmem:[#allocation6 + $0xa8] sm:$0xff] }
 0x54b   : > { %26728 = vst [vmem:[#allocation29_spill] sm:$0xff] %v24747_v3  ;;  %26733 = vst [vmem:[#allocation35_spill] sm:$0xff] %v24767_v2  ;;  %v24779_v3 = vld [vmem:[#allocation6 + $0xc8] sm:$0xff] }
 0x54c   : > { %26737 = vst [vmem:[#allocation39_spill] sm:$0xff] %v24779_v3 }
 0x54f   : > { %20675 = vmatmul.mubr.bf16.gmra.mrb[20].mxu1 %v24716_v9 }
 0x550   : > { %20678 = vmatprep.mubr.bf16.mxu1 %v24719_v26 }
 0x557   : > { %20679 = vmatmul.mubr.bf16.gmra.mrb[24].mxu1 %v24724_v12  ;;  %v24743_v12 = vsel %vm2662_vm1, %v26726_v43, %v26632_v32  ;;  %v24770_v43 = vld [vmem:[#allocation6 + $0xb0] sm:$0xff]  ;;  %v24773_v32 = vld [vmem:[#allocation6 + $0xb8] sm:$0xff] }
 0x558   : > { %20682 = vmatprep.mubr.bf16.mxu1 %v24727_v61  ;;  %26727 = vst [vmem:[#allocation28_spill] sm:$0xff] %v24743_v12  ;;  %v24752_v61 = vld [vmem:[#allocation6 + $0x90] sm:$0xff]  ;;  %26734 = vst [vmem:[#allocation36_spill] sm:$0xff] %v24770_v43  ;;  %v24776_v12 = vld [vmem:[#allocation6 + $0xc0] sm:$0xff] }
 0x559   : > { %26730 = vst [vmem:[#allocation32_spill] sm:$0xff] %v24752_v61  ;;  %26735 = vst [vmem:[#allocation37_spill] sm:$0xff] %v24773_v32 }
 0x55a   : > { %26736 = vst [vmem:[#allocation38_spill] sm:$0xff] %v24776_v12 }
 0x55f   : > { %20683 = vmatmul.mubr.bf16.gmra.mrb[28].mxu1 %v24749_v23  ;;  %v23351_v23 = vld [vmem:[#allocation7 + $0x148] sm:$0xff] }
 0x560   : > { %20686 = vmatprep.mubr.bf16.mxu1 %v24752_v61  ;;  %v23349_v61 = vld [vmem:[#allocation7 + $0x138] sm:$0xff] }
 0x567   : > { %20687 = vmatmul.mubr.bf16.gmra.mrb[32].mxu1 %v24761_v48  ;;  %v23347_v48 = vld [vmem:[#allocation7 + $0x128] sm:$0xff] }
 0x568   : > { %20690 = vmatprep.mubr.bf16.mxu1 %v24764_v36  ;;  %v24782_v36 = vld [vmem:[#allocation6 + $0xd0] sm:$0xff] }
 0x569   : > { %26738 = vst [vmem:[#allocation40_spill] sm:$0xff] %v24782_v36 }
 0x56f   : > { %20691 = vmatmul.mubr.bf16.gmra.mrb[36].mxu1 %v24767_v2  ;;  %v24785_v2 = vld [vmem:[#allocation6 + $0xd8] sm:$0xff] }
 0x570   : > { %20694 = vmatprep.mubr.bf16.mxu1 %v24770_v43  ;;  %26739 = vst [vmem:[#allocation41_spill] sm:$0xff] %v24785_v2  ;;  %v24788_v43 = vld [vmem:[#allocation6 + $0xe0] sm:$0xff] }
 0x571   : > { %26740 = vst [vmem:[#allocation42_spill] sm:$0xff] %v24788_v43 }
 0x577   : > { %20695 = vmatmul.mubr.bf16.gmra.mrb[40].mxu1 %v24773_v32  ;;  %v24791_v32 = vld [vmem:[#allocation6 + $0xe8] sm:$0xff] }
 0x578   : > { %20698 = vmatprep.mubr.bf16.mxu1 %v24776_v12  ;;  %26741 = vst [vmem:[#allocation43_spill] sm:$0xff] %v24791_v32  ;;  %v24794_v12 = vld [vmem:[#allocation6 + $0xf0] sm:$0xff] }
 0x579   : > { %26742 = vst [vmem:[#allocation44_spill] sm:$0xff] %v24794_v12 }
 0x57f   : > { %20699 = vmatmul.mubr.bf16.gmra.mrb[44].mxu1 %v24779_v3  ;;  %v24797_v3 = vld [vmem:[#allocation6 + $0xf8] sm:$0xff] }
 0x580   : > { %20702 = vmatprep.mubr.bf16.mxu1 %v24782_v36  ;;  %26743 = vst [vmem:[#allocation45_spill] sm:$0xff] %v24797_v3  ;;  %v24800_v36 = vld [vmem:[#allocation6 + $0x100] sm:$0xff] }
 0x581   : > { %26744 = vst [vmem:[#allocation46_spill] sm:$0xff] %v24800_v36 }
 0x587   : > { %20703 = vmatmul.mubr.bf16.gmra.mrb[48].mxu1 %v24785_v2  ;;  %v24803_v2 = vld [vmem:[#allocation6 + $0x108] sm:$0xff] }
 0x588   : > { %20706 = vmatprep.mubr.bf16.mxu1 %v24788_v43  ;;  %26745 = vst [vmem:[#allocation47_spill] sm:$0xff] %v24803_v2  ;;  %v24806_v43 = vld [vmem:[#allocation6 + $0x110] sm:$0xff] }
 0x589   : > { %26746 = vst [vmem:[#allocation48_spill] sm:$0xff] %v24806_v43 }
 0x58f   : > { %20707 = vmatmul.mubr.bf16.gmra.mrb[52].mxu1 %v24791_v32  ;;  %v24809_v32 = vld [vmem:[#allocation6 + $0x118] sm:$0xff] }
 0x590   : > { %20710 = vmatprep.mubr.bf16.mxu1 %v24794_v12  ;;  %26747 = vst [vmem:[#allocation49_spill] sm:$0xff] %v24809_v32  ;;  %v24812_v12 = vld [vmem:[#allocation6 + $0x120] sm:$0xff] }
 0x591   : > { %26748 = vst [vmem:[#allocation50_spill] sm:$0xff] %v24812_v12 }
 0x597   : > { %20711 = vmatmul.mubr.bf16.gmra.mrb[56].mxu1 %v24797_v3  ;;  %v24815_v3 = vld [vmem:[#allocation6 + $0x128] sm:$0xff] }
 0x598   : > { %20714 = vmatprep.mubr.bf16.mxu1 %v24800_v36  ;;  %26749 = vst [vmem:[#allocation51_spill] sm:$0xff] %v24815_v3  ;;  %v24818_v36 = vld [vmem:[#allocation6 + $0x130] sm:$0xff] }
 0x599   : > { %26750 = vst [vmem:[#allocation52_spill] sm:$0xff] %v24818_v36 }
 0x59f   : > { %20715 = vmatmul.mubr.bf16.gmra.mrb[60].mxu1 %v24803_v2  ;;  %v24821_v2 = vld [vmem:[#allocation6 + $0x138] sm:$0xff] }
 0x5a0   : > { %20718 = vmatprep.mubr.bf16.mxu1 %v24806_v43  ;;  %26751 = vst [vmem:[#allocation53_spill] sm:$0xff] %v24821_v2  ;;  %v24824_v43 = vld [vmem:[#allocation6 + $0x140] sm:$0xff] }
 0x5a1   : > { %26752 = vst [vmem:[#allocation54_spill] sm:$0xff] %v24824_v43 }
 0x5a7   : > { %20719 = vmatmul.mubr.bf16.gmra.mrb[64].mxu1 %v24809_v32  ;;  %v24827_v32 = vld [vmem:[#allocation6 + $0x148] sm:$0xff] }
 0x5a8   : > { %20722 = vmatprep.mubr.bf16.mxu1 %v24812_v12  ;;  %26753 = vst [vmem:[#allocation55_spill] sm:$0xff] %v24827_v32  ;;  %v24830_v12 = vld [vmem:[#allocation6 + $0x150] sm:$0xff] }
 0x5a9   : > { %26754 = vst [vmem:[#allocation56_spill] sm:$0xff] %v24830_v12 }
 0x5af   : > { %20723 = vmatmul.mubr.bf16.gmra.mrb[68].mxu1 %v24815_v3  ;;  %v24833_v3 = vld [vmem:[#allocation6 + $0x158] sm:$0xff] }
 0x5b0   : > { %20726 = vmatprep.mubr.bf16.mxu1 %v24818_v36  ;;  %26755 = vst [vmem:[#allocation57_spill] sm:$0xff] %v24833_v3  ;;  %v24836_v36 = vld [vmem:[#allocation6 + $0x160] sm:$0xff] }
 0x5b1   : > { %26756 = vst [vmem:[#allocation58_spill] sm:$0xff] %v24836_v36 }
 0x5b7   : > { %20727 = vmatmul.mubr.bf16.gmra.mrb[72].mxu1 %v24821_v2  ;;  %v24839_v2 = vld [vmem:[#allocation6 + $0x168] sm:$0xff] }
 0x5b8   : > { %20730 = vmatprep.mubr.bf16.mxu1 %v24824_v43  ;;  %26757 = vst [vmem:[#allocation59_spill] sm:$0xff] %v24839_v2  ;;  %v24842_v43 = vld [vmem:[#allocation6 + $0x170] sm:$0xff] }
 0x5b9   : > { %26758 = vst [vmem:[#allocation60_spill] sm:$0xff] %v24842_v43 }
 0x5bf   : > { %20731 = vmatmul.mubr.bf16.gmra.mrb[76].mxu1 %v24827_v32  ;;  %v24845_v32 = vld [vmem:[#allocation6 + $0x178] sm:$0xff] }
 0x5c0   : > { %20734 = vmatprep.mubr.bf16.mxu1 %v24830_v12  ;;  %26759 = vst [vmem:[#allocation61_spill] sm:$0xff] %v24845_v32  ;;  %v24853_v12 = vld [vmem:[#allocation7 + $0x20] sm:$0xff] }
 0x5c1   : > { %26760 = vst [vmem:[#allocation62_spill] sm:$0xff] %v24853_v12 }
 0x5c7   : > { %20735 = vmatmul.mubr.bf16.gmra.mrb[80].mxu1 %v24833_v3  ;;  %v6769_v3 = vld [vmem:[#allocation7 + $0x10] sm:$0xff] }
 0x5c8   : > { %20738 = vmatprep.mubr.bf16.mxu1 %v24836_v36  ;;  %v23051_v36 = vld [vmem:[%s26597_s3 + $0x188] sm:$0xff]  }
 0x5cf   : > { %20739 = vmatmul.mubr.bf16.gmra.mrb[84].mxu1 %v24839_v2  ;;  %v6770_v2 = vld [vmem:[#allocation7 + $0x18] sm:$0xff] }
 0x5d0   : > { %20742 = vmatprep.mubr.bf16.mxu1 %v24842_v43  ;;  %v23345_v43 = vld [vmem:[#allocation7 + $0x118] sm:$0xff] }
 0x5d7   : > { %20743 = vmatmul.mubr.bf16.gmra.mrb[88].mxu1 %v24845_v32  ;;  %v24876_v32 = vld [vmem:[#allocation7 + $0x38] sm:$0xff] }
 0x5d8   : > { %20746 = vmatprep.mubr.bf16.mxu1 %v24411_v51  ;;  %v23052_v51 = vld [vmem:[%s26597_s3 + $0x190] sm:$0xff]   ;;  %26763 = vst [vmem:[#allocation65_spill] sm:$0xff] %v24876_v32 }
 0x5df   : > { %20747 = vmatmul.mubr.bf16.gmra.mrb[92].mxu1 %v24592_v20  ;;  %v24863_v20 = vld [vmem:[#allocation7 + $0x28] sm:$0xff] }
 0x5e0   : > { %20766 = vmatprep.mubr.bf16.mxu1 %v6769_v3  ;;  %v23053_v3 = vld [vmem:[%s26597_s3 + $0x198] sm:$0xff]   ;;  %26761 = vst [vmem:[#allocation63_spill] sm:$0xff] %v24863_v20 }
 0x5e7   : > { %20767 = vmatmul.mubr.bf16.vlgmr.msra.gmra.mrb[0].mxu1 %v6770_v2  ;;  %v24866_v2 = vld [vmem:[#allocation7 + $0x30] sm:$0xff] }
 0x5e8   : > { %20863 = vmatpush3.bf16.msra.mxu1 %v24758_v18  ;;  %20770 = vmatprep.mubr.bf16.mxu1 %v24853_v12  ;;  %26762 = vst [vmem:[#allocation64_spill] sm:$0xff] %v24866_v2  ;;  %v23056_v18 = vld [vmem:[%s23776_s21 + $0x1a0] sm:$0xff]   ;;  %v23055_v12 = vld [vmem:[%s26597_s3 + $0x1a8] sm:$0xff]   ;;  %s26854_s21 = sld [smem:[#allocation24_spill]] }
 0x5e9   : > { %20864 = vmatprep.subr.bf16.mxu1 %v23051_v36  ;;  %20187 = vmatmul.mubr.bf16.gmra.mrb[208].mxu0 %v23056_v18  ;;  %v24888_v18 = vld [vmem:[#allocation7 + $0x50] sm:$0xff] }
 0x5ea   : > { %26766 = vst [vmem:[#allocation68_spill] sm:$0xff] %v24888_v18 }
 0x5ec   : > { %20865 = vmatpush3.bf16.msra.mxu1 %v23051_v36  ;;  %v23054_v36 = vld [vmem:[%s26597_s3 + $0x1a0] sm:$0xff]  }
 0x5ed   : > { %20866 = vmatprep.subr.bf16.mxu1 %v23052_v51 }
 0x5ee   : > { %p26857_p7 = scmp.ne.s32.totalorder %s26854_s21, 0 }
 0x5ef   : > { %20771 = vmatmul.mubr.bf16.gmra.mrb[4].mxu1 %v24863_v20  ;;  %v24879_v20 = vld [vmem:[#allocation7 + $0x40] sm:$0xff] }
 0x5f0   : > { %20774 = vmatprep.mubr.bf16.mxu1 %v24866_v2  ;;  %20867 = vmatpush3.bf16.msra.mxu1 %v23052_v51  ;;  %26764 = vst [vmem:[#allocation66_spill] sm:$0xff] %v24879_v20  ;;  %v23057_v51 = vld [vmem:[%s26597_s3 + $0x1b0] sm:$0xff]   ;;  %v23343_v2 = vld [vmem:[#allocation7 + $0x108] sm:$0xff]  ;;  %p23451_p8 = pnand %p23450_p4, %p26857_p7 }
 0x5f1   : > { %20868 = vmatprep.subr.bf16.mxu1 %v23053_v3 }
 0x5f2   : > { %p23452_p11 = pneg %p23451_p8 }
 0x5f4   : > { %20869 = vmatpush3.bf16.msra.mxu1 %v23053_v3  ;;  %v24885_v3 = vld [vmem:[#allocation7 + $0x48] sm:$0xff]  ;;  %p23459_p9 = pnand %p23458_p6, %p23452_p11 }
 0x5f5   : > { %20870 = vmatprep.subr.bf16.mxu1 %v23054_v36  ;;  %26765 = vst [vmem:[#allocation67_spill] sm:$0xff] %v24885_v3 }
 0x5f7   : > { %20775 = vmatmul.mubr.bf16.gmra.mrb[8].mxu1 %v24876_v32  ;;  %v24891_v32 = vld [vmem:[#allocation7 + $0x58] sm:$0xff] }
 0x5f8   : > { %20778 = vmatprep.mubr.bf16.mxu1 %v24879_v20  ;;  %20871 = vmatpush3.bf16.msra.mxu1 %v23054_v36  ;;  %26767 = vst [vmem:[#allocation69_spill] sm:$0xff] %v24891_v32  ;;  %v24894_v36 = vld [vmem:[#allocation7 + $0x60] sm:$0xff] }
 0x5f9   : > { %20872 = vmatprep.subr.bf16.mxu1 %v23055_v12  ;;  %26768 = vst [vmem:[#allocation70_spill] sm:$0xff] %v24894_v36  ;;  %v24939_v20 = vld [vmem:[#allocation7 + $0xc0] sm:$0xff] }
 0x5fa   : > { %26780 = vst [vmem:[#allocation82_spill] sm:$0xff] %v24939_v20 }
 0x5fc   : > { %20873 = vmatpush3.bf16.msra.mxu1 %v23055_v12  ;;  %v23058_v12 = vld [vmem:[%s26597_s3 + $0x1b8] sm:$0xff]  }
 0x5fd   : > { %20874 = vmatprep.subr.bf16.mxu1 %v23057_v51 }
 0x5ff   : > { %20779 = vmatmul.mubr.bf16.gmra.mrb[12].mxu1 %v24885_v3  ;;  %v24900_v3 = vld [vmem:[#allocation7 + $0x68] sm:$0xff] }
 0x600   : > { %20782 = vmatprep.mubr.bf16.mxu1 %v24888_v18  ;;  %20875 = vmatpush3.bf16.msra.mxu1 %v23057_v51  ;;  %26769 = vst [vmem:[#allocation71_spill] sm:$0xff] %v24900_v3  ;;  %v24903_v18 = vld [vmem:[#allocation7 + $0x70] sm:$0xff]  ;;  %v24906_v51 = vld [vmem:[#allocation7 + $0x78] sm:$0xff] }
 0x601   : > { %20876 = vmatprep.subr.bf16.mxu1 %v23058_v12  ;;  %26770 = vst [vmem:[#allocation72_spill] sm:$0xff] %v24903_v18  ;;  %26771 = vst [vmem:[#allocation73_spill] sm:$0xff] %v24906_v51 }
 0x604   : > { %20877 = vmatpush3.bf16.msra.mxu1 %v23058_v12  ;;  %v24915_v12 = vld [vmem:[#allocation7 + $0x90] sm:$0xff] }
 0x605   : > { %26774 = vst [vmem:[#allocation76_spill] sm:$0xff] %v24915_v12 }
 0x607   : > { %20783 = vmatmul.mubr.bf16.gmra.mrb[16].mxu1 %v24891_v32  ;;  %v24909_v32 = vld [vmem:[#allocation7 + $0x80] sm:$0xff] }
 0x608   : > { %20786 = vmatprep.mubr.bf16.mxu1 %v24894_v36  ;;  %26772 = vst [vmem:[#allocation74_spill] sm:$0xff] %v24909_v32  ;;  %v24912_v36 = vld [vmem:[#allocation7 + $0x88] sm:$0xff] }
 0x609   : > { %26773 = vst [vmem:[#allocation75_spill] sm:$0xff] %v24912_v36 }
 0x60f   : > { %20787 = vmatmul.mubr.bf16.gmra.mrb[20].mxu1 %v24900_v3  ;;  %v24936_v3 = vld [vmem:[#allocation7 + $0xb8] sm:$0xff] }
 0x610   : > { %20790 = vmatprep.mubr.bf16.mxu1 %v24903_v18  ;;  %v24921_v18 = vld [vmem:[%s26597_s3 + $0x1c0] sm:$0xff]   ;;  %26779 = vst [vmem:[#allocation81_spill] sm:$0xff] %v24936_v3 }
 0x611   : > { %20974 = vmatprep.subr.bf16.mxu1 %v24921_v18 }
 0x617   : > { %20791 = vmatmul.mubr.bf16.gmra.mrb[24].mxu1 %v24906_v51  ;;  %v24924_v51 = vld [vmem:[#allocation7 + $0x98] sm:$0xff] }
 0x618   : > { %20794 = vmatprep.mubr.bf16.mxu1 %v24909_v32  ;;  %26775 = vst [vmem:[#allocation77_spill] sm:$0xff] %v24924_v51  ;;  %v24927_v32 = vld [vmem:[#allocation7 + $0xa0] sm:$0xff] }
 0x619   : > { %26776 = vst [vmem:[#allocation78_spill] sm:$0xff] %v24927_v32 }
 0x61f   : > { %20795 = vmatmul.mubr.bf16.gmra.mrb[28].mxu1 %v24912_v36  ;;  %v24930_v36 = vld [vmem:[#allocation7 + $0xa8] sm:$0xff] }
 0x620   : > { %20798 = vmatprep.mubr.bf16.mxu1 %v24915_v12  ;;  %26777 = vst [vmem:[#allocation79_spill] sm:$0xff] %v24930_v36  ;;  %v24933_v12 = vld [vmem:[#allocation7 + $0xb0] sm:$0xff] }
 0x621   : > { %26778 = vst [vmem:[#allocation80_spill] sm:$0xff] %v24933_v12 }
 0x627   : > { %20799 = vmatmul.mubr.bf16.gmra.mrb[32].mxu1 %v24924_v51  ;;  %v24942_v51 = vld [vmem:[#allocation7 + $0xc8] sm:$0xff] }
 0x628   : > { %20802 = vmatprep.mubr.bf16.mxu1 %v24927_v32  ;;  %26781 = vst [vmem:[#allocation83_spill] sm:$0xff] %v24942_v51  ;;  %v24945_v32 = vld [vmem:[#allocation7 + $0xd0] sm:$0xff] }
 0x629   : > { %26782 = vst [vmem:[#allocation84_spill] sm:$0xff] %v24945_v32 }
 0x62f   : > { %20803 = vmatmul.mubr.bf16.gmra.mrb[36].mxu1 %v24930_v36  ;;  %v24948_v36 = vld [vmem:[#allocation7 + $0xd8] sm:$0xff] }
 0x630   : > { %20806 = vmatprep.mubr.bf16.mxu1 %v24933_v12  ;;  %26783 = vst [vmem:[#allocation85_spill] sm:$0xff] %v24948_v36  ;;  %v24951_v12 = vld [vmem:[#allocation7 + $0xe0] sm:$0xff] }
 0x631   : > { %26784 = vst [vmem:[#allocation86_spill] sm:$0xff] %v24951_v12 }
 0x637   : > { %20807 = vmatmul.mubr.bf16.gmra.mrb[40].mxu1 %v24936_v3  ;;  %v24954_v3 = vld [vmem:[#allocation7 + $0xe8] sm:$0xff] }
 0x638   : > { %20810 = vmatprep.mubr.bf16.mxu1 %v24939_v20  ;;  %26785 = vst [vmem:[#allocation87_spill] sm:$0xff] %v24954_v3  ;;  %v24957_v20 = vld [vmem:[#allocation7 + $0xf0] sm:$0xff] }
 0x639   : > { %26786 = vst [vmem:[#allocation88_spill] sm:$0xff] %v24957_v20 }
 0x63f   : > { %20811 = vmatmul.mubr.bf16.gmra.mrb[44].mxu1 %v24942_v51  ;;  %v24960_v51 = vld [vmem:[#allocation7 + $0xf8] sm:$0xff] }
 0x640   : > { %20814 = vmatprep.mubr.bf16.mxu1 %v24945_v32  ;;  %26787 = vst [vmem:[#allocation89_spill] sm:$0xff] %v24960_v51  ;;  %v23342_v32 = vld [vmem:[#allocation7 + $0x100] sm:$0xff] }
 0x647   : > { %20815 = vmatmul.mubr.bf16.gmra.mrb[48].mxu1 %v24948_v36  ;;  %v23344_v36 = vld [vmem:[#allocation7 + $0x110] sm:$0xff] }
 0x648   : > { %20818 = vmatprep.mubr.bf16.mxu1 %v24951_v12  ;;  %v23346_v12 = vld [vmem:[#allocation7 + $0x120] sm:$0xff] }
 0x64f   : > { %20819 = vmatmul.mubr.bf16.gmra.mrb[52].mxu1 %v24954_v3  ;;  %v23348_v3 = vld [vmem:[#allocation7 + $0x130] sm:$0xff] }
 0x650   : > { %20822 = vmatprep.mubr.bf16.mxu1 %v24957_v20  ;;  %v23350_v20 = vld [vmem:[#allocation7 + $0x140] sm:$0xff] }
 0x657   : > { %20823 = vmatmul.mubr.bf16.gmra.mrb[56].mxu1 %v24960_v51  ;;  %v23352_v51 = vld [vmem:[#allocation7 + $0x150] sm:$0xff] }
 0x658   : > { %20826 = vmatprep.mubr.bf16.mxu1 %v23342_v32  ;;  %v23353_v32 = vld [vmem:[#allocation7 + $0x158] sm:$0xff] }
 0x65f   : > { %20827 = vmatmul.mubr.bf16.gmra.mrb[60].mxu1 %v23343_v2  ;;  %v23354_v2 = vld [vmem:[#allocation7 + $0x160] sm:$0xff] }
 0x660   : > { %20830 = vmatprep.mubr.bf16.mxu1 %v23344_v36  ;;  %v23355_v36 = vld [vmem:[#allocation7 + $0x168] sm:$0xff] }
 0x667   : > { %20831 = vmatmul.mubr.bf16.gmra.mrb[64].mxu1 %v23345_v43  ;;  %v23356_v43 = vld [vmem:[#allocation7 + $0x170] sm:$0xff] }
 0x668   : > { %20834 = vmatprep.mubr.bf16.mxu1 %v23346_v12  ;;  %v23357_v12 = vld [vmem:[#allocation7 + $0x178] sm:$0xff] }
 0x66f   : > { %20835 = vmatmul.mubr.bf16.gmra.mrb[68].mxu1 %v23347_v48 }
 0x670   : > { %20838 = vmatprep.mubr.bf16.mxu1 %v23348_v3 }
 0x677   : > { %20839 = vmatmul.mubr.bf16.gmra.mrb[72].mxu1 %v23349_v61  ;;  %v23061_v61 = vld [vmem:[%s26597_s3 + $0x1d0] sm:$0xff]  }
 0x678   : > { %20842 = vmatprep.mubr.bf16.mxu1 %v23350_v20  ;;  %v23060_v20 = vld [vmem:[%s26597_s3 + $0x1c8] sm:$0xff]  }
 0x67f   : > { %20843 = vmatmul.mubr.bf16.gmra.mrb[76].mxu1 %v23351_v23 }
 0x680   : > { %20846 = vmatprep.mubr.bf16.mxu1 %v23352_v51  ;;  %v2444_v51 = vshrl.u32 %v24729_v47, 16 }
 0x687   : > { %20847 = vmatmul.mubr.bf16.gmra.mrb[80].mxu1 %v23353_v32 }
 0x688   : > { %20850 = vmatprep.mubr.bf16.mxu1 %v23354_v2 }
 0x68f   : > { %20851 = vmatmul.mubr.bf16.gmra.mrb[84].mxu1 %v23355_v36 }
 0x690   : > { %20854 = vmatprep.mubr.bf16.mxu1 %v23356_v43 }
 0x697   : > { %20855 = vmatmul.mubr.bf16.gmra.mrb[88].mxu1 %v23357_v12  ;;  %v26805_v12 = vld [vmem:[#allocation45_spill] sm:$0xff] }
 0x698   : > { %20858 = vmatprep.mubr.bf16.mxu1 %v24423_v8  ;;  %v23062_v8 = vld [vmem:[%s26597_s3 + $0x1d8] sm:$0xff]  }
 0x69f   : > { %20859 = vmatmul.mubr.bf16.gmra.mrb[92].mxu1 %v24586_v0 }
 0x6a0   : > { %20878 = vmatprep.mubr.bf16.mxu1 %v24503_v53  ;;  %v23063_v53 = vld [vmem:[%s26597_s3 + $0x1e0] sm:$0xff]  }
 0x6a7   : > { %20879 = vmatmul.mubr.bf16.vlgmr.msra.gmra.mrb[0].mxu1 %v24512_v63  ;;  %v23064_v63 = vld [vmem:[%s26597_s3 + $0x1e8] sm:$0xff]  }
 0x6a8   : > { %20975 = vmatpush3.bf16.msra.mxu1 %v24921_v18  ;;  %20882 = vmatprep.mubr.bf16.mxu1 %v24515_v30  ;;  %v23065_v30 = vld [vmem:[%s26597_s3 + $0x1f0] sm:$0xff]  }
 0x6a9   : > { %20976 = vmatprep.subr.bf16.mxu1 %v23060_v20 }
 0x6ac   : > { %20977 = vmatpush3.bf16.msra.mxu1 %v23060_v20  ;;  %v26806_v20 = vld [vmem:[#allocation46_spill] sm:$0xff] }
 0x6ad   : > { %20978 = vmatprep.subr.bf16.mxu1 %v23061_v61 }
 0x6af   : > { %20883 = vmatmul.mubr.bf16.gmra.mrb[4].mxu1 %v24524_v5 }
 0x6b0   : > { %20886 = vmatprep.mubr.bf16.mxu1 %v24527_v44  ;;  %20979 = vmatpush3.bf16.msra.mxu1 %v23061_v61  ;;  %v23358_v44 = vld [vmem:[%s26596_s2] ss:$0 sm:$0xff] }
 0x6b1   : > { %20980 = vmatprep.subr.bf16.mxu1 %v23062_v8  ;;  %v23077_v61 = vld [vmem:[#allocation8 + $0x10] sm:$0xff]  }
 0x6b4   : > { %20981 = vmatpush3.bf16.msra.mxu1 %v23062_v8  ;;  %v26807_v8 = vld [vmem:[#allocation47_spill] sm:$0xff] }
 0x6b5   : > { %20982 = vmatprep.subr.bf16.mxu1 %v23063_v53 }
 0x6b7   : > { %20887 = vmatmul.mubr.bf16.gmra.mrb[8].mxu1 %v24533_v37 }
 0x6b8   : > { %20890 = vmatprep.mubr.bf16.mxu1 %v24536_v60  ;;  %20983 = vmatpush3.bf16.msra.mxu1 %v23063_v53  ;;  %v26808_v53 = vld [vmem:[#allocation48_spill] sm:$0xff] }
 0x6b9   : > { %20984 = vmatprep.subr.bf16.mxu1 %v23064_v63 }
 0x6bc   : > { %20985 = vmatpush3.bf16.msra.mxu1 %v23064_v63  ;;  %v1434_v5 = vpop.f32.mrb[208].mxu0  ;;  %v26809_v63 = vld [vmem:[#allocation49_spill] sm:$0xff] }
 0x6bd   : > { %20986 = vmatprep.subr.bf16.mxu1 %v23065_v30  ;;  %v1764_v37 = vadd.f32 %v23358_v44, %v1434_v5  ;;  %v20188_v60 = vpop.f32.mrb[209].mxu0  ;;  %v26811_v5 = vld [vmem:[#allocation51_spill] sm:$0xff] }
 0x6be   : > { %v1437_v0 = vpop.f32.mrb[210].mxu0  ;;  %v26814_v60 = vld [vmem:[#allocation54_spill] sm:$0xff] }
 0x6bf   : > { %20891 = vmatmul.mubr.bf16.gmra.mrb[12].mxu1 %v24539_v22  ;;  %v1870_v23 = vmax.f32 %v1764_v37, 0.0  ;;  %v1765_v48 = vadd.f32 %v23358_v44, %v1437_v0  ;;  %v23066_v22 = vld [vmem:[%s26597_s3 + $0x1f8] sm:$0xff]   ;;  %v26812_v44 = vld [vmem:[#allocation52_spill] sm:$0xff]  ;;  %v26813_v37 = vld [vmem:[#allocation53_spill] sm:$0xff] }
 0x6c0   : > { %20894 = vmatprep.mubr.bf16.mxu1 %v24543_v57  ;;  %20987 = vmatpush3.bf16.msra.mxu1 %v23065_v30  ;;  %v20189_v57 = vpop.f32.mrb[211].mxu0  ;;  %v26810_v30 = vld [vmem:[#allocation50_spill] sm:$0xff]  ;;  %v26815_v0 = vld [vmem:[#allocation55_spill] sm:$0xff] }
 0x6c1   : > { %v1871_v3 = vmax.f32 %v1765_v48, 0.0  ;;  %20988 = vmatprep.subr.bf16.mxu1 %v23066_v22  ;;  %v26817_v48 = vld [vmem:[#allocation57_spill] sm:$0xff] }
 0x6c2   : > { %v23078_v57 = vld [vmem:[#allocation8 + $0x18] sm:$0xff]  }
 0x6c3   : > { %v1924_v18 = vpack.c.bf16 %v1871_v3, %v1870_v23  ;;  %v26816_v23 = vld [vmem:[#allocation56_spill] sm:$0xff]  ;;  %v26819_v3 = vld [vmem:[#allocation59_spill] sm:$0xff] }
 0x6c4   : > { %20989 = vmatpush3.bf16.msra.mxu1 %v23066_v22  ;;  %v26818_v22 = vld [vmem:[#allocation58_spill] sm:$0xff] }
 0x6c5   : > { %1977 = vst [vmem:[#allocation3 + $0x1a0] sm:$0xff] %v1924_v18  ;;  %v26820_v18 = vld [vmem:[#allocation60_spill] sm:$0xff] }
 0x6c7   : > { %20895 = vmatmul.mubr.bf16.gmra.mrb[16].mxu1 %v24552_v41 }
 0x6c8   : > { %20898 = vmatprep.mubr.bf16.mxu1 %v24555_v14 }
 0x6cc   : > { %v2030_v41 = vld [vmem:[#allocation3 + $0x1a0] sm:$0x1] }
 0x6cd   : > { %v2608_v14 = vld [vmem:[#allocation3 + $0x1a0] sm:$0x1]  ;;  %v2448_v32 = vshll.u32 %v2030_v41, 16 }
 0x6ce   : > { %v2766_v2 = vrot.slane %v2608_v14, 1  ;;  %v26821_v41 = vld [vmem:[#allocation61_spill] sm:$0xff] }
 0x6cf   : > { %20899 = vmatmul.mubr.bf16.gmra.mrb[20].mxu1 %v24558_v54  ;;  %v23067_v54 = vld [vmem:[%s26597_s3 + $0x200] sm:$0xff]   ;;  %v2450_v36 = vrot.slane %v2448_v32, 1  ;;  %v23360_v14 = vld [vmem:[#allocation6 + $0x180] sm:$0xff] }
 0x6d0   : > { %20902 = vmatprep.mubr.bf16.mxu1 %v24561_v42  ;;  %v2446_v42 = vor.u32 %v2444_v51, %v24736_v28  ;;  %21086 = vmatprep.subr.bf16.mxu1 %v23067_v54  ;;  %v26804_v28 = vld [vmem:[#allocation44_spill] sm:$0xff]  ;;  %v26822_v51 = vld [vmem:[#allocation30_spill] sm:$0xff]  ;;  %v26823_v32 = vld [vmem:[#allocation29_spill] sm:$0xff] }
 0x6d2   : > { %v25018_v43 = vsel %vm2031_vm2, %v2446_v42, %v2450_v36  ;;  %v26826_v42 = vld [vmem:[#allocation64_spill] sm:$0xff]  ;;  %v26827_v36 = vld [vmem:[#allocation65_spill] sm:$0xff] }
 0x6d7   : > { %20903 = vmatmul.mubr.bf16.gmra.mrb[24].mxu1 %v24564_v59  ;;  %v26788_v59 = vrot.slane %v24729_v47, 1 }
 0x6d8   : > { %20906 = vmatprep.mubr.bf16.mxu1 %v24570_v62 }
 0x6d9   : > { %v25015_v62 = vsel %vm2662_vm1, %v26788_v59, %v2766_v2  ;;  %v26824_v2 = vld [vmem:[#allocation62_spill] sm:$0xff] }
 0x6da   : > { %v26828_v59 = vld [vmem:[#allocation66_spill] sm:$0xff] }
 0x6df   : > { %20907 = vmatmul.mubr.bf16.gmra.mrb[28].mxu1 %v24594_v24  ;;  %v7623_v24 = vld [vmem:[#allocation3 + $0x140] sm:$0xff] }
 0x6e0   : > { %20910 = vmatprep.mubr.bf16.mxu1 %v24597_v25  ;;  %v7624_v25 = vld [vmem:[#allocation3 + $0x148] sm:$0xff] }
 0x6e7   : > { %20911 = vmatmul.mubr.bf16.gmra.mrb[32].mxu1 %v24600_v38  ;;  %v7625_v38 = vld [vmem:[#allocation3 + $0x150] sm:$0xff] }
 0x6e8   : > { %20914 = vmatprep.mubr.bf16.mxu1 %v24603_v16  ;;  %v7626_v16 = vld [vmem:[#allocation3 + $0x158] sm:$0xff] }
 0x6ef   : > { %20915 = vmatmul.mubr.bf16.gmra.mrb[36].mxu1 %v24606_v56  ;;  %v7627_v56 = vld [vmem:[#allocation3 + $0x160] sm:$0xff] }
 0x6f0   : > { %20918 = vmatprep.mubr.bf16.mxu1 %v24609_v49  ;;  %v7628_v49 = vld [vmem:[#allocation3 + $0x168] sm:$0xff] }
 0x6f7   : > { %20919 = vmatmul.mubr.bf16.gmra.mrb[40].mxu1 %v24612_v19  ;;  %v7629_v19 = vld [vmem:[#allocation3 + $0x170] sm:$0xff] }
 0x6f8   : > { %20922 = vmatprep.mubr.bf16.mxu1 %v24615_v40  ;;  %v7630_v40 = vld [vmem:[#allocation3 + $0x178] sm:$0xff] }
 0x6ff   : > { %20923 = vmatmul.mubr.bf16.gmra.mrb[44].mxu1 %v24618_v58  ;;  %v7631_v58 = vld [vmem:[#allocation3 + $0x180] sm:$0xff] }
 0x700   : > { %20926 = vmatprep.mubr.bf16.mxu1 %v24621_v13  ;;  %v23359_v13 = vld [vmem:[#allocation3 + $0x188] sm:$0xff] }
 0x707   : > { %20927 = vmatmul.mubr.bf16.gmra.mrb[48].mxu1 %v24624_v35  ;;  %v23068_v35 = vld [vmem:[%s26597_s3 + $0x208] sm:$0xff]  }
 0x708   : > { %20930 = vmatprep.mubr.bf16.mxu1 %v24627_v55  ;;  %v23073_v55 = vld [vmem:[#allocation8] sm:$0xff]  }
 0x709   : > { %21198 = vmatprep.subr.bf16.mxu0 %v23073_v55 }
 0x70a   : > { %21199 = vmatpush3.bf16.msra.mxu0 %v23073_v55  ;;  %v23080_v55 = vld [vmem:[#allocation8 + $0x28] sm:$0xff]  }
 0x70f   : > { %20931 = vmatmul.mubr.bf16.gmra.mrb[52].mxu1 %v24630_v10  ;;  %v23069_v10 = vld [vmem:[%s26597_s3 + $0x210] sm:$0xff]  }
 0x710   : > { %20934 = vmatprep.mubr.bf16.mxu1 %v24633_v31  ;;  %v23071_v31 = vld [vmem:[%s26597_s3 + $0x220] sm:$0xff]  }
 0x717   : > { %20935 = vmatmul.mubr.bf16.gmra.mrb[56].mxu1 %v24636_v52  ;;  %v23072_v52 = vld [vmem:[%s26597_s3 + $0x228] sm:$0xff]  }
 0x718   : > { %20938 = vmatprep.mubr.bf16.mxu1 %v24639_v7  ;;  %v23074_v7 = vld [vmem:[%s26597_s3 + $0x230] sm:$0xff]  }
 0x71f   : > { %20939 = vmatmul.mubr.bf16.gmra.mrb[60].mxu1 %v24642_v29  ;;  %v23075_v29 = vld [vmem:[%s26597_s3 + $0x238] sm:$0xff]  }
 0x720   : > { %20942 = vmatprep.mubr.bf16.mxu1 %v24645_v11  ;;  %v26789_v11 = vld [vmem:[#allocation26_spill] sm:$0xff] }
 0x727   : > { %20943 = vmatmul.mubr.bf16.gmra.mrb[64].mxu1 %v24648_v39  ;;  %v26790_v39 = vld [vmem:[#allocation27_spill] sm:$0xff] }
 0x728   : > { %20946 = vmatprep.mubr.bf16.mxu1 %v24651_v1  ;;  %v26791_v1 = vld [vmem:[#allocation31_spill] sm:$0xff] }
 0x72f   : > { %20947 = vmatmul.mubr.bf16.gmra.mrb[68].mxu1 %v24654_v27  ;;  %v26792_v27 = vld [vmem:[#allocation32_spill] sm:$0xff] }
 0x730   : > { %20950 = vmatprep.mubr.bf16.mxu1 %v7623_v24  ;;  %v26829_v24 = vld [vmem:[#allocation67_spill] sm:$0xff] }
 0x737   : > { %20951 = vmatmul.mubr.bf16.gmra.mrb[72].mxu1 %v7624_v25  ;;  %v26830_v25 = vld [vmem:[#allocation68_spill] sm:$0xff] }
 0x738   : > { %20954 = vmatprep.mubr.bf16.mxu1 %v7625_v38  ;;  %v23079_v38 = vld [vmem:[#allocation8 + $0x20] sm:$0xff]  }
 0x73f   : > { %20955 = vmatmul.mubr.bf16.gmra.mrb[76].mxu1 %v7626_v16  ;;  %v26831_v16 = vld [vmem:[#allocation69_spill] sm:$0xff] }
 0x740   : > { %20958 = vmatprep.mubr.bf16.mxu1 %v7627_v56  ;;  %v26833_v56 = vld [vmem:[#allocation71_spill] sm:$0xff] }
 0x747   : > { %20959 = vmatmul.mubr.bf16.gmra.mrb[80].mxu1 %v7628_v49  ;;  %v26834_v49 = vld [vmem:[#allocation72_spill] sm:$0xff] }
 0x748   : > { %20962 = vmatprep.mubr.bf16.mxu1 %v7629_v19  ;;  %v26835_v19 = vld [vmem:[#allocation73_spill] sm:$0xff] }
 0x74f   : > { %20963 = vmatmul.mubr.bf16.gmra.mrb[84].mxu1 %v7630_v40  ;;  %v26836_v40 = vld [vmem:[#allocation74_spill] sm:$0xff] }
 0x750   : > { %20966 = vmatprep.mubr.bf16.mxu1 %v7631_v58  ;;  %v26837_v58 = vld [vmem:[#allocation75_spill] sm:$0xff] }
 0x757   : > { %20967 = vmatmul.mubr.bf16.gmra.mrb[88].mxu1 %v23359_v13  ;;  %v26838_v13 = vld [vmem:[#allocation76_spill] sm:$0xff] }
 0x758   : > { %20970 = vmatprep.mubr.bf16.mxu1 %v24550_v6  ;;  %v23070_v6 = vld [vmem:[%s26597_s3 + $0x218] sm:$0xff]  }
 0x75f   : > { %20971 = vmatmul.mubr.bf16.gmra.mrb[92].mxu1 %v24729_v47  ;;  %v26803_v47 = vld [vmem:[#allocation43_spill] sm:$0xff] }
 0x760   : > { %20990 = vmatprep.mubr.bf16.mxu1 %v24670_v15  ;;  %v23076_v15 = vld [vmem:[#allocation8 + $0x8] sm:$0xff]  }
 0x761   : > { %21200 = vmatprep.subr.bf16.mxu0 %v23076_v15 }
 0x762   : > { %21201 = vmatpush3.bf16.msra.mxu0 %v23076_v15  ;;  %v26850_v15 = vld [vmem:[#allocation88_spill] sm:$0xff] }
 0x763   : > { %21202 = vmatprep.subr.bf16.mxu0 %v23077_v61 }
 0x766   : > { %21203 = vmatpush3.bf16.msra.mxu0 %v23077_v61  ;;  %v9261_v61 = vld [vmem:[#allocation7 + $0x150] sm:$0xff] }
 0x767   : > { %20991 = vmatmul.mubr.bf16.vlgmr.msra.gmra.mrb[0].mxu1 %v24680_v17  ;;  %v26793_v17 = vld [vmem:[#allocation33_spill] sm:$0xff]  ;;  %21204 = vmatprep.subr.bf16.mxu0 %v23078_v57 }
 0x768   : > { %21087 = vmatpush3.bf16.msra.mxu1 %v23067_v54  ;;  %20994 = vmatprep.mubr.bf16.mxu1 %v24683_v50  ;;  %v26794_v50 = vld [vmem:[#allocation34_spill] sm:$0xff]  ;;  %v26825_v54 = vld [vmem:[#allocation63_spill] sm:$0xff] }
 0x769   : > { %21088 = vmatprep.subr.bf16.mxu1 %v23068_v35 }
 0x76a   : > { %21205 = vmatpush3.bf16.msra.mxu0 %v23078_v57 }
 0x76b   : > { %21206 = vmatprep.subr.bf16.mxu0 %v23079_v38 }
 0x76c   : > { %21089 = vmatpush3.bf16.msra.mxu1 %v23068_v35  ;;  %v26839_v35 = vld [vmem:[#allocation77_spill] sm:$0xff] }
 0x76d   : > { %21090 = vmatprep.subr.bf16.mxu1 %v23069_v10 }
 0x76e   : > { %21207 = vmatpush3.bf16.msra.mxu0 %v23079_v38  ;;  %v25142_v38 = vld [vmem:[%s26598_s4] ss:$0 sm:$0xff] }
 0x76f   : > { %20995 = vmatmul.mubr.bf16.gmra.mrb[4].mxu1 %v24692_v45  ;;  %v26795_v45 = vld [vmem:[#allocation35_spill] sm:$0xff]  ;;  %21208 = vmatprep.subr.bf16.mxu0 %v23080_v55 }
 0x770   : > { %20998 = vmatprep.mubr.bf16.mxu1 %v24695_v4  ;;  %21091 = vmatpush3.bf16.msra.mxu1 %v23069_v10  ;;  %v26796_v4 = vld [vmem:[#allocation36_spill] sm:$0xff]  ;;  %v26840_v10 = vld [vmem:[#allocation78_spill] sm:$0xff] }
 0x771   : > { %21092 = vmatprep.subr.bf16.mxu1 %v23070_v6 }
 0x772   : > { %21209 = vmatpush3.bf16.msra.mxu0 %v23080_v55 }
 0x774   : > { %21093 = vmatpush3.bf16.msra.mxu1 %v23070_v6  ;;  %v26841_v6 = vld [vmem:[#allocation79_spill] sm:$0xff] }
 0x775   : > { %21094 = vmatprep.subr.bf16.mxu1 %v23071_v31 }
 0x777   : > { %20999 = vmatmul.mubr.bf16.gmra.mrb[8].mxu1 %v24701_v46  ;;  %v26797_v46 = vld [vmem:[#allocation37_spill] sm:$0xff] }
 0x778   : > { %21002 = vmatprep.mubr.bf16.mxu1 %v24704_v21  ;;  %21095 = vmatpush3.bf16.msra.mxu1 %v23071_v31  ;;  %v26798_v21 = vld [vmem:[#allocation38_spill] sm:$0xff]  ;;  %v26842_v31 = vld [vmem:[#allocation80_spill] sm:$0xff] }
 0x779   : > { %21096 = vmatprep.subr.bf16.mxu1 %v23072_v52 }
 0x77c   : > { %21097 = vmatpush3.bf16.msra.mxu1 %v23072_v52  ;;  %v26843_v52 = vld [vmem:[#allocation81_spill] sm:$0xff] }
 0x77d   : > { %21098 = vmatprep.subr.bf16.mxu1 %v23074_v7 }
 0x77f   : > { %21003 = vmatmul.mubr.bf16.gmra.mrb[12].mxu1 %v24707_v33  ;;  %v26799_v33 = vld [vmem:[#allocation39_spill] sm:$0xff] }
 0x780   : > { %21006 = vmatprep.mubr.bf16.mxu1 %v24710_v34  ;;  %21099 = vmatpush3.bf16.msra.mxu1 %v23074_v7  ;;  %v26800_v34 = vld [vmem:[#allocation40_spill] sm:$0xff]  ;;  %v26844_v7 = vld [vmem:[#allocation82_spill] sm:$0xff] }
 0x781   : > { %21100 = vmatprep.subr.bf16.mxu1 %v23075_v29 }
 0x784   : > { %21101 = vmatpush3.bf16.msra.mxu1 %v23075_v29  ;;  %v26845_v29 = vld [vmem:[#allocation83_spill] sm:$0xff] }
 0x787   : > { %21007 = vmatmul.mubr.bf16.gmra.mrb[16].mxu1 %v24716_v9  ;;  %v26801_v9 = vld [vmem:[#allocation41_spill] sm:$0xff] }
 0x788   : > { %21010 = vmatprep.mubr.bf16.mxu1 %v24719_v26  ;;  %v26802_v26 = vld [vmem:[#allocation42_spill] sm:$0xff] }
 0x78f   : > { %21011 = vmatmul.mubr.bf16.gmra.mrb[20].mxu1 %v26789_v11  ;;  %v26846_v11 = vld [vmem:[#allocation84_spill] sm:$0xff] }
 0x790   : > { %21014 = vmatprep.mubr.bf16.mxu1 %v26790_v39  ;;  %v26847_v39 = vld [vmem:[#allocation85_spill] sm:$0xff] }
 0x797   : > { %21015 = vmatmul.mubr.bf16.gmra.mrb[24].mxu1 %v26791_v1  ;;  %v26848_v1 = vld [vmem:[#allocation86_spill] sm:$0xff] }
 0x798   : > { %21018 = vmatprep.mubr.bf16.mxu1 %v26792_v27  ;;  %v26849_v27 = vld [vmem:[#allocation87_spill] sm:$0xff] }
 0x79f   : > { %21019 = vmatmul.mubr.bf16.gmra.mrb[28].mxu1 %v26793_v17  ;;  %v26851_v17 = vld [vmem:[#allocation89_spill] sm:$0xff] }
 0x7a0   : > { %21022 = vmatprep.mubr.bf16.mxu1 %v26794_v50  ;;  %v9251_v50 = vld [vmem:[#allocation7 + $0x100] sm:$0xff] }
 0x7a7   : > { %21023 = vmatmul.mubr.bf16.gmra.mrb[32].mxu1 %v26795_v45  ;;  %v9252_v45 = vld [vmem:[#allocation7 + $0x108] sm:$0xff] }
 0x7a8   : > { %21026 = vmatprep.mubr.bf16.mxu1 %v26796_v4  ;;  %v9253_v4 = vld [vmem:[#allocation7 + $0x110] sm:$0xff] }
 0x7af   : > { %21027 = vmatmul.mubr.bf16.gmra.mrb[36].mxu1 %v26797_v46  ;;  %v23528_v46 = vmov 0  }
 0x7b0   : > { %21030 = vmatprep.mubr.bf16.mxu1 %v26798_v21  ;;  %483 = vst [vmem:[#allocation4] sm:$0xff] %v23528_v46  ;;  %484 = vst [vmem:[#allocation4 + $0x8] sm:$0xff] %v23528_v46  ;;  %v9254_v21 = vld [vmem:[#allocation7 + $0x118] sm:$0xff] }
 0x7b1   : > { %485 = vst [vmem:[#allocation4 + $0x10] sm:$0xff] %v23528_v46  ;;  %486 = vst [vmem:[#allocation4 + $0x18] sm:$0xff] %v23528_v46 }
 0x7b2   : > { %487 = vst [vmem:[#allocation4 + $0x20] sm:$0xff] %v23528_v46  ;;  %488 = vst [vmem:[#allocation4 + $0x28] sm:$0xff] %v23528_v46 }
 0x7b3   : > { %489 = vst [vmem:[#allocation4 + $0x30] sm:$0xff] %v23528_v46  ;;  %490 = vst [vmem:[#allocation4 + $0x38] sm:$0xff] %v23528_v46 }
 0x7b4   : > { %491 = vst [vmem:[#allocation4 + $0x40] sm:$0xff] %v23528_v46  ;;  %492 = vst [vmem:[#allocation4 + $0x48] sm:$0xff] %v23528_v46 }
 0x7b5   : > { %493 = vst [vmem:[#allocation4 + $0x50] sm:$0xff] %v23528_v46  ;;  %494 = vst [vmem:[#allocation4 + $0x58] sm:$0xff] %v23528_v46 }
 0x7b6   : > { %495 = vst [vmem:[#allocation4 + $0x60] sm:$0xff] %v23528_v46 }
 0x7b7   : > { %21031 = vmatmul.mubr.bf16.gmra.mrb[40].mxu1 %v26799_v33  ;;  %v9255_v33 = vld [vmem:[#allocation7 + $0x120] sm:$0xff] }
 0x7b8   : > { %21034 = vmatprep.mubr.bf16.mxu1 %v26800_v34  ;;  %v9256_v34 = vld [vmem:[#allocation7 + $0x128] sm:$0xff] }
 0x7bf   : > { %21035 = vmatmul.mubr.bf16.gmra.mrb[44].mxu1 %v26801_v9  ;;  %v9257_v9 = vld [vmem:[#allocation7 + $0x130] sm:$0xff] }
 0x7c0   : > { %21038 = vmatprep.mubr.bf16.mxu1 %v26802_v26  ;;  %v23081_v26 = vld [vmem:[#allocation8 + $0x30] sm:$0xff]  }
 0x7c1   : > { %21210 = vmatprep.subr.bf16.mxu0 %v23081_v26 }
 0x7c2   : > { %21211 = vmatpush3.bf16.msra.mxu0 %v23081_v26 }
 0x7c7   : > { %21039 = vmatmul.mubr.bf16.gmra.mrb[48].mxu1 %v26803_v47  ;;  %v23082_v47 = vld [vmem:[#allocation8 + $0x38] sm:$0xff]  }
 0x7c8   : > { %21042 = vmatprep.mubr.bf16.mxu1 %v26804_v28  ;;  %v9258_v28 = vld [vmem:[#allocation7 + $0x138] sm:$0xff]  ;;  %21212 = vmatprep.subr.bf16.mxu0 %v23082_v47 }
 0x7c9   : > { %21213 = vmatpush3.bf16.msra.mxu0 %v23082_v47 }
 0x7cf   : > { %21043 = vmatmul.mubr.bf16.gmra.mrb[52].mxu1 %v26805_v12  ;;  %v9259_v12 = vld [vmem:[#allocation7 + $0x140] sm:$0xff] }
 0x7d0   : > { %21046 = vmatprep.mubr.bf16.mxu1 %v26806_v20  ;;  %v9260_v20 = vld [vmem:[#allocation7 + $0x148] sm:$0xff] }
 0x7d7   : > { %21047 = vmatmul.mubr.bf16.gmra.mrb[56].mxu1 %v26807_v8  ;;  %v9262_v8 = vld [vmem:[#allocation7 + $0x158] sm:$0xff] }
 0x7d8   : > { %21050 = vmatprep.mubr.bf16.mxu1 %v26808_v53  ;;  %v9263_v53 = vld [vmem:[#allocation7 + $0x160] sm:$0xff] }
 0x7df   : > { %21051 = vmatmul.mubr.bf16.gmra.mrb[60].mxu1 %v26809_v63  ;;  %v9264_v63 = vld [vmem:[#allocation7 + $0x168] sm:$0xff] }
 0x7e0   : > { %21054 = vmatprep.mubr.bf16.mxu1 %v26810_v30  ;;  %v9265_v30 = vld [vmem:[#allocation7 + $0x170] sm:$0xff] }
 0x7e7   : > { %21055 = vmatmul.mubr.bf16.gmra.mrb[64].mxu1 %v26811_v5  ;;  %v9266_v5 = vld [vmem:[#allocation7 + $0x178] sm:$0xff] }
 0x7e8   : > { %21058 = vmatprep.mubr.bf16.mxu1 %v26812_v44  ;;  %v23361_v44 = vld [vmem:[#allocation7 + $0x180] sm:$0xff] }
 0x7ef   : > { %21059 = vmatmul.mubr.bf16.gmra.mrb[68].mxu1 %v26813_v37  ;;  %v23362_v37 = vld [vmem:[#allocation7 + $0x188] sm:$0xff] }
 0x7f0   : > { %21062 = vmatprep.mubr.bf16.mxu1 %v26814_v60  ;;  %v26852_v60 = vld [vmem:[#allocation28_spill] sm:$0xff] }
 0x7f7   : > { %21063 = vmatmul.mubr.bf16.gmra.mrb[72].mxu1 %v26815_v0 }
 0x7f8   : > { %21066 = vmatprep.mubr.bf16.mxu1 %v26816_v23 }
 0x7ff   : > { %21067 = vmatmul.mubr.bf16.gmra.mrb[76].mxu1 %v26817_v48 }
 0x800   : > { %21070 = vmatprep.mubr.bf16.mxu1 %v26818_v22 }
 0x807   : > { %21071 = vmatmul.mubr.bf16.gmra.mrb[80].mxu1 %v26819_v3 }
 0x808   : > { %21074 = vmatprep.mubr.bf16.mxu1 %v26820_v18 }
 0x80f   : > { %21075 = vmatmul.mubr.bf16.gmra.mrb[84].mxu1 %v26821_v41 }
 0x810   : > { %21078 = vmatprep.mubr.bf16.mxu1 %v23360_v14 }
 0x817   : > { %21079 = vmatmul.mubr.bf16.gmra.mrb[88].mxu1 %v26822_v51 }
 0x818   : > { %21082 = vmatprep.mubr.bf16.mxu1 %v26823_v32 }
 0x81f   : > { %21083 = vmatmul.mubr.bf16.gmra.mrb[92].mxu1 %v25018_v43  ;;  %v26832_v43 = vld [vmem:[#allocation70_spill] sm:$0xff] }
 0x820   : > { %21102 = vmatprep.mubr.bf16.mxu1 %v26824_v2 }
 0x827   : > { %21103 = vmatmul.mubr.bf16.vlgmr.msra.gmra.mrb[0].mxu1 %v26825_v54 }
 0x828   : > { %21106 = vmatprep.mubr.bf16.mxu1 %v26826_v42 }
 0x82f   : > { %21107 = vmatmul.mubr.bf16.gmra.mrb[4].mxu1 %v26827_v36 }
 0x830   : > { %21110 = vmatprep.mubr.bf16.mxu1 %v26828_v59 }
 0x837   : > { %21111 = vmatmul.mubr.bf16.gmra.mrb[8].mxu1 %v26829_v24 }
 0x838   : > { %21114 = vmatprep.mubr.bf16.mxu1 %v26830_v25 }
 0x83f   : > { %21115 = vmatmul.mubr.bf16.gmra.mrb[12].mxu1 %v26831_v16 }
 0x840   : > { %21118 = vmatprep.mubr.bf16.mxu1 %v26832_v43 }
 0x847   : > { %21119 = vmatmul.mubr.bf16.gmra.mrb[16].mxu1 %v26833_v56 }
 0x848   : > { %21122 = vmatprep.mubr.bf16.mxu1 %v26834_v49 }
 0x84f   : > { %21123 = vmatmul.mubr.bf16.gmra.mrb[20].mxu1 %v26835_v19 }
 0x850   : > { %21126 = vmatprep.mubr.bf16.mxu1 %v26836_v40 }
 0x857   : > { %21127 = vmatmul.mubr.bf16.gmra.mrb[24].mxu1 %v26837_v58 }
 0x858   : > { %21130 = vmatprep.mubr.bf16.mxu1 %v26838_v13 }
 0x85f   : > { %21131 = vmatmul.mubr.bf16.gmra.mrb[28].mxu1 %v26839_v35 }
 0x860   : > { %21134 = vmatprep.mubr.bf16.mxu1 %v26840_v10 }
 0x867   : > { %21135 = vmatmul.mubr.bf16.gmra.mrb[32].mxu1 %v26841_v6 }
 0x868   : > { %21138 = vmatprep.mubr.bf16.mxu1 %v26842_v31 }
 0x86f   : > { %21139 = vmatmul.mubr.bf16.gmra.mrb[36].mxu1 %v26843_v52 }
 0x870   : > { %21142 = vmatprep.mubr.bf16.mxu1 %v26844_v7 }
 0x877   : > { %21143 = vmatmul.mubr.bf16.gmra.mrb[40].mxu1 %v26845_v29 }
 0x878   : > { %21146 = vmatprep.mubr.bf16.mxu1 %v26846_v11  ;;  %v25146_v11 = vld [vmem:[#allocation8 + $0x40] sm:$0xff]  }
 0x879   : > { %21234 = vmatprep.subr.bf16.mxu0 %v25146_v11 }
 0x87f   : > { %21147 = vmatmul.mubr.bf16.gmra.mrb[44].mxu1 %v26847_v39 }
 0x880   : > { %21150 = vmatprep.mubr.bf16.mxu1 %v26848_v1 }
 0x887   : > { %21151 = vmatmul.mubr.bf16.gmra.mrb[48].mxu1 %v26849_v27 }
 0x888   : > { %21154 = vmatprep.mubr.bf16.mxu1 %v26850_v15 }
 0x88f   : > { %21155 = vmatmul.mubr.bf16.gmra.mrb[52].mxu1 %v26851_v17 }
 0x890   : > { %21158 = vmatprep.mubr.bf16.mxu1 %v9251_v50 }
 0x897   : > { %21159 = vmatmul.mubr.bf16.gmra.mrb[56].mxu1 %v9252_v45 }
 0x898   : > { %21162 = vmatprep.mubr.bf16.mxu1 %v9253_v4 }
 0x89f   : > { %21163 = vmatmul.mubr.bf16.gmra.mrb[60].mxu1 %v9254_v21 }
 0x8a0   : > { %21166 = vmatprep.mubr.bf16.mxu1 %v9255_v33 }
 0x8a7   : > { %21167 = vmatmul.mubr.bf16.gmra.mrb[64].mxu1 %v9256_v34 }
 0x8a8   : > { %21170 = vmatprep.mubr.bf16.mxu1 %v9257_v9 }
 0x8af   : > { %21171 = vmatmul.mubr.bf16.gmra.mrb[68].mxu1 %v9258_v28 }
 0x8b0   : > { %21174 = vmatprep.mubr.bf16.mxu1 %v9259_v12 }
 0x8b7   : > { %21175 = vmatmul.mubr.bf16.gmra.mrb[72].mxu1 %v9260_v20 }
 0x8b8   : > { %21178 = vmatprep.mubr.bf16.mxu1 %v9261_v61 }
 0x8bf   : > { %21179 = vmatmul.mubr.bf16.gmra.mrb[76].mxu1 %v9262_v8 }
 0x8c0   : > { %21182 = vmatprep.mubr.bf16.mxu1 %v9263_v53 }
 0x8c7   : > { %21183 = vmatmul.mubr.bf16.gmra.mrb[80].mxu1 %v9264_v63 }
 0x8c8   : > { %21186 = vmatprep.mubr.bf16.mxu1 %v9265_v30 }
 0x8cf   : > { %21187 = vmatmul.mubr.bf16.gmra.mrb[84].mxu1 %v9266_v5 }
 0x8d0   : > { %21190 = vmatprep.mubr.bf16.mxu1 %v23361_v44 }
 0x8d7   : > { %21191 = vmatmul.mubr.bf16.gmra.mrb[88].mxu1 %v23362_v37 }
 0x8d8   : > { %21194 = vmatprep.mubr.bf16.mxu1 %v26852_v60 }
 0x8df   : > { %21195 = vmatmul.mubr.bf16.gmra.mrb[92].mxu1 %v25015_v62 }
 0x8fa   : > { %v21104_v0 = vpop.f32.mrb[0].mxu1 }
 0x8fb   : > { %9947 = vst [vmem:[#allocation2 + $0x10] sm:$0xff] %v21104_v0  ;;  %v9370_v23 = vpop.f32.mrb[1].mxu1 }
 0x8fc   : > { %9945 = vst [vmem:[#allocation2] sm:$0xff] %v9370_v23  ;;  %v21105_v48 = vpop.f32.mrb[2].mxu1 }
 0x8fd   : > { %v9373_v22 = vpop.f32.mrb[3].mxu1 }
 0x8fe   : > { %9946 = vst [vmem:[#allocation2 + $0x8] sm:$0xff] %v9373_v22 }
 0x902   : > { %v21108_v57 = vpop.f32.mrb[4].mxu1  ;;  %v10044_v14 = vld [vmem:[#allocation2 + $0x10] ss:$2 sm:$0xf] }
 0x903   : > { %9951 = vst [vmem:[#allocation2 + $0x30] sm:$0xff] %v21108_v57  ;;  %v9386_v3 = vpop.f32.mrb[5].mxu1  ;;  %v10048_v51 = vld [vmem:[#allocation2 + $0x11] ss:$2 sm:$0xf] }
 0x904   : > { %9949 = vst [vmem:[#allocation2 + $0x20] sm:$0xff] %v9386_v3  ;;  %v21109_v18 = vpop.f32.mrb[6].mxu1  ;;  %v10050_v62 = vmax.f32 %v10044_v14, %v10048_v51 }
 0x905   : > { %v9389_v41 = vpop.f32.mrb[7].mxu1  ;;  %v10042_v42 = vld [vmem:[#allocation2] ss:$2 sm:$0xff]  ;;  %v10046_v36 = vld [vmem:[#allocation2 + $0x1] ss:$2 sm:$0xff] }
 0x906   : > { %9950 = vst [vmem:[#allocation2 + $0x28] sm:$0xff] %v9389_v41  ;;  %v10049_v19 = vmax.f32 %v10042_v42, %v10046_v36 }
 0x90a   : > { %v21112_v32 = vpop.f32.mrb[8].mxu1  ;;  %v10054_v2 = vld [vmem:[#allocation2 + $0x30] ss:$2 sm:$0xf] }
 0x90b   : > { %v10058_v54 = vld [vmem:[#allocation2 + $0x31] ss:$2 sm:$0xf]  ;;  %9955 = vst [vmem:[#allocation2 + $0x50] sm:$0xff] %v21112_v32  ;;  %v9402_v24 = vpop.f32.mrb[9].mxu1 }
 0x90c   : > { %v10060_v59 = vmax.f32 %v10054_v2, %v10058_v54  ;;  %9953 = vst [vmem:[#allocation2 + $0x40] sm:$0xff] %v9402_v24  ;;  %v21113_v25 = vpop.f32.mrb[10].mxu1 }
 0x90d   : > { %v10052_v43 = vld [vmem:[#allocation2 + $0x20] ss:$2 sm:$0xff]  ;;  %v10056_v56 = vld [vmem:[#allocation2 + $0x21] ss:$2 sm:$0xff]  ;;  %v9405_v49 = vpop.f32.mrb[11].mxu1 }
 0x90e   : > { %v10062_v16 = vmax.f32 %v10050_v62, %v10060_v59  ;;  %v10059_v40 = vmax.f32 %v10052_v43, %v10056_v56  ;;  %9954 = vst [vmem:[#allocation2 + $0x48] sm:$0xff] %v9405_v49 }
 0x910   : > { %v10061_v58 = vmax.f32 %v10049_v19, %v10059_v40  ;;  %v10070_v13 = vadd.f32 %v25142_v38, %v10062_v16  ;;  %v23084_v16 = vld [vmem:[#allocation8 + $0x48] sm:$0xff]  }
 0x912   : > { %v21116_v35 = vpop.f32.mrb[12].mxu1  ;;  %v10069_v55 = vadd.f32 %v25142_v38, %v10061_v58  ;;  %v10072_v52 = vmax.f32 %v10070_v13, 0.0  ;;  %v10078_v39 = vld [vmem:[#allocation2 + $0x50] ss:$2 sm:$0xf] }
 0x913   : > { %9959 = vst [vmem:[#allocation2 + $0x70] sm:$0xff] %v21116_v35  ;;  %v9418_v10 = vpop.f32.mrb[13].mxu1  ;;  %v10082_v1 = vld [vmem:[#allocation2 + $0x51] ss:$2 sm:$0xf] }
 0x914   : > { %9957 = vst [vmem:[#allocation2 + $0x60] sm:$0xff] %v9418_v10  ;;  %v21117_v6 = vpop.f32.mrb[14].mxu1  ;;  %v10071_v31 = vmax.f32 %v10069_v55, 0.0  ;;  %v10084_v50 = vmax.f32 %v10078_v39, %v10082_v1  ;;  %v23085_v55 = vld [vmem:[#allocation8 + $0x50] sm:$0xff]  }
 0x915   : > { %v9421_v7 = vpop.f32.mrb[15].mxu1  ;;  %v10076_v45 = vld [vmem:[#allocation2 + $0x40] ss:$2 sm:$0xff]  ;;  %v10080_v4 = vld [vmem:[#allocation2 + $0x41] ss:$2 sm:$0xff] }
 0x916   : > { %9958 = vst [vmem:[#allocation2 + $0x68] sm:$0xff] %v9421_v7  ;;  %v10073_v29 = vpack.c.bf16 %v10072_v52, %v10071_v31  ;;  %v10083_v28 = vmax.f32 %v10076_v45, %v10080_v4 }
 0x918   : > { %10074 = vst [vmem:[#allocation4] sm:$0x3f] %v10073_v29 }
 0x91a   : > { %v21120_v27 = vpop.f32.mrb[16].mxu1  ;;  %v10088_v15 = vld [vmem:[#allocation2 + $0x70] ss:$2 sm:$0xf] }
 0x91b   : > { %v10092_v17 = vld [vmem:[#allocation2 + $0x71] ss:$2 sm:$0xf]  ;;  %9963 = vst [vmem:[#allocation2 + $0x90] sm:$0xff] %v21120_v27  ;;  %v9434_v21 = vpop.f32.mrb[17].mxu1 }
 0x91c   : > { %v10094_v46 = vmax.f32 %v10088_v15, %v10092_v17  ;;  %9961 = vst [vmem:[#allocation2 + $0x80] sm:$0xff] %v9434_v21  ;;  %v21121_v33 = vpop.f32.mrb[18].mxu1 }
 0x91d   : > { %v10086_v9 = vld [vmem:[#allocation2 + $0x60] ss:$2 sm:$0xff]  ;;  %v10090_v26 = vld [vmem:[#allocation2 + $0x61] ss:$2 sm:$0xff]  ;;  %v9437_v47 = vpop.f32.mrb[19].mxu1  ;;  %v23087_v33 = vld [vmem:[#allocation8 + $0x60] sm:$0xff]  }
 0x91e   : > { %v10096_v34 = vmax.f32 %v10084_v50, %v10094_v46  ;;  %v10093_v12 = vmax.f32 %v10086_v9, %v10090_v26  ;;  %9962 = vst [vmem:[#allocation2 + $0x88] sm:$0xff] %v9437_v47 }
 0x91f   : > { %v10595_v20 = vld [vmem:[#allocation4] sm:$0xff] }
 0x920   : > { %v10098_v61 = vadd.f32 %v25142_v38, %v10096_v34  ;;  %v10095_v8 = vmax.f32 %v10083_v28, %v10093_v12  ;;  %21214 = vmatprep.mubr.bf16.mxu0 %v10595_v20  ;;  %v10399_v2 = vshll.u32 %v10595_v20, 16  ;;  %v10397_v35 = vshrl.u32 %v10595_v20, 16 }
 0x922   : > { %v21124_v53 = vpop.f32.mrb[20].mxu1  ;;  %v10097_v30 = vadd.f32 %v25142_v38, %v10095_v8  ;;  %v10100_v44 = vmax.f32 %v10098_v61, 0.0  ;;  %v10106_v23 = vld [vmem:[#allocation2 + $0x90] ss:$2 sm:$0xf]  ;;  %v10401_v19 = vrot.slane %v10399_v2, 1 }
 0x923   : > { %9967 = vst [vmem:[#allocation2 + $0xb0] sm:$0xff] %v21124_v53  ;;  %v9450_v63 = vpop.f32.mrb[21].mxu1  ;;  %v10110_v48 = vld [vmem:[#allocation2 + $0x91] ss:$2 sm:$0xf] }
 0x924   : > { %9965 = vst [vmem:[#allocation2 + $0xa0] sm:$0xff] %v9450_v63  ;;  %v21125_v5 = vpop.f32.mrb[22].mxu1  ;;  %v10099_v60 = vmax.f32 %v10097_v30, 0.0  ;;  %v10112_v3 = vmax.f32 %v10106_v23, %v10110_v48  ;;  %v10402_v52 = vor.u32 %v10401_v19, %v10397_v35  ;;  %v23088_v30 = vld [vmem:[#allocation8 + $0x68] sm:$0xff]  }
 0x925   : > { %v9453_v37 = vpop.f32.mrb[23].mxu1  ;;  %v10104_v18 = vld [vmem:[#allocation2 + $0x80] ss:$2 sm:$0xff]  ;;  %v10108_v41 = vld [vmem:[#allocation2 + $0x81] ss:$2 sm:$0xff] }
 0x926   : > { %9966 = vst [vmem:[#allocation2 + $0xa8] sm:$0xff] %v9453_v37  ;;  %v10101_v0 = vpack.c.bf16 %v10100_v44, %v10099_v60  ;;  %v10111_v59 = vmax.f32 %v10104_v18, %v10108_v41  ;;  %v23089_v41 = vld [vmem:[#allocation8 + $0x70] sm:$0xff]  }
 0x928   : > { %10102 = vst [vmem:[#allocation4 + $0x8] sm:$0x3f] %v10101_v0 }
 0x92a   : > { %v10116_v22 = vld [vmem:[#allocation2 + $0xb0] ss:$2 sm:$0xf]  ;;  %v10120_v57 = vld [vmem:[#allocation2 + $0xb1] ss:$2 sm:$0xf] }
 0x92b   : > { %v10122_v14 = vmax.f32 %v10116_v22, %v10120_v57  ;;  %v21128_v51 = vpop.f32.mrb[24].mxu1 }
 0x92c   : > { %9971 = vst [vmem:[#allocation2 + $0xd0] sm:$0xff] %v21128_v51  ;;  %v9466_v32 = vpop.f32.mrb[25].mxu1 }
 0x92d   : > { %v10124_v54 = vmax.f32 %v10112_v3, %v10122_v14  ;;  %v10114_v62 = vld [vmem:[#allocation2 + $0xa0] ss:$2 sm:$0xff]  ;;  %v10118_v42 = vld [vmem:[#allocation2 + $0xa1] ss:$2 sm:$0xff]  ;;  %9969 = vst [vmem:[#allocation2 + $0xc0] sm:$0xff] %v9466_v32  ;;  %v21129_v36 = vpop.f32.mrb[26].mxu1 }
 0x92e   : > { %v10121_v24 = vmax.f32 %v10114_v62, %v10118_v42  ;;  %v9469_v25 = vpop.f32.mrb[27].mxu1  ;;  %v23090_v36 = vld [vmem:[#allocation8 + $0x78] sm:$0xff]  }
 0x92f   : > { %9970 = vst [vmem:[#allocation2 + $0xc8] sm:$0xff] %v9469_v25  ;;  %v10126_v43 = vadd.f32 %v25142_v38, %v10124_v54  ;;  %v25152_v49 = vld [vmem:[#allocation4 + $0x8] sm:$0xff] }
 0x930   : > { %v10123_v56 = vmax.f32 %v10111_v59, %v10121_v24  ;;  %21215 = vmatmul.mubr.bf16.vlgmr.msra.gmra.mrb[212].mxu0 %v25152_v49  ;;  %v10404_v40 = vshll.u32 %v25152_v49, 16  ;;  %v10408_v5 = vshrl.u32 %v25152_v49, 16  ;;  %v10547_v37 = vrot.slane %v25152_v49, 1 }
 0x931   : > { %21235 = vmatpush3.bf16.msra.mxu0 %v25146_v11  ;;  %v10128_v31 = vmax.f32 %v10126_v43, 0.0  ;;  %v23086_v11 = vld [vmem:[#allocation8 + $0x58] sm:$0xff]  }
 0x932   : > { %v10125_v58 = vadd.f32 %v25142_v38, %v10123_v56  ;;  %v21132_v13 = vpop.f32.mrb[28].mxu1  ;;  %21236 = vmatprep.subr.bf16.mxu0 %v23084_v16  ;;  %v10406_v7 = vrot.slane %v10404_v40, 1  ;;  %v25180_v40 = vld [vmem:[#allocation8 + $0x80] sm:$0xff]  }
 0x933   : > { %9975 = vst [vmem:[#allocation2 + $0xf0] sm:$0xff] %v21132_v13  ;;  %v9482_v10 = vpop.f32.mrb[29].mxu1  ;;  %v10134_v15 = vld [vmem:[#allocation2 + $0xd0] ss:$2 sm:$0xf] }
 0x934   : > { %v10127_v6 = vmax.f32 %v10125_v58, 0.0  ;;  %9973 = vst [vmem:[#allocation2 + $0xe0] sm:$0xff] %v9482_v10  ;;  %v21133_v29 = vpop.f32.mrb[30].mxu1  ;;  %v25159_v27 = vsel %vm2031_vm2, %v10402_v52, %v10406_v7  ;;  %v10138_v17 = vld [vmem:[#allocation2 + $0xd1] ss:$2 sm:$0xf]  ;;  %v10410_v22 = vor.u32 %v10408_v5, %v10406_v7 }
 0x935   : > { %v9485_v39 = vpop.f32.mrb[31].mxu1  ;;  %21237 = vmatpush3.bf16.msra.mxu0 %v23084_v16  ;;  %v10140_v4 = vmax.f32 %v10134_v15, %v10138_v17 }
 0x936   : > { %v10129_v1 = vpack.c.bf16 %v10128_v31, %v10127_v6  ;;  %9974 = vst [vmem:[#allocation2 + $0xe8] sm:$0xff] %v9485_v39  ;;  %21238 = vmatprep.subr.bf16.mxu0 %v23085_v55  ;;  %v10132_v34 = vld [vmem:[#allocation2 + $0xc0] ss:$2 sm:$0xff]  ;;  %v10136_v9 = vld [vmem:[#allocation2 + $0xc1] ss:$2 sm:$0xff] }
 0x937   : > { %v10139_v8 = vmax.f32 %v10132_v34, %v10136_v9 }
 0x938   : > { %10130 = vst [vmem:[#allocation4 + $0x10] sm:$0x3f] %v10129_v1 }
 0x939   : > { %21239 = vmatpush3.bf16.msra.mxu0 %v23085_v55 }
 0x93a   : > { %v10144_v50 = vld [vmem:[#allocation2 + $0xf0] ss:$2 sm:$0xf]  ;;  %v10148_v45 = vld [vmem:[#allocation2 + $0xf1] ss:$2 sm:$0xf]  ;;  %21240 = vmatprep.subr.bf16.mxu0 %v23086_v11 }
 0x93b   : > { %v10150_v46 = vmax.f32 %v10144_v50, %v10148_v45  ;;  %v21136_v21 = vpop.f32.mrb[32].mxu1 }
 0x93c   : > { %9979 = vst [vmem:[#allocation2 + $0x110] sm:$0xff] %v21136_v21  ;;  %v9498_v26 = vpop.f32.mrb[33].mxu1 }
 0x93d   : > { %v10152_v47 = vmax.f32 %v10140_v4, %v10150_v46  ;;  %9977 = vst [vmem:[#allocation2 + $0x100] sm:$0xff] %v9498_v26  ;;  %v21137_v28 = vpop.f32.mrb[34].mxu1  ;;  %v10142_v12 = vld [vmem:[#allocation2 + $0xe0] ss:$2 sm:$0xff]  ;;  %v10146_v20 = vld [vmem:[#allocation2 + $0xe1] ss:$2 sm:$0xff]  ;;  %21241 = vmatpush3.bf16.msra.mxu0 %v23086_v11 }
 0x93e   : > { %v9501_v61 = vpop.f32.mrb[35].mxu1  ;;  %v10149_v53 = vmax.f32 %v10142_v12, %v10146_v20  ;;  %21242 = vmatprep.subr.bf16.mxu0 %v23087_v33 }
 0x93f   : > { %9978 = vst [vmem:[#allocation2 + $0x108] sm:$0xff] %v9501_v61  ;;  %v25161_v63 = vld [vmem:[#allocation4 + $0x10] sm:$0xff]  ;;  %v10154_v0 = vadd.f32 %v25142_v38, %v10152_v47 }
 0x940   : > { %21218 = vmatprep.mubr.bf16.mxu0 %v25161_v63  ;;  %v10412_v44 = vshll.u32 %v25161_v63, 16  ;;  %v10549_v60 = vrot.slane %v25161_v63, 1  ;;  %v10151_v23 = vmax.f32 %v10139_v8, %v10149_v53  ;;  %v10416_v50 = vshrl.u32 %v25161_v63, 16 }
 0x941   : > { %21243 = vmatpush3.bf16.msra.mxu0 %v23087_v33  ;;  %v10156_v54 = vmax.f32 %v10154_v0, 0.0 }
 0x942   : > { %v21140_v48 = vpop.f32.mrb[36].mxu1  ;;  %v10414_v57 = vrot.slane %v10412_v44, 1  ;;  %v25174_v3 = vsel %vm2662_vm1, %v10547_v37, %v10549_v60  ;;  %v10153_v18 = vadd.f32 %v25142_v38, %v10151_v23  ;;  %21244 = vmatprep.subr.bf16.mxu0 %v23088_v30 }
 0x943   : > { %9983 = vst [vmem:[#allocation2 + $0x130] sm:$0xff] %v21140_v48  ;;  %v9514_v14 = vpop.f32.mrb[37].mxu1  ;;  %v10162_v59 = vld [vmem:[#allocation2 + $0x110] ss:$2 sm:$0xf] }
 0x944   : > { %v25178_v51 = vsel %vm2031_vm2, %v10410_v22, %v10414_v57  ;;  %9981 = vst [vmem:[#allocation2 + $0x120] sm:$0xff] %v9514_v14  ;;  %v21141_v32 = vpop.f32.mrb[38].mxu1  ;;  %v10155_v2 = vmax.f32 %v10153_v18, 0.0  ;;  %v10166_v24 = vld [vmem:[#allocation2 + $0x111] ss:$2 sm:$0xf]  ;;  %v10418_v21 = vor.u32 %v10416_v50, %v10414_v57 }
 0x945   : > { %v9517_v62 = vpop.f32.mrb[39].mxu1  ;;  %21245 = vmatpush3.bf16.msra.mxu0 %v23088_v30  ;;  %v10168_v43 = vmax.f32 %v10162_v59, %v10166_v24 }
 0x946   : > { %9982 = vst [vmem:[#allocation2 + $0x128] sm:$0xff] %v9517_v62  ;;  %v10157_v42 = vpack.c.bf16 %v10156_v54, %v10155_v2  ;;  %21246 = vmatprep.subr.bf16.mxu0 %v23089_v41  ;;  %v10160_v58 = vld [vmem:[#allocation2 + $0x100] ss:$2 sm:$0xff]  ;;  %v10164_v13 = vld [vmem:[#allocation2 + $0x101] ss:$2 sm:$0xff] }
 0x947   : > { %v10167_v7 = vmax.f32 %v10160_v58, %v10164_v13 }
 0x948   : > { %10158 = vst [vmem:[#allocation4 + $0x18] sm:$0x3f] %v10157_v42 }
 0x949   : > { %21247 = vmatpush3.bf16.msra.mxu0 %v23089_v41 }
 0x94a   : > { %v10172_v25 = vld [vmem:[#allocation2 + $0x130] ss:$2 sm:$0xf]  ;;  %v10176_v16 = vld [vmem:[#allocation2 + $0x131] ss:$2 sm:$0xf]  ;;  %21248 = vmatprep.subr.bf16.mxu0 %v23090_v36 }
 0x94b   : > { %v10178_v56 = vmax.f32 %v10172_v25, %v10176_v16  ;;  %v21144_v19 = vpop.f32.mrb[40].mxu1 }
 0x94c   : > { %9987 = vst [vmem:[#allocation2 + $0x150] sm:$0xff] %v21144_v19  ;;  %v9530_v35 = vpop.f32.mrb[41].mxu1 }
 0x94d   : > { %v10180_v55 = vmax.f32 %v10168_v43, %v10178_v56  ;;  %9985 = vst [vmem:[#allocation2 + $0x140] sm:$0xff] %v9530_v35  ;;  %v21145_v10 = vpop.f32.mrb[42].mxu1  ;;  %v10170_v6 = vld [vmem:[#allocation2 + $0x120] ss:$2 sm:$0xff]  ;;  %v10174_v31 = vld [vmem:[#allocation2 + $0x121] ss:$2 sm:$0xff]  ;;  %21249 = vmatpush3.bf16.msra.mxu0 %v23090_v36 }
 0x94e   : > { %v9533_v52 = vpop.f32.mrb[43].mxu1  ;;  %v10177_v29 = vmax.f32 %v10170_v6, %v10174_v31  ;;  %21270 = vmatprep.subr.bf16.mxu0 %v25180_v40 }
 0x94f   : > { %9986 = vst [vmem:[#allocation2 + $0x148] sm:$0xff] %v9533_v52  ;;  %v25183_v39 = vld [vmem:[#allocation4 + $0x18] sm:$0xff]  ;;  %v10182_v1 = vadd.f32 %v25142_v38, %v10180_v55 }
 0x950   : > { %v10179_v11 = vmax.f32 %v10167_v7, %v10177_v29  ;;  %21219 = vmatmul.mubr.bf16.gmra.mrb[216].mxu0 %v25183_v39  ;;  %v10420_v15 = vshll.u32 %v25183_v39, 16  ;;  %v10551_v45 = vrot.slane %v25183_v39, 1 }
 0x951   : > { %v10184_v47 = vmax.f32 %v10182_v1, 0.0 }
 0x952   : > { %v21148_v17 = vpop.f32.mrb[44].mxu1  ;;  %v10181_v4 = vadd.f32 %v25142_v38, %v10179_v11  ;;  %v25191_v33 = vrot.slane %v10420_v15, 1  ;;  %v25198_v34 = vsel %vm2662_vm1, %v10549_v60, %v10551_v45 }
 0x953   : > { %9991 = vst [vmem:[#allocation2 + $0x170] sm:$0xff] %v21148_v17  ;;  %v9546_v46 = vpop.f32.mrb[45].mxu1  ;;  %v10190_v61 = vld [vmem:[#allocation2 + $0x150] ss:$2 sm:$0xf] }
 0x954   : > { %9989 = vst [vmem:[#allocation2 + $0x160] sm:$0xff] %v9546_v46  ;;  %v21149_v9 = vpop.f32.mrb[46].mxu1  ;;  %v10183_v26 = vmax.f32 %v10181_v4, 0.0  ;;  %v25202_v12 = vsel %vm2031_vm2, %v10418_v21, %v25191_v33  ;;  %v10194_v8 = vld [vmem:[#allocation2 + $0x151] ss:$2 sm:$0xf] }
 0x955   : > { %v9549_v28 = vpop.f32.mrb[47].mxu1  ;;  %v10196_v63 = vmax.f32 %v10190_v61, %v10194_v8 }
 0x956   : > { %9990 = vst [vmem:[#allocation2 + $0x168] sm:$0xff] %v9549_v28  ;;  %v10185_v20 = vpack.c.bf16 %v10184_v47, %v10183_v26  ;;  %v10188_v60 = vld [vmem:[#allocation2 + $0x140] ss:$2 sm:$0xff]  ;;  %v10192_v0 = vld [vmem:[#allocation2 + $0x141] ss:$2 sm:$0xff] }
 0x957   : > { %v10195_v14 = vmax.f32 %v10188_v60, %v10192_v0 }
 0x958   : > { %10186 = vst [vmem:[#allocation4 + $0x20] sm:$0x3f] %v10185_v20 }
 0x95a   : > { %v10200_v53 = vld [vmem:[#allocation2 + $0x170] ss:$2 sm:$0xf]  ;;  %v10204_v30 = vld [vmem:[#allocation2 + $0x171] ss:$2 sm:$0xf] }
 0x95b   : > { %v10206_v5 = vmax.f32 %v10200_v53, %v10204_v30  ;;  %v21152_v44 = vpop.f32.mrb[48].mxu1 }
 0x95c   : > { %9995 = vst [vmem:[#allocation2 + $0x190] sm:$0xff] %v21152_v44  ;;  %v9562_v23 = vpop.f32.mrb[49].mxu1 }
 0x95d   : > { %v10208_v48 = vmax.f32 %v10196_v63, %v10206_v5  ;;  %9993 = vst [vmem:[#allocation2 + $0x180] sm:$0xff] %v9562_v23  ;;  %v21153_v22 = vpop.f32.mrb[50].mxu1  ;;  %v10198_v57 = vld [vmem:[#allocation2 + $0x160] ss:$2 sm:$0xff]  ;;  %v10202_v18 = vld [vmem:[#allocation2 + $0x161] ss:$2 sm:$0xff] }
 0x95e   : > { %v9565_v41 = vpop.f32.mrb[51].mxu1  ;;  %v10205_v32 = vmax.f32 %v10198_v57, %v10202_v18 }
 0x95f   : > { %9994 = vst [vmem:[#allocation2 + $0x188] sm:$0xff] %v9565_v41  ;;  %v25204_v2 = vld [vmem:[#allocation4 + $0x20] sm:$0xff]  ;;  %v10210_v54 = vadd.f32 %v25142_v38, %v10208_v48 }
 0x960   : > { %v10207_v62 = vmax.f32 %v10195_v14, %v10205_v32  ;;  %21222 = vmatprep.mubr.bf16.mxu0 %v25204_v2 }
 0x961   : > { %v10212_v16 = vmax.f32 %v10210_v54, 0.0 }
 0x962   : > { %v21156_v42 = vpop.f32.mrb[52].mxu1  ;;  %v10209_v36 = vadd.f32 %v25142_v38, %v10207_v62 }
 0x963   : > { %9999 = vst [vmem:[#allocation2 + $0x1b0] sm:$0xff] %v21156_v42  ;;  %v9578_v59 = vpop.f32.mrb[53].mxu1  ;;  %v10218_v19 = vld [vmem:[#allocation2 + $0x190] ss:$2 sm:$0xf] }
 0x964   : > { %9997 = vst [vmem:[#allocation2 + $0x1a0] sm:$0xff] %v9578_v59  ;;  %v21157_v24 = vpop.f32.mrb[54].mxu1  ;;  %v10211_v25 = vmax.f32 %v10209_v36, 0.0  ;;  %v10222_v58 = vld [vmem:[#allocation2 + $0x191] ss:$2 sm:$0xf] }
 0x965   : > { %v9581_v43 = vpop.f32.mrb[55].mxu1  ;;  %v10224_v55 = vmax.f32 %v10218_v19, %v10222_v58 }
 0x966   : > { %9998 = vst [vmem:[#allocation2 + $0x1a8] sm:$0xff] %v9581_v43  ;;  %v10213_v56 = vpack.c.bf16 %v10212_v16, %v10211_v25  ;;  %v10216_v31 = vld [vmem:[#allocation2 + $0x180] ss:$2 sm:$0xff]  ;;  %v10220_v52 = vld [vmem:[#allocation2 + $0x181] ss:$2 sm:$0xff] }
 0x967   : > { %v10223_v50 = vmax.f32 %v10216_v31, %v10220_v52 }
 0x968   : > { %10214 = vst [vmem:[#allocation4 + $0x28] sm:$0x3f] %v10213_v56 }
 0x96a   : > { %v10228_v13 = vld [vmem:[#allocation2 + $0x1b0] ss:$2 sm:$0xf]  ;;  %v10232_v35 = vld [vmem:[#allocation2 + $0x1b1] ss:$2 sm:$0xf] }
 0x96b   : > { %v10234_v10 = vmax.f32 %v10228_v13, %v10232_v35  ;;  %v21160_v6 = vpop.f32.mrb[56].mxu1 }
 0x96c   : > { %10003 = vst [vmem:[#allocation2 + $0x1d0] sm:$0xff] %v21160_v6  ;;  %v9594_v7 = vpop.f32.mrb[57].mxu1 }
 0x96d   : > { %v10236_v29 = vmax.f32 %v10224_v55, %v10234_v10  ;;  %10001 = vst [vmem:[#allocation2 + $0x1c0] sm:$0xff] %v9594_v7  ;;  %v21161_v1 = vpop.f32.mrb[58].mxu1  ;;  %v10226_v11 = vld [vmem:[#allocation2 + $0x1a0] ss:$2 sm:$0xff]  ;;  %v10230_v15 = vld [vmem:[#allocation2 + $0x1a1] ss:$2 sm:$0xff] }
 0x96e   : > { %v9597_v17 = vpop.f32.mrb[59].mxu1  ;;  %v10233_v4 = vmax.f32 %v10226_v11, %v10230_v15 }
 0x96f   : > { %10002 = vst [vmem:[#allocation2 + $0x1c8] sm:$0xff] %v9597_v17  ;;  %v25209_v46 = vld [vmem:[#allocation4 + $0x28] sm:$0xff]  ;;  %v10238_v21 = vadd.f32 %v25142_v38, %v10236_v29 }
 0x970   : > { %v10235_v9 = vmax.f32 %v10223_v50, %v10233_v4  ;;  %21223 = vmatmul.mubr.bf16.gmra.mrb[220].mxu0 %v25209_v46 }
 0x971   : > { %v10240_v8 = vmax.f32 %v10238_v21, 0.0 }
 0x972   : > { %v21164_v26 = vpop.f32.mrb[60].mxu1  ;;  %v10237_v47 = vadd.f32 %v25142_v38, %v10235_v9 }
 0x973   : > { %10007 = vst [vmem:[#allocation2 + $0x1f0] sm:$0xff] %v21164_v26  ;;  %v9610_v28 = vpop.f32.mrb[61].mxu1  ;;  %v10246_v63 = vld [vmem:[#allocation2 + $0x1d0] ss:$2 sm:$0xf] }
 0x974   : > { %10005 = vst [vmem:[#allocation2 + $0x1e0] sm:$0xff] %v9610_v28  ;;  %v21165_v20 = vpop.f32.mrb[62].mxu1  ;;  %v10239_v61 = vmax.f32 %v10237_v47, 0.0  ;;  %v10250_v5 = vld [vmem:[#allocation2 + $0x1d1] ss:$2 sm:$0xf] }
 0x975   : > { %v9613_v53 = vpop.f32.mrb[63].mxu1  ;;  %v10252_v0 = vmax.f32 %v10246_v63, %v10250_v5 }
 0x976   : > { %10006 = vst [vmem:[#allocation2 + $0x1e8] sm:$0xff] %v9613_v53  ;;  %v10241_v30 = vpack.c.bf16 %v10240_v8, %v10239_v61  ;;  %v10244_v22 = vld [vmem:[#allocation2 + $0x1c0] ss:$2 sm:$0xff]  ;;  %v10248_v57 = vld [vmem:[#allocation2 + $0x1c1] ss:$2 sm:$0xff] }
 0x977   : > { %v10251_v42 = vmax.f32 %v10244_v22, %v10248_v57 }
 0x978   : > { %10242 = vst [vmem:[#allocation4 + $0x30] sm:$0x3f] %v10241_v30 }
 0x97a   : > { %v10256_v44 = vld [vmem:[#allocation2 + $0x1f0] ss:$2 sm:$0xf]  ;;  %v10260_v60 = vld [vmem:[#allocation2 + $0x1f1] ss:$2 sm:$0xf] }
 0x97b   : > { %v10262_v23 = vmax.f32 %v10256_v44, %v10260_v60  ;;  %v21168_v48 = vpop.f32.mrb[64].mxu1 }
 0x97c   : > { %10011 = vst [vmem:[#allocation2 + $0x210] sm:$0xff] %v21168_v48  ;;  %v9626_v18 = vpop.f32.mrb[65].mxu1 }
 0x97d   : > { %v10264_v41 = vmax.f32 %v10252_v0, %v10262_v23  ;;  %10009 = vst [vmem:[#allocation2 + $0x200] sm:$0xff] %v9626_v18  ;;  %v21169_v14 = vpop.f32.mrb[66].mxu1  ;;  %v10254_v32 = vld [vmem:[#allocation2 + $0x1e0] ss:$2 sm:$0xff]  ;;  %v10258_v54 = vld [vmem:[#allocation2 + $0x1e1] ss:$2 sm:$0xff] }
 0x97e   : > { %v9629_v62 = vpop.f32.mrb[67].mxu1  ;;  %v10261_v36 = vmax.f32 %v10254_v32, %v10258_v54 }
 0x97f   : > { %10010 = vst [vmem:[#allocation2 + $0x208] sm:$0xff] %v9629_v62  ;;  %v25214_v59 = vld [vmem:[#allocation4 + $0x30] sm:$0xff]  ;;  %v10266_v24 = vadd.f32 %v25142_v38, %v10264_v41 }
 0x980   : > { %v10263_v25 = vmax.f32 %v10251_v42, %v10261_v36  ;;  %21226 = vmatprep.mubr.bf16.mxu0 %v25214_v59 }
 0x981   : > { %v10268_v13 = vmax.f32 %v10266_v24, 0.0 }
 0x982   : > { %v21172_v16 = vpop.f32.mrb[68].mxu1  ;;  %v10265_v43 = vadd.f32 %v25142_v38, %v10263_v25 }
 0x983   : > { %10015 = vst [vmem:[#allocation2 + $0x230] sm:$0xff] %v21172_v16  ;;  %v9642_v56 = vpop.f32.mrb[69].mxu1  ;;  %v10274_v10 = vld [vmem:[#allocation2 + $0x210] ss:$2 sm:$0xf] }
 0x984   : > { %10013 = vst [vmem:[#allocation2 + $0x220] sm:$0xff] %v9642_v56  ;;  %v21173_v19 = vpop.f32.mrb[70].mxu1  ;;  %v10267_v58 = vmax.f32 %v10265_v43, 0.0  ;;  %v10278_v6 = vld [vmem:[#allocation2 + $0x211] ss:$2 sm:$0xf] }
 0x985   : > { %v9645_v35 = vpop.f32.mrb[71].mxu1  ;;  %v10280_v7 = vmax.f32 %v10274_v10, %v10278_v6 }
 0x986   : > { %10014 = vst [vmem:[#allocation2 + $0x228] sm:$0xff] %v9645_v35  ;;  %v10269_v55 = vpack.c.bf16 %v10268_v13, %v10267_v58  ;;  %v10272_v11 = vld [vmem:[#allocation2 + $0x200] ss:$2 sm:$0xff]  ;;  %v10276_v15 = vld [vmem:[#allocation2 + $0x201] ss:$2 sm:$0xff] }
 0x987   : > { %v10279_v47 = vmax.f32 %v10272_v11, %v10276_v15 }
 0x988   : > { %10270 = vst [vmem:[#allocation4 + $0x38] sm:$0x3f] %v10269_v55 }
 0x98a   : > { %v10284_v31 = vld [vmem:[#allocation2 + $0x230] ss:$2 sm:$0xf]  ;;  %v10288_v52 = vld [vmem:[#allocation2 + $0x231] ss:$2 sm:$0xf] }
 0x98b   : > { %v10290_v29 = vmax.f32 %v10284_v31, %v10288_v52  ;;  %v21176_v1 = vpop.f32.mrb[72].mxu1 }
 0x98c   : > { %10019 = vst [vmem:[#allocation2 + $0x250] sm:$0xff] %v21176_v1  ;;  %v9658_v17 = vpop.f32.mrb[73].mxu1 }
 0x98d   : > { %v10292_v50 = vmax.f32 %v10280_v7, %v10290_v29  ;;  %10017 = vst [vmem:[#allocation2 + $0x240] sm:$0xff] %v9658_v17  ;;  %v21177_v4 = vpop.f32.mrb[74].mxu1  ;;  %v10282_v21 = vld [vmem:[#allocation2 + $0x220] ss:$2 sm:$0xff]  ;;  %v10286_v9 = vld [vmem:[#allocation2 + $0x221] ss:$2 sm:$0xff] }
 0x98e   : > { %v9661_v26 = vpop.f32.mrb[75].mxu1  ;;  %v10289_v28 = vmax.f32 %v10282_v21, %v10286_v9 }
 0x98f   : > { %10018 = vst [vmem:[#allocation2 + $0x248] sm:$0xff] %v9661_v26  ;;  %v25219_v20 = vld [vmem:[#allocation4 + $0x38] sm:$0xff]  ;;  %v10294_v61 = vadd.f32 %v25142_v38, %v10292_v50 }
 0x990   : > { %v10291_v8 = vmax.f32 %v10279_v47, %v10289_v28  ;;  %21227 = vmatmul.mubr.bf16.gmra.mrb[224].mxu0 %v25219_v20 }
 0x991   : > { %v10296_v60 = vmax.f32 %v10294_v61, 0.0 }
 0x992   : > { %v21180_v53 = vpop.f32.mrb[76].mxu1  ;;  %v10293_v30 = vadd.f32 %v25142_v38, %v10291_v8 }
 0x993   : > { %10023 = vst [vmem:[#allocation2 + $0x270] sm:$0xff] %v21180_v53  ;;  %v9674_v63 = vpop.f32.mrb[77].mxu1  ;;  %v10302_v48 = vld [vmem:[#allocation2 + $0x250] ss:$2 sm:$0xf] }
 0x994   : > { %10021 = vst [vmem:[#allocation2 + $0x260] sm:$0xff] %v9674_v63  ;;  %v21181_v5 = vpop.f32.mrb[78].mxu1  ;;  %v10295_v44 = vmax.f32 %v10293_v30, 0.0  ;;  %v10306_v22 = vld [vmem:[#allocation2 + $0x251] ss:$2 sm:$0xf] }
 0x995   : > { %v9677_v0 = vpop.f32.mrb[79].mxu1  ;;  %v10308_v41 = vmax.f32 %v10302_v48, %v10306_v22 }
 0x996   : > { %10022 = vst [vmem:[#allocation2 + $0x268] sm:$0xff] %v9677_v0  ;;  %v10297_v23 = vpack.c.bf16 %v10296_v60, %v10295_v44  ;;  %v10300_v54 = vld [vmem:[#allocation2 + $0x240] ss:$2 sm:$0xff]  ;;  %v10304_v62 = vld [vmem:[#allocation2 + $0x241] ss:$2 sm:$0xff] }
 0x997   : > { %v10307_v56 = vmax.f32 %v10300_v54, %v10304_v62 }
 0x998   : > { %10298 = vst [vmem:[#allocation4 + $0x40] sm:$0x3f] %v10297_v23 }
 0x99a   : > { %v10312_v57 = vld [vmem:[#allocation2 + $0x270] ss:$2 sm:$0xf]  ;;  %v10316_v18 = vld [vmem:[#allocation2 + $0x271] ss:$2 sm:$0xf] }
 0x99b   : > { %v10318_v14 = vmax.f32 %v10312_v57, %v10316_v18  ;;  %v21184_v32 = vpop.f32.mrb[80].mxu1 }
 0x99c   : > { %10027 = vst [vmem:[#allocation2 + $0x290] sm:$0xff] %v21184_v32  ;;  %v9690_v42 = vpop.f32.mrb[81].mxu1  ;;  %v10428_v32 = vshll.u32 %v25204_v2, 16 }
 0x99d   : > { %v10320_v36 = vmax.f32 %v10308_v41, %v10318_v14  ;;  %10025 = vst [vmem:[#allocation2 + $0x280] sm:$0xff] %v9690_v42  ;;  %v21185_v24 = vpop.f32.mrb[82].mxu1  ;;  %v10310_v25 = vld [vmem:[#allocation2 + $0x260] ss:$2 sm:$0xff]  ;;  %v10314_v16 = vld [vmem:[#allocation2 + $0x261] ss:$2 sm:$0xff] }
 0x99e   : > { %v9693_v43 = vpop.f32.mrb[83].mxu1  ;;  %v10317_v19 = vmax.f32 %v10310_v25, %v10314_v16  ;;  %v23092_v42 = vld [vmem:[#allocation8 + $0x88] sm:$0xff]  }
 0x99f   : > { %10026 = vst [vmem:[#allocation2 + $0x288] sm:$0xff] %v9693_v43  ;;  %v25224_v58 = vld [vmem:[#allocation4 + $0x40] sm:$0xff]  ;;  %v10322_v13 = vadd.f32 %v25142_v38, %v10320_v36  ;;  %v10436_v36 = vshll.u32 %v25209_v46, 16 }
 0x9a0   : > { %v10319_v35 = vmax.f32 %v10307_v56, %v10317_v19  ;;  %21230 = vmatprep.mubr.bf16.mxu0 %v25224_v58 }
 0x9a1   : > { %v10324_v7 = vmax.f32 %v10322_v13, 0.0  ;;  %v10424_v13 = vshrl.u32 %v25183_v39, 16  ;;  %v23104_v39 = vld [vmem:[#allocation8 + $0xe8] sm:$0xff]  }
 0x9a2   : > { %v21188_v55 = vpop.f32.mrb[84].mxu1  ;;  %v10321_v10 = vadd.f32 %v25142_v38, %v10319_v35  ;;  %v23093_v35 = vld [vmem:[#allocation8 + $0x90] sm:$0xff]  }
 0x9a3   : > { %10031 = vst [vmem:[#allocation2 + $0x2b0] sm:$0xff] %v21188_v55  ;;  %v9706_v6 = vpop.f32.mrb[85].mxu1  ;;  %v10330_v11 = vld [vmem:[#allocation2 + $0x290] ss:$2 sm:$0xf] }
 0x9a4   : > { %10029 = vst [vmem:[#allocation2 + $0x2a0] sm:$0xff] %v9706_v6  ;;  %v21189_v31 = vpop.f32.mrb[86].mxu1  ;;  %v10323_v52 = vmax.f32 %v10321_v10, 0.0  ;;  %v10334_v15 = vld [vmem:[#allocation2 + $0x291] ss:$2 sm:$0xf] }
 0x9a5   : > { %v9709_v29 = vpop.f32.mrb[87].mxu1  ;;  %v10336_v4 = vmax.f32 %v10330_v11, %v10334_v15  ;;  %v10432_v31 = vshrl.u32 %v25204_v2, 16  ;;  %v10444_v15 = vshll.u32 %v25214_v59, 16 }
 0x9a6   : > { %10030 = vst [vmem:[#allocation2 + $0x2a8] sm:$0xff] %v9709_v29  ;;  %v10325_v1 = vpack.c.bf16 %v10324_v7, %v10323_v52  ;;  %v10328_v26 = vld [vmem:[#allocation2 + $0x280] ss:$2 sm:$0xff]  ;;  %v10332_v47 = vld [vmem:[#allocation2 + $0x281] ss:$2 sm:$0xff]  ;;  %v10438_v52 = vrot.slane %v10436_v36, 1  ;;  %v10426_v29 = vor.u32 %v10424_v13, %v25191_v33 }
 0x9a7   : > { %v10335_v5 = vmax.f32 %v10328_v26, %v10332_v47  ;;  %v10452_v47 = vshll.u32 %v25219_v20, 16  ;;  %v10460_v36 = vshll.u32 %v25224_v58, 16  ;;  %v10532_v13 = vld [vmem:[#allocation4 + $0x60] sm:$0x1] }
 0x9a8   : > { %10326 = vst [vmem:[#allocation4 + $0x48] sm:$0x3f] %v10325_v1 }
 0x9aa   : > { %v10340_v17 = vld [vmem:[#allocation2 + $0x2b0] ss:$2 sm:$0xf]  ;;  %v10344_v50 = vld [vmem:[#allocation2 + $0x2b1] ss:$2 sm:$0xf] }
 0x9ab   : > { %v10346_v21 = vmax.f32 %v10340_v17, %v10344_v50  ;;  %v21192_v9 = vpop.f32.mrb[88].mxu1 }
 0x9ac   : > { %10035 = vst [vmem:[#allocation2 + $0x2d0] sm:$0xff] %v21192_v9  ;;  %v9722_v28 = vpop.f32.mrb[89].mxu1 }
 0x9ad   : > { %v10348_v61 = vmax.f32 %v10336_v4, %v10346_v21  ;;  %10033 = vst [vmem:[#allocation2 + $0x2c0] sm:$0xff] %v9722_v28  ;;  %v21193_v8 = vpop.f32.mrb[90].mxu1  ;;  %v10338_v53 = vld [vmem:[#allocation2 + $0x2a0] ss:$2 sm:$0xff]  ;;  %v10342_v30 = vld [vmem:[#allocation2 + $0x2a1] ss:$2 sm:$0xff] }
 0x9ae   : > { %v9725_v63 = vpop.f32.mrb[91].mxu1  ;;  %v10345_v44 = vmax.f32 %v10338_v53, %v10342_v30  ;;  %v23094_v21 = vld [vmem:[#allocation8 + $0x98] sm:$0xff]  }
 0x9af   : > { %10034 = vst [vmem:[#allocation2 + $0x2c8] sm:$0xff] %v9725_v63  ;;  %v25229_v60 = vld [vmem:[#allocation4 + $0x48] sm:$0xff]  ;;  %v10350_v0 = vadd.f32 %v25142_v38, %v10348_v61 }
 0x9b0   : > { %v10347_v23 = vmax.f32 %v10335_v5, %v10345_v44  ;;  %21231 = vmatmul.mubr.bf16.gmra.mrb[228].mxu0 %v25229_v60  ;;  %v10468_v55 = vshll.u32 %v25229_v60, 16  ;;  %v10472_v28 = vshrl.u32 %v25229_v60, 16  ;;  %v10563_v61 = vrot.slane %v25229_v60, 1 }
 0x9b1   : > { %21250 = vmatprep.mubr.bf16.mxu0 %v25159_v27  ;;  %v10352_v18 = vmax.f32 %v10350_v0, 0.0  ;;  %v10430_v27 = vrot.slane %v10428_v32, 1  ;;  %v10446_v5 = vrot.slane %v10444_v15, 1  ;;  %v23095_v0 = vld [vmem:[#allocation8 + $0xa0] sm:$0xff]   ;;  %v10454_v32 = vrot.slane %v10452_v47, 1 }
 0x9b2   : > { %v21196_v48 = vpop.f32.mrb[92].mxu1  ;;  %v10349_v22 = vadd.f32 %v25142_v38, %v10347_v23  ;;  %v10470_v9 = vrot.slane %v10468_v55, 1 }
 0x9b3   : > { %10039 = vst [vmem:[#allocation2 + $0x2f0] sm:$0xff] %v21196_v48  ;;  %v9738_v57 = vpop.f32.mrb[93].mxu1  ;;  %v10358_v24 = vld [vmem:[#allocation2 + $0x2d0] ss:$2 sm:$0xf]  ;;  %v10434_v11 = vor.u32 %v10432_v31, %v10430_v27  ;;  %v25246_v4 = vsel %vm2031_vm2, %v10426_v29, %v10430_v27  ;;  %v23098_v31 = vld [vmem:[#allocation8 + $0xb8] sm:$0xff]  }
 0x9b4   : > { %v10351_v41 = vmax.f32 %v10349_v22, 0.0  ;;  %10037 = vst [vmem:[#allocation2 + $0x2e0] sm:$0xff] %v9738_v57  ;;  %v21197_v14 = vpop.f32.mrb[94].mxu1  ;;  %v10362_v25 = vld [vmem:[#allocation2 + $0x2d1] ss:$2 sm:$0xf]  ;;  %v10474_v23 = vor.u32 %v10472_v28, %v10470_v9 }
 0x9b5   : > { %v9741_v54 = vpop.f32.mrb[95].mxu1  ;;  %v10364_v56 = vmax.f32 %v10358_v24, %v10362_v25  ;;  %v25249_v26 = vsel %vm2031_vm2, %v10434_v11, %v10438_v52  ;;  %v10440_v57 = vshrl.u32 %v25209_v46, 16  ;;  %v23096_v24 = vld [vmem:[#allocation8 + $0xa8] sm:$0xff]  }
 0x9b6   : > { %v10353_v62 = vpack.c.bf16 %v10352_v18, %v10351_v41  ;;  %10038 = vst [vmem:[#allocation2 + $0x2e8] sm:$0xff] %v9741_v54  ;;  %v10356_v10 = vld [vmem:[#allocation2 + $0x2c0] ss:$2 sm:$0xff]  ;;  %v10360_v6 = vld [vmem:[#allocation2 + $0x2c1] ss:$2 sm:$0xff]  ;;  %v10448_v18 = vshrl.u32 %v25214_v59, 16 }
 0x9b7   : > { %v10363_v17 = vmax.f32 %v10356_v10, %v10360_v6  ;;  %v10442_v54 = vor.u32 %v10440_v57, %v10438_v52  ;;  %v10569_v52 = vrot.slane %v10532_v13, 1  ;;  %v10553_v57 = vrot.slane %v25204_v2, 1  ;;  %v23108_v13 = vld [vmem:[#allocation8 + $0x108] sm:$0xff]  }
 0x9b8   : > { %10354 = vst [vmem:[#allocation4 + $0x50] sm:$0x3f] %v10353_v62  ;;  %21251 = vmatmul.mubr.bf16.vlgmr.msra.gmra.mrb[212].mxu0 %v25178_v51 }
 0x9b9   : > { %21271 = vmatpush3.bf16.msra.mxu0 %v25180_v40  ;;  %21254 = vmatprep.mubr.bf16.mxu0 %v25202_v12  ;;  %v25276_v25 = vsel %vm2031_vm2, %v10442_v54, %v10446_v5  ;;  %v25326_v49 = vsel %vm2662_vm1, %v10551_v45, %v10553_v57  ;;  %v10559_v54 = vrot.slane %v25219_v20, 1 }
 0x9ba   : > { %v10368_v16 = vld [vmem:[#allocation2 + $0x2f0] ss:$2 sm:$0xf]  ;;  %v10372_v43 = vld [vmem:[#allocation2 + $0x2f1] ss:$2 sm:$0xf]  ;;  %21272 = vmatprep.subr.bf16.mxu0 %v23092_v42 }
 0x9bb   : > { %v10374_v19 = vmax.f32 %v10368_v16, %v10372_v43  ;;  %v10462_v16 = vrot.slane %v10460_v36, 1  ;;  %v23097_v43 = vld [vmem:[#allocation8 + $0xb0] sm:$0xff]   ;;  %v10561_v36 = vrot.slane %v25224_v58, 1 }
 0x9bd   : > { %v10376_v7 = vmax.f32 %v10364_v56, %v10374_v19  ;;  %v10366_v1 = vld [vmem:[#allocation2 + $0x2e0] ss:$2 sm:$0xff]  ;;  %v10370_v40 = vld [vmem:[#allocation2 + $0x2e1] ss:$2 sm:$0xff]  ;;  %21273 = vmatpush3.bf16.msra.mxu0 %v23092_v42  ;;  %v10450_v42 = vor.u32 %v10448_v18, %v10446_v5  ;;  %v10395_v56 = vld [vmem:[#allocation4 + $0x60] sm:$0x1] }
 0x9be   : > { %v10373_v50 = vmax.f32 %v10366_v1, %v10370_v40  ;;  %21274 = vmatprep.subr.bf16.mxu0 %v23093_v35  ;;  %v10456_v19 = vshrl.u32 %v25219_v20, 16  ;;  %v10492_v10 = vshll.u32 %v10395_v56, 16  ;;  %v10555_v18 = vrot.slane %v25209_v46, 1  ;;  %v23107_v56 = vld [vmem:[#allocation8 + $0x100] sm:$0xff]  }
 0x9bf   : > { %v25252_v33 = vld [vmem:[#allocation4 + $0x50] sm:$0xff]  ;;  %v10378_v8 = vadd.f32 %v25142_v38, %v10376_v7  ;;  %v25280_v27 = vsel %vm2031_vm2, %v10450_v42, %v10454_v32  ;;  %v23105_v42 = vld [vmem:[#allocation8 + $0xf0] sm:$0xff]  }
 0x9c0   : > { %v10375_v53 = vmax.f32 %v10363_v17, %v10373_v50  ;;  %21255 = vmatmul.mubr.bf16.gmra.mrb[216].mxu0 %v25246_v4  ;;  %v10476_v30 = vshll.u32 %v25252_v33, 16  ;;  %v10565_v63 = vrot.slane %v25252_v33, 1  ;;  %v10458_v55 = vor.u32 %v10456_v19, %v10454_v32  ;;  %v11298_v19 = vld [vmem:[#allocation4 + $0x8] sm:$0xff] }
 0x9c1   : > { %21258 = vmatprep.mubr.bf16.mxu0 %v25249_v26  ;;  %21275 = vmatpush3.bf16.msra.mxu0 %v23093_v35  ;;  %v10380_v41 = vmax.f32 %v10378_v8, 0.0  ;;  %v10464_v35 = vshrl.u32 %v25224_v58, 16  ;;  %v10480_v1 = vshrl.u32 %v25252_v33, 16  ;;  %v10494_v50 = vrot.slane %v10492_v10, 1  ;;  %v23110_v10 = vld [vmem:[#allocation8 + $0x118] sm:$0xff]  }
 0x9c2   : > { %v10377_v44 = vadd.f32 %v25142_v38, %v10375_v53  ;;  %21276 = vmatprep.subr.bf16.mxu0 %v23094_v21  ;;  %v10478_v48 = vrot.slane %v10476_v30, 1  ;;  %v25265_v22 = vsel %vm2662_vm1, %v10563_v61, %v10565_v63  ;;  %v25286_v7 = vsel %vm2031_vm2, %v10458_v55, %v10462_v16  ;;  %v10520_v53 = vld [vmem:[#allocation4] sm:$0xfe]  ;;  %v25358_v55 = vld [vmem:[#allocation4 + $0x18] sm:$0xff] }
 0x9c3   : > { %10592 = vst [vmem:[#allocation7 + $0x48] sm:$0xff] %v25265_v22  ;;  %v10466_v6 = vor.u32 %v10464_v35, %v10462_v16  ;;  %v10557_v32 = vrot.slane %v25214_v59, 1  ;;  %v25345_v16 = vsel %vm2662_vm1, %v10559_v54, %v10561_v36  ;;  %v25355_v35 = vld [vmem:[#allocation4 + $0x10] sm:$0xff] }
 0x9c4   : > { %v10379_v14 = vmax.f32 %v10377_v44, 0.0  ;;  %v25271_v38 = vsel %vm2031_vm2, %v10474_v23, %v10478_v48  ;;  %v10482_v17 = vor.u32 %v10480_v1, %v10478_v48  ;;  %v10546_v44 = vrot.slane %v10520_v53, 1  ;;  %v23100_v23 = vld [vmem:[#allocation8 + $0xc8] sm:$0xff]   ;;  %v23101_v48 = vld [vmem:[#allocation8 + $0xd0] sm:$0xff]   ;;  %v23114_v1 = vld [vmem:[#allocation8 + $0x138] sm:$0xff]  }
 0x9c5   : > { %21277 = vmatpush3.bf16.msra.mxu0 %v23094_v21  ;;  %10517 = vst [vmem:[#allocation6 + $0x48] sm:$0xff] %v25271_v38  ;;  %v25293_v40 = vsel %vm2031_vm2, %v10466_v6, %v10470_v9  ;;  %v23099_v21 = vld [vmem:[#allocation8 + $0xc0] sm:$0xff]   ;;  %v25336_v45 = vsel %vm2662_vm1, %v10555_v18, %v10557_v32  ;;  %v23129_v53 = vld [vmem:[#allocation8 + $0x1b0] sm:$0xff]  }
 0x9c6   : > { %v10381_v62 = vpack.c.bf16 %v10380_v41, %v10379_v14  ;;  %21278 = vmatprep.subr.bf16.mxu0 %v23095_v0  ;;  %v23102_v41 = vld [vmem:[#allocation8 + $0xd8] sm:$0xff]   ;;  %v23103_v14 = vld [vmem:[#allocation8 + $0xe0] sm:$0xff]  }
 0x9c7   : > { %v23111_v6 = vld [vmem:[#allocation8 + $0x120] sm:$0xff]  }
 0x9c8   : > { %10382 = vst [vmem:[#allocation4 + $0x58] sm:$0x3f] %v10381_v62  ;;  %21259 = vmatmul.mubr.bf16.gmra.mrb[220].mxu0 %v25276_v25  ;;  %v25340_v62 = vsel %vm2662_vm1, %v10557_v32, %v10559_v54  ;;  %v23136_v32 = vld [vmem:[#allocation8 + $0x1e8] sm:$0xff]   ;;  %v12047_v54 = vld [vmem:[#allocation4 + $0x38] sm:$0xff] }
 0x9c9   : > { %21262 = vmatprep.mubr.bf16.mxu0 %v25280_v27  ;;  %21279 = vmatpush3.bf16.msra.mxu0 %v23095_v0  ;;  %v10548_v0 = vsel %vm2662_vm1, %v10546_v44, %v10547_v37  ;;  %v25330_v37 = vsel %vm2662_vm1, %v10553_v57, %v10555_v18  ;;  %v23131_v44 = vld [vmem:[#allocation8 + $0x1c0] sm:$0xff]   ;;  %v23134_v57 = vld [vmem:[#allocation8 + $0x1d8] sm:$0xff]   ;;  %v12045_v18 = vld [vmem:[#allocation4 + $0x28] sm:$0xff] }
 0x9ca   : > { %21280 = vmatprep.subr.bf16.mxu0 %v23096_v24 }
 0x9cd   : > { %21281 = vmatpush3.bf16.msra.mxu0 %v23096_v24  ;;  %v23106_v24 = vld [vmem:[#allocation8 + $0xf8] sm:$0xff]  }
 0x9ce   : > { %21282 = vmatprep.subr.bf16.mxu0 %v23097_v43 }
 0x9cf   : > { %v25288_v29 = vld [vmem:[#allocation4 + $0x58] sm:$0xff] }
 0x9d0   : > { %21263 = vmatmul.mubr.bf16.gmra.mrb[224].mxu0 %v25286_v7  ;;  %v10484_v11 = vshll.u32 %v25288_v29, 16  ;;  %v10567_v15 = vrot.slane %v25288_v29, 1  ;;  %v10488_v8 = vshrl.u32 %v25288_v29, 16 }
 0x9d1   : > { %21266 = vmatprep.mubr.bf16.mxu0 %v25293_v40  ;;  %21283 = vmatpush3.bf16.msra.mxu0 %v23097_v43  ;;  %v25351_v43 = vsel %vm2662_vm1, %v10561_v36, %v10563_v61  ;;  %v23109_v61 = vld [vmem:[#allocation8 + $0x110] sm:$0xff]   ;;  %v23138_v36 = vld [vmem:[#allocation8 + $0x1f8] sm:$0xff]  }
 0x9d2   : > { %21284 = vmatprep.subr.bf16.mxu0 %v23098_v31  ;;  %v10486_v47 = vrot.slane %v10484_v11, 1  ;;  %v25299_v28 = vsel %vm2662_vm1, %v10565_v63, %v10567_v15  ;;  %v25303_v9 = vsel %vm2662_vm1, %v10567_v15, %v10569_v52  ;;  %v23113_v52 = vld [vmem:[#allocation8 + $0x130] sm:$0xff]   ;;  %v23122_v15 = vld [vmem:[#allocation8 + $0x178] sm:$0xff]  }
 0x9d3   : > { %10593 = vst [vmem:[#allocation7 + $0x50] sm:$0xff] %v25299_v28  ;;  %10594 = vst [vmem:[#allocation7 + $0x58] sm:$0xff] %v25303_v9  ;;  %v23121_v11 = vld [vmem:[#allocation8 + $0x170] sm:$0xff]  }
 0x9d4   : > { %v25308_v30 = vsel %vm2031_vm2, %v10482_v17, %v10486_v47  ;;  %v10490_v5 = vor.u32 %v10488_v8, %v10486_v47  ;;  %v23123_v17 = vld [vmem:[#allocation8 + $0x180] sm:$0xff]   ;;  %v23126_v47 = vld [vmem:[#allocation8 + $0x198] sm:$0xff]  }
 0x9d5   : > { %21285 = vmatpush3.bf16.msra.mxu0 %v23098_v31  ;;  %10518 = vst [vmem:[#allocation6 + $0x50] sm:$0xff] %v25308_v30  ;;  %v23112_v31 = vld [vmem:[#allocation8 + $0x128] sm:$0xff]   ;;  %v23127_v8 = vld [vmem:[#allocation8 + $0x1a0] sm:$0xff]  }
 0x9d6   : > { %21306 = vmatprep.subr.bf16.mxu0 %v23099_v21  ;;  %v25312_v63 = vsel %vm2031_vm2, %v10490_v5, %v10494_v50  ;;  %v23124_v50 = vld [vmem:[#allocation8 + $0x188] sm:$0xff]   ;;  %v23130_v5 = vld [vmem:[#allocation8 + $0x1b8] sm:$0xff]  }
 0x9d7   : > { %10519 = vst [vmem:[#allocation6 + $0x58] sm:$0xff] %v25312_v63 }
 0x9d8   : > { %21267 = vmatmul.mubr.bf16.gmra.mrb[228].mxu0 %v25271_v38 }
 0x9d9   : > { %21286 = vmatprep.mubr.bf16.mxu0 %v10548_v0  ;;  %v23132_v0 = vld [vmem:[#allocation8 + $0x1c8] sm:$0xff]  }
 0x9e0   : > { %21287 = vmatmul.mubr.bf16.vlgmr.msra.gmra.mrb[212].mxu0 %v25174_v3 }
 0x9e1   : > { %21307 = vmatpush3.bf16.msra.mxu0 %v23099_v21  ;;  %21290 = vmatprep.mubr.bf16.mxu0 %v25198_v34  ;;  %v23125_v21 = vld [vmem:[#allocation8 + $0x190] sm:$0xff]  }
 0x9e2   : > { %21308 = vmatprep.subr.bf16.mxu0 %v23100_v23 }
 0x9e5   : > { %21309 = vmatpush3.bf16.msra.mxu0 %v23100_v23  ;;  %v12044_v23 = vld [vmem:[#allocation4 + $0x20] sm:$0xff] }
 0x9e6   : > { %21310 = vmatprep.subr.bf16.mxu0 %v23101_v48 }
 0x9e8   : > { %21291 = vmatmul.mubr.bf16.gmra.mrb[216].mxu0 %v25326_v49 }
 0x9e9   : > { %21294 = vmatprep.mubr.bf16.mxu0 %v25330_v37  ;;  %21311 = vmatpush3.bf16.msra.mxu0 %v23101_v48  ;;  %v23133_v48 = vld [vmem:[#allocation8 + $0x1d0] sm:$0xff]  }
 0x9ea   : > { %21312 = vmatprep.subr.bf16.mxu0 %v23102_v41 }
 0x9ed   : > { %21313 = vmatpush3.bf16.msra.mxu0 %v23102_v41  ;;  %v12046_v41 = vld [vmem:[#allocation4 + $0x30] sm:$0xff] }
 0x9ee   : > { %21314 = vmatprep.subr.bf16.mxu0 %v23103_v14 }
 0x9f0   : > { %21295 = vmatmul.mubr.bf16.gmra.mrb[220].mxu0 %v25336_v45 }
 0x9f1   : > { %21298 = vmatprep.mubr.bf16.mxu0 %v25340_v62  ;;  %21315 = vmatpush3.bf16.msra.mxu0 %v23103_v14  ;;  %v23135_v14 = vld [vmem:[#allocation8 + $0x1e0] sm:$0xff]  }
 0x9f2   : > { %21316 = vmatprep.subr.bf16.mxu0 %v23104_v39 }
 0x9f5   : > { %21317 = vmatpush3.bf16.msra.mxu0 %v23104_v39  ;;  %v12048_v39 = vld [vmem:[#allocation4 + $0x40] sm:$0xff] }
 0x9f6   : > { %21318 = vmatprep.subr.bf16.mxu0 %v23105_v42 }
 0x9f8   : > { %21299 = vmatmul.mubr.bf16.gmra.mrb[224].mxu0 %v25345_v16 }
 0x9f9   : > { %21302 = vmatprep.mubr.bf16.mxu0 %v25351_v43  ;;  %21319 = vmatpush3.bf16.msra.mxu0 %v23105_v42  ;;  %v23137_v42 = vld [vmem:[#allocation8 + $0x1f0] sm:$0xff]  }
 0x9fa   : > { %21320 = vmatprep.subr.bf16.mxu0 %v23106_v24 }
 0x9fd   : > { %21321 = vmatpush3.bf16.msra.mxu0 %v23106_v24  ;;  %v23139_v24 = vld [vmem:[#allocation8 + $0x200] sm:$0xff]  }
 0x9fe   : > { %21342 = vmatprep.subr.bf16.mxu0 %v23107_v56 }
 0xa00   : > { %21303 = vmatmul.mubr.bf16.gmra.mrb[228].mxu0 %v25265_v22 }
 0xa01   : > { %21322 = vmatprep.mubr.bf16.mxu0 %v11298_v19  ;;  %v23141_v19 = vld [vmem:[#allocation8 + $0x210] sm:$0xff]  }
 0xa08   : > { %21323 = vmatmul.mubr.bf16.vlgmr.msra.gmra.mrb[212].mxu0 %v25355_v35 }
 0xa09   : > { %21343 = vmatpush3.bf16.msra.mxu0 %v23107_v56  ;;  %21326 = vmatprep.mubr.bf16.mxu0 %v25358_v55  ;;  %v23140_v56 = vld [vmem:[#allocation8 + $0x208] sm:$0xff]  }
 0xa0a   : > { %21344 = vmatprep.subr.bf16.mxu0 %v23108_v13 }
 0xa0d   : > { %21345 = vmatpush3.bf16.msra.mxu0 %v23108_v13 }
 0xa0e   : > { %21346 = vmatprep.subr.bf16.mxu0 %v23109_v61 }
 0xa10   : > { %21327 = vmatmul.mubr.bf16.gmra.mrb[216].mxu0 %v25204_v2  ;;  %v23115_v2 = vld [vmem:[#allocation8 + $0x140] sm:$0xff]  }
 0xa11   : > { %21330 = vmatprep.mubr.bf16.mxu0 %v25209_v46  ;;  %21347 = vmatpush3.bf16.msra.mxu0 %v23109_v61  ;;  %v23116_v46 = vld [vmem:[#allocation8 + $0x148] sm:$0xff]  }
 0xa12   : > { %21348 = vmatprep.subr.bf16.mxu0 %v23110_v10 }
 0xa15   : > { %21349 = vmatpush3.bf16.msra.mxu0 %v23110_v10 }
 0xa16   : > { %21350 = vmatprep.subr.bf16.mxu0 %v23111_v6 }
 0xa18   : > { %21331 = vmatmul.mubr.bf16.gmra.mrb[220].mxu0 %v25214_v59  ;;  %v23117_v59 = vld [vmem:[#allocation8 + $0x150] sm:$0xff]  }
 0xa19   : > { %21334 = vmatprep.mubr.bf16.mxu0 %v25219_v20  ;;  %21351 = vmatpush3.bf16.msra.mxu0 %v23111_v6  ;;  %v23118_v20 = vld [vmem:[#allocation8 + $0x158] sm:$0xff]  }
 0xa1a   : > { %21352 = vmatprep.subr.bf16.mxu0 %v23112_v31 }
 0xa1d   : > { %21353 = vmatpush3.bf16.msra.mxu0 %v23112_v31 }
 0xa1e   : > { %21354 = vmatprep.subr.bf16.mxu0 %v23113_v52 }
 0xa20   : > { %21335 = vmatmul.mubr.bf16.gmra.mrb[224].mxu0 %v25224_v58  ;;  %v23119_v58 = vld [vmem:[#allocation8 + $0x160] sm:$0xff]  }
 0xa21   : > { %21338 = vmatprep.mubr.bf16.mxu0 %v25229_v60  ;;  %21355 = vmatpush3.bf16.msra.mxu0 %v23113_v52 }
 0xa22   : > { %21356 = vmatprep.subr.bf16.mxu0 %v23114_v1 }
 0xa25   : > { %21357 = vmatpush3.bf16.msra.mxu0 %v23114_v1  ;;  %v23156_v1 = vld [vmem:[#allocation11 + $0x48] sm:$0xff]  }
 0xa26   : > { %21378 = vmatprep.subr.bf16.mxu0 %v23115_v2 }
 0xa28   : > { %21339 = vmatmul.mubr.bf16.gmra.mrb[228].mxu0 %v25252_v33 }
 0xa29   : > { %21358 = vmatprep.mubr.bf16.mxu0 %v25178_v51  ;;  %v23120_v51 = vld [vmem:[#allocation8 + $0x168] sm:$0xff]  }
 0xa30   : > { %21359 = vmatmul.mubr.bf16.vlgmr.msra.gmra.mrb[212].mxu0 %v25202_v12 }
 0xa31   : > { %21379 = vmatpush3.bf16.msra.mxu0 %v23115_v2  ;;  %21362 = vmatprep.mubr.bf16.mxu0 %v25246_v4 }
 0xa32   : > { %21380 = vmatprep.subr.bf16.mxu0 %v23116_v46 }
 0xa35   : > { %21381 = vmatpush3.bf16.msra.mxu0 %v23116_v46 }
 0xa36   : > { %21382 = vmatprep.subr.bf16.mxu0 %v23117_v59 }
 0xa38   : > { %21363 = vmatmul.mubr.bf16.gmra.mrb[216].mxu0 %v25249_v26 }
 0xa39   : > { %21366 = vmatprep.mubr.bf16.mxu0 %v25276_v25  ;;  %21383 = vmatpush3.bf16.msra.mxu0 %v23117_v59 }
 0xa3a   : > { %21384 = vmatprep.subr.bf16.mxu0 %v23118_v20 }
 0xa3d   : > { %21385 = vmatpush3.bf16.msra.mxu0 %v23118_v20 }
 0xa3e   : > { %21386 = vmatprep.subr.bf16.mxu0 %v23119_v58 }
 0xa40   : > { %21367 = vmatmul.mubr.bf16.gmra.mrb[220].mxu0 %v25280_v27 }
 0xa41   : > { %21370 = vmatprep.mubr.bf16.mxu0 %v25286_v7  ;;  %21387 = vmatpush3.bf16.msra.mxu0 %v23119_v58 }
 0xa42   : > { %21388 = vmatprep.subr.bf16.mxu0 %v23120_v51 }
 0xa45   : > { %21389 = vmatpush3.bf16.msra.mxu0 %v23120_v51 }
 0xa46   : > { %21390 = vmatprep.subr.bf16.mxu0 %v23121_v11 }
 0xa48   : > { %21371 = vmatmul.mubr.bf16.gmra.mrb[224].mxu0 %v25293_v40 }
 0xa49   : > { %21374 = vmatprep.mubr.bf16.mxu0 %v25271_v38  ;;  %21391 = vmatpush3.bf16.msra.mxu0 %v23121_v11 }
 0xa4a   : > { %21392 = vmatprep.subr.bf16.mxu0 %v23122_v15 }
 0xa4d   : > { %21393 = vmatpush3.bf16.msra.mxu0 %v23122_v15 }
 0xa4e   : > { %21414 = vmatprep.subr.bf16.mxu0 %v23123_v17 }
 0xa50   : > { %21375 = vmatmul.mubr.bf16.gmra.mrb[228].mxu0 %v25308_v30 }
 0xa51   : > { %21394 = vmatprep.mubr.bf16.mxu0 %v25174_v3  ;;  %v23128_v3 = vld [vmem:[#allocation8 + $0x1a8] sm:$0xff]  }
 0xa58   : > { %21395 = vmatmul.mubr.bf16.vlgmr.msra.gmra.mrb[212].mxu0 %v25198_v34 }
 0xa59   : > { %21415 = vmatpush3.bf16.msra.mxu0 %v23123_v17  ;;  %21398 = vmatprep.mubr.bf16.mxu0 %v25326_v49 }
 0xa5a   : > { %21416 = vmatprep.subr.bf16.mxu0 %v23124_v50 }
 0xa5d   : > { %21417 = vmatpush3.bf16.msra.mxu0 %v23124_v50 }
 0xa5e   : > { %21418 = vmatprep.subr.bf16.mxu0 %v23125_v21 }
 0xa60   : > { %21399 = vmatmul.mubr.bf16.gmra.mrb[216].mxu0 %v25330_v37 }
 0xa61   : > { %21402 = vmatprep.mubr.bf16.mxu0 %v25336_v45  ;;  %21419 = vmatpush3.bf16.msra.mxu0 %v23125_v21 }
 0xa62   : > { %21420 = vmatprep.subr.bf16.mxu0 %v23126_v47 }
 0xa65   : > { %21421 = vmatpush3.bf16.msra.mxu0 %v23126_v47  ;;  %v23157_v47 = vld [vmem:[#allocation11 + $0x50] sm:$0xff]  }
 0xa66   : > { %21422 = vmatprep.subr.bf16.mxu0 %v23127_v8 }
 0xa68   : > { %21403 = vmatmul.mubr.bf16.gmra.mrb[220].mxu0 %v25340_v62 }
 0xa69   : > { %21406 = vmatprep.mubr.bf16.mxu0 %v25345_v16  ;;  %21423 = vmatpush3.bf16.msra.mxu0 %v23127_v8 }
 0xa6a   : > { %21424 = vmatprep.subr.bf16.mxu0 %v23128_v3 }
 0xa6d   : > { %21425 = vmatpush3.bf16.msra.mxu0 %v23128_v3 }
 0xa6e   : > { %21426 = vmatprep.subr.bf16.mxu0 %v23129_v53 }
 0xa70   : > { %21407 = vmatmul.mubr.bf16.gmra.mrb[224].mxu0 %v25351_v43 }
 0xa71   : > { %21410 = vmatprep.mubr.bf16.mxu0 %v25265_v22  ;;  %21427 = vmatpush3.bf16.msra.mxu0 %v23129_v53 }
 0xa72   : > { %21428 = vmatprep.subr.bf16.mxu0 %v23130_v5 }
 0xa75   : > { %21429 = vmatpush3.bf16.msra.mxu0 %v23130_v5 }
 0xa76   : > { %21450 = vmatprep.subr.bf16.mxu0 %v23131_v44 }
 0xa78   : > { %21411 = vmatmul.mubr.bf16.gmra.mrb[228].mxu0 %v25299_v28 }
 0xa79   : > { %21430 = vmatprep.mubr.bf16.mxu0 %v25355_v35 }
 0xa80   : > { %21431 = vmatmul.mubr.bf16.vlgmr.msra.gmra.mrb[212].mxu0 %v25358_v55 }
 0xa81   : > { %21451 = vmatpush3.bf16.msra.mxu0 %v23131_v44  ;;  %21434 = vmatprep.mubr.bf16.mxu0 %v12044_v23 }
 0xa82   : > { %21452 = vmatprep.subr.bf16.mxu0 %v23132_v0 }
 0xa85   : > { %21453 = vmatpush3.bf16.msra.mxu0 %v23132_v0 }
 0xa86   : > { %21454 = vmatprep.subr.bf16.mxu0 %v23133_v48 }
 0xa88   : > { %21435 = vmatmul.mubr.bf16.gmra.mrb[216].mxu0 %v12045_v18 }
 0xa89   : > { %21438 = vmatprep.mubr.bf16.mxu0 %v12046_v41  ;;  %21455 = vmatpush3.bf16.msra.mxu0 %v23133_v48 }
 0xa8a   : > { %21456 = vmatprep.subr.bf16.mxu0 %v23134_v57 }
 0xa8d   : > { %21457 = vmatpush3.bf16.msra.mxu0 %v23134_v57  ;;  %v23158_v57 = vld [vmem:[#allocation11 + $0x58] sm:$0xff]  }
 0xa8e   : > { %21458 = vmatprep.subr.bf16.mxu0 %v23135_v14 }
 0xa90   : > { %21439 = vmatmul.mubr.bf16.gmra.mrb[220].mxu0 %v12047_v54 }
 0xa91   : > { %21442 = vmatprep.mubr.bf16.mxu0 %v12048_v39  ;;  %21459 = vmatpush3.bf16.msra.mxu0 %v23135_v14 }
 0xa92   : > { %21460 = vmatprep.subr.bf16.mxu0 %v23136_v32 }
 0xa95   : > { %21461 = vmatpush3.bf16.msra.mxu0 %v23136_v32 }
 0xa96   : > { %21462 = vmatprep.subr.bf16.mxu0 %v23137_v42 }
 0xa98   : > { %21443 = vmatmul.mubr.bf16.gmra.mrb[224].mxu0 %v25229_v60  ;;  %v23142_v60 = vld [vmem:[#allocation8 + $0x218] sm:$0xff]  }
 0xa99   : > { %21446 = vmatprep.mubr.bf16.mxu0 %v25252_v33  ;;  %21463 = vmatpush3.bf16.msra.mxu0 %v23137_v42  ;;  %v23143_v33 = vld [vmem:[#allocation8 + $0x220] sm:$0xff]  }
 0xa9a   : > { %21464 = vmatprep.subr.bf16.mxu0 %v23138_v36 }
 0xa9d   : > { %21465 = vmatpush3.bf16.msra.mxu0 %v23138_v36 }
 0xa9e   : > { %21486 = vmatprep.subr.bf16.mxu0 %v23139_v24 }
 0xaa0   : > { %21447 = vmatmul.mubr.bf16.gmra.mrb[228].mxu0 %v25288_v29  ;;  %v23152_v29 = vld [vmem:[#allocation11 + $0x28] sm:$0xff]  }
 0xaa1   : > { %21466 = vmatprep.mubr.bf16.mxu0 %v25202_v12  ;;  %v23144_v12 = vld [vmem:[#allocation8 + $0x228] sm:$0xff]  }
 0xaa8   : > { %21467 = vmatmul.mubr.bf16.vlgmr.msra.gmra.mrb[212].mxu0 %v25246_v4  ;;  %v23145_v4 = vld [vmem:[#allocation8 + $0x230] sm:$0xff]  }
 0xaa9   : > { %21487 = vmatpush3.bf16.msra.mxu0 %v23139_v24  ;;  %21470 = vmatprep.mubr.bf16.mxu0 %v25249_v26  ;;  %v23146_v26 = vld [vmem:[#allocation8 + $0x238] sm:$0xff]  }
 0xaaa   : > { %21488 = vmatprep.subr.bf16.mxu0 %v23140_v56 }
 0xaad   : > { %21489 = vmatpush3.bf16.msra.mxu0 %v23140_v56 }
 0xaae   : > { %21490 = vmatprep.subr.bf16.mxu0 %v23141_v19 }
 0xab0   : > { %21471 = vmatmul.mubr.bf16.gmra.mrb[216].mxu0 %v25276_v25  ;;  %v23147_v25 = vld [vmem:[#allocation11] sm:$0xff]  }
 0xab1   : > { %21474 = vmatprep.mubr.bf16.mxu0 %v25280_v27  ;;  %21491 = vmatpush3.bf16.msra.mxu0 %v23141_v19  ;;  %v23148_v27 = vld [vmem:[#allocation11 + $0x8] sm:$0xff]  }
 0xab2   : > { %21492 = vmatprep.subr.bf16.mxu0 %v23142_v60 }
 0xab5   : > { %21493 = vmatpush3.bf16.msra.mxu0 %v23142_v60 }
 0xab6   : > { %21494 = vmatprep.subr.bf16.mxu0 %v23143_v33 }
 0xab8   : > { %21475 = vmatmul.mubr.bf16.gmra.mrb[220].mxu0 %v25286_v7  ;;  %v23149_v7 = vld [vmem:[#allocation11 + $0x10] sm:$0xff]  }
 0xab9   : > { %21478 = vmatprep.mubr.bf16.mxu0 %v25293_v40  ;;  %21495 = vmatpush3.bf16.msra.mxu0 %v23143_v33  ;;  %v23153_v40 = vld [vmem:[#allocation11 + $0x30] sm:$0xff]  }
 0xaba   : > { %21496 = vmatprep.subr.bf16.mxu0 %v23144_v12 }
 0xabd   : > { %21497 = vmatpush3.bf16.msra.mxu0 %v23144_v12 }
 0xabe   : > { %21498 = vmatprep.subr.bf16.mxu0 %v23145_v4 }
 0xac0   : > { %21479 = vmatmul.mubr.bf16.gmra.mrb[224].mxu0 %v25271_v38  ;;  %v23151_v38 = vld [vmem:[#allocation11 + $0x20] sm:$0xff]  }
 0xac1   : > { %21482 = vmatprep.mubr.bf16.mxu0 %v25308_v30  ;;  %21499 = vmatpush3.bf16.msra.mxu0 %v23145_v4  ;;  %v23154_v30 = vld [vmem:[#allocation11 + $0x38] sm:$0xff]  }
 0xac2   : > { %21500 = vmatprep.subr.bf16.mxu0 %v23146_v26 }
 0xac5   : > { %21501 = vmatpush3.bf16.msra.mxu0 %v23146_v26 }
 0xac6   : > { %21522 = vmatprep.subr.bf16.mxu0 %v23147_v25 }
 0xac8   : > { %21483 = vmatmul.mubr.bf16.gmra.mrb[228].mxu0 %v25312_v63 }
 0xac9   : > { %21502 = vmatprep.mubr.bf16.mxu0 %v25198_v34  ;;  %v23150_v34 = vld [vmem:[#allocation11 + $0x18] sm:$0xff]  }
 0xad0   : > { %21503 = vmatmul.mubr.bf16.vlgmr.msra.gmra.mrb[212].mxu0 %v25326_v49 }
 0xad1   : > { %21506 = vmatprep.mubr.bf16.mxu0 %v25330_v37  ;;  %21523 = vmatpush3.bf16.msra.mxu0 %v23147_v25 }
 0xad2   : > { %21524 = vmatprep.subr.bf16.mxu0 %v23148_v27 }
 0xad5   : > { %21525 = vmatpush3.bf16.msra.mxu0 %v23148_v27 }
 0xad6   : > { %21526 = vmatprep.subr.bf16.mxu0 %v23149_v7 }
 0xad8   : > { %21507 = vmatmul.mubr.bf16.gmra.mrb[216].mxu0 %v25336_v45 }
 0xad9   : > { %21510 = vmatprep.mubr.bf16.mxu0 %v25340_v62  ;;  %21527 = vmatpush3.bf16.msra.mxu0 %v23149_v7 }
 0xada   : > { %21528 = vmatprep.subr.bf16.mxu0 %v23150_v34 }
 0xadd   : > { %21529 = vmatpush3.bf16.msra.mxu0 %v23150_v34 }
 0xade   : > { %21530 = vmatprep.subr.bf16.mxu0 %v23151_v38 }
 0xae0   : > { %21511 = vmatmul.mubr.bf16.gmra.mrb[220].mxu0 %v25345_v16 }
 0xae1   : > { %21514 = vmatprep.mubr.bf16.mxu0 %v25351_v43  ;;  %21531 = vmatpush3.bf16.msra.mxu0 %v23151_v38 }
 0xae2   : > { %21532 = vmatprep.subr.bf16.mxu0 %v23152_v29 }
 0xae5   : > { %21533 = vmatpush3.bf16.msra.mxu0 %v23152_v29 }
 0xae6   : > { %21534 = vmatprep.subr.bf16.mxu0 %v23153_v40 }
 0xae8   : > { %21515 = vmatmul.mubr.bf16.gmra.mrb[224].mxu0 %v25265_v22  ;;  %v23155_v22 = vld [vmem:[#allocation11 + $0x40] sm:$0xff]  }
 0xae9   : > { %21518 = vmatprep.mubr.bf16.mxu0 %v25299_v28  ;;  %21535 = vmatpush3.bf16.msra.mxu0 %v23153_v40  ;;  %v25416_v28 = vld [vmem:[%s26600_s6] ss:$0 sm:$0xff]  ;;  %v23159_v40 = vld [vmem:[#allocation11 + $0x60] sm:$0xff]  }
 0xaea   : > { %21536 = vmatprep.subr.bf16.mxu0 %v23154_v30 }
 0xaed   : > { %21537 = vmatpush3.bf16.msra.mxu0 %v23154_v30 }
 0xaee   : > { %21554 = vmatprep.subr.bf16.mxu0 %v23155_v22 }
 0xaf0   : > { %21519 = vmatmul.mubr.bf16.gmra.mrb[228].mxu0 %v25303_v9 }
 0xba3   : > { %v21504_v9 = vpop.f32.mrb[212].mxu0 }
 0xba4   : > { %v12815_v63 = vadd.f32 %v21504_v9, %v25416_v28  ;;  %v12647_v49 = vpop.f32.mrb[213].mxu0 }
 0xba5   : > { %v21505_v37 = vpop.f32.mrb[214].mxu0  ;;  %v12813_v45 = vadd.f32 %v25416_v28, %v12647_v49 }
 0xba6   : > { %v12816_v62 = vadd.f32 %v21505_v37, %v25416_v28  ;;  %v12650_v16 = vpop.f32.mrb[215].mxu0  ;;  %v12835_v13 = vmax.f32 %v12815_v63, 0.0 }
 0xba7   : > { %v12814_v43 = vadd.f32 %v25416_v28, %v12650_v16  ;;  %v12833_v55 = vmax.f32 %v12813_v45, 0.0 }
 0xba8   : > { %v12836_v35 = vmax.f32 %v12816_v62, 0.0 }
 0xba9   : > { %v12834_v61 = vmax.f32 %v12814_v43, 0.0 }
 0xbaa   : > { %v25422_v10 = vpack.c.bf16 %v12836_v35, %v12835_v13 }
 0xbab   : > { %v21508_v6 = vpop.f32.mrb[216].mxu0  ;;  %v12853_v31 = vpack.c.bf16 %v12834_v61, %v12833_v55  ;;  %v23160_v55 = vld [vmem:[#allocation11 + $0x68] sm:$0xff]  }
 0xbac   : > { %v12663_v52 = vpop.f32.mrb[217].mxu0  ;;  %v12819_v2 = vadd.f32 %v21508_v6, %v25416_v28  ;;  %v12891_v58 = vshll.u32 %v25422_v10, 16  ;;  %v12895_v32 = vshrl.u32 %v25422_v10, 16  ;;  %v13003_v60 = vrot.slane %v25422_v10, 1 }
 0xbad   : > { %v21509_v46 = vpop.f32.mrb[218].mxu0  ;;  %12863 = vst [vmem:[#allocation5] sm:$0xff] %v12853_v31  ;;  %21538 = vmatprep.mubr.bf16.mxu0 %v12853_v31  ;;  %v12817_v59 = vadd.f32 %v25416_v28, %v12663_v52  ;;  %v12886_v20 = vshll.u32 %v12853_v31, 16  ;;  %v12884_v17 = vshrl.u32 %v12853_v31, 16 }
 0xbae   : > { %v12820_v51 = vadd.f32 %v21509_v46, %v25416_v28  ;;  %v12666_v11 = vpop.f32.mrb[219].mxu0  ;;  %21539 = vmatmul.mubr.bf16.vlgmr.msra.gmra.mrb[232].mxu0 %v25422_v10  ;;  %v12839_v8 = vmax.f32 %v12819_v2, 0.0  ;;  %v12893_v44 = vrot.slane %v12891_v58, 1 }
 0xbaf   : > { %21555 = vmatpush3.bf16.msra.mxu0 %v23155_v22  ;;  %v12818_v15 = vadd.f32 %v25416_v28, %v12666_v11  ;;  %v12888_v50 = vrot.slane %v12886_v20, 1  ;;  %v12837_v3 = vmax.f32 %v12817_v59, 0.0 }
 0xbb0   : > { %v12840_v21 = vmax.f32 %v12820_v51, 0.0  ;;  %21556 = vmatprep.subr.bf16.mxu0 %v23156_v1  ;;  %v12897_v4 = vor.u32 %v12895_v32, %v12893_v44 }
 0xbb1   : > { %v12838_v53 = vmax.f32 %v12818_v15, 0.0  ;;  %v12889_v5 = vor.u32 %v12888_v50, %v12884_v17 }
 0xbb2   : > { %v25430_v0 = vpack.c.bf16 %v12840_v21, %v12839_v8 }
 0xbb3   : > { %v21512_v23 = vpop.f32.mrb[220].mxu0  ;;  %21557 = vmatpush3.bf16.msra.mxu0 %v23156_v1  ;;  %v25432_v48 = vpack.c.bf16 %v12838_v53, %v12837_v3  ;;  %v25435_v18 = vsel %vm2031_vm2, %v12889_v5, %v12893_v44 }
 0xbb4   : > { %v12679_v41 = vpop.f32.mrb[221].mxu0  ;;  %21558 = vmatprep.subr.bf16.mxu0 %v23157_v47  ;;  %v12823_v14 = vadd.f32 %v21512_v23, %v25416_v28  ;;  %v12907_v54 = vshll.u32 %v25430_v0, 16  ;;  %v12982_v39 = vld [vmem:[#allocation5] sm:$0xfe]  ;;  %v13007_v42 = vrot.slane %v25430_v0, 1  ;;  %v12911_v6 = vshrl.u32 %v25430_v0, 16 }
 0xbb5   : > { %v21513_v36 = vpop.f32.mrb[222].mxu0  ;;  %21542 = vmatprep.mubr.bf16.mxu0 %v25432_v48  ;;  %v12821_v24 = vadd.f32 %v25416_v28, %v12679_v41  ;;  %v12899_v56 = vshll.u32 %v25432_v48, 16  ;;  %v13002_v19 = vrot.slane %v12982_v39, 1  ;;  %v12903_v26 = vshrl.u32 %v25432_v48, 16 }
 0xbb6   : > { %v12824_v33 = vadd.f32 %v21513_v36, %v25416_v28  ;;  %v12682_v12 = vpop.f32.mrb[223].mxu0  ;;  %21543 = vmatmul.mubr.bf16.gmra.mrb[236].mxu0 %v25430_v0  ;;  %v13005_v25 = vrot.slane %v25432_v48, 1  ;;  %v12843_v7 = vmax.f32 %v12823_v14, 0.0  ;;  %v12909_v30 = vrot.slane %v12907_v54, 1  ;;  %v23162_v36 = vld [vmem:[#allocation11 + $0x78] sm:$0xff]  }
 0xbb7   : > { %21559 = vmatpush3.bf16.msra.mxu0 %v23157_v47  ;;  %v12822_v27 = vadd.f32 %v25416_v28, %v12682_v12  ;;  %v12901_v34 = vrot.slane %v12899_v56, 1  ;;  %v25451_v38 = vsel %vm2662_vm1, %v13002_v19, %v13003_v60  ;;  %v12841_v63 = vmax.f32 %v12821_v24, 0.0  ;;  %v23161_v47 = vld [vmem:[#allocation11 + $0x70] sm:$0xff]  }
 0xbb8   : > { %v12844_v29 = vmax.f32 %v12824_v33, 0.0  ;;  %21560 = vmatprep.subr.bf16.mxu0 %v23158_v57  ;;  %v25454_v22 = vsel %vm2662_vm1, %v13003_v60, %v13005_v25  ;;  %v25457_v9 = vsel %vm2662_vm1, %v13005_v25, %v13007_v42  ;;  %v12913_v51 = vor.u32 %v12911_v6, %v12909_v30 }
 0xbb9   : > { %v12842_v49 = vmax.f32 %v12822_v27, 0.0  ;;  %v25460_v37 = vsel %vm2031_vm2, %v12897_v4, %v12901_v34  ;;  %v12905_v45 = vor.u32 %v12903_v26, %v12901_v34  ;;  %13033 = vst [vmem:[#allocation7 + $0x10] sm:$0xff] %v25457_v9 }
 0xbba   : > { %v25463_v62 = vpack.c.bf16 %v12844_v29, %v12843_v7 }
 0xbbb   : > { %v21516_v16 = vpop.f32.mrb[224].mxu0  ;;  %21561 = vmatpush3.bf16.msra.mxu0 %v23158_v57  ;;  %v25465_v43 = vpack.c.bf16 %v12842_v49, %v12841_v63  ;;  %v25468_v13 = vsel %vm2031_vm2, %v12905_v45, %v12909_v30  ;;  %v23163_v49 = vld [vmem:[#allocation11 + $0x80] sm:$0xff]  }
 0xbbc   : > { %v12695_v35 = vpop.f32.mrb[225].mxu0  ;;  %21562 = vmatprep.subr.bf16.mxu0 %v23159_v40  ;;  %v12827_v61 = vadd.f32 %v21516_v16, %v25416_v28  ;;  %12974 = vst [vmem:[#allocation6 + $0x10] sm:$0xff] %v25468_v13  ;;  %v12923_v31 = vshll.u32 %v25463_v62, 16  ;;  %v13011_v52 = vrot.slane %v25463_v62, 1  ;;  %v12927_v24 = vshrl.u32 %v25463_v62, 16 }
 0xbbd   : > { %v21517_v1 = vpop.f32.mrb[226].mxu0  ;;  %21546 = vmatprep.mubr.bf16.mxu0 %v25465_v43  ;;  %v12825_v2 = vadd.f32 %v25416_v28, %v12695_v35  ;;  %v12915_v46 = vshll.u32 %v25465_v43, 16  ;;  %v13009_v59 = vrot.slane %v25465_v43, 1  ;;  %v12919_v17 = vshrl.u32 %v25465_v43, 16 }
 0xbbe   : > { %v12828_v20 = vadd.f32 %v21517_v1, %v25416_v28  ;;  %v12698_v58 = vpop.f32.mrb[227].mxu0  ;;  %21547 = vmatmul.mubr.bf16.gmra.mrb[240].mxu0 %v25463_v62  ;;  %v12847_v8 = vmax.f32 %v12827_v61, 0.0  ;;  %v12925_v3 = vrot.slane %v12923_v31, 1 }
 0xbbf   : > { %21563 = vmatpush3.bf16.msra.mxu0 %v23159_v40  ;;  %v12826_v11 = vadd.f32 %v25416_v28, %v12698_v58  ;;  %v12917_v15 = vrot.slane %v12915_v46, 1  ;;  %v25484_v50 = vsel %vm2662_vm1, %v13007_v42, %v13009_v59  ;;  %v25488_v53 = vsel %vm2662_vm1, %v13009_v59, %v13011_v52 }
 0xbc0   : > { %v12848_v21 = vmax.f32 %v12828_v20, 0.0  ;;  %21564 = vmatprep.subr.bf16.mxu0 %v23160_v55  ;;  %13034 = vst [vmem:[#allocation7 + $0x18] sm:$0xff] %v25484_v50  ;;  %v12845_v5 = vmax.f32 %v12825_v2, 0.0  ;;  %13035 = vst [vmem:[#allocation7 + $0x20] sm:$0xff] %v25488_v53  ;;  %v12929_v27 = vor.u32 %v12927_v24, %v12925_v3  ;;  %v23167_v24 = vld [vmem:[#allocation11 + $0xa0] sm:$0xff]  }
 0xbc1   : > { %v12846_v44 = vmax.f32 %v12826_v11, 0.0  ;;  %v25491_v23 = vsel %vm2031_vm2, %v12913_v51, %v12917_v15  ;;  %v12921_v57 = vor.u32 %v12919_v17, %v12917_v15  ;;  %v23164_v15 = vld [vmem:[#allocation11 + $0x88] sm:$0xff]  }
 0xbc2   : > { %v25494_v41 = vpack.c.bf16 %v12848_v21, %v12847_v8  ;;  %12975 = vst [vmem:[#allocation6 + $0x18] sm:$0xff] %v25491_v23 }
 0xbc3   : > { %v21520_v14 = vpop.f32.mrb[228].mxu0  ;;  %21565 = vmatpush3.bf16.msra.mxu0 %v23160_v55  ;;  %v25497_v32 = vpack.c.bf16 %v12846_v44, %v12845_v5  ;;  %v25500_v54 = vsel %vm2031_vm2, %v12921_v57, %v12925_v3  ;;  %v23165_v3 = vld [vmem:[#allocation11 + $0x90] sm:$0xff]  }
 0xbc4   : > { %12784 = vst [vmem:[#allocation2 + $0x90] sm:$0xff] %v21520_v14  ;;  %v12831_v39 = vadd.f32 %v21520_v14, %v25416_v28  ;;  %v12711_v42 = vpop.f32.mrb[229].mxu0  ;;  %21566 = vmatprep.subr.bf16.mxu0 %v23161_v47  ;;  %12870 = vst [vmem:[#allocation5 + $0x38] sm:$0xff] %v25494_v41  ;;  %v12939_v56 = vshll.u32 %v25494_v41, 16  ;;  %v13015_v19 = vrot.slane %v25494_v41, 1  ;;  %v12943_v2 = vshrl.u32 %v25494_v41, 16 }
 0xbc5   : > { %12976 = vst [vmem:[#allocation6 + $0x20] sm:$0xff] %v25500_v54  ;;  %12782 = vst [vmem:[#allocation2 + $0x80] sm:$0xff] %v12711_v42  ;;  %v12829_v60 = vadd.f32 %v25416_v28, %v12711_v42  ;;  %v21521_v33 = vpop.f32.mrb[230].mxu0  ;;  %21550 = vmatprep.mubr.bf16.mxu0 %v25497_v32  ;;  %v12931_v12 = vshll.u32 %v25497_v32, 16  ;;  %v13013_v4 = vrot.slane %v25497_v32, 1  ;;  %v12935_v29 = vshrl.u32 %v25497_v32, 16 }
 0xbc6   : > { %v12832_v26 = vadd.f32 %v21521_v33, %v25416_v28  ;;  %v12714_v25 = vpop.f32.mrb[231].mxu0  ;;  %v12851_v30 = vmax.f32 %v12831_v39, 0.0  ;;  %v12941_v45 = vrot.slane %v12939_v56, 1  ;;  %v23168_v56 = vld [vmem:[#allocation11 + $0xa8] sm:$0xff]  }
 0xbc7   : > { %12783 = vst [vmem:[#allocation2 + $0x88] sm:$0xff] %v12714_v25  ;;  %v12830_v7 = vadd.f32 %v25416_v28, %v12714_v25  ;;  %21567 = vmatpush3.bf16.msra.mxu0 %v23161_v47  ;;  %v12933_v34 = vrot.slane %v12931_v12, 1  ;;  %v25516_v40 = vsel %vm2662_vm1, %v13011_v52, %v13013_v4  ;;  %v25520_v16 = vsel %vm2662_vm1, %v13013_v4, %v13015_v19  ;;  %v23171_v12 = vld [vmem:[#allocation11 + $0xc0] sm:$0xff]   ;;  %v23172_v4 = vld [vmem:[#allocation11 + $0xc8] sm:$0xff]   ;;  %v23174_v25 = vld [vmem:[#allocation11 + $0xd8] sm:$0xff]  }
 0xbc8   : > { %v12852_v63 = vmax.f32 %v12832_v26, 0.0  ;;  %21568 = vmatprep.subr.bf16.mxu0 %v23162_v36  ;;  %13036 = vst [vmem:[#allocation7 + $0x28] sm:$0xff] %v25516_v40  ;;  %v12849_v35 = vmax.f32 %v12829_v60, 0.0  ;;  %13037 = vst [vmem:[#allocation7 + $0x30] sm:$0xff] %v25520_v16  ;;  %v12945_v20 = vor.u32 %v12943_v2, %v12941_v45  ;;  %v23170_v60 = vld [vmem:[#allocation11 + $0xb8] sm:$0xff]   ;;  %v23173_v26 = vld [vmem:[#allocation11 + $0xd0] sm:$0xff]  }
 0xbc9   : > { %v12850_v55 = vmax.f32 %v12830_v7, 0.0  ;;  %v25523_v28 = vsel %vm2031_vm2, %v12929_v27, %v12933_v34  ;;  %v12937_v61 = vor.u32 %v12935_v29, %v12933_v34  ;;  %v23176_v27 = vld [vmem:[#allocation11 + $0xe8] sm:$0xff]   ;;  %v23177_v7 = vld [vmem:[#allocation11 + $0xf0] sm:$0xff]   ;;  %v23178_v34 = vld [vmem:[#allocation11 + $0xf8] sm:$0xff]  }
 0xbca   : > { %v12862_v6 = vpack.c.bf16 %v12852_v63, %v12851_v30  ;;  %12977 = vst [vmem:[#allocation6 + $0x28] sm:$0xff] %v25523_v28  ;;  %v23179_v30 = vld [vmem:[#allocation11 + $0x100] sm:$0xff]   ;;  %v23180_v63 = vld [vmem:[#allocation11 + $0x108] sm:$0xff]  }
 0xbcb   : > { %v25527_v31 = vpack.c.bf16 %v12850_v55, %v12849_v35  ;;  %v13048_v52 = vld [vmem:[#allocation5 + $0x38] sm:$0xf]  ;;  %21569 = vmatpush3.bf16.msra.mxu0 %v23162_v36  ;;  %v25530_v1 = vsel %vm2031_vm2, %v12937_v61, %v12941_v45  ;;  %v23166_v36 = vld [vmem:[#allocation11 + $0x98] sm:$0xff]   ;;  %v23185_v55 = vld [vmem:[#allocation11 + $0x130] sm:$0xff]  }
 0xbcc   : > { %12872 = vst [vmem:[#allocation5 + $0x48] sm:$0xff] %v12862_v6  ;;  %21551 = vmatmul.mubr.bf16.gmra.mrb[244].mxu0 %v13048_v52  ;;  %21586 = vmatprep.subr.bf16.mxu0 %v23163_v49  ;;  %12978 = vst [vmem:[#allocation6 + $0x30] sm:$0xff] %v25530_v1  ;;  %v23182_v45 = vld [vmem:[#allocation11 + $0x118] sm:$0xff]   ;;  %v23184_v35 = vld [vmem:[#allocation11 + $0x128] sm:$0xff]  }
 0xbcd   : > { %12871 = vst [vmem:[#allocation5 + $0x40] sm:$0xff] %v25527_v31  ;;  %21570 = vmatprep.mubr.bf16.mxu0 %v25435_v18  ;;  %v12947_v46 = vshll.u32 %v25527_v31, 16  ;;  %v13017_v59 = vrot.slane %v25527_v31, 1  ;;  %v12951_v21 = vshrl.u32 %v25527_v31, 16  ;;  %v23186_v61 = vld [vmem:[#allocation11 + $0x138] sm:$0xff]   ;;  %v23187_v52 = vld [vmem:[#allocation11 + $0x140] sm:$0xff]  }
 0xbce   : > { %v23188_v2 = vld [vmem:[#allocation11 + $0x148] sm:$0xff]  }
 0xbcf   : > { %v12949_v58 = vrot.slane %v12947_v46, 1  ;;  %v25539_v51 = vsel %vm2662_vm1, %v13015_v19, %v13017_v59  ;;  %v23169_v19 = vld [vmem:[#allocation11 + $0xb0] sm:$0xff]  }
 0xbd0   : > { %13038 = vst [vmem:[#allocation7 + $0x38] sm:$0xff] %v25539_v51  ;;  %v23189_v46 = vld [vmem:[#allocation11 + $0x150] sm:$0xff]  }
 0xbd1   : > { %v25543_v11 = vsel %vm2031_vm2, %v12945_v20, %v12949_v58  ;;  %v12953_v5 = vor.u32 %v12951_v21, %v12949_v58  ;;  %v23192_v20 = vld [vmem:[#allocation11 + $0x168] sm:$0xff]   ;;  %v23193_v58 = vld [vmem:[#allocation11 + $0x170] sm:$0xff]  }
 0xbd2   : > { %12979 = vst [vmem:[#allocation6 + $0x38] sm:$0xff] %v25543_v11  ;;  %v23196_v21 = vld [vmem:[#allocation11 + $0x188] sm:$0xff]  }
 0xbd3   : > { %v12882_v18 = vld [vmem:[#allocation5 + $0x48] sm:$0x1f] }
 0xbd4   : > { %v12991_v17 = vld [vmem:[#allocation5 + $0x48] sm:$0x1f]  ;;  %21571 = vmatmul.mubr.bf16.vlgmr.msra.gmra.mrb[232].mxu0 %v25460_v37  ;;  %v12955_v47 = vshll.u32 %v12882_v18, 16  ;;  %v12959_v57 = vshrl.u32 %v12882_v18, 16  ;;  %v13659_v6 = vld [vmem:[#allocation5 + $0x40] sm:$0xf] }
 0xbd5   : > { %v13019_v8 = vrot.slane %v12991_v17, 1  ;;  %21587 = vmatpush3.bf16.msra.mxu0 %v23163_v49  ;;  %21574 = vmatprep.mubr.bf16.mxu0 %v25468_v13  ;;  %v23181_v49 = vld [vmem:[#allocation11 + $0x110] sm:$0xff]   ;;  %v23195_v17 = vld [vmem:[#allocation11 + $0x180] sm:$0xff]  }
 0xbd6   : > { %21588 = vmatprep.subr.bf16.mxu0 %v23164_v15  ;;  %v12957_v44 = vrot.slane %v12955_v47, 1  ;;  %v23197_v47 = vld [vmem:[#allocation11 + $0x190] sm:$0xff]  }
 0xbd7   : > { %v25550_v14 = vsel %vm2662_vm1, %v13017_v59, %v13019_v8  ;;  %13040 = vst [vmem:[#allocation7 + $0x48] sm:$0xf] %v13019_v8  ;;  %v13445_v29 = vld [vmem:[#allocation7 + $0x38] sm:$0xf] }
 0xbd8   : > { %13039 = vst [vmem:[#allocation7 + $0x40] sm:$0xff] %v25550_v14  ;;  %v25554_v39 = vsel %vm2031_vm2, %v12953_v5, %v12957_v44  ;;  %v12961_v42 = vor.u32 %v12959_v57, %v12957_v44  ;;  %v23190_v59 = vld [vmem:[#allocation11 + $0x158] sm:$0xff]   ;;  %v23201_v5 = vld [vmem:[#allocation11 + $0x1b0] sm:$0xff]  }
 0xbd9   : > { %21589 = vmatpush3.bf16.msra.mxu0 %v23164_v15  ;;  %12980 = vst [vmem:[#allocation6 + $0x40] sm:$0xff] %v25554_v39  ;;  %v13231_v33 = vld [vmem:[#allocation6 + $0x38] sm:$0xf] }
 0xbda   : > { %21590 = vmatprep.subr.bf16.mxu0 %v23165_v3  ;;  %12981 = vst [vmem:[#allocation6 + $0x48] sm:$0xf] %v12961_v42  ;;  %v23194_v15 = vld [vmem:[#allocation11 + $0x178] sm:$0xff]   ;;  %v23203_v42 = vld [vmem:[#allocation11 + $0x1c0] sm:$0xff]  }
 0xbdb   : > { %v23198_v8 = vld [vmem:[#allocation11 + $0x198] sm:$0xff]  }
 0xbdc   : > { %21575 = vmatmul.mubr.bf16.gmra.mrb[236].mxu0 %v25491_v23  ;;  %v23202_v44 = vld [vmem:[#allocation11 + $0x1b8] sm:$0xff]  }
 0xbdd   : > { %21591 = vmatpush3.bf16.msra.mxu0 %v23165_v3  ;;  %21578 = vmatprep.mubr.bf16.mxu0 %v25500_v54  ;;  %v23200_v3 = vld [vmem:[#allocation11 + $0x1a8] sm:$0xff]  }
 0xbde   : > { %21592 = vmatprep.subr.bf16.mxu0 %v23166_v36 }
 0xbdf   : > { %v14087_v57 = vld [vmem:[#allocation7 + $0x40] sm:$0xf] }
 0xbe0   : > { %v13873_v18 = vld [vmem:[#allocation6 + $0x40] sm:$0xf] }
 0xbe1   : > { %21593 = vmatpush3.bf16.msra.mxu0 %v23166_v36  ;;  %v23204_v36 = vld [vmem:[#allocation11 + $0x1c8] sm:$0xff]  }
 0xbe2   : > { %21594 = vmatprep.subr.bf16.mxu0 %v23167_v24 }
 0xbe4   : > { %21579 = vmatmul.mubr.bf16.gmra.mrb[240].mxu0 %v25523_v28 }
 0xbe5   : > { %21595 = vmatpush3.bf16.msra.mxu0 %v23167_v24  ;;  %21582 = vmatprep.mubr.bf16.mxu0 %v25530_v1  ;;  %v23205_v24 = vld [vmem:[#allocation11 + $0x1d0] sm:$0xff]  }
 0xbe6   : > { %21596 = vmatprep.subr.bf16.mxu0 %v23168_v56 }
 0xbe9   : > { %21597 = vmatpush3.bf16.msra.mxu0 %v23168_v56  ;;  %v23206_v56 = vld [vmem:[#allocation11 + $0x1d8] sm:$0xff]  }
 0xbea   : > { %21598 = vmatprep.subr.bf16.mxu0 %v23169_v19 }
 0xbec   : > { %21583 = vmatmul.mubr.bf16.gmra.mrb[244].mxu0 %v13231_v33  ;;  %v23216_v33 = vld [vmem:[#allocation11 + $0x228] sm:$0xff]  }
 0xbed   : > { %21599 = vmatpush3.bf16.msra.mxu0 %v23169_v19  ;;  %21602 = vmatprep.mubr.bf16.mxu0 %v25451_v38  ;;  %v23175_v38 = vld [vmem:[#allocation11 + $0xe0] sm:$0xff]   ;;  %v23208_v19 = vld [vmem:[#allocation11 + $0x1e8] sm:$0xff]  }
 0xbee   : > { %21600 = vmatprep.subr.bf16.mxu0 %v23170_v60 }
 0xbf1   : > { %21601 = vmatpush3.bf16.msra.mxu0 %v23170_v60  ;;  %v14301_v60 = vld [vmem:[#allocation5 + $0x48] sm:$0xf] }
 0xbf2   : > { %21618 = vmatprep.subr.bf16.mxu0 %v23171_v12 }
 0xbf4   : > { %21603 = vmatmul.mubr.bf16.vlgmr.msra.gmra.mrb[232].mxu0 %v25454_v22 }
 0xbf5   : > { %21619 = vmatpush3.bf16.msra.mxu0 %v23171_v12  ;;  %21606 = vmatprep.mubr.bf16.mxu0 %v25457_v9  ;;  %v14515_v12 = vld [vmem:[#allocation6 + $0x48] sm:$0xf] }
 0xbf6   : > { %21620 = vmatprep.subr.bf16.mxu0 %v23172_v4 }
 0xbf9   : > { %21621 = vmatpush3.bf16.msra.mxu0 %v23172_v4  ;;  %v18508_v4 = vld [vmem:[%s26603_s9 + $0x2a0] sm:$0xff] }
 0xbfa   : > { %21622 = vmatprep.subr.bf16.mxu0 %v23173_v26 }
 0xbfc   : > { %21607 = vmatmul.mubr.bf16.gmra.mrb[236].mxu0 %v25484_v50 }
 0xbfd   : > { %21623 = vmatpush3.bf16.msra.mxu0 %v23173_v26  ;;  %21610 = vmatprep.mubr.bf16.mxu0 %v25488_v53 }
 0xbfe   : > { %21624 = vmatprep.subr.bf16.mxu0 %v23174_v25 }
 0xc01   : > { %21625 = vmatpush3.bf16.msra.mxu0 %v23174_v25 }
 0xc02   : > { %21626 = vmatprep.subr.bf16.mxu0 %v23175_v38 }
 0xc04   : > { %21611 = vmatmul.mubr.bf16.gmra.mrb[240].mxu0 %v25516_v40 }
 0xc05   : > { %21627 = vmatpush3.bf16.msra.mxu0 %v23175_v38  ;;  %21614 = vmatprep.mubr.bf16.mxu0 %v25520_v16  ;;  %v18512_v38 = vld [vmem:[%s26603_s9 + $0x2c0] sm:$0xff] }
 0xc06   : > { %21628 = vmatprep.subr.bf16.mxu0 %v23176_v27 }
 0xc09   : > { %21629 = vmatpush3.bf16.msra.mxu0 %v23176_v27  ;;  %v18516_v27 = vld [vmem:[%s26603_s9 + $0x2e0] sm:$0xff] }
 0xc0a   : > { %21630 = vmatprep.subr.bf16.mxu0 %v23177_v7 }
 0xc0c   : > { %21615 = vmatmul.mubr.bf16.gmra.mrb[244].mxu0 %v13445_v29  ;;  %v18520_v29 = vld [vmem:[%s26603_s9 + $0x300] sm:$0xff] }
 0xc0d   : > { %21631 = vmatpush3.bf16.msra.mxu0 %v23177_v7  ;;  %21634 = vmatprep.mubr.bf16.mxu0 %v25422_v10  ;;  %v23183_v10 = vld [vmem:[#allocation11 + $0x120] sm:$0xff]   ;;  %v18577_v7 = vcombine.high %v18512_v38, %v18516_v27 }
 0xc0e   : > { %21632 = vmatprep.subr.bf16.mxu0 %v23178_v34 }
 0xc11   : > { %21633 = vmatpush3.bf16.msra.mxu0 %v23178_v34  ;;  %v18576_v34 = vcombine.low %v18512_v38, %v18516_v27 }
 0xc12   : > { %21650 = vmatprep.subr.bf16.mxu0 %v23179_v30 }
 0xc14   : > { %21635 = vmatmul.mubr.bf16.vlgmr.msra.gmra.mrb[232].mxu0 %v25432_v48 }
 0xc15   : > { %21651 = vmatpush3.bf16.msra.mxu0 %v23179_v30  ;;  %21638 = vmatprep.mubr.bf16.mxu0 %v25430_v0  ;;  %v18524_v30 = vld [vmem:[%s26603_s9 + $0x320] sm:$0xff] }
 0xc16   : > { %21652 = vmatprep.subr.bf16.mxu0 %v23180_v63 }
 0xc19   : > { %21653 = vmatpush3.bf16.msra.mxu0 %v23180_v63  ;;  %v18585_v63 = vcombine.high %v18520_v29, %v18524_v30 }
 0xc1a   : > { %21654 = vmatprep.subr.bf16.mxu0 %v23181_v49 }
 0xc1c   : > { %21639 = vmatmul.mubr.bf16.gmra.mrb[236].mxu0 %v25465_v43 }
 0xc1d   : > { %21655 = vmatpush3.bf16.msra.mxu0 %v23181_v49  ;;  %21642 = vmatprep.mubr.bf16.mxu0 %v25463_v62  ;;  %v18584_v49 = vcombine.low %v18520_v29, %v18524_v30 }
 0xc1e   : > { %21656 = vmatprep.subr.bf16.mxu0 %v23182_v45 }
 0xc21   : > { %21657 = vmatpush3.bf16.msra.mxu0 %v23182_v45  ;;  %v18528_v45 = vld [vmem:[%s26603_s9 + $0x340] sm:$0xff] }
 0xc22   : > { %21658 = vmatprep.subr.bf16.mxu0 %v23183_v10 }
 0xc24   : > { %21643 = vmatmul.mubr.bf16.gmra.mrb[240].mxu0 %v25497_v32 }
 0xc25   : > { %21659 = vmatpush3.bf16.msra.mxu0 %v23183_v10  ;;  %21646 = vmatprep.mubr.bf16.mxu0 %v25494_v41  ;;  %v18532_v10 = vld [vmem:[%s26603_s9 + $0x360] sm:$0xff] }
 0xc26   : > { %21660 = vmatprep.subr.bf16.mxu0 %v23184_v35 }
 0xc29   : > { %21661 = vmatpush3.bf16.msra.mxu0 %v23184_v35  ;;  %v18593_v35 = vcombine.high %v18528_v45, %v18532_v10 }
 0xc2a   : > { %21662 = vmatprep.subr.bf16.mxu0 %v23185_v55 }
 0xc2c   : > { %21647 = vmatmul.mubr.bf16.gmra.mrb[244].mxu0 %v13659_v6  ;;  %v18540_v6 = vld [vmem:[%s26603_s9 + $0x3a0] sm:$0xff] }
 0xc2d   : > { %21663 = vmatpush3.bf16.msra.mxu0 %v23185_v55  ;;  %21666 = vmatprep.mubr.bf16.mxu0 %v25460_v37  ;;  %v23191_v37 = vld [vmem:[#allocation11 + $0x160] sm:$0xff]   ;;  %v18592_v55 = vcombine.low %v18528_v45, %v18532_v10 }
 0xc2e   : > { %21664 = vmatprep.subr.bf16.mxu0 %v23186_v61 }
 0xc31   : > { %21665 = vmatpush3.bf16.msra.mxu0 %v23186_v61  ;;  %v18536_v61 = vld [vmem:[%s26603_s9 + $0x380] sm:$0xff] }
 0xc32   : > { %21682 = vmatprep.subr.bf16.mxu0 %v23187_v52 }
 0xc34   : > { %21667 = vmatmul.mubr.bf16.vlgmr.msra.gmra.mrb[232].mxu0 %v25468_v13 }
 0xc35   : > { %21683 = vmatpush3.bf16.msra.mxu0 %v23187_v52  ;;  %21670 = vmatprep.mubr.bf16.mxu0 %v25491_v23  ;;  %v18544_v52 = vld [vmem:[%s26603_s9 + $0x3c0] sm:$0xff] }
 0xc36   : > { %21684 = vmatprep.subr.bf16.mxu0 %v23188_v2 }
 0xc39   : > { %21685 = vmatpush3.bf16.msra.mxu0 %v23188_v2  ;;  %v18601_v2 = vcombine.high %v18536_v61, %v18540_v6 }
 0xc3a   : > { %21686 = vmatprep.subr.bf16.mxu0 %v23189_v46 }
 0xc3c   : > { %21671 = vmatmul.mubr.bf16.gmra.mrb[236].mxu0 %v25500_v54 }
 0xc3d   : > { %21687 = vmatpush3.bf16.msra.mxu0 %v23189_v46  ;;  %21674 = vmatprep.mubr.bf16.mxu0 %v25523_v28  ;;  %v18548_v46 = vld [vmem:[%s26603_s9 + $0x3e0] sm:$0xff] }
 0xc3e   : > { %21688 = vmatprep.subr.bf16.mxu0 %v23190_v59 }
 0xc41   : > { %21689 = vmatpush3.bf16.msra.mxu0 %v23190_v59  ;;  %v25664_v59 = vld [vmem:[%s26603_s9 + $0x208] sm:$0xff] }
 0xc42   : > { %21690 = vmatprep.subr.bf16.mxu0 %v23191_v37 }
 0xc44   : > { %21675 = vmatmul.mubr.bf16.gmra.mrb[240].mxu0 %v25530_v1 }
 0xc45   : > { %21691 = vmatpush3.bf16.msra.mxu0 %v23191_v37  ;;  %21678 = vmatprep.mubr.bf16.mxu0 %v25543_v11  ;;  %v25669_v37 = vld [vmem:[%s26603_s9 + $0x228] sm:$0xff] }
 0xc46   : > { %21692 = vmatprep.subr.bf16.mxu0 %v23192_v20 }
 0xc49   : > { %21693 = vmatpush3.bf16.msra.mxu0 %v23192_v20  ;;  %v18600_v20 = vcombine.low %v18536_v61, %v18540_v6 }
 0xc4a   : > { %21694 = vmatprep.subr.bf16.mxu0 %v23193_v58 }
 0xc4c   : > { %21679 = vmatmul.mubr.bf16.gmra.mrb[244].mxu0 %v13873_v18  ;;  %v18608_v18 = vcombine.low %v18544_v52, %v18548_v46 }
 0xc4d   : > { %21695 = vmatpush3.bf16.msra.mxu0 %v23193_v58  ;;  %21698 = vmatprep.mubr.bf16.mxu0 %v25454_v22  ;;  %v23199_v22 = vld [vmem:[#allocation11 + $0x1a0] sm:$0xff]   ;;  %v18554_v58 = vcombine.low %v25664_v59, %v25669_v37 }
 0xc4e   : > { %21696 = vmatprep.subr.bf16.mxu0 %v23194_v15 }
 0xc51   : > { %21697 = vmatpush3.bf16.msra.mxu0 %v23194_v15  ;;  %v18609_v15 = vcombine.high %v18544_v52, %v18548_v46 }
 0xc52   : > { %21714 = vmatprep.subr.bf16.mxu0 %v23195_v17 }
 0xc54   : > { %21699 = vmatmul.mubr.bf16.vlgmr.msra.gmra.mrb[232].mxu0 %v25457_v9 }
 0xc55   : > { %21715 = vmatpush3.bf16.msra.mxu0 %v23195_v17  ;;  %21702 = vmatprep.mubr.bf16.mxu0 %v25484_v50  ;;  %v18555_v17 = vcombine.high %v25664_v59, %v25669_v37 }
 0xc56   : > { %21716 = vmatprep.subr.bf16.mxu0 %v23196_v21 }
 0xc59   : > { %21717 = vmatpush3.bf16.msra.mxu0 %v23196_v21 }
 0xc5a   : > { %21718 = vmatprep.subr.bf16.mxu0 %v23197_v47 }
 0xc5c   : > { %21703 = vmatmul.mubr.bf16.gmra.mrb[236].mxu0 %v25488_v53 }
 0xc5d   : > { %21719 = vmatpush3.bf16.msra.mxu0 %v23197_v47  ;;  %21706 = vmatprep.mubr.bf16.mxu0 %v25516_v40 }
 0xc5e   : > { %21720 = vmatprep.subr.bf16.mxu0 %v23198_v8 }
 0xc61   : > { %21721 = vmatpush3.bf16.msra.mxu0 %v23198_v8 }
 0xc62   : > { %21722 = vmatprep.subr.bf16.mxu0 %v23199_v22 }
 0xc64   : > { %21707 = vmatmul.mubr.bf16.gmra.mrb[240].mxu0 %v25520_v16 }
 0xc65   : > { %21723 = vmatpush3.bf16.msra.mxu0 %v23199_v22  ;;  %21710 = vmatprep.mubr.bf16.mxu0 %v25539_v51 }
 0xc66   : > { %21724 = vmatprep.subr.bf16.mxu0 %v23200_v3 }
 0xc69   : > { %21725 = vmatpush3.bf16.msra.mxu0 %v23200_v3 }
 0xc6a   : > { %21726 = vmatprep.subr.bf16.mxu0 %v23201_v5 }
 0xc6c   : > { %21711 = vmatmul.mubr.bf16.gmra.mrb[244].mxu0 %v14087_v57 }
 0xc6d   : > { %21727 = vmatpush3.bf16.msra.mxu0 %v23201_v5  ;;  %21730 = vmatprep.mubr.bf16.mxu0 %v25432_v48  ;;  %v23207_v48 = vld [vmem:[#allocation11 + $0x1e0] sm:$0xff]  }
 0xc6e   : > { %21728 = vmatprep.subr.bf16.mxu0 %v23202_v44 }
 0xc71   : > { %21729 = vmatpush3.bf16.msra.mxu0 %v23202_v44 }
 0xc72   : > { %21746 = vmatprep.subr.bf16.mxu0 %v23203_v42 }
 0xc74   : > { %21731 = vmatmul.mubr.bf16.vlgmr.msra.gmra.mrb[232].mxu0 %v25430_v0  ;;  %v23209_v0 = vld [vmem:[#allocation11 + $0x1f0] sm:$0xff]  }
 0xc75   : > { %21747 = vmatpush3.bf16.msra.mxu0 %v23203_v42  ;;  %21734 = vmatprep.mubr.bf16.mxu0 %v25465_v43  ;;  %v23210_v43 = vld [vmem:[#allocation11 + $0x1f8] sm:$0xff]  }
 0xc76   : > { %21748 = vmatprep.subr.bf16.mxu0 %v23204_v36 }
 0xc79   : > { %21749 = vmatpush3.bf16.msra.mxu0 %v23204_v36 }
 0xc7a   : > { %21750 = vmatprep.subr.bf16.mxu0 %v23205_v24 }
 0xc7c   : > { %21735 = vmatmul.mubr.bf16.gmra.mrb[236].mxu0 %v25463_v62  ;;  %v23211_v62 = vld [vmem:[#allocation11 + $0x200] sm:$0xff]  }
 0xc7d   : > { %21751 = vmatpush3.bf16.msra.mxu0 %v23205_v24  ;;  %21738 = vmatprep.mubr.bf16.mxu0 %v25497_v32  ;;  %v23212_v32 = vld [vmem:[#allocation11 + $0x208] sm:$0xff]  }
 0xc7e   : > { %21752 = vmatprep.subr.bf16.mxu0 %v23206_v56 }
 0xc81   : > { %21753 = vmatpush3.bf16.msra.mxu0 %v23206_v56 }
 0xc82   : > { %21754 = vmatprep.subr.bf16.mxu0 %v23207_v48 }
 0xc84   : > { %21739 = vmatmul.mubr.bf16.gmra.mrb[240].mxu0 %v25494_v41  ;;  %v23213_v41 = vld [vmem:[#allocation11 + $0x210] sm:$0xff]  }
 0xc85   : > { %21755 = vmatpush3.bf16.msra.mxu0 %v23207_v48  ;;  %21742 = vmatprep.mubr.bf16.mxu0 %v25527_v31  ;;  %v23214_v31 = vld [vmem:[#allocation11 + $0x218] sm:$0xff]  }
 0xc86   : > { %21756 = vmatprep.subr.bf16.mxu0 %v23208_v19 }
 0xc89   : > { %21757 = vmatpush3.bf16.msra.mxu0 %v23208_v19 }
 0xc8a   : > { %21758 = vmatprep.subr.bf16.mxu0 %v23209_v0 }
 0xc8c   : > { %21743 = vmatmul.mubr.bf16.gmra.mrb[244].mxu0 %v14301_v60 }
 0xc8d   : > { %21759 = vmatpush3.bf16.msra.mxu0 %v23209_v0  ;;  %21762 = vmatprep.mubr.bf16.mxu0 %v25468_v13  ;;  %v23215_v13 = vld [vmem:[#allocation11 + $0x220] sm:$0xff]  }
 0xc8e   : > { %21760 = vmatprep.subr.bf16.mxu0 %v23210_v43 }
 0xc91   : > { %21761 = vmatpush3.bf16.msra.mxu0 %v23210_v43 }
 0xc92   : > { %21778 = vmatprep.subr.bf16.mxu0 %v23211_v62 }
 0xc94   : > { %21763 = vmatmul.mubr.bf16.vlgmr.msra.gmra.mrb[232].mxu0 %v25491_v23  ;;  %v23217_v23 = vld [vmem:[#allocation11 + $0x230] sm:$0xff]  }
 0xc95   : > { %21779 = vmatpush3.bf16.msra.mxu0 %v23211_v62  ;;  %21766 = vmatprep.mubr.bf16.mxu0 %v25500_v54  ;;  %v23218_v54 = vld [vmem:[#allocation11 + $0x238] sm:$0xff]  }
 0xc96   : > { %21780 = vmatprep.subr.bf16.mxu0 %v23212_v32 }
 0xc99   : > { %21781 = vmatpush3.bf16.msra.mxu0 %v23212_v32 }
 0xc9a   : > { %21782 = vmatprep.subr.bf16.mxu0 %v23213_v41 }
 0xc9c   : > { %21767 = vmatmul.mubr.bf16.gmra.mrb[236].mxu0 %v25523_v28  ;;  %v14729_v28 = vld [vmem:[#allocation7 + $0x48] sm:$0xf] }
 0xc9d   : > { %21783 = vmatpush3.bf16.msra.mxu0 %v23213_v41  ;;  %21770 = vmatprep.mubr.bf16.mxu0 %v25530_v1  ;;  %v25610_v1 = vld [vmem:[#allocation4 + $0x60] sm:$0xff] }
 0xc9e   : > { %21784 = vmatprep.subr.bf16.mxu0 %v23214_v31 }
 0xca1   : > { %21785 = vmatpush3.bf16.msra.mxu0 %v23214_v31 }
 0xca2   : > { %21786 = vmatprep.subr.bf16.mxu0 %v23215_v13 }
 0xca4   : > { %21771 = vmatmul.mubr.bf16.gmra.mrb[240].mxu0 %v25543_v11 }
 0xca5   : > { %21787 = vmatpush3.bf16.msra.mxu0 %v23215_v13  ;;  %21774 = vmatprep.mubr.bf16.mxu0 %v25554_v39  ;;  %v18504_v39 = vld [vmem:[%s26603_s9 + $0x280] sm:$0xff] }
 0xca6   : > { %21788 = vmatprep.subr.bf16.mxu0 %v23216_v33  ;;  %v18569_v26 = vcombine.high %v18504_v39, %v18508_v4  ;;  %v18568_v25 = vcombine.low %v18504_v39, %v18508_v4 }
 0xca9   : > { %21789 = vmatpush3.bf16.msra.mxu0 %v23216_v33 }
 0xcaa   : > { %21790 = vmatprep.subr.bf16.mxu0 %v23217_v23 }
 0xcac   : > { %21775 = vmatmul.mubr.bf16.gmra.mrb[244].mxu0 %v14515_v12 }
 0xcad   : > { %21791 = vmatpush3.bf16.msra.mxu0 %v23217_v23  ;;  %21794 = vmatprep.mubr.bf16.mxu0 %v25457_v9  ;;  %v18488_v9 = vld [vmem:[%s26603_s9 + $0x200] sm:$0xff] }
 0xcae   : > { %21792 = vmatprep.subr.bf16.mxu0 %v23218_v54 }
 0xcb1   : > { %21793 = vmatpush3.bf16.msra.mxu0 %v23218_v54 }
 0xcb4   : > { %21795 = vmatmul.mubr.bf16.vlgmr.msra.gmra.mrb[232].mxu0 %v25484_v50  ;;  %v18492_v50 = vld [vmem:[%s26603_s9 + $0x220] sm:$0xff] }
 0xcb5   : > { %21798 = vmatprep.mubr.bf16.mxu0 %v25488_v53  ;;  %v18553_v53 = vcombine.high %v18488_v9, %v18492_v50 }
 0xcb7   : > { %15453 = vmatprep.subr.bf16.mxu0 %v18553_v53 }
 0xcbc   : > { %21799 = vmatmul.mubr.bf16.gmra.mrb[236].mxu0 %v25516_v40  ;;  %v18552_v40 = vcombine.low %v18488_v9, %v18492_v50 }
 0xcbd   : > { %21802 = vmatprep.mubr.bf16.mxu0 %v25520_v16  ;;  %v18496_v16 = vld [vmem:[%s26603_s9 + $0x240] sm:$0xff] }
 0xcbe   : > { %15454 = vmatpush1.bf16.msra.mxu0 %v18552_v40 }
 0xcc4   : > { %21803 = vmatmul.mubr.bf16.gmra.mrb[240].mxu0 %v25539_v51  ;;  %v18500_v51 = vld [vmem:[%s26603_s9 + $0x260] sm:$0xff] }
 0xcc5   : > { %21806 = vmatprep.mubr.bf16.mxu0 %v25550_v14  ;;  %v18561_v11 = vcombine.high %v18496_v16, %v18500_v51  ;;  %v18560_v14 = vcombine.low %v18496_v16, %v18500_v51 }
 0xcc7   : > { %15455 = vmatprep.subr.bf16.mxu0 %v18561_v11 }
 0xcc8   : > { %15456 = vmatpush1.bf16.msra.mxu0 %v18560_v14 }
 0xcc9   : > { %15457 = vmatprep.subr.bf16.mxu0 %v18569_v26 }
 0xccc   : > { %21807 = vmatmul.mubr.bf16.gmra.mrb[244].mxu0 %v14729_v28 }
 0xccd   : > { %15485 = vmatprep.mubr.bf16.mxu0 %v25610_v1  ;;  %15458 = vmatpush1.bf16.msra.mxu0 %v18568_v25 }
 0xcce   : > { %15459 = vmatprep.subr.bf16.mxu0 %v18577_v7 }
 0xcd1   : > { %15460 = vmatpush1.bf16.msra.mxu0 %v18576_v34 }
 0xcd2   : > { %15461 = vmatprep.subr.bf16.mxu0 %v18585_v63 }
 0xcd5   : > { %15462 = vmatpush1.bf16.msra.mxu0 %v18584_v49  ;;  %v14936_v49 = vld [vmem:[%s26602_s8] sm:$0x1] }
 0xcd6   : > { %15463 = vmatprep.subr.bf16.mxu0 %v18593_v35 }
 0xcd9   : > { %15464 = vmatpush1.bf16.msra.mxu0 %v18592_v55 }
 0xcda   : > { %15465 = vmatprep.subr.bf16.mxu0 %v18601_v2 }
 0xcdd   : > { %15466 = vmatpush1.bf16.msra.mxu0 %v18600_v20 }
 0xcde   : > { %15467 = vmatprep.subr.bf16.mxu0 %v18609_v15 }
 0xce1   : > { %15468 = vmatpush1.bf16.msra.mxu0 %v18608_v18 }
 0xce2   : > { %15494 = vmatprep.subr.bf16.mxu0 %v18555_v17 }
 0xd87   : > { %v21796_v21 = vpop.f32.mrb[232].mxu0 }
 0xd88   : > { %14923 = vst [vmem:[#allocation2 + $0x10] sm:$0xff] %v21796_v21  ;;  %v14829_v47 = vpop.f32.mrb[233].mxu0 }
 0xd89   : > { %14921 = vst [vmem:[#allocation2] sm:$0xff] %v14829_v47  ;;  %v21797_v8 = vpop.f32.mrb[234].mxu0  ;;  %v18497_v47 = vld [vmem:[%s26603_s9 + $0x248] sm:$0xff] }
 0xd8a   : > { %v14832_v22 = vpop.f32.mrb[235].mxu0  ;;  %v18501_v8 = vld [vmem:[%s26603_s9 + $0x268] sm:$0xff] }
 0xd8b   : > { %14922 = vst [vmem:[#allocation2 + $0x8] sm:$0xff] %v14832_v22 }
 0xd8f   : > { %v21800_v3 = vpop.f32.mrb[236].mxu0  ;;  %v14938_v42 = vld [vmem:[#allocation2 + $0x10] sm:$0xf]  ;;  %v14955_v56 = vld [vmem:[#allocation2 + $0x14] sm:$0xf] }
 0xd90   : > { %14927 = vst [vmem:[#allocation2 + $0x30] sm:$0xff] %v21800_v3  ;;  %v14845_v5 = vpop.f32.mrb[237].mxu0  ;;  %v14937_v36 = vld [vmem:[#allocation2] sm:$0xf]  ;;  %v14954_v24 = vld [vmem:[#allocation2 + $0x4] sm:$0xf] }
 0xd91   : > { %14925 = vst [vmem:[#allocation2 + $0x20] sm:$0xff] %v14845_v5  ;;  %v21801_v44 = vpop.f32.mrb[238].mxu0  ;;  %v14941_v41 = vmax.f32 %v14937_v36, %v14938_v42  ;;  %v14958_v13 = vmax.f32 %v14954_v24, %v14955_v56  ;;  %v18563_v36 = vcombine.high %v18497_v47, %v18501_v8  ;;  %v18505_v24 = vld [vmem:[%s26603_s9 + $0x288] sm:$0xff] }
 0xd92   : > { %v14848_v57 = vpop.f32.mrb[239].mxu0  ;;  %v18509_v56 = vld [vmem:[%s26603_s9 + $0x2a8] sm:$0xff] }
 0xd93   : > { %14926 = vst [vmem:[#allocation2 + $0x28] sm:$0xff] %v14848_v57  ;;  %v18570_v59 = vcombine.low %v18505_v24, %v18509_v56 }
 0xd97   : > { %v21804_v48 = vpop.f32.mrb[240].mxu0  ;;  %v14940_v19 = vld [vmem:[#allocation2 + $0x30] sm:$0xf]  ;;  %v14957_v0 = vld [vmem:[#allocation2 + $0x34] sm:$0xf] }
 0xd98   : > { %14931 = vst [vmem:[#allocation2 + $0x50] sm:$0xff] %v21804_v48  ;;  %v14861_v43 = vpop.f32.mrb[241].mxu0  ;;  %v14939_v60 = vld [vmem:[#allocation2 + $0x20] sm:$0xf]  ;;  %v14956_v62 = vld [vmem:[#allocation2 + $0x24] sm:$0xf] }
 0xd99   : > { %14929 = vst [vmem:[#allocation2 + $0x40] sm:$0xff] %v14861_v43  ;;  %v21805_v32 = vpop.f32.mrb[242].mxu0  ;;  %v14942_v31 = vmax.f32 %v14939_v60, %v14940_v19  ;;  %v14959_v33 = vmax.f32 %v14956_v62, %v14957_v0  ;;  %v18562_v0 = vcombine.low %v18497_v47, %v18501_v8  ;;  %v18571_v62 = vcombine.high %v18505_v24, %v18509_v56  ;;  %v18526_v47 = vld [vmem:[%s26603_s9 + $0x330] sm:$0xff] }
 0xd9a   : > { %v14864_v23 = vpop.f32.mrb[243].mxu0  ;;  %v18513_v32 = vld [vmem:[%s26603_s9 + $0x2c8] sm:$0xff]  ;;  %v18542_v24 = vld [vmem:[%s26603_s9 + $0x3b0] sm:$0xff] }
 0xd9b   : > { %14930 = vst [vmem:[#allocation2 + $0x48] sm:$0xff] %v14864_v23  ;;  %v14943_v54 = vmax.f32 %v14941_v41, %v14942_v31  ;;  %v14960_v12 = vmax.f32 %v14958_v13, %v14959_v33  ;;  %v18517_v41 = vld [vmem:[%s26603_s9 + $0x2e8] sm:$0xff] }
 0xd9c   : > { %v18579_v33 = vcombine.high %v18513_v32, %v18517_v41  ;;  %v18521_v23 = vld [vmem:[%s26603_s9 + $0x308] sm:$0xff] }
 0xd9d   : > { %v14945_v28 = vsel %vm14944_vm3, %v14943_v54, -inf  ;;  %v14961_v9 = vsel %vm14944_vm3, %v14960_v12, -inf  ;;  %v18525_v54 = vld [vmem:[%s26603_s9 + $0x328] sm:$0xff] }
 0xd9e   : > { %v14946_v50 = vrot.slane %v14945_v28, 4  ;;  %v14962_v53 = vrot.slane %v14961_v9, 4 }
 0xd9f   : > { %v21808_v40 = vpop.f32.mrb[244].mxu0  ;;  %v14971_v27 = vld [vmem:[#allocation2 + $0x50] sm:$0xf]  ;;  %v14987_v7 = vld [vmem:[#allocation2 + $0x54] sm:$0xf] }
 0xda0   : > { %14935 = vst [vmem:[#allocation2 + $0x70] sm:$0xff] %v21808_v40  ;;  %v14877_v16 = vpop.f32.mrb[245].mxu0  ;;  %v14947_v51 = vmax.f32 %v14945_v28, %v14946_v50  ;;  %v14963_v11 = vmax.f32 %v14961_v9, %v14962_v53  ;;  %v14970_v30 = vld [vmem:[#allocation2 + $0x40] sm:$0xf]  ;;  %v14986_v63 = vld [vmem:[#allocation2 + $0x44] sm:$0xf]  ;;  %v18578_v9 = vcombine.low %v18513_v32, %v18517_v41  ;;  %v18587_v40 = vcombine.high %v18521_v23, %v18525_v54 }
 0xda1   : > { %14933 = vst [vmem:[#allocation2 + $0x60] sm:$0xff] %v14877_v16  ;;  %v21809_v14 = vpop.f32.mrb[246].mxu0  ;;  %v14974_v52 = vmax.f32 %v14970_v30, %v14971_v27  ;;  %v14990_v46 = vmax.f32 %v14986_v63, %v14987_v7  ;;  %v18529_v16 = vld [vmem:[%s26603_s9 + $0x348] sm:$0xff]  ;;  %v18494_v30 = vld [vmem:[%s26603_s9 + $0x230] sm:$0xff]  ;;  %v18495_v32 = vld [vmem:[%s26603_s9 + $0x238] sm:$0xff] }
 0xda2   : > { %v14880_v39 = vpop.f32.mrb[247].mxu0  ;;  %v14948_v4 = vrot.slane %v14947_v51, 2  ;;  %v14964_v26 = vrot.slane %v14963_v11, 2  ;;  %v18549_v27 = vld [vmem:[%s26603_s9 + $0x3e8] sm:$0xff] }
 0xda3   : > { %14934 = vst [vmem:[#allocation2 + $0x68] sm:$0xff] %v14880_v39  ;;  %v18537_v39 = vld [vmem:[%s26603_s9 + $0x388] sm:$0xff] }
 0xda4   : > { %v14949_v25 = vmax.f32 %v14947_v51, %v14948_v4  ;;  %v14965_v38 = vmax.f32 %v14963_v11, %v14964_v26  ;;  %v18533_v51 = vld [vmem:[%s26603_s9 + $0x368] sm:$0xff]  ;;  %v18586_v11 = vcombine.low %v18521_v23, %v18525_v54  ;;  %v18511_v23 = vld [vmem:[%s26603_s9 + $0x2b8] sm:$0xff] }
 0xda5   : > { %v18595_v14 = vcombine.high %v18529_v16, %v18533_v51  ;;  %v18541_v4 = vld [vmem:[%s26603_s9 + $0x3a8] sm:$0xff]  ;;  %v18594_v26 = vcombine.low %v18529_v16, %v18533_v51  ;;  %v18523_v51 = vld [vmem:[%s26603_s9 + $0x318] sm:$0xff] }
 0xda6   : > { %v14950_v34 = vrot.slane %v14949_v25, 1  ;;  %v14966_v29 = vrot.slane %v14965_v38, 1  ;;  %v18602_v7 = vcombine.low %v18537_v39, %v18541_v4 }
 0xda7   : > { %v14973_v45 = vld [vmem:[#allocation2 + $0x70] sm:$0xf]  ;;  %v14989_v10 = vld [vmem:[#allocation2 + $0x74] sm:$0xf] }
 0xda8   : > { %v14951_v35 = vmax.f32 %v14949_v25, %v14950_v34  ;;  %v14967_v55 = vmax.f32 %v14965_v38, %v14966_v29  ;;  %v14972_v61 = vld [vmem:[#allocation2 + $0x60] sm:$0xf]  ;;  %v14988_v6 = vld [vmem:[#allocation2 + $0x64] sm:$0xf]  ;;  %v18603_v25 = vcombine.high %v18537_v39, %v18541_v4  ;;  %v18545_v38 = vld [vmem:[%s26603_s9 + $0x3c8] sm:$0xff] }
 0xda9   : > { %v14975_v2 = vmax.f32 %v14972_v61, %v14973_v45  ;;  %v14991_v20 = vmax.f32 %v14988_v6, %v14989_v10  ;;  %v18611_v34 = vcombine.high %v18545_v38, %v18549_v27  ;;  %v18490_v29 = vld [vmem:[%s26603_s9 + $0x210] sm:$0xff]  ;;  %v18610_v63 = vcombine.low %v18545_v38, %v18549_v27  ;;  %v18531_v4 = vld [vmem:[%s26603_s9 + $0x358] sm:$0xff] }
 0xdaa   : > { %v25680_v15 = vadd.f32 %v14951_v35, %v14936_v49  ;;  %v14968_v18 = vadd.f32 %v14967_v55, %v14936_v49  ;;  %v18498_v45 = vld [vmem:[%s26603_s9 + $0x250] sm:$0xff]  ;;  %v18556_v35 = vcombine.low %v18490_v29, %v18494_v30  ;;  %v18539_v27 = vld [vmem:[%s26603_s9 + $0x398] sm:$0xff] }
 0xdab   : > { %v14976_v17 = vmax.f32 %v14974_v52, %v14975_v2  ;;  %v14992_v21 = vmax.f32 %v14990_v46, %v14991_v20  ;;  %v18502_v10 = vld [vmem:[%s26603_s9 + $0x270] sm:$0xff] }
 0xdac   : > { %v14969_v22 = vmax.f32 %v14968_v18, 0.0  ;;  %v18565_v55 = vcombine.high %v18498_v45, %v18502_v10  ;;  %v18506_v61 = vld [vmem:[%s26603_s9 + $0x290] sm:$0xff]  ;;  %v18564_v52 = vcombine.low %v18498_v45, %v18502_v10  ;;  %v15003_v10 = vld [vmem:[%s26603_s9] sm:$0xff] }
 0xdad   : > { %v14977_v3 = vsel %vm14944_vm3, %v14976_v17, -inf  ;;  %v14993_v5 = vsel %vm14944_vm3, %v14992_v21, -inf  ;;  %v18510_v6 = vld [vmem:[%s26603_s9 + $0x2b0] sm:$0xff] }
 0xdae   : > { %v14978_v44 = vrot.slane %v14977_v3, 4  ;;  %v14994_v57 = vrot.slane %v14993_v5, 4  ;;  %v25690_v42 = vpack.c.bf16 %v14969_v22, %v14969_v22  ;;  %v18573_v2 = vcombine.high %v18506_v61, %v18510_v6  ;;  %v18514_v46 = vld [vmem:[%s26603_s9 + $0x2d0] sm:$0xff] }
 0xdaf   : > { %v18518_v20 = vld [vmem:[%s26603_s9 + $0x2f0] sm:$0xff]  ;;  %v18572_v18 = vcombine.low %v18506_v61, %v18510_v6  ;;  %v15011_v6 = vld [vmem:[%s26603_s9 + $0x40] sm:$0xff] }
 0xdb0   : > { %v14979_v48 = vmax.f32 %v14977_v3, %v14978_v44  ;;  %v14995_v19 = vmax.f32 %v14993_v5, %v14994_v57  ;;  %15486 = vmatmul.mubr.bf16.vlgmr.msra.gmra.mrb[248].mxu0 %v25690_v42  ;;  %v18581_v17 = vcombine.high %v18514_v46, %v18518_v20  ;;  %v18522_v21 = vld [vmem:[%s26603_s9 + $0x310] sm:$0xff]  ;;  %v18580_v8 = vcombine.low %v18514_v46, %v18518_v20  ;;  %v15019_v20 = vld [vmem:[%s26603_s9 + $0x80] sm:$0xff] }
 0xdb1   : > { %15495 = vmatpush1.bf16.msra.mxu0 %v18554_v58  ;;  %15526 = vmatprep.mubr.bf16.mxu0 %v25610_v1  ;;  %v18589_v22 = vcombine.high %v18522_v21, %v18526_v47  ;;  %v18530_v3 = vld [vmem:[%s26603_s9 + $0x350] sm:$0xff]  ;;  %v18588_v44 = vcombine.low %v18522_v21, %v18526_v47  ;;  %v15027_v47 = vld [vmem:[%s26603_s9 + $0xc0] sm:$0xff] }
 0xdb2   : > { %v14980_v43 = vrot.slane %v14979_v48, 2  ;;  %v14996_v60 = vrot.slane %v14995_v19, 2  ;;  %15496 = vmatprep.subr.bf16.mxu0 %v18563_v36  ;;  %v18534_v5 = vld [vmem:[%s26603_s9 + $0x370] sm:$0xff] }
 0xdb3   : > { %v18597_v57 = vcombine.high %v18530_v3, %v18534_v5  ;;  %v18538_v36 = vld [vmem:[%s26603_s9 + $0x390] sm:$0xff]  ;;  %v18596_v56 = vcombine.low %v18530_v3, %v18534_v5  ;;  %v15039_v5 = vld [vmem:[%s26603_s9 + $0x120] sm:$0xff] }
 0xdb4   : > { %v14981_v31 = vmax.f32 %v14979_v48, %v14980_v43  ;;  %v14997_v13 = vmax.f32 %v14995_v19, %v14996_v60  ;;  %v18605_v48 = vcombine.high %v18538_v36, %v18542_v24  ;;  %v18546_v19 = vld [vmem:[%s26603_s9 + $0x3d0] sm:$0xff]  ;;  %v18604_v43 = vcombine.low %v18538_v36, %v18542_v24  ;;  %v15043_v36 = vld [vmem:[%s26603_s9 + $0x140] sm:$0xff] }
 0xdb5   : > { %15497 = vmatpush1.bf16.msra.mxu0 %v18562_v0  ;;  %v18550_v0 = vld [vmem:[%s26603_s9 + $0x3f0] sm:$0xff]  ;;  %v15047_v24 = vld [vmem:[%s26603_s9 + $0x160] sm:$0xff] }
 0xdb6   : > { %v14982_v37 = vrot.slane %v14981_v31, 1  ;;  %v14998_v58 = vrot.slane %v14997_v13, 1  ;;  %15498 = vmatprep.subr.bf16.mxu0 %v18571_v62  ;;  %v18613_v60 = vcombine.high %v18546_v19, %v18550_v0  ;;  %v18491_v62 = vld [vmem:[%s26603_s9 + $0x218] sm:$0xff]  ;;  %v18612_v41 = vcombine.low %v18546_v19, %v18550_v0  ;;  %v15051_v19 = vld [vmem:[%s26603_s9 + $0x180] sm:$0xff] }
 0xdb7   : > { %v15055_v0 = vld [vmem:[%s26603_s9 + $0x1a0] sm:$0xff] }
 0xdb8   : > { %v14983_v12 = vmax.f32 %v14981_v31, %v14982_v37  ;;  %v14999_v28 = vmax.f32 %v14997_v13, %v14998_v58  ;;  %v18559_v31 = vcombine.high %v18491_v62, %v18495_v32  ;;  %v18499_v13 = vld [vmem:[%s26603_s9 + $0x258] sm:$0xff]  ;;  %v18558_v37 = vcombine.low %v18491_v62, %v18495_v32  ;;  %v15059_v62 = vld [vmem:[%s26603_s9 + $0x1c0] sm:$0xff] }
 0xdb9   : > { %15499 = vmatpush1.bf16.msra.mxu0 %v18570_v59  ;;  %v18503_v59 = vld [vmem:[%s26603_s9 + $0x278] sm:$0xff]  ;;  %v15063_v32 = vld [vmem:[%s26603_s9 + $0x1e0] sm:$0xff] }
 0xdba   : > { %v25715_v50 = vadd.f32 %v14983_v12, %v14936_v49  ;;  %v25717_v53 = vadd.f32 %v14999_v28, %v14936_v49  ;;  %15500 = vmatprep.subr.bf16.mxu0 %v18579_v33  ;;  %v18557_v49 = vcombine.high %v18490_v29, %v18494_v30  ;;  %v18567_v58 = vcombine.high %v18499_v13, %v18503_v59  ;;  %v18507_v33 = vld [vmem:[%s26603_s9 + $0x298] sm:$0xff] }
 0xdbb   : > { %v18566_v54 = vcombine.low %v18499_v13, %v18503_v59  ;;  %v18575_v12 = vcombine.high %v18507_v33, %v18511_v23  ;;  %v18515_v28 = vld [vmem:[%s26603_s9 + $0x2d8] sm:$0xff]  ;;  %v15004_v13 = vld [vmem:[%s26603_s9 + $0x8] sm:$0xff] }
 0xdbc   : > { %v18547_v30 = vld [vmem:[%s26603_s9 + $0x3d8] sm:$0xff]  ;;  %v15008_v59 = vld [vmem:[%s26603_s9 + $0x28] sm:$0xff] }
 0xdbd   : > { %15501 = vmatpush1.bf16.msra.mxu0 %v18578_v9  ;;  %v18519_v9 = vld [vmem:[%s26603_s9 + $0x2f8] sm:$0xff] }
 0xdbe   : > { %15502 = vmatprep.subr.bf16.mxu0 %v18587_v40  ;;  %v18574_v40 = vcombine.low %v18507_v33, %v18511_v23  ;;  %v18583_v16 = vcombine.high %v18515_v28, %v18519_v9  ;;  %v18619_v33 = vcombine.high %v15004_v13, %v15008_v59  ;;  %v15012_v23 = vld [vmem:[%s26603_s9 + $0x48] sm:$0xff] }
 0xdc1   : > { %15503 = vmatpush1.bf16.msra.mxu0 %v18586_v11  ;;  %v18527_v11 = vld [vmem:[%s26603_s9 + $0x338] sm:$0xff] }
 0xdc2   : > { %15504 = vmatprep.subr.bf16.mxu0 %v18595_v14  ;;  %v18582_v14 = vcombine.low %v18515_v28, %v18519_v9  ;;  %v18591_v39 = vcombine.high %v18523_v51, %v18527_v11 }
 0xdc5   : > { %15505 = vmatpush1.bf16.msra.mxu0 %v18594_v26  ;;  %v18535_v26 = vld [vmem:[%s26603_s9 + $0x378] sm:$0xff] }
 0xdc6   : > { %15506 = vmatprep.subr.bf16.mxu0 %v18603_v25  ;;  %v18590_v25 = vcombine.low %v18523_v51, %v18527_v11  ;;  %v18599_v38 = vcombine.high %v18531_v4, %v18535_v26  ;;  %v15028_v11 = vld [vmem:[%s26603_s9 + $0xc8] sm:$0xff] }
 0xdc9   : > { %15507 = vmatpush1.bf16.msra.mxu0 %v18602_v7  ;;  %v18543_v7 = vld [vmem:[%s26603_s9 + $0x3b8] sm:$0xff] }
 0xdca   : > { %15508 = vmatprep.subr.bf16.mxu0 %v18611_v34  ;;  %v18598_v34 = vcombine.low %v18531_v4, %v18535_v26  ;;  %v18607_v29 = vcombine.high %v18539_v27, %v18543_v7  ;;  %v15036_v26 = vld [vmem:[%s26603_s9 + $0x108] sm:$0xff] }
 0xdcd   : > { %15509 = vmatpush1.bf16.msra.mxu0 %v18610_v63  ;;  %v18551_v63 = vld [vmem:[%s26603_s9 + $0x3f8] sm:$0xff] }
 0xdce   : > { %15535 = vmatprep.subr.bf16.mxu0 %v18557_v49  ;;  %v18606_v49 = vcombine.low %v18539_v27, %v18543_v7  ;;  %v18615_v45 = vcombine.high %v18547_v30, %v18551_v63  ;;  %v15044_v7 = vld [vmem:[%s26603_s9 + $0x148] sm:$0xff] }
 0xdd0   : > { %15527 = vmatmul.mubr.bf16.vlgmr.msra.gmra.mrb[252].mxu0 %v25690_v42 }
 0xdd1   : > { %15536 = vmatpush1.bf16.msra.mxu0 %v18556_v35  ;;  %15567 = vmatprep.mubr.bf16.mxu0 %v25610_v1  ;;  %v15007_v35 = vld [vmem:[%s26603_s9 + $0x20] sm:$0xff] }
 0xdd2   : > { %15537 = vmatprep.subr.bf16.mxu0 %v18565_v55  ;;  %v18614_v55 = vcombine.low %v18547_v30, %v18551_v63  ;;  %v18617_v61 = vcombine.high %v15003_v10, %v15007_v35  ;;  %v15052_v63 = vld [vmem:[%s26603_s9 + $0x188] sm:$0xff] }
 0xdd5   : > { %15538 = vmatpush1.bf16.msra.mxu0 %v18564_v52  ;;  %v15015_v52 = vld [vmem:[%s26603_s9 + $0x60] sm:$0xff] }
 0xdd6   : > { %15539 = vmatprep.subr.bf16.mxu0 %v18573_v2  ;;  %v18616_v2 = vcombine.low %v15003_v10, %v15007_v35  ;;  %v18625_v46 = vcombine.high %v15011_v6, %v15015_v52  ;;  %v15060_v35 = vld [vmem:[%s26603_s9 + $0x1c8] sm:$0xff] }
 0xdd9   : > { %15540 = vmatpush1.bf16.msra.mxu0 %v18572_v18  ;;  %v15023_v18 = vld [vmem:[%s26603_s9 + $0xa0] sm:$0xff] }
 0xdda   : > { %15541 = vmatprep.subr.bf16.mxu0 %v18581_v17  ;;  %v18624_v17 = vcombine.low %v15011_v6, %v15015_v52  ;;  %v18633_v21 = vcombine.high %v15019_v20, %v15023_v18  ;;  %v15005_v52 = vld [vmem:[%s26603_s9 + $0x10] sm:$0xff] }
 0xddd   : > { %15542 = vmatpush1.bf16.msra.mxu0 %v18580_v8  ;;  %v15031_v8 = vld [vmem:[%s26603_s9 + $0xe0] sm:$0xff] }
 0xdde   : > { %15543 = vmatprep.subr.bf16.mxu0 %v18589_v22  ;;  %v18632_v22 = vcombine.low %v15019_v20, %v15023_v18  ;;  %v18641_v3 = vcombine.high %v15027_v47, %v15031_v8  ;;  %v15013_v18 = vld [vmem:[%s26603_s9 + $0x50] sm:$0xff] }
 0xde1   : > { %15544 = vmatpush1.bf16.msra.mxu0 %v18588_v44  ;;  %v18640_v44 = vcombine.low %v15027_v47, %v15031_v8  ;;  %v15021_v8 = vld [vmem:[%s26603_s9 + $0x90] sm:$0xff] }
 0xde2   : > { %15545 = vmatprep.subr.bf16.mxu0 %v18597_v57 }
 0xde5   : > { %15546 = vmatpush1.bf16.msra.mxu0 %v18596_v56 }
 0xde6   : > { %15547 = vmatprep.subr.bf16.mxu0 %v18605_v48  ;;  %v18657_v48 = vcombine.high %v15043_v36, %v15047_v24 }
 0xde9   : > { %15548 = vmatpush1.bf16.msra.mxu0 %v18604_v43  ;;  %v18656_v43 = vcombine.low %v15043_v36, %v15047_v24  ;;  %v15037_v24 = vld [vmem:[%s26603_s9 + $0x110] sm:$0xff] }
 0xdea   : > { %15549 = vmatprep.subr.bf16.mxu0 %v18613_v60  ;;  %v18665_v60 = vcombine.high %v15051_v19, %v15055_v0 }
 0xded   : > { %15550 = vmatpush1.bf16.msra.mxu0 %v18612_v41  ;;  %v18664_v41 = vcombine.low %v15051_v19, %v15055_v0  ;;  %v15045_v0 = vld [vmem:[%s26603_s9 + $0x150] sm:$0xff] }
 0xdee   : > { %15576 = vmatprep.subr.bf16.mxu0 %v18559_v31  ;;  %v18673_v31 = vcombine.high %v15059_v62, %v15063_v32 }
 0xdf0   : > { %15568 = vmatmul.mubr.bf16.vlgmr.msra.gmra.mrb[0].mxu0 %v25690_v42 }
 0xdf1   : > { %15577 = vmatpush1.bf16.msra.mxu0 %v18558_v37  ;;  %15608 = vmatprep.mubr.bf16.mxu0 %v25610_v1  ;;  %v18672_v37 = vcombine.low %v15059_v62, %v15063_v32  ;;  %v15053_v32 = vld [vmem:[%s26603_s9 + $0x190] sm:$0xff] }
 0xdf2   : > { %15578 = vmatprep.subr.bf16.mxu0 %v18567_v58  ;;  %v14953_v58 = vmax.f32 %v25680_v15, 0.0  ;;  %v15020_v15 = vld [vmem:[%s26603_s9 + $0x88] sm:$0xff] }
 0xdf4   : > { %v25900_v28 = vpack.c.bf16 %v14953_v58, %v14953_v58 }
 0xdf5   : > { %15579 = vmatpush1.bf16.msra.mxu0 %v18566_v54  ;;  %v15016_v54 = vld [vmem:[%s26603_s9 + $0x68] sm:$0xff] }
 0xdf6   : > { %15580 = vmatprep.subr.bf16.mxu0 %v18575_v12  ;;  %v18618_v12 = vcombine.low %v15004_v13, %v15008_v59  ;;  %v18627_v9 = vcombine.high %v15012_v23, %v15016_v54  ;;  %v15061_v59 = vld [vmem:[%s26603_s9 + $0x1d0] sm:$0xff] }
 0xdf9   : > { %15581 = vmatpush1.bf16.msra.mxu0 %v18574_v40  ;;  %v15024_v40 = vld [vmem:[%s26603_s9 + $0xa8] sm:$0xff] }
 0xdfa   : > { %15582 = vmatprep.subr.bf16.mxu0 %v18583_v16  ;;  %v18626_v16 = vcombine.low %v15012_v23, %v15016_v54  ;;  %v18635_v51 = vcombine.high %v15020_v15, %v15024_v40  ;;  %v15006_v23 = vld [vmem:[%s26603_s9 + $0x18] sm:$0xff] }
 0xdfb   : > { %v15010_v54 = vld [vmem:[%s26603_s9 + $0x38] sm:$0xff] }
 0xdfd   : > { %15583 = vmatpush1.bf16.msra.mxu0 %v18582_v14  ;;  %v15032_v14 = vld [vmem:[%s26603_s9 + $0xe8] sm:$0xff] }
 0xdfe   : > { %15584 = vmatprep.subr.bf16.mxu0 %v18591_v39  ;;  %v18634_v39 = vcombine.low %v15020_v15, %v15024_v40  ;;  %v18643_v4 = vcombine.high %v15028_v11, %v15032_v14  ;;  %v15014_v15 = vld [vmem:[%s26603_s9 + $0x58] sm:$0xff] }
 0xdff   : > { %v15018_v40 = vld [vmem:[%s26603_s9 + $0x78] sm:$0xff] }
 0xe01   : > { %15585 = vmatpush1.bf16.msra.mxu0 %v18590_v25  ;;  %v15040_v25 = vld [vmem:[%s26603_s9 + $0x128] sm:$0xff] }
 0xe02   : > { %15586 = vmatprep.subr.bf16.mxu0 %v18599_v38  ;;  %v18642_v38 = vcombine.low %v15028_v11, %v15032_v14  ;;  %v18651_v27 = vcombine.high %v15036_v26, %v15040_v25  ;;  %v15022_v11 = vld [vmem:[%s26603_s9 + $0x98] sm:$0xff] }
 0xe03   : > { %v15026_v14 = vld [vmem:[%s26603_s9 + $0xb8] sm:$0xff] }
 0xe05   : > { %15587 = vmatpush1.bf16.msra.mxu0 %v18598_v34  ;;  %v15048_v34 = vld [vmem:[%s26603_s9 + $0x168] sm:$0xff] }
 0xe06   : > { %15588 = vmatprep.subr.bf16.mxu0 %v18607_v29  ;;  %v18650_v29 = vcombine.low %v15036_v26, %v15040_v25  ;;  %v18659_v30 = vcombine.high %v15044_v7, %v15048_v34  ;;  %v15030_v26 = vld [vmem:[%s26603_s9 + $0xd8] sm:$0xff] }
 0xe07   : > { %v15034_v25 = vld [vmem:[%s26603_s9 + $0xf8] sm:$0xff] }
 0xe09   : > { %15589 = vmatpush1.bf16.msra.mxu0 %v18606_v49  ;;  %v15056_v49 = vld [vmem:[%s26603_s9 + $0x1a8] sm:$0xff] }
 0xe0a   : > { %15590 = vmatprep.subr.bf16.mxu0 %v18615_v45  ;;  %v18658_v45 = vcombine.low %v15044_v7, %v15048_v34  ;;  %v18667_v10 = vcombine.high %v15052_v63, %v15056_v49  ;;  %v15038_v7 = vld [vmem:[%s26603_s9 + $0x118] sm:$0xff]  ;;  %v18646_v34 = vcombine.low %v15030_v26, %v15034_v25 }
 0xe0d   : > { %15591 = vmatpush1.bf16.msra.mxu0 %v18614_v55  ;;  %v15064_v55 = vld [vmem:[%s26603_s9 + $0x1e8] sm:$0xff] }
 0xe0e   : > { %15937 = vmatprep.subr.bf16.mxu0 %v18617_v61  ;;  %v18666_v61 = vcombine.low %v15052_v63, %v15056_v49  ;;  %v18675_v6 = vcombine.high %v15060_v35, %v15064_v55  ;;  %v15050_v63 = vld [vmem:[%s26603_s9 + $0x178] sm:$0xff] }
 0xe10   : > { %15609 = vmatmul.mubr.bf16.vlgmr.msra.gmra.mrb[4].mxu0 %v25690_v42  ;;  %v15035_v42 = vld [vmem:[%s26603_s9 + $0x100] sm:$0xff] }
 0xe11   : > { %15938 = vmatpush1.bf16.msra.mxu0 %v18616_v2  ;;  %15969 = vmatprep.mubr.bf16.mxu0 %v25610_v1  ;;  %v18649_v57 = vcombine.high %v15035_v42, %v15039_v5  ;;  %v18648_v56 = vcombine.low %v15035_v42, %v15039_v5  ;;  %v15009_v2 = vld [vmem:[%s26603_s9 + $0x30] sm:$0xff] }
 0xe12   : > { %15939 = vmatprep.subr.bf16.mxu0 %v18625_v46  ;;  %v18674_v46 = vcombine.low %v15060_v35, %v15064_v55  ;;  %v18621_v20 = vcombine.high %v15005_v52, %v15009_v2  ;;  %v15029_v5 = vld [vmem:[%s26603_s9 + $0xd0] sm:$0xff]  ;;  %v15058_v35 = vld [vmem:[%s26603_s9 + $0x1b8] sm:$0xff] }
 0xe15   : > { %15940 = vmatpush1.bf16.msra.mxu0 %v18624_v17  ;;  %v15017_v17 = vld [vmem:[%s26603_s9 + $0x70] sm:$0xff] }
 0xe16   : > { %15941 = vmatprep.subr.bf16.mxu0 %v18633_v21  ;;  %v18620_v21 = vcombine.low %v15005_v52, %v15009_v2  ;;  %v18629_v47 = vcombine.high %v15013_v18, %v15017_v17  ;;  %v15062_v52 = vld [vmem:[%s26603_s9 + $0x1d8] sm:$0xff] }
 0xe17   : > { %v15066_v2 = vld [vmem:[%s26603_s9 + $0x1f8] sm:$0xff] }
 0xe19   : > { %15942 = vmatpush1.bf16.msra.mxu0 %v18632_v22  ;;  %v15025_v22 = vld [vmem:[%s26603_s9 + $0xb0] sm:$0xff] }
 0xe1a   : > { %15943 = vmatprep.subr.bf16.mxu0 %v18641_v3  ;;  %v18628_v3 = vcombine.low %v15013_v18, %v15017_v17  ;;  %v18637_v42 = vcombine.high %v15021_v8, %v15025_v22 }
 0xe1d   : > { %15944 = vmatpush1.bf16.msra.mxu0 %v18640_v44  ;;  %v15033_v44 = vld [vmem:[%s26603_s9 + $0xf0] sm:$0xff] }
 0xe1e   : > { %15945 = vmatprep.subr.bf16.mxu0 %v18649_v57  ;;  %v18636_v57 = vcombine.low %v15021_v8, %v15025_v22  ;;  %v18645_v36 = vcombine.high %v15029_v5, %v15033_v44  ;;  %v18684_v8 = vld [vmem:[%s26603_s9 + $0x420] sm:$0xff]  ;;  %v18678_v22 = vcombine.low %v15062_v52, %v15066_v2 }
 0xe21   : > { %15946 = vmatpush1.bf16.msra.mxu0 %v18648_v56  ;;  %v15041_v56 = vld [vmem:[%s26603_s9 + $0x130] sm:$0xff] }
 0xe22   : > { %15947 = vmatprep.subr.bf16.mxu0 %v18657_v48  ;;  %v18644_v48 = vcombine.low %v15029_v5, %v15033_v44  ;;  %v18653_v19 = vcombine.high %v15037_v24, %v15041_v56  ;;  %v18692_v5 = vld [vmem:[%s26603_s9 + $0x460] sm:$0xff] }
 0xe25   : > { %15948 = vmatpush1.bf16.msra.mxu0 %v18656_v43  ;;  %v15049_v43 = vld [vmem:[%s26603_s9 + $0x170] sm:$0xff] }
 0xe26   : > { %15949 = vmatprep.subr.bf16.mxu0 %v18665_v60  ;;  %v18652_v60 = vcombine.low %v15037_v24, %v15041_v56  ;;  %v18661_v62 = vcombine.high %v15045_v0, %v15049_v43  ;;  %v18700_v24 = vld [vmem:[%s26603_s9 + $0x4a0] sm:$0xff] }
 0xe29   : > { %15950 = vmatpush1.bf16.msra.mxu0 %v18664_v41  ;;  %v15057_v41 = vld [vmem:[%s26603_s9 + $0x1b0] sm:$0xff] }
 0xe2a   : > { %15951 = vmatprep.subr.bf16.mxu0 %v18673_v31  ;;  %v18660_v31 = vcombine.low %v15045_v0, %v15049_v43  ;;  %v18669_v13 = vcombine.high %v15053_v32, %v15057_v41  ;;  %v18668_v58 = vcombine.low %v15053_v32, %v15057_v41  ;;  %v18704_v0 = vld [vmem:[%s26603_s9 + $0x4c0] sm:$0xff] }
 0xe2b   : > { %v18708_v43 = vld [vmem:[%s26603_s9 + $0x4e0] sm:$0xff] }
 0xe2c   : > { %v18716_v32 = vld [vmem:[%s26603_s9 + $0x520] sm:$0xff]  ;;  %v18768_v41 = vcombine.low %v18704_v0, %v18708_v43 }
 0xe2d   : > { %15952 = vmatpush1.bf16.msra.mxu0 %v18672_v37  ;;  %v15065_v37 = vld [vmem:[%s26603_s9 + $0x1f0] sm:$0xff] }
 0xe2e   : > { %15978 = vmatprep.subr.bf16.mxu0 %v18619_v33  ;;  %v18677_v33 = vcombine.high %v15061_v59, %v15065_v37 }
 0xe30   : > { %15970 = vmatmul.mubr.bf16.vlgmr.msra.gmra.mrb[8].mxu0 %v25900_v28 }
 0xe31   : > { %15979 = vmatpush1.bf16.msra.mxu0 %v18618_v12  ;;  %16010 = vmatprep.mubr.bf16.mxu0 %v25610_v1  ;;  %v18676_v12 = vcombine.low %v15061_v59, %v15065_v37  ;;  %v18724_v59 = vld [vmem:[%s26603_s9 + $0x560] sm:$0xff] }
 0xe32   : > { %15980 = vmatprep.subr.bf16.mxu0 %v18627_v9  ;;  %v18623_v9 = vcombine.high %v15006_v23, %v15010_v54 }
 0xe35   : > { %15981 = vmatpush1.bf16.msra.mxu0 %v18626_v16  ;;  %v18622_v16 = vcombine.low %v15006_v23, %v15010_v54  ;;  %v18732_v23 = vld [vmem:[%s26603_s9 + $0x5a0] sm:$0xff] }
 0xe36   : > { %15982 = vmatprep.subr.bf16.mxu0 %v18635_v51  ;;  %v18631_v51 = vcombine.high %v15014_v15, %v15018_v40 }
 0xe39   : > { %15983 = vmatpush1.bf16.msra.mxu0 %v18634_v39  ;;  %v18630_v39 = vcombine.low %v15014_v15, %v15018_v40  ;;  %v18736_v15 = vld [vmem:[%s26603_s9 + $0x5c0] sm:$0xff] }
 0xe3a   : > { %15984 = vmatprep.subr.bf16.mxu0 %v18643_v4  ;;  %v18639_v4 = vcombine.high %v15022_v11, %v15026_v14  ;;  %v18740_v40 = vld [vmem:[%s26603_s9 + $0x5e0] sm:$0xff] }
 0xe3d   : > { %15985 = vmatpush1.bf16.msra.mxu0 %v18642_v38  ;;  %v18638_v38 = vcombine.low %v15022_v11, %v15026_v14 }
 0xe3e   : > { %15986 = vmatprep.subr.bf16.mxu0 %v18651_v27  ;;  %v18647_v27 = vcombine.high %v15030_v26, %v15034_v25  ;;  %v18685_v26 = vld [vmem:[%s26603_s9 + $0x428] sm:$0xff]  ;;  %v18800_v25 = vcombine.low %v18736_v15, %v18740_v40 }
 0xe41   : > { %15987 = vmatpush1.bf16.msra.mxu0 %v18650_v29 }
 0xe42   : > { %15988 = vmatprep.subr.bf16.mxu0 %v18659_v30  ;;  %v15046_v30 = vld [vmem:[%s26603_s9 + $0x158] sm:$0xff] }
 0xe43   : > { %v18662_v55 = vcombine.low %v15046_v30, %v15050_v63 }
 0xe45   : > { %15989 = vmatpush1.bf16.msra.mxu0 %v18658_v45  ;;  %v18663_v45 = vcombine.high %v15046_v30, %v15050_v63  ;;  %v18701_v63 = vld [vmem:[%s26603_s9 + $0x4a8] sm:$0xff] }
 0xe46   : > { %15990 = vmatprep.subr.bf16.mxu0 %v18667_v10  ;;  %v15054_v10 = vld [vmem:[%s26603_s9 + $0x198] sm:$0xff] }
 0xe47   : > { %v18670_v18 = vcombine.low %v15054_v10, %v15058_v35 }
 0xe49   : > { %15991 = vmatpush1.bf16.msra.mxu0 %v18666_v61  ;;  %v18671_v61 = vcombine.high %v15054_v10, %v15058_v35  ;;  %v18705_v10 = vld [vmem:[%s26603_s9 + $0x4c8] sm:$0xff] }
 0xe4a   : > { %15992 = vmatprep.subr.bf16.mxu0 %v18675_v6  ;;  %v18709_v35 = vld [vmem:[%s26603_s9 + $0x4e8] sm:$0xff] }
 0xe4d   : > { %15993 = vmatpush1.bf16.msra.mxu0 %v18674_v46 }
 0xe4e   : > { %16019 = vmatprep.subr.bf16.mxu0 %v18621_v20 }
 0xe50   : > { %16011 = vmatmul.mubr.bf16.vlgmr.msra.gmra.mrb[12].mxu0 %v25900_v28 }
 0xe51   : > { %16020 = vmatpush1.bf16.msra.mxu0 %v18620_v21  ;;  %16051 = vmatprep.mubr.bf16.mxu0 %v25610_v1  ;;  %v18679_v21 = vcombine.high %v15062_v52, %v15066_v2  ;;  %v18713_v52 = vld [vmem:[%s26603_s9 + $0x508] sm:$0xff] }
 0xe52   : > { %16021 = vmatprep.subr.bf16.mxu0 %v18629_v47  ;;  %v18680_v47 = vld [vmem:[%s26603_s9 + $0x400] sm:$0xff]  ;;  %v18717_v2 = vld [vmem:[%s26603_s9 + $0x528] sm:$0xff] }
 0xe53   : > { %v18744_v44 = vcombine.low %v18680_v47, %v18684_v8 }
 0xe55   : > { %16022 = vmatpush1.bf16.msra.mxu0 %v18628_v3  ;;  %v18745_v3 = vcombine.high %v18680_v47, %v18684_v8  ;;  %v18778_v47 = vcombine.low %v18713_v52, %v18717_v2 }
 0xe56   : > { %16023 = vmatprep.subr.bf16.mxu0 %v18637_v42  ;;  %v18688_v42 = vld [vmem:[%s26603_s9 + $0x440] sm:$0xff] }
 0xe57   : > { %v18752_v56 = vcombine.low %v18688_v42, %v18692_v5 }
 0xe59   : > { %16024 = vmatpush1.bf16.msra.mxu0 %v18636_v57  ;;  %v18753_v57 = vcombine.high %v18688_v42, %v18692_v5 }
 0xe5a   : > { %16025 = vmatprep.subr.bf16.mxu0 %v18645_v36  ;;  %v18696_v36 = vld [vmem:[%s26603_s9 + $0x480] sm:$0xff] }
 0xe5d   : > { %16026 = vmatpush1.bf16.msra.mxu0 %v18644_v48  ;;  %v26063_v48 = vld [vmem:[#allocation4 + $0x60] sm:$0xff] }
 0xe5e   : > { %16027 = vmatprep.subr.bf16.mxu0 %v18653_v19  ;;  %v18761_v19 = vcombine.high %v18696_v36, %v18700_v24 }
 0xe61   : > { %16028 = vmatpush1.bf16.msra.mxu0 %v18652_v60  ;;  %v18760_v60 = vcombine.low %v18696_v36, %v18700_v24  ;;  %v18741_v36 = vld [vmem:[%s26603_s9 + $0x5e8] sm:$0xff] }
 0xe62   : > { %16029 = vmatprep.subr.bf16.mxu0 %v18661_v62  ;;  %v18712_v62 = vld [vmem:[%s26603_s9 + $0x500] sm:$0xff] }
 0xe63   : > { %v18776_v37 = vcombine.low %v18712_v62, %v18716_v32 }
 0xe65   : > { %16030 = vmatpush1.bf16.msra.mxu0 %v18660_v31  ;;  %v18777_v31 = vcombine.high %v18712_v62, %v18716_v32 }
 0xe66   : > { %16031 = vmatprep.subr.bf16.mxu0 %v18669_v13  ;;  %v18720_v13 = vld [vmem:[%s26603_s9 + $0x540] sm:$0xff] }
 0xe67   : > { %v18784_v54 = vcombine.low %v18720_v13, %v18724_v59 }
 0xe69   : > { %16032 = vmatpush1.bf16.msra.mxu0 %v18668_v58  ;;  %v18785_v58 = vcombine.high %v18720_v13, %v18724_v59 }
 0xe6a   : > { %16033 = vmatprep.subr.bf16.mxu0 %v18677_v33  ;;  %v18728_v33 = vld [vmem:[%s26603_s9 + $0x580] sm:$0xff] }
 0xe6b   : > { %v18792_v11 = vcombine.low %v18728_v33, %v18732_v23 }
 0xe6d   : > { %16034 = vmatpush1.bf16.msra.mxu0 %v18676_v12  ;;  %v18793_v12 = vcombine.high %v18728_v33, %v18732_v23 }
 0xe6e   : > { %16060 = vmatprep.subr.bf16.mxu0 %v18623_v9 }
 0xe70   : > { %16052 = vmatmul.mubr.bf16.vlgmr.msra.gmra.mrb[16].mxu0 %v25900_v28 }
 0xe71   : > { %16061 = vmatpush1.bf16.msra.mxu0 %v18622_v16  ;;  %16092 = vmatprep.mubr.bf16.mxu0 %v25610_v1  ;;  %v15042_v1 = vld [vmem:[%s26603_s9 + $0x138] sm:$0xff] }
 0xe72   : > { %16062 = vmatprep.subr.bf16.mxu0 %v18631_v51  ;;  %v18655_v29 = vcombine.high %v15038_v7, %v15042_v1  ;;  %v18654_v49 = vcombine.low %v15038_v7, %v15042_v1  ;;  %v18689_v7 = vld [vmem:[%s26603_s9 + $0x448] sm:$0xff] }
 0xe73   : > { %v18693_v1 = vld [vmem:[%s26603_s9 + $0x468] sm:$0xff] }
 0xe74   : > { %v18755_v30 = vcombine.high %v18689_v7, %v18693_v1 }
 0xe75   : > { %16063 = vmatpush1.bf16.msra.mxu0 %v18630_v39  ;;  %v18801_v39 = vcombine.high %v18736_v15, %v18740_v40 }
 0xe76   : > { %16064 = vmatprep.subr.bf16.mxu0 %v18639_v4  ;;  %v18681_v4 = vld [vmem:[%s26603_s9 + $0x408] sm:$0xff] }
 0xe79   : > { %16065 = vmatpush1.bf16.msra.mxu0 %v18638_v38  ;;  %v14985_v38 = vmax.f32 %v25715_v50, 0.0  ;;  %v18697_v50 = vld [vmem:[%s26603_s9 + $0x488] sm:$0xff] }
 0xe7a   : > { %16066 = vmatprep.subr.bf16.mxu0 %v18647_v27  ;;  %v18747_v27 = vcombine.high %v18681_v4, %v18685_v26 }
 0xe7d   : > { %16067 = vmatpush1.bf16.msra.mxu0 %v18646_v34  ;;  %v18746_v34 = vcombine.low %v18681_v4, %v18685_v26  ;;  %v18722_v4 = vld [vmem:[%s26603_s9 + $0x550] sm:$0xff] }
 0xe7e   : > { %16068 = vmatprep.subr.bf16.mxu0 %v18655_v29  ;;  %v26113_v29 = vpack.c.bf16 %v14985_v38, %v14985_v38  ;;  %v18726_v26 = vld [vmem:[%s26603_s9 + $0x570] sm:$0xff] }
 0xe7f   : > { %v18789_v38 = vcombine.high %v18722_v4, %v18726_v26 }
 0xe81   : > { %16069 = vmatpush1.bf16.msra.mxu0 %v18654_v49  ;;  %v18754_v49 = vcombine.low %v18689_v7, %v18693_v1  ;;  %v18734_v7 = vld [vmem:[%s26603_s9 + $0x5b0] sm:$0xff]  ;;  %v18788_v1 = vcombine.low %v18722_v4, %v18726_v26  ;;  %v18812_v4 = vld [vmem:[%s26603_s9 + $0x620] sm:$0xff] }
 0xe82   : > { %16070 = vmatprep.subr.bf16.mxu0 %v18663_v45  ;;  %v18763_v45 = vcombine.high %v18697_v50, %v18701_v63 }
 0xe83   : > { %v26034_v6 = vpop.f32.mrb[248].mxu0 }
 0xe84   : > { %v26042_v46 = vpop.f32.mrb[249].mxu0 }
 0xe85   : > { %16071 = vmatpush1.bf16.msra.mxu0 %v18662_v55  ;;  %v15491_v20 = vpop.f32.mrb[250].mxu0  ;;  %v18762_v55 = vcombine.low %v18697_v50, %v18701_v63  ;;  %v18738_v50 = vld [vmem:[%s26603_s9 + $0x5d0] sm:$0xff] }
 0xe86   : > { %v15492_v17 = vpop.f32.mrb[251].mxu0  ;;  %16072 = vmatprep.subr.bf16.mxu0 %v18671_v61  ;;  %v18771_v61 = vcombine.high %v18705_v10, %v18709_v35  ;;  %v18770_v20 = vcombine.low %v18705_v10, %v18709_v35  ;;  %v18742_v63 = vld [vmem:[%s26603_s9 + $0x5f0] sm:$0xff] }
 0xe87   : > { %v18721_v17 = vld [vmem:[%s26603_s9 + $0x548] sm:$0xff] }
 0xe89   : > { %16073 = vmatpush1.bf16.msra.mxu0 %v18670_v18  ;;  %v18779_v18 = vcombine.high %v18713_v52, %v18717_v2  ;;  %v18687_v52 = vld [vmem:[%s26603_s9 + $0x438] sm:$0xff]  ;;  %v18804_v2 = vcombine.low %v18738_v50, %v18742_v63 }
 0xe8a   : > { %16074 = vmatprep.subr.bf16.mxu0 %v18679_v21  ;;  %v18725_v21 = vld [vmem:[%s26603_s9 + $0x568] sm:$0xff] }
 0xe8b   : > { %v18787_v8 = vcombine.high %v18721_v17, %v18725_v21  ;;  %v18786_v42 = vcombine.low %v18721_v17, %v18725_v21  ;;  %v18695_v17 = vld [vmem:[%s26603_s9 + $0x478] sm:$0xff] }
 0xe8d   : > { %16075 = vmatpush1.bf16.msra.mxu0 %v18678_v22  ;;  %v18729_v22 = vld [vmem:[%s26603_s9 + $0x588] sm:$0xff] }
 0xe8e   : > { %16487 = vmatprep.subr.bf16.mxu0 %v18745_v3  ;;  %v18733_v3 = vld [vmem:[%s26603_s9 + $0x5a8] sm:$0xff] }
 0xe8f   : > { %v18795_v5 = vcombine.high %v18729_v22, %v18733_v3 }
 0xe90   : > { %16093 = vmatmul.mubr.bf16.vlgmr.msra.gmra.mrb[20].mxu0 %v25900_v28  ;;  %v18769_v28 = vcombine.high %v18704_v0, %v18708_v43 }
 0xe91   : > { %16488 = vmatpush1.bf16.msra.mxu0 %v18744_v44  ;;  %16519 = vmatprep.mubr.bf16.mxu0 %v26063_v48 }
 0xe92   : > { %16489 = vmatprep.subr.bf16.mxu0 %v18753_v57  ;;  %v18737_v57 = vld [vmem:[%s26603_s9 + $0x5c8] sm:$0xff] }
 0xe93   : > { %v18803_v43 = vcombine.high %v18737_v57, %v18741_v36  ;;  %v18802_v62 = vcombine.low %v18737_v57, %v18741_v36  ;;  %v18711_v57 = vld [vmem:[%s26603_s9 + $0x4f8] sm:$0xff] }
 0xe95   : > { %16490 = vmatpush1.bf16.msra.mxu0 %v18752_v56 }
 0xe96   : > { %16491 = vmatprep.subr.bf16.mxu0 %v18761_v19  ;;  %v18794_v19 = vcombine.low %v18729_v22, %v18733_v3  ;;  %v18703_v22 = vld [vmem:[%s26603_s9 + $0x4b8] sm:$0xff] }
 0xe99   : > { %16492 = vmatpush1.bf16.msra.mxu0 %v18760_v60  ;;  %v18682_v60 = vld [vmem:[%s26603_s9 + $0x410] sm:$0xff] }
 0xe9a   : > { %16493 = vmatprep.subr.bf16.mxu0 %v18769_v28  ;;  %v18686_v28 = vld [vmem:[%s26603_s9 + $0x430] sm:$0xff] }
 0xe9b   : > { %v18749_v32 = vcombine.high %v18682_v60, %v18686_v28  ;;  %v18748_v13 = vcombine.low %v18682_v60, %v18686_v28  ;;  %v18723_v28 = vld [vmem:[%s26603_s9 + $0x558] sm:$0xff] }
 0xe9d   : > { %16494 = vmatpush1.bf16.msra.mxu0 %v18768_v41  ;;  %v18690_v41 = vld [vmem:[%s26603_s9 + $0x450] sm:$0xff] }
 0xe9e   : > { %16495 = vmatprep.subr.bf16.mxu0 %v18777_v31  ;;  %v18694_v31 = vld [vmem:[%s26603_s9 + $0x470] sm:$0xff] }
 0xe9f   : > { %v18757_v59 = vcombine.high %v18690_v41, %v18694_v31  ;;  %v18756_v33 = vcombine.low %v18690_v41, %v18694_v31  ;;  %v18731_v31 = vld [vmem:[%s26603_s9 + $0x598] sm:$0xff] }
 0xea1   : > { %16496 = vmatpush1.bf16.msra.mxu0 %v18776_v37  ;;  %v18698_v37 = vld [vmem:[%s26603_s9 + $0x490] sm:$0xff] }
 0xea2   : > { %16497 = vmatprep.subr.bf16.mxu0 %v18785_v58  ;;  %v18702_v58 = vld [vmem:[%s26603_s9 + $0x4b0] sm:$0xff] }
 0xea3   : > { %v26090_v9 = vpop.f32.mrb[252].mxu0  ;;  %v18765_v23 = vcombine.high %v18698_v37, %v18702_v58  ;;  %v18764_v15 = vcombine.low %v18698_v37, %v18702_v58 }
 0xea4   : > { %v26098_v16 = vpop.f32.mrb[253].mxu0 }
 0xea5   : > { %v15532_v51 = vpop.f32.mrb[254].mxu0  ;;  %16498 = vmatpush1.bf16.msra.mxu0 %v18784_v54  ;;  %v18706_v54 = vld [vmem:[%s26603_s9 + $0x4d0] sm:$0xff] }
 0xea6   : > { %v15533_v14 = vpop.f32.mrb[255].mxu0  ;;  %16499 = vmatprep.subr.bf16.mxu0 %v18793_v12  ;;  %v18710_v12 = vld [vmem:[%s26603_s9 + $0x4f0] sm:$0xff] }
 0xea7   : > { %v18773_v40 = vcombine.high %v18706_v54, %v18710_v12  ;;  %v18714_v51 = vld [vmem:[%s26603_s9 + $0x510] sm:$0xff]  ;;  %v18772_v14 = vcombine.low %v18706_v54, %v18710_v12 }
 0xea9   : > { %16500 = vmatpush1.bf16.msra.mxu0 %v18792_v11  ;;  %v18718_v11 = vld [vmem:[%s26603_s9 + $0x530] sm:$0xff] }
 0xeaa   : > { %16501 = vmatprep.subr.bf16.mxu0 %v18801_v39  ;;  %v18781_v39 = vcombine.high %v18714_v51, %v18718_v11 }
 0xead   : > { %16502 = vmatpush1.bf16.msra.mxu0 %v18800_v25  ;;  %v18780_v25 = vcombine.low %v18714_v51, %v18718_v11 }
 0xeae   : > { %16528 = vmatprep.subr.bf16.mxu0 %v18747_v27  ;;  %v18730_v27 = vld [vmem:[%s26603_s9 + $0x590] sm:$0xff] }
 0xeaf   : > { %v18796_v10 = vcombine.low %v18730_v27, %v18734_v7 }
 0xeb0   : > { %16520 = vmatmul.mubr.bf16.vlgmr.msra.gmra.mrb[24].mxu0 %v26113_v29 }
 0xeb1   : > { %16529 = vmatpush1.bf16.msra.mxu0 %v18746_v34  ;;  %16560 = vmatprep.mubr.bf16.mxu0 %v26063_v48  ;;  %v18797_v34 = vcombine.high %v18730_v27, %v18734_v7  ;;  %v18824_v7 = vld [vmem:[%s26603_s9 + $0x680] sm:$0xff] }
 0xeb2   : > { %16530 = vmatprep.subr.bf16.mxu0 %v18755_v30 }
 0xeb5   : > { %16531 = vmatpush1.bf16.msra.mxu0 %v18754_v49 }
 0xeb6   : > { %16532 = vmatprep.subr.bf16.mxu0 %v18763_v45 }
 0xeb9   : > { %16533 = vmatpush1.bf16.msra.mxu0 %v18762_v55  ;;  %v18805_v55 = vcombine.high %v18738_v50, %v18742_v63  ;;  %v18832_v63 = vld [vmem:[%s26603_s9 + $0x6c0] sm:$0xff] }
 0xeba   : > { %16534 = vmatprep.subr.bf16.mxu0 %v18771_v61  ;;  %v18683_v61 = vld [vmem:[%s26603_s9 + $0x418] sm:$0xff] }
 0xebb   : > { %v18750_v21 = vcombine.low %v18683_v61, %v18687_v52 }
 0xebd   : > { %16535 = vmatpush1.bf16.msra.mxu0 %v18770_v20  ;;  %v18751_v20 = vcombine.high %v18683_v61, %v18687_v52 }
 0xebe   : > { %16536 = vmatprep.subr.bf16.mxu0 %v18779_v18  ;;  %v18691_v18 = vld [vmem:[%s26603_s9 + $0x458] sm:$0xff] }
 0xebf   : > { %v18758_v3 = vcombine.low %v18691_v18, %v18695_v17 }
 0xec1   : > { %16537 = vmatpush1.bf16.msra.mxu0 %v18778_v47  ;;  %v18759_v47 = vcombine.high %v18691_v18, %v18695_v17 }
 0xec2   : > { %16538 = vmatprep.subr.bf16.mxu0 %v18787_v8  ;;  %v18699_v8 = vld [vmem:[%s26603_s9 + $0x498] sm:$0xff] }
 0xec3   : > { %v26147_v44 = vpop.f32.mrb[0].mxu0  ;;  %v18766_v36 = vcombine.low %v18699_v8, %v18703_v22 }
 0xec4   : > { %v26155_v24 = vpop.f32.mrb[1].mxu0 }
 0xec5   : > { %v15573_v56 = vpop.f32.mrb[2].mxu0  ;;  %16539 = vmatpush1.bf16.msra.mxu0 %v18786_v42  ;;  %v18767_v42 = vcombine.high %v18699_v8, %v18703_v22 }
 0xec6   : > { %v15574_v0 = vpop.f32.mrb[3].mxu0  ;;  %16540 = vmatprep.subr.bf16.mxu0 %v18795_v5  ;;  %v18707_v5 = vld [vmem:[%s26603_s9 + $0x4d8] sm:$0xff] }
 0xec7   : > { %v18775_v56 = vcombine.high %v18707_v5, %v18711_v57  ;;  %v18719_v0 = vld [vmem:[%s26603_s9 + $0x538] sm:$0xff] }
 0xec9   : > { %16541 = vmatpush1.bf16.msra.mxu0 %v18794_v19  ;;  %v18715_v19 = vld [vmem:[%s26603_s9 + $0x518] sm:$0xff] }
 0xeca   : > { %16542 = vmatprep.subr.bf16.mxu0 %v18803_v43  ;;  %v18774_v43 = vcombine.low %v18707_v5, %v18711_v57  ;;  %v18783_v60 = vcombine.high %v18715_v19, %v18719_v0  ;;  %v18868_v5 = vld [vmem:[%s26603_s9 + $0x7e0] sm:$0xff] }
 0xecd   : > { %16543 = vmatpush1.bf16.msra.mxu0 %v18802_v62  ;;  %v18727_v62 = vld [vmem:[%s26603_s9 + $0x578] sm:$0xff] }
 0xece   : > { %16569 = vmatprep.subr.bf16.mxu0 %v18749_v32  ;;  %v18782_v32 = vcombine.low %v18715_v19, %v18719_v0  ;;  %v18791_v41 = vcombine.high %v18723_v28, %v18727_v62 }
 0xed0   : > { %16561 = vmatmul.mubr.bf16.vlgmr.msra.gmra.mrb[28].mxu0 %v26113_v29 }
 0xed1   : > { %16570 = vmatpush1.bf16.msra.mxu0 %v18748_v13  ;;  %16601 = vmatprep.mubr.bf16.mxu0 %v26063_v48  ;;  %v18735_v13 = vld [vmem:[%s26603_s9 + $0x5b8] sm:$0xff] }
 0xed2   : > { %16571 = vmatprep.subr.bf16.mxu0 %v18757_v59  ;;  %v18790_v59 = vcombine.low %v18723_v28, %v18727_v62  ;;  %v18799_v37 = vcombine.high %v18731_v31, %v18735_v13  ;;  %v18798_v51 = vcombine.low %v18731_v31, %v18735_v13  ;;  %v18809_v28 = vld [vmem:[%s26603_s9 + $0x608] sm:$0xff] }
 0xed3   : > { %v18813_v62 = vld [vmem:[%s26603_s9 + $0x628] sm:$0xff] }
 0xed4   : > { %v18821_v31 = vld [vmem:[%s26603_s9 + $0x668] sm:$0xff]  ;;  %v18874_v13 = vcombine.low %v18809_v28, %v18813_v62 }
 0xed5   : > { %16572 = vmatpush1.bf16.msra.mxu0 %v18756_v33  ;;  %v18739_v33 = vld [vmem:[%s26603_s9 + $0x5d8] sm:$0xff] }
 0xed6   : > { %16573 = vmatprep.subr.bf16.mxu0 %v18765_v23  ;;  %v18743_v23 = vld [vmem:[%s26603_s9 + $0x5f8] sm:$0xff] }
 0xed9   : > { %16574 = vmatpush1.bf16.msra.mxu0 %v18764_v15 }
 0xeda   : > { %16575 = vmatprep.subr.bf16.mxu0 %v18773_v40 }
 0xedd   : > { %16576 = vmatpush1.bf16.msra.mxu0 %v18772_v14  ;;  %v18807_v14 = vcombine.high %v18739_v33, %v18743_v23 }
 0xede   : > { %16577 = vmatprep.subr.bf16.mxu0 %v18781_v39  ;;  %v18808_v39 = vld [vmem:[%s26603_s9 + $0x600] sm:$0xff] }
 0xedf   : > { %v18873_v26 = vcombine.high %v18808_v39, %v18812_v4 }
 0xee1   : > { %16578 = vmatpush1.bf16.msra.mxu0 %v18780_v25  ;;  %v18820_v25 = vld [vmem:[%s26603_s9 + $0x660] sm:$0xff] }
 0xee2   : > { %16579 = vmatprep.subr.bf16.mxu0 %v18789_v38  ;;  %v18872_v38 = vcombine.low %v18808_v39, %v18812_v4  ;;  %v18845_v39 = vld [vmem:[%s26603_s9 + $0x728] sm:$0xff] }
 0xee3   : > { %v26201_v30 = vpop.f32.mrb[4].mxu0 }
 0xee4   : > { %v26209_v49 = vpop.f32.mrb[5].mxu0 }
 0xee5   : > { %v15614_v45 = vpop.f32.mrb[6].mxu0  ;;  %16580 = vmatpush1.bf16.msra.mxu0 %v18788_v1  ;;  %v18828_v1 = vld [vmem:[%s26603_s9 + $0x6a0] sm:$0xff] }
 0xee6   : > { %v15615_v35 = vpop.f32.mrb[7].mxu0  ;;  %16581 = vmatprep.subr.bf16.mxu0 %v18797_v34  ;;  %v18889_v50 = vcombine.high %v18824_v7, %v18828_v1  ;;  %v18836_v45 = vld [vmem:[%s26603_s9 + $0x6e0] sm:$0xff] }
 0xee7   : > { %v18897_v35 = vcombine.high %v18832_v63, %v18836_v45  ;;  %v18896_v61 = vcombine.low %v18832_v63, %v18836_v45  ;;  %v18865_v63 = vld [vmem:[%s26603_s9 + $0x7c8] sm:$0xff] }
 0xee8   : > { %v18869_v45 = vld [vmem:[%s26603_s9 + $0x7e8] sm:$0xff] }
 0xee9   : > { %16582 = vmatpush1.bf16.msra.mxu0 %v18796_v10  ;;  %v18888_v10 = vcombine.low %v18824_v7, %v18828_v1  ;;  %v18861_v7 = vld [vmem:[%s26603_s9 + $0x7a8] sm:$0xff] }
 0xeea   : > { %16583 = vmatprep.subr.bf16.mxu0 %v18805_v55  ;;  %v18844_v55 = vld [vmem:[%s26603_s9 + $0x720] sm:$0xff] }
 0xeed   : > { %16584 = vmatpush1.bf16.msra.mxu0 %v18804_v2  ;;  %v18848_v2 = vld [vmem:[%s26603_s9 + $0x740] sm:$0xff] }
 0xeee   : > { %16610 = vmatprep.subr.bf16.mxu0 %v18751_v20  ;;  %v18852_v20 = vld [vmem:[%s26603_s9 + $0x760] sm:$0xff] }
 0xeef   : > { %v18913_v17 = vcombine.high %v18848_v2, %v18852_v20  ;;  %v18912_v8 = vcombine.low %v18848_v2, %v18852_v20  ;;  %v18931_v2 = vcombine.high %v18865_v63, %v18869_v45  ;;  %v18810_v20 = vld [vmem:[%s26603_s9 + $0x610] sm:$0xff] }
 0xef0   : > { %16602 = vmatmul.mubr.bf16.vlgmr.msra.gmra.mrb[32].mxu0 %v26113_v29 }
 0xef1   : > { %16611 = vmatpush1.bf16.msra.mxu0 %v18750_v21  ;;  %16642 = vmatprep.mubr.bf16.mxu0 %v26063_v48  ;;  %v18856_v21 = vld [vmem:[%s26603_s9 + $0x780] sm:$0xff] }
 0xef2   : > { %16612 = vmatprep.subr.bf16.mxu0 %v18759_v47  ;;  %v18860_v47 = vld [vmem:[%s26603_s9 + $0x7a0] sm:$0xff] }
 0xef3   : > { %v18921_v22 = vcombine.high %v18856_v21, %v18860_v47  ;;  %v18920_v0 = vcombine.low %v18856_v21, %v18860_v47  ;;  %v18822_v21 = vld [vmem:[%s26603_s9 + $0x670] sm:$0xff] }
 0xef5   : > { %16613 = vmatpush1.bf16.msra.mxu0 %v18758_v3 }
 0xef6   : > { %16614 = vmatprep.subr.bf16.mxu0 %v18767_v42  ;;  %v18864_v42 = vld [vmem:[%s26603_s9 + $0x7c0] sm:$0xff] }
 0xef9   : > { %16615 = vmatpush1.bf16.msra.mxu0 %v18766_v36 }
 0xefa   : > { %16616 = vmatprep.subr.bf16.mxu0 %v18775_v56 }
 0xefd   : > { %16617 = vmatpush1.bf16.msra.mxu0 %v18774_v43 }
 0xefe   : > { %16618 = vmatprep.subr.bf16.mxu0 %v18783_v60  ;;  %v18929_v60 = vcombine.high %v18864_v42, %v18868_v5 }
 0xf01   : > { %16619 = vmatpush1.bf16.msra.mxu0 %v18782_v32  ;;  %v15001_v32 = vmax.f32 %v25717_v53, 0.0  ;;  %v18825_v53 = vld [vmem:[%s26603_s9 + $0x688] sm:$0xff] }
 0xf02   : > { %16620 = vmatprep.subr.bf16.mxu0 %v18791_v41  ;;  %v18817_v41 = vld [vmem:[%s26603_s9 + $0x648] sm:$0xff] }
 0xf03   : > { %v15971_v58 = vpop.f32.mrb[8].mxu0 }
 0xf04   : > { %v26262_v54 = vadd.f32 %v15971_v58, %v26034_v6  ;;  %v15973_v12 = vpop.f32.mrb[9].mxu0  ;;  %v18806_v6 = vcombine.low %v18739_v33, %v18743_v23  ;;  %v18829_v58 = vld [vmem:[%s26603_s9 + $0x6a8] sm:$0xff]  ;;  %v18882_v33 = vcombine.low %v18817_v41, %v18821_v31 }
 0xf05   : > { %v26265_v15 = vadd.f32 %v15973_v12, %v26042_v46  ;;  %v15975_v40 = vpop.f32.mrb[10].mxu0  ;;  %16621 = vmatpush1.bf16.msra.mxu0 %v18790_v59  ;;  %v18816_v46 = vld [vmem:[%s26603_s9 + $0x640] sm:$0xff]  ;;  %v26336_v59 = vpack.c.bf16 %v15001_v32, %v15001_v32  ;;  %v18891_v23 = vcombine.high %v18825_v53, %v18829_v58  ;;  %v18833_v12 = vld [vmem:[%s26603_s9 + $0x6c8] sm:$0xff]  ;;  %v18850_v32 = vld [vmem:[%s26603_s9 + $0x750] sm:$0xff] }
 0xf06   : > { %v15976_v11 = vpop.f32.mrb[11].mxu0  ;;  %16622 = vmatprep.subr.bf16.mxu0 %v18799_v37  ;;  %v18881_v27 = vcombine.high %v18816_v46, %v18820_v25  ;;  %v18880_v34 = vcombine.low %v18816_v46, %v18820_v25  ;;  %v18883_v37 = vcombine.high %v18817_v41, %v18821_v31  ;;  %v18837_v40 = vld [vmem:[%s26603_s9 + $0x6e8] sm:$0xff] }
 0xf07   : > { %v18899_v11 = vcombine.high %v18833_v12, %v18837_v40  ;;  %v18898_v4 = vcombine.low %v18833_v12, %v18837_v40  ;;  %v18853_v46 = vld [vmem:[%s26603_s9 + $0x768] sm:$0xff]  ;;  %v18870_v12 = vld [vmem:[%s26603_s9 + $0x7f0] sm:$0xff] }
 0xf09   : > { %16623 = vmatpush1.bf16.msra.mxu0 %v18798_v51  ;;  %v18890_v51 = vcombine.low %v18825_v53, %v18829_v58 }
 0xf0a   : > { %16624 = vmatprep.subr.bf16.mxu0 %v18807_v14  ;;  %v18841_v14 = vld [vmem:[%s26603_s9 + $0x708] sm:$0xff] }
 0xf0b   : > { %v18906_v25 = vcombine.low %v18841_v14, %v18845_v39 }
 0xf0d   : > { %16625 = vmatpush1.bf16.msra.mxu0 %v18806_v6  ;;  %v18907_v6 = vcombine.high %v18841_v14, %v18845_v39 }
 0xf0e   : > { %17045 = vmatprep.subr.bf16.mxu0 %v18873_v26  ;;  %v18849_v26 = vld [vmem:[%s26603_s9 + $0x748] sm:$0xff] }
 0xf0f   : > { %v18914_v1 = vcombine.low %v18849_v26, %v18853_v46 }
 0xf10   : > { %16643 = vmatmul.mubr.bf16.vlgmr.msra.gmra.mrb[36].mxu0 %v26113_v29  ;;  %v18840_v29 = vld [vmem:[%s26603_s9 + $0x700] sm:$0xff] }
 0xf11   : > { %17046 = vmatpush1.bf16.msra.mxu0 %v18872_v38  ;;  %17077 = vmatprep.mubr.bf16.mxu0 %v26063_v48  ;;  %v18905_v52 = vcombine.high %v18840_v29, %v18844_v55  ;;  %v18904_v18 = vcombine.low %v18840_v29, %v18844_v55  ;;  %v18915_v38 = vcombine.high %v18849_v26, %v18853_v46  ;;  %v18811_v26 = vld [vmem:[%s26603_s9 + $0x618] sm:$0xff] }
 0xf12   : > { %17047 = vmatprep.subr.bf16.mxu0 %v18881_v27  ;;  %v18857_v27 = vld [vmem:[%s26603_s9 + $0x788] sm:$0xff]  ;;  %v18815_v46 = vld [vmem:[%s26603_s9 + $0x638] sm:$0xff] }
 0xf15   : > { %17048 = vmatpush1.bf16.msra.mxu0 %v18880_v34  ;;  %v18923_v34 = vcombine.high %v18857_v27, %v18861_v7 }
 0xf16   : > { %17049 = vmatprep.subr.bf16.mxu0 %v18889_v50 }
 0xf19   : > { %17050 = vmatpush1.bf16.msra.mxu0 %v18888_v10 }
 0xf1a   : > { %17051 = vmatprep.subr.bf16.mxu0 %v18897_v35 }
 0xf1d   : > { %17052 = vmatpush1.bf16.msra.mxu0 %v18896_v61  ;;  %v18922_v61 = vcombine.low %v18857_v27, %v18861_v7  ;;  %v18878_v27 = vcombine.low %v18811_v26, %v18815_v46 }
 0xf1e   : > { %17053 = vmatprep.subr.bf16.mxu0 %v18905_v52 }
 0xf21   : > { %17054 = vmatpush1.bf16.msra.mxu0 %v18904_v18  ;;  %v18814_v18 = vld [vmem:[%s26603_s9 + $0x630] sm:$0xff] }
 0xf22   : > { %17055 = vmatprep.subr.bf16.mxu0 %v18913_v17  ;;  %v18877_v17 = vcombine.high %v18810_v20, %v18814_v18  ;;  %v18876_v47 = vcombine.low %v18810_v20, %v18814_v18  ;;  %v18851_v18 = vld [vmem:[%s26603_s9 + $0x758] sm:$0xff] }
 0xf23   : > { %v16012_v3 = vpop.f32.mrb[12].mxu0 }
 0xf24   : > { %v26318_v57 = vadd.f32 %v16012_v3, %v26090_v9  ;;  %v16014_v36 = vpop.f32.mrb[13].mxu0  ;;  %v18928_v9 = vcombine.low %v18864_v42, %v18868_v5  ;;  %v18830_v3 = vld [vmem:[%s26603_s9 + $0x6b0] sm:$0xff] }
 0xf25   : > { %v26321_v56 = vadd.f32 %v16014_v36, %v26098_v16  ;;  %v16016_v19 = vpop.f32.mrb[14].mxu0  ;;  %17056 = vmatpush1.bf16.msra.mxu0 %v18912_v8  ;;  %v18875_v16 = vcombine.high %v18809_v28, %v18813_v62  ;;  %v18834_v36 = vld [vmem:[%s26603_s9 + $0x6d0] sm:$0xff] }
 0xf26   : > { %v16017_v43 = vpop.f32.mrb[15].mxu0  ;;  %17057 = vmatprep.subr.bf16.mxu0 %v18921_v22  ;;  %v18826_v22 = vld [vmem:[%s26603_s9 + $0x690] sm:$0xff] }
 0xf27   : > { %v18893_v5 = vcombine.high %v18826_v22, %v18830_v3  ;;  %v18838_v19 = vld [vmem:[%s26603_s9 + $0x6f0] sm:$0xff] }
 0xf28   : > { %v18901_v43 = vcombine.high %v18834_v36, %v18838_v19  ;;  %v18846_v28 = vld [vmem:[%s26603_s9 + $0x730] sm:$0xff]  ;;  %v18900_v62 = vcombine.low %v18834_v36, %v18838_v19 }
 0xf29   : > { %17058 = vmatpush1.bf16.msra.mxu0 %v18920_v0  ;;  %v18892_v0 = vcombine.low %v18826_v22, %v18830_v3 }
 0xf2a   : > { %17059 = vmatprep.subr.bf16.mxu0 %v18929_v60  ;;  %v18842_v60 = vld [vmem:[%s26603_s9 + $0x710] sm:$0xff] }
 0xf2b   : > { %v18908_v41 = vcombine.low %v18842_v60, %v18846_v28 }
 0xf2d   : > { %17060 = vmatpush1.bf16.msra.mxu0 %v18928_v9  ;;  %v18909_v9 = vcombine.high %v18842_v60, %v18846_v28 }
 0xf2e   : > { %17086 = vmatprep.subr.bf16.mxu0 %v18875_v16  ;;  %v18854_v16 = vld [vmem:[%s26603_s9 + $0x770] sm:$0xff] }
 0xf2f   : > { %v18917_v31 = vcombine.high %v18850_v32, %v18854_v16  ;;  %v18916_v53 = vcombine.low %v18850_v32, %v18854_v16  ;;  %v23219_v32 = vld [vmem:[#allocation13 + $0x40] sm:$0xff]  }
 0xf30   : > { %17078 = vmatmul.mubr.bf16.vlgmr.msra.gmra.mrb[40].mxu0 %v26336_v59  ;;  %v23220_v16 = vld [vmem:[#allocation13] sm:$0xff]  }
 0xf31   : > { %17087 = vmatpush1.bf16.msra.mxu0 %v18874_v13  ;;  %17118 = vmatprep.mubr.bf16.mxu0 %v26063_v48  ;;  %v18858_v13 = vld [vmem:[%s26603_s9 + $0x790] sm:$0xff] }
 0xf32   : > { %17088 = vmatprep.subr.bf16.mxu0 %v18883_v37  ;;  %v18862_v37 = vld [vmem:[%s26603_s9 + $0x7b0] sm:$0xff] }
 0xf33   : > { %v18925_v58 = vcombine.high %v18858_v13, %v18862_v37  ;;  %v18924_v39 = vcombine.low %v18858_v13, %v18862_v37  ;;  %v23225_v13 = vld [vmem:[#allocation13 + $0x58] sm:$0xff]  }
 0xf34   : > { %v23226_v37 = vld [vmem:[#allocation13 + $0x18] sm:$0xff]  }
 0xf35   : > { %17089 = vmatpush1.bf16.msra.mxu0 %v18882_v33 }
 0xf36   : > { %17090 = vmatprep.subr.bf16.mxu0 %v18891_v23  ;;  %v18866_v23 = vld [vmem:[%s26603_s9 + $0x7d0] sm:$0xff] }
 0xf39   : > { %17091 = vmatpush1.bf16.msra.mxu0 %v18890_v51 }
 0xf3a   : > { %17092 = vmatprep.subr.bf16.mxu0 %v18899_v11 }
 0xf3d   : > { %17093 = vmatpush1.bf16.msra.mxu0 %v18898_v4 }
 0xf3e   : > { %17094 = vmatprep.subr.bf16.mxu0 %v18907_v6  ;;  %v18933_v6 = vcombine.high %v18866_v23, %v18870_v12 }
 0xf41   : > { %17095 = vmatpush1.bf16.msra.mxu0 %v18906_v25  ;;  %v18879_v25 = vcombine.high %v18811_v26, %v18815_v46  ;;  %v23233_v46 = vld [vmem:[#allocation13 + $0x78] sm:$0xff]  }
 0xf42   : > { %17096 = vmatprep.subr.bf16.mxu0 %v18915_v38  ;;  %v18823_v38 = vld [vmem:[%s26603_s9 + $0x678] sm:$0xff] }
 0xf43   : > { %v16053_v50 = vpop.f32.mrb[16].mxu0 }
 0xf44   : > { %v26377_v10 = vadd.f32 %v16053_v50, %v26147_v44  ;;  %v16055_v35 = vpop.f32.mrb[17].mxu0  ;;  %v18930_v44 = vcombine.low %v18865_v63, %v18869_v45  ;;  %v18835_v45 = vld [vmem:[%s26603_s9 + $0x6d8] sm:$0xff] }
 0xf45   : > { %v26380_v29 = vadd.f32 %v16055_v35, %v26155_v24  ;;  %v16057_v55 = vpop.f32.mrb[18].mxu0  ;;  %17097 = vmatpush1.bf16.msra.mxu0 %v18914_v1  ;;  %v18818_v24 = vld [vmem:[%s26603_s9 + $0x650] sm:$0xff]  ;;  %v18827_v1 = vld [vmem:[%s26603_s9 + $0x698] sm:$0xff] }
 0xf46   : > { %v16058_v52 = vpop.f32.mrb[19].mxu0  ;;  %17098 = vmatprep.subr.bf16.mxu0 %v18923_v34  ;;  %v18885_v8 = vcombine.high %v18818_v24, %v18822_v21  ;;  %v18884_v42 = vcombine.low %v18818_v24, %v18822_v21  ;;  %v18831_v34 = vld [vmem:[%s26603_s9 + $0x6b8] sm:$0xff] }
 0xf47   : > { %v18895_v63 = vcombine.high %v18827_v1, %v18831_v34  ;;  %v18839_v35 = vld [vmem:[%s26603_s9 + $0x6f8] sm:$0xff]  ;;  %v18894_v55 = vcombine.low %v18827_v1, %v18831_v34 }
 0xf48   : > { %v18843_v52 = vld [vmem:[%s26603_s9 + $0x718] sm:$0xff] }
 0xf49   : > { %17099 = vmatpush1.bf16.msra.mxu0 %v18922_v61  ;;  %v18903_v61 = vcombine.high %v18835_v45, %v18839_v35  ;;  %v18859_v21 = vld [vmem:[%s26603_s9 + $0x798] sm:$0xff] }
 0xf4a   : > { %17100 = vmatprep.subr.bf16.mxu0 %v18931_v2  ;;  %v18902_v2 = vcombine.low %v18835_v45, %v18839_v35 }
 0xf4d   : > { %17101 = vmatpush1.bf16.msra.mxu0 %v18930_v44  ;;  %v18855_v44 = vld [vmem:[%s26603_s9 + $0x778] sm:$0xff] }
 0xf4e   : > { %17127 = vmatprep.subr.bf16.mxu0 %v18877_v17  ;;  %v18919_v24 = vcombine.high %v18851_v18, %v18855_v44 }
 0xf50   : > { %17119 = vmatmul.mubr.bf16.vlgmr.msra.gmra.mrb[44].mxu0 %v26336_v59 }
 0xf51   : > { %17128 = vmatpush1.bf16.msra.mxu0 %v18876_v47  ;;  %17159 = vmatprep.mubr.bf16.mxu0 %v26063_v48  ;;  %v18863_v47 = vld [vmem:[%s26603_s9 + $0x7b8] sm:$0xff] }
 0xf52   : > { %17129 = vmatprep.subr.bf16.mxu0 %v18885_v8  ;;  %v18918_v8 = vcombine.low %v18851_v18, %v18855_v44  ;;  %v18927_v22 = vcombine.high %v18859_v21, %v18863_v47  ;;  %v18926_v60 = vcombine.low %v18859_v21, %v18863_v47 }
 0xf55   : > { %17130 = vmatpush1.bf16.msra.mxu0 %v18884_v42  ;;  %v18867_v42 = vld [vmem:[%s26603_s9 + $0x7d8] sm:$0xff] }
 0xf56   : > { %17131 = vmatprep.subr.bf16.mxu0 %v18893_v5  ;;  %v18871_v5 = vld [vmem:[%s26603_s9 + $0x7f8] sm:$0xff] }
 0xf59   : > { %17132 = vmatpush1.bf16.msra.mxu0 %v18892_v0 }
 0xf5a   : > { %17133 = vmatprep.subr.bf16.mxu0 %v18901_v43 }
 0xf5d   : > { %17134 = vmatpush1.bf16.msra.mxu0 %v18900_v62  ;;  %v18935_v62 = vcombine.high %v18867_v42, %v18871_v5 }
 0xf5e   : > { %17135 = vmatprep.subr.bf16.mxu0 %v18909_v9  ;;  %v18934_v9 = vcombine.low %v18867_v42, %v18871_v5  ;;  %v23237_v5 = vld [vmem:[#allocation13 + $0xc8] sm:$0xff]  }
 0xf61   : > { %17136 = vmatpush1.bf16.msra.mxu0 %v18908_v41  ;;  %v23221_v41 = vld [vmem:[#allocation13 + $0x48] sm:$0xff]  }
 0xf62   : > { %17137 = vmatprep.subr.bf16.mxu0 %v18917_v31  ;;  %v23224_v31 = vld [vmem:[#allocation13 + $0x10] sm:$0xff]  }
 0xf63   : > { %v16094_v33 = vpop.f32.mrb[20].mxu0 }
 0xf64   : > { %v26433_v40 = vadd.f32 %v16094_v33, %v26201_v30  ;;  %v16096_v51 = vpop.f32.mrb[21].mxu0  ;;  %v18932_v30 = vcombine.low %v18866_v23, %v18870_v12  ;;  %v23229_v33 = vld [vmem:[#allocation13 + $0x68] sm:$0xff]  }
 0xf65   : > { %v26436_v11 = vadd.f32 %v16096_v51, %v26209_v49  ;;  %v16098_v14 = vpop.f32.mrb[22].mxu0  ;;  %17138 = vmatpush1.bf16.msra.mxu0 %v18916_v53  ;;  %v18819_v49 = vld [vmem:[%s26603_s9 + $0x658] sm:$0xff]  ;;  %v23227_v53 = vld [vmem:[#allocation13 + $0x60] sm:$0xff]  }
 0xf66   : > { %v16099_v4 = vpop.f32.mrb[23].mxu0  ;;  %17139 = vmatprep.subr.bf16.mxu0 %v18925_v58  ;;  %v18887_v7 = vcombine.high %v18819_v49, %v18823_v38  ;;  %v18886_v50 = vcombine.low %v18819_v49, %v18823_v38  ;;  %v23228_v58 = vld [vmem:[#allocation13 + $0x20] sm:$0xff]   ;;  %v23230_v23 = vld [vmem:[#allocation13 + $0x28] sm:$0xff]  }
 0xf69   : > { %17140 = vmatpush1.bf16.msra.mxu0 %v18924_v39 }
 0xf6a   : > { %17141 = vmatprep.subr.bf16.mxu0 %v18933_v6  ;;  %v23232_v6 = vld [vmem:[#allocation13 + $0x30] sm:$0xff]  }
 0xf6d   : > { %17142 = vmatpush1.bf16.msra.mxu0 %v18932_v30  ;;  %v23234_v30 = vld [vmem:[#allocation13 + $0x38] sm:$0xff]  }
 0xf6e   : > { %17168 = vmatprep.subr.bf16.mxu0 %v18879_v25  ;;  %v23235_v25 = vld [vmem:[#allocation13 + $0xc0] sm:$0xff]  }
 0xf70   : > { %17160 = vmatmul.mubr.bf16.vlgmr.msra.gmra.mrb[48].mxu0 %v26336_v59 }
 0xf71   : > { %17169 = vmatpush1.bf16.msra.mxu0 %v18878_v27  ;;  %17200 = vmatprep.mubr.bf16.mxu0 %v26063_v48  ;;  %v18847_v48 = vld [vmem:[%s26603_s9 + $0x738] sm:$0xff] }
 0xf72   : > { %17170 = vmatprep.subr.bf16.mxu0 %v18887_v7  ;;  %v18911_v20 = vcombine.high %v18843_v52, %v18847_v48  ;;  %v18910_v17 = vcombine.low %v18843_v52, %v18847_v48 }
 0xf75   : > { %17171 = vmatpush1.bf16.msra.mxu0 %v18886_v50 }
 0xf76   : > { %17172 = vmatprep.subr.bf16.mxu0 %v18895_v63 }
 0xf79   : > { %17173 = vmatpush1.bf16.msra.mxu0 %v18894_v55  ;;  %v17219_v55 = vlaneseq }
 0xf7a   : > { %17174 = vmatprep.subr.bf16.mxu0 %v18903_v61 }
 0xf7b   : > { %v26513_v61 = vshrl.u32 %v17219_v55, 7  ;;  %v23261_v55 = vld [vmem:[#allocation13 + $0x168] sm:$0xff]  }
 0xf7d   : > { %17175 = vmatpush1.bf16.msra.mxu0 %v18902_v2  ;;  %v17225_v52 = vsub.s32 1, %v26513_v61 }
 0xf7e   : > { %17176 = vmatprep.subr.bf16.mxu0 %v18911_v20 }
 0xf81   : > { %17177 = vmatpush1.bf16.msra.mxu0 %v18910_v17 }
 0xf82   : > { %17178 = vmatprep.subr.bf16.mxu0 %v18919_v24 }
 0xf83   : > { %v16521_v3 = vpop.f32.mrb[24].mxu0 }
 0xf84   : > { %v26489_v36 = vadd.f32 %v16521_v3, %v26262_v54  ;;  %v16523_v19 = vpop.f32.mrb[25].mxu0  ;;  %v23222_v54 = vld [vmem:[#allocation13 + $0x8] sm:$0xff]   ;;  %v23236_v3 = vld [vmem:[#allocation13 + $0x80] sm:$0xff]  }
 0xf85   : > { %v26492_v0 = vadd.f32 %v16523_v19, %v26265_v15  ;;  %v16525_v43 = vpop.f32.mrb[26].mxu0  ;;  %17179 = vmatpush1.bf16.msra.mxu0 %v18918_v8  ;;  %v23223_v15 = vld [vmem:[#allocation13 + $0x50] sm:$0xff]   ;;  %v23238_v19 = vld [vmem:[#allocation13 + $0x88] sm:$0xff]  }
 0xf86   : > { %v16526_v28 = vpop.f32.mrb[27].mxu0  ;;  %17180 = vmatprep.subr.bf16.mxu0 %v18927_v22  ;;  %v23239_v43 = vld [vmem:[#allocation13 + $0xd0] sm:$0xff]  }
 0xf87   : > { %v23243_v28 = vld [vmem:[#allocation13 + $0xe0] sm:$0xff]  }
 0xf89   : > { %17181 = vmatpush1.bf16.msra.mxu0 %v18926_v60  ;;  %v23242_v60 = vld [vmem:[#allocation13 + $0x98] sm:$0xff]  }
 0xf8a   : > { %17182 = vmatprep.subr.bf16.mxu0 %v18935_v62  ;;  %v23244_v62 = vld [vmem:[#allocation13 + $0xa0] sm:$0xff]  }
 0xf8d   : > { %17183 = vmatpush1.bf16.msra.mxu0 %v18934_v9  ;;  %v23245_v9 = vld [vmem:[#allocation13 + $0xe8] sm:$0xff]  }
 0xf8e   : > { %19874 = vmatprep.subr.bf16.mxu0 %v23219_v32  ;;  %v17229_v32 = vsub.s32 2, %v26513_v61 }
 0xf90   : > { %17201 = vmatmul.mubr.bf16.vlgmr.msra.gmra.mrb[52].mxu0 %v26336_v59  ;;  %v23231_v59 = vld [vmem:[#allocation13 + $0x70] sm:$0xff]  }
 0xf91   : > { %19875 = vmatpush3.bf16.msra.mxu0 %v23220_v16  ;;  %v23246_v16 = vld [vmem:[#allocation13 + $0xa8] sm:$0xff]  }
 0xf92   : > { %19876 = vmatprep.subr.bf16.mxu0 %v23221_v41  ;;  %v17233_v41 = vsub.s32 3, %v26513_v61 }
 0xf95   : > { %19877 = vmatpush3.bf16.msra.mxu0 %v23222_v54  ;;  %v23247_v54 = vld [vmem:[#allocation13 + $0xf0] sm:$0xff]  }
 0xf96   : > { %19878 = vmatprep.subr.bf16.mxu0 %v23223_v15 }
 0xf99   : > { %19879 = vmatpush3.bf16.msra.mxu0 %v23224_v31 }
 0xf9a   : > { %19880 = vmatprep.subr.bf16.mxu0 %v23225_v13 }
 0xf9d   : > { %19881 = vmatpush3.bf16.msra.mxu0 %v23226_v37  ;;  %v23248_v37 = vld [vmem:[#allocation13 + $0xb0] sm:$0xff]  }
 0xf9e   : > { %19882 = vmatprep.subr.bf16.mxu0 %v23227_v53 }
 0xfa1   : > { %19883 = vmatpush3.bf16.msra.mxu0 %v23228_v58 }
 0xfa2   : > { %19884 = vmatprep.subr.bf16.mxu0 %v23229_v33  ;;  %v23249_v33 = vld [vmem:[#allocation13 + $0xf8] sm:$0xff]  }
 0xfa3   : > { %v16562_v12 = vpop.f32.mrb[28].mxu0 }
 0xfa4   : > { %v26496_v51 = vadd.f32 %v16562_v12, %v26318_v57  ;;  %v16564_v14 = vpop.f32.mrb[29].mxu0 }
 0xfa5   : > { %v26499_v39 = vadd.f32 %v16564_v14, %v26321_v56  ;;  %v16566_v4 = vpop.f32.mrb[30].mxu0  ;;  %19885 = vmatpush3.bf16.msra.mxu0 %v23230_v23 }
 0xfa6   : > { %v16567_v26 = vpop.f32.mrb[31].mxu0  ;;  %19886 = vmatprep.subr.bf16.mxu0 %v23231_v59 }
 0xfa9   : > { %19887 = vmatpush3.bf16.msra.mxu0 %v23232_v6  ;;  %v23250_v6 = vld [vmem:[#allocation13 + $0xb8] sm:$0xff]  }
 0xfaa   : > { %19888 = vmatprep.subr.bf16.mxu0 %v23233_v46  ;;  %v23251_v46 = vld [vmem:[#allocation13 + $0x140] sm:$0xff]  }
 0xfad   : > { %19889 = vmatpush3.bf16.msra.mxu0 %v23234_v30 }
 0xfae   : > { %19896 = vmatprep.subr.bf16.mxu0 %v23235_v25 }
 0xfc3   : > { %v16603_v49 = vpop.f32.mrb[32].mxu0 }
 0xfc4   : > { %v26502_v57 = vadd.f32 %v16603_v49, %v26377_v10  ;;  %v16605_v38 = vpop.f32.mrb[33].mxu0  ;;  %v17221_v10 = vsub.s32 0, %v26513_v61  ;;  %v23252_v49 = vld [vmem:[#allocation13 + $0x100] sm:$0xff]  }
 0xfc5   : > { %v26505_v56 = vadd.f32 %v16605_v38, %v26380_v29  ;;  %v16607_v27 = vpop.f32.mrb[34].mxu0  ;;  %v26519_v29 = vld [vmem:[%s26604_s10] sm:$0xff] }
 0xfc6   : > { %v16608_v7 = vpop.f32.mrb[35].mxu0  ;;  %v17230_v15 = vrot.slane %v26519_v29, %v17229_v32  ;;  %v17234_v13 = vrot.slane %v26519_v29, %v17233_v41  ;;  %v23255_v27 = vld [vmem:[#allocation13 + $0x150] sm:$0xff]   ;;  %v23274_v32 = vld [vmem:[#allocation13 + $0x198] sm:$0xff]   ;;  %v23276_v41 = vld [vmem:[#allocation13 + $0x1a0] sm:$0xff]  }
 0xfc7   : > { %v23256_v7 = vld [vmem:[#allocation13 + $0x110] sm:$0xff]  }
 0xfe3   : > { %v16644_v1 = vpop.f32.mrb[36].mxu0 }
 0xfe4   : > { %v26508_v34 = vadd.f32 %v16644_v1, %v26433_v40  ;;  %v16646_v50 = vpop.f32.mrb[37].mxu0  ;;  %v17222_v40 = vrot.slane %v26519_v29, %v17221_v10  ;;  %v23257_v1 = vld [vmem:[#allocation13 + $0x158] sm:$0xff]   ;;  %v17237_v10 = vsub.s32 4, %v26513_v61 }
 0xfe5   : > { %v26511_v63 = vadd.f32 %v16646_v50, %v26436_v11  ;;  %v16648_v45 = vpop.f32.mrb[38].mxu0  ;;  %v17226_v11 = vrot.slane %v26519_v29, %v17225_v52  ;;  %v23258_v50 = vld [vmem:[#allocation13 + $0x118] sm:$0xff]   ;;  %v23262_v52 = vld [vmem:[#allocation13 + $0x128] sm:$0xff]  }
 0xfe6   : > { %v16649_v35 = vpop.f32.mrb[39].mxu0  ;;  %v23259_v45 = vld [vmem:[#allocation13 + $0x160] sm:$0xff]  }
 0xfe7   : > { %v23260_v35 = vld [vmem:[#allocation13 + $0x120] sm:$0xff]  }
0x1003   : > { %v17079_v48 = vpop.f32.mrb[40].mxu0 }
0x1004   : > { %v17209_v2 = vadd.f32 %v17079_v48, %v26489_v36  ;;  %v17081_v20 = vpop.f32.mrb[41].mxu0  ;;  %v23240_v36 = vld [vmem:[#allocation13 + $0x90] sm:$0xff]  }
0x1005   : > { %v17210_v18 = vadd.f32 %v17081_v20, %v26492_v0  ;;  %v17083_v44 = vpop.f32.mrb[42].mxu0  ;;  %v23241_v0 = vld [vmem:[#allocation13 + $0xd8] sm:$0xff]   ;;  %v23263_v48 = vld [vmem:[#allocation13 + $0x170] sm:$0xff]  }
0x1006   : > { %v17259_v17 = vadd.f32 %v17222_v40, %v17209_v2  ;;  %v17084_v24 = vpop.f32.mrb[43].mxu0  ;;  %v17241_v40 = vsub.s32 5, %v26513_v61 }
0x1007   : > { %v17260_v21 = vadd.f32 %v17226_v11, %v17210_v18  ;;  %v17238_v11 = vrot.slane %v26519_v29, %v17237_v10  ;;  %v23264_v18 = vld [vmem:[#allocation13 + $0x130] sm:$0xff]   ;;  %v23265_v24 = vld [vmem:[#allocation13 + $0x178] sm:$0xff]  }
0x1008   : > { %v17267_v47 = vmax.f32 %v17259_v17, 0.0  ;;  %v17242_v20 = vrot.slane %v26519_v29, %v17241_v40 }
0x1009   : > { %v17268_v8 = vmax.f32 %v17260_v21, 0.0 }
0x100a   : > { %v17275_v42 = vpack.c.bf16 %v17267_v47, %v17267_v47 }
0x100b   : > { %v17276_v22 = vpack.c.bf16 %v17268_v8, %v17268_v8 }
0x100d   : > { %17828 = vmatprep.mubr.bf16.mxu0 %v17276_v22 }
0x100e   : > { %17829 = vmatmul.mubr.bf16.vlgmr.msra.gmra.mrb[56].mxu0 %v17275_v42  ;;  %v23266_v42 = vld [vmem:[#allocation13 + $0x138] sm:$0xff]  }
0x100f   : > { %19897 = vmatpush3.bf16.msra.mxu0 %v23236_v3 }
0x1010   : > { %19898 = vmatprep.subr.bf16.mxu0 %v23237_v5 }
0x1013   : > { %19899 = vmatpush3.bf16.msra.mxu0 %v23238_v19  ;;  %v23267_v19 = vld [vmem:[#allocation13 + $0x1c0] sm:$0xff]  }
0x1014   : > { %19900 = vmatprep.subr.bf16.mxu0 %v23239_v43 }
0x1017   : > { %19901 = vmatpush3.bf16.msra.mxu0 %v23240_v36 }
0x1018   : > { %19902 = vmatprep.subr.bf16.mxu0 %v23241_v0  ;;  %v23268_v0 = vld [vmem:[#allocation13 + $0x180] sm:$0xff]  }
0x101b   : > { %19903 = vmatpush3.bf16.msra.mxu0 %v23242_v60 }
0x101c   : > { %19904 = vmatprep.subr.bf16.mxu0 %v23243_v28  ;;  %v23271_v28 = vld [vmem:[#allocation13 + $0x1d0] sm:$0xff]  }
0x101f   : > { %19905 = vmatpush3.bf16.msra.mxu0 %v23244_v62  ;;  %v23272_v62 = vld [vmem:[#allocation13 + $0x190] sm:$0xff]  }
0x1020   : > { %19906 = vmatprep.subr.bf16.mxu0 %v23245_v9  ;;  %v23273_v9 = vld [vmem:[#allocation13 + $0x1d8] sm:$0xff]  }
0x1023   : > { %v17120_v31 = vpop.f32.mrb[44].mxu0  ;;  %19907 = vmatpush3.bf16.msra.mxu0 %v23246_v16  ;;  %v23275_v16 = vld [vmem:[#allocation13 + $0x1e0] sm:$0xff]  }
0x1024   : > { %v17211_v53 = vadd.f32 %v17120_v31, %v26496_v51  ;;  %v17122_v58 = vpop.f32.mrb[45].mxu0  ;;  %19908 = vmatprep.subr.bf16.mxu0 %v23247_v54  ;;  %v23253_v51 = vld [vmem:[#allocation13 + $0x148] sm:$0xff]  }
0x1025   : > { %v17212_v23 = vadd.f32 %v17122_v58, %v26499_v39  ;;  %v17124_v59 = vpop.f32.mrb[46].mxu0  ;;  %v23254_v39 = vld [vmem:[#allocation13 + $0x108] sm:$0xff]  }
0x1026   : > { %v17261_v12 = vadd.f32 %v17230_v15, %v17211_v53  ;;  %v17125_v14 = vpop.f32.mrb[47].mxu0  ;;  %v23277_v54 = vld [vmem:[#allocation13 + $0x1e8] sm:$0xff]   ;;  %v17245_v15 = vsub.s32 6, %v26513_v61 }
0x1027   : > { %v17262_v4 = vadd.f32 %v17234_v13, %v17212_v23  ;;  %19909 = vmatpush3.bf16.msra.mxu0 %v23248_v37  ;;  %v23278_v31 = vld [vmem:[#allocation13 + $0x1a8] sm:$0xff]   ;;  %v17249_v13 = vsub.s32 7, %v26513_v61  ;;  %v23279_v37 = vld [vmem:[#allocation13 + $0x1f0] sm:$0xff]   ;;  %v23281_v14 = vld [vmem:[#allocation13 + $0x1f8] sm:$0xff]  }
0x1028   : > { %v17269_v26 = vmax.f32 %v17261_v12, 0.0  ;;  %19910 = vmatprep.subr.bf16.mxu0 %v23249_v33  ;;  %v17246_v53 = vrot.slane %v26519_v29, %v17245_v15  ;;  %v23280_v23 = vld [vmem:[#allocation13 + $0x1b0] sm:$0xff]  }
0x1029   : > { %v17270_v30 = vmax.f32 %v17262_v4, 0.0  ;;  %v17250_v33 = vrot.slane %v26519_v29, %v17249_v13 }
0x102a   : > { %v17277_v38 = vpack.c.bf16 %v17269_v26, %v17269_v26 }
0x102b   : > { %v17278_v25 = vpack.c.bf16 %v17270_v30, %v17270_v30  ;;  %19911 = vmatpush3.bf16.msra.mxu0 %v23250_v6  ;;  %v23282_v30 = vld [vmem:[#allocation13 + $0x1b8] sm:$0xff]  }
0x102c   : > { %19918 = vmatprep.subr.bf16.mxu0 %v23251_v46 }
0x102d   : > { %17868 = vmatprep.mubr.bf16.mxu0 %v17278_v25 }
0x102e   : > { %17869 = vmatmul.mubr.bf16.vlgmr.msra.gmra.mrb[60].mxu0 %v17277_v38 }
0x102f   : > { %19919 = vmatpush3.bf16.msra.mxu0 %v23252_v49 }
0x1030   : > { %19920 = vmatprep.subr.bf16.mxu0 %v23253_v51 }
0x1033   : > { %19921 = vmatpush3.bf16.msra.mxu0 %v23254_v39 }
0x1034   : > { %19922 = vmatprep.subr.bf16.mxu0 %v23255_v27 }
0x1037   : > { %19923 = vmatpush3.bf16.msra.mxu0 %v23256_v7 }
0x1038   : > { %19924 = vmatprep.subr.bf16.mxu0 %v23257_v1 }
0x103b   : > { %19925 = vmatpush3.bf16.msra.mxu0 %v23258_v50 }
0x103c   : > { %19926 = vmatprep.subr.bf16.mxu0 %v23259_v45 }
0x103f   : > { %19927 = vmatpush3.bf16.msra.mxu0 %v23260_v35 }
0x1040   : > { %19928 = vmatprep.subr.bf16.mxu0 %v23261_v55 }
0x1043   : > { %v17161_v2 = vpop.f32.mrb[48].mxu0  ;;  %19929 = vmatpush3.bf16.msra.mxu0 %v23262_v52 }
0x1044   : > { %v17213_v44 = vadd.f32 %v17161_v2, %v26502_v57  ;;  %v17163_v17 = vpop.f32.mrb[49].mxu0  ;;  %19930 = vmatprep.subr.bf16.mxu0 %v23263_v48  ;;  %v23269_v57 = vld [vmem:[#allocation13 + $0x1c8] sm:$0xff]  }
0x1045   : > { %v17214_v21 = vadd.f32 %v17163_v17, %v26505_v56  ;;  %v17165_v47 = vpop.f32.mrb[50].mxu0  ;;  %v23270_v56 = vld [vmem:[#allocation13 + $0x188] sm:$0xff]  }
0x1046   : > { %v17263_v8 = vadd.f32 %v17238_v11, %v17213_v44  ;;  %v17166_v22 = vpop.f32.mrb[51].mxu0 }
0x1047   : > { %v17264_v3 = vadd.f32 %v17242_v20, %v17214_v21  ;;  %19931 = vmatpush3.bf16.msra.mxu0 %v23264_v18 }
0x1048   : > { %v17271_v5 = vmax.f32 %v17263_v8, 0.0  ;;  %19932 = vmatprep.subr.bf16.mxu0 %v23265_v24 }
0x1049   : > { %v17272_v43 = vmax.f32 %v17264_v3, 0.0 }
0x104a   : > { %v17279_v60 = vpack.c.bf16 %v17271_v5, %v17271_v5 }
0x104b   : > { %v17280_v36 = vpack.c.bf16 %v17272_v43, %v17272_v43  ;;  %19933 = vmatpush3.bf16.msra.mxu0 %v23266_v42 }
0x104c   : > { %19940 = vmatprep.subr.bf16.mxu0 %v23267_v19 }
0x104d   : > { %17908 = vmatprep.mubr.bf16.mxu0 %v17280_v36 }
0x104e   : > { %17909 = vmatmul.mubr.bf16.vlgmr.msra.gmra.mrb[64].mxu0 %v17279_v60 }
0x104f   : > { %19941 = vmatpush3.bf16.msra.mxu0 %v23268_v0 }
0x1050   : > { %19942 = vmatprep.subr.bf16.mxu0 %v23269_v57 }
0x1053   : > { %19943 = vmatpush3.bf16.msra.mxu0 %v23270_v56 }
0x1054   : > { %19944 = vmatprep.subr.bf16.mxu0 %v23271_v28 }
0x1057   : > { %19945 = vmatpush3.bf16.msra.mxu0 %v23272_v62 }
0x1058   : > { %19946 = vmatprep.subr.bf16.mxu0 %v23273_v9 }
0x105b   : > { %19947 = vmatpush3.bf16.msra.mxu0 %v23274_v32 }
0x105c   : > { %19948 = vmatprep.subr.bf16.mxu0 %v23275_v16 }
0x105f   : > { %19949 = vmatpush3.bf16.msra.mxu0 %v23276_v41 }
0x1060   : > { %19950 = vmatprep.subr.bf16.mxu0 %v23277_v54 }
0x1063   : > { %v17202_v58 = vpop.f32.mrb[52].mxu0  ;;  %19951 = vmatpush3.bf16.msra.mxu0 %v23278_v31 }
0x1064   : > { %v17215_v59 = vadd.f32 %v17202_v58, %v26508_v34  ;;  %v17204_v12 = vpop.f32.mrb[53].mxu0  ;;  %19952 = vmatprep.subr.bf16.mxu0 %v23279_v37 }
0x1065   : > { %v17216_v4 = vadd.f32 %v17204_v12, %v26511_v63  ;;  %v17206_v6 = vpop.f32.mrb[54].mxu0  ;;  %v17411_v63 = vld [vmem:[%s26606_s12] sm:$0x1] }
0x1066   : > { %v17265_v26 = vadd.f32 %v17246_v53, %v17215_v59  ;;  %v17207_v46 = vpop.f32.mrb[55].mxu0 }
0x1067   : > { %v17266_v61 = vadd.f32 %v17250_v33, %v17216_v4  ;;  %19953 = vmatpush3.bf16.msra.mxu0 %v23280_v23 }
0x1068   : > { %v17273_v25 = vmax.f32 %v17265_v26, 0.0  ;;  %19954 = vmatprep.subr.bf16.mxu0 %v23281_v14 }
0x1069   : > { %v17274_v49 = vmax.f32 %v17266_v61, 0.0 }
0x106a   : > { %v17281_v29 = vpack.c.bf16 %v17273_v25, %v17273_v25 }
0x106b   : > { %v17282_v38 = vpack.c.bf16 %v17274_v49, %v17274_v49  ;;  %19955 = vmatpush3.bf16.msra.mxu0 %v23282_v30 }
0x106d   : > { %17948 = vmatprep.mubr.bf16.mxu0 %v17282_v38 }
0x106e   : > { %17949 = vmatmul.mubr.bf16.vlgmr.msra.gmra.mrb[68].mxu0 %v17281_v29 }
0x10e1   : > { %v19890_v34 = vpop.f32.mrb[56].mxu0 }
0x10e2   : > { %v19891_v51 = vpop.f32.mrb[57].mxu0 }
0x10e3   : > { %v19892_v39 = vadd.f32 %v19891_v51, %v19890_v34  ;;  %v19893_v27 = vpop.f32.mrb[58].mxu0 }
0x10e4   : > { %v19894_v7 = vpop.f32.mrb[59].mxu0 }
0x10e5   : > { %v17831_v45 = vadd.f32 %v19892_v39, %v17411_v63 }
0x1101   : > { %v19912_v1 = vpop.f32.mrb[60].mxu0 }
0x1102   : > { %v19913_v50 = vpop.f32.mrb[61].mxu0 }
0x1103   : > { %v19914_v35 = vadd.f32 %v19913_v50, %v19912_v1  ;;  %v19915_v55 = vpop.f32.mrb[62].mxu0 }
0x1104   : > { %v19916_v10 = vpop.f32.mrb[63].mxu0 }
0x1105   : > { %v17871_v52 = vadd.f32 %v19914_v35, %v17831_v45 }
0x1121   : > { %v19934_v40 = vpop.f32.mrb[64].mxu0 }
0x1122   : > { %v19935_v48 = vpop.f32.mrb[65].mxu0 }
0x1123   : > { %v19936_v11 = vadd.f32 %v19935_v48, %v19934_v40  ;;  %v19937_v2 = vpop.f32.mrb[66].mxu0 }
0x1124   : > { %v19938_v20 = vpop.f32.mrb[67].mxu0 }
0x1125   : > { %v17911_v18 = vadd.f32 %v19936_v11, %v17871_v52 }
0x1141   : > { %v19956_v44 = vpop.f32.mrb[68].mxu0 }
0x1142   : > { %v19957_v17 = vpop.f32.mrb[69].mxu0 }
0x1143   : > { %v19958_v24 = vadd.f32 %v19957_v17, %v19956_v44  ;;  %v19959_v21 = vpop.f32.mrb[70].mxu0 }
0x1144   : > { %v19960_v47 = vpop.f32.mrb[71].mxu0 }
0x1145   : > { %v17951_v8 = vadd.f32 %v19958_v24, %v17911_v18 }
0x1147   : > { %v17957_v22 = vsel %vm17956_vm4, %v17951_v8, -inf }
0x1148   : > { %17958 = vmax.xlane.f32.xlu0 %v17957_v22 }
0x11d5   : > { %v17959_v3 = vpop.xlane.xlu0 %17958 }
0x11d6   : > { %v17960_v42 = vsub.f32 %v17951_v8, %v17959_v3 }
0x11d8   : > { %v17961_v5 = vmul.f32 1.442695, %v17960_v42 }
0x11da   : > { %23283 = vpow2.f32 %v17961_v5 }
0x11e4   : > { %v23284_v19 = vpop.eup %23283 }
0x11e5   : > { %v17963_v43 = vsel %vm17956_vm4, %v23284_v19, 0.0 }
0x11e6   : > { %17964 = vadd.xlane.f32.xlu0 %v17963_v43 }
0x1273   : > { %v17965_v36 = vpop.xlane.xlu0 %17964 }
0x1274   : > { %23285 = vlog2.f32 %v17965_v36 }
0x127e   : > { %v23286_v0 = vpop.eup %23285 }
0x127f   : > { %v17967_v60 = vmul.f32 0.6931472, %v23286_v0 }
0x1281   : > { %v17968_v57 = vsub.f32 %v17960_v42, %v17967_v60 }
0x1283   : > { %17969 = vst [vmem:[%s476_s18] sm:$0x1] %v17968_v57 }
0x1284   : > { %23462 = shalt.err (!%p23459_p9)
}
0x1285   : > { %s23463_s16 = scalar_lea.hbm %s26552_s30, 16  ;;  %s23467_s26 = scalar_lea.hbm %s26856_s22, 32 }
0x1286   : > { %p23464_p2 = scmp.ne.s32.totalorder %s26552_s30, %s23463_s16  ;;  %p23468_p5 = scmp.lt.u32.totalorder %s26552_s30, %s26856_s22 }
0x1287   : > { %p23469_p10 = scmp.lt.u32.totalorder %s23467_s26, %s23463_s16  ;;  %p23471_p4 = scmp.lt.u32.totalorder %s23463_s16, %s26552_s30 }
0x1288   : > { %p23465_p0 = pnand %p23464_p2, %p26857_p7 }
0x1289   : > { %p23470_p12 = por %p23469_p10, %p23468_p5 }
0x128a   : > { %p23466_p3 = pneg %p23465_p0 }
0x128b   : > { %p23472_p8 = por %p23471_p4, %p23470_p12 }
0x128d   : > { %p23473_p11 = pnand %p23472_p8, %p23466_p3 }
0x128f   : > { %23476 = shalt.err (!%p23473_p11)
}
0x1290   : > { %22879 = dma.vmem_to_hbm [thread:$0]  (%p26857_p7), %s26554_s19, 16, %s26552_s30, %s17971_s13  }
0x1291 PF: > { %s26858_s24 = sld [smem:[#allocation21_spill]]  ;;  %s26859_s15 = sld [smem:[#allocation18_spill]] }
0x1292   : > { %s26860_s27 = sld [smem:[#allocation25_spill]] }
0x1297   : > { %p22901_p13 = scmp.ge.s32.totalorder %s26858_s24, 2  ;;  %s17995_s25 = sand.u32 1, %s26859_s15  }
0x1298   : > { %p26861_p1 = scmp.ne.s32.totalorder %s26860_s27, 0  ;;  %s17996_s29 = scalar_lea.sflag [#allocation10], %s17995_s25 }
0x129a   : > { %p22892_p6 = pnand %p22901_p13, %p26861_p1 }
0x129c   : > { %23502 = dma.done.wait (!%p22892_p6), %s17996_s29, 16  }
0x129d   : > { %23504 = vsyncadd (!%p22892_p6), %s17996_s29, 4294967280  ;;  %s26862_s28 = sld [smem:[#allocation22_spill]]  ;;  %s26863_s25 = sld [smem:[#allocation19_spill]] }
0x129e   : > { %s26864_s26 = sld [smem:[#allocation20_spill]]  ;;  %s26865_s27 = sld [smem:[#allocation23_spill]] }
0x12a3   : > { %p25_p9 = scmp.ge.s32.totalorder %s26862_s28, 4  }
0x12a5   :  { %27 = sbr.rel (!%p25_p9) target bundleno = 7 (0x7), region = 242 }
0x12ac   :  { %18000 = vsyncpa [#allocation9], 1 }
0x12ad   :  { %18002 = vsyncpa [#allocation9 + $0x1], 1 }
0x12ae   :  { %18003 = vsyncpa [#allocation12], 1 }
0x12af   :  { %18004 = vsyncpa [#allocation10], 1 }
0x12b0   :  { %18006 = vsyncpa [#allocation10 + $0x1], 1 }

</bundles_post_ra>
